<compile_context>
chip_gen: v7x
topology: tpu7x:2x2x1
jax: 0.10.0
libtpu: 0.0.40
codegen_flags: <defaults>
</compile_context>

<pallas_src>
import jax
import jax.numpy as jnp
from jax.experimental import pallas as pl
from jax.experimental.pallas import tpu as pltpu

INPUT_DIM = 784
HIDDEN = 400
LATENT = 20
LANE = 128
LATENT_PAD = 64                                        # mu and logvar each padded to 64 lanes
INPUT_PAD = ((INPUT_DIM + LANE - 1) // LANE) * LANE    # 896 = 7 * 128


def vae_kernel(x_ref, eps_ref,
               w1_ref, b1_ref,
               wh_ref, bh_ref,
               w3_ref, b3_ref,
               w4_ref, b4_ref,
               recon_ref, head_ref):
    # encode: h1 = relu(x @ W1 + b1)   (bf16 MXU matmul, f32 accumulation)
    x = x_ref[...].astype(jnp.bfloat16)
    h1 = jnp.dot(x, w1_ref[...], preferred_element_type=jnp.float32) + b1_ref[...]
    h1 = jnp.maximum(h1, 0.0).astype(jnp.bfloat16)

    # merged fc21|fc22 head: lanes [0:64) -> mu, [64:128) -> logvar (first 20 valid each).
    head = jnp.dot(h1, wh_ref[...], preferred_element_type=jnp.float32) + bh_ref[...]
    head_ref[...] = head                               # lane-dense (tile_b, 128) f32 store

    lp = eps_ref.shape[-1]                             # 64 (padded latent width)
    mu_pad = head[:, :lp]
    logvar_pad = head[:, lp:]

    # reparameterize in f32: z = mu + eps * exp(0.5 * logvar).
    # eps may carry arbitrary values in lanes >= latent_dim; that is harmless because the
    # corresponding rows of w3 are zero (see prepare_params asserts).
    z = mu_pad + eps_ref[...] * jnp.exp(0.5 * logvar_pad)

    # decode: sigmoid(relu(z @ W3 + b3) @ W4 + b4)
    h3 = jnp.dot(z.astype(jnp.bfloat16), w3_ref[...],
                 preferred_element_type=jnp.float32) + b3_ref[...]
    h3 = jnp.maximum(h3, 0.0).astype(jnp.bfloat16)
    logits = jnp.dot(h3, w4_ref[...], preferred_element_type=jnp.float32) + b4_ref[...]
    # sigmoid via EUP exp + approximate EUP reciprocal (no VPU divide).  The approx
    # error (~1e-3) is below the bf16 output quantization (~4e-3), so this stays safe
    # for a downstream BCE loss accumulated in f32.
    recon = pl.reciprocal(1.0 + jnp.exp(-logits), approx=True)
    recon_ref[...] = recon.astype(recon_ref.dtype)


def init_params(key, input_dim=INPUT_DIM, hidden=HIDDEN, latent_dim=LATENT):
    """PyTorch-style uniform(-1/sqrt(fan_in), +1/sqrt(fan_in)); weights are (in, out)."""
    def linear(k, fan_in, fan_out):
        kw, kb = jax.random.split(k)
        bound = 1.0 / jnp.sqrt(float(fan_in))
        w = jax.random.uniform(kw, (fan_in, fan_out), jnp.float32, -bound, bound)
        b = jax.random.uniform(kb, (1, fan_out), jnp.float32, -bound, bound)
        return w, b

    k1, k21, k22, k3, k4 = jax.random.split(key, 5)
    w1, b1 = linear(k1, input_dim, hidden)
    w21, b21 = linear(k21, hidden, latent_dim)
    w22, b22 = linear(k22, hidden, latent_dim)
    w3, b3 = linear(k3, latent_dim, hidden)
    w4, b4 = linear(k4, hidden, input_dim)
    return dict(w1=w1, b1=b1, w21=w21, b21=b21, w22=w22, b22=b22,
                w3=w3, b3=b3, w4=w4, b4=b4)


def prepare_params(params, input_dim=INPUT_DIM, hidden=HIDDEN, latent_dim=LATENT):
    """Convert f32 (in, out)-layout params into the padded, bf16 kernel layout."""
    assert latent_dim <= LATENT_PAD
    input_pad = ((input_dim + LANE - 1) // LANE) * LANE

    # Merged encoder head: [mu | 0-pad | logvar | 0-pad], lane width 2 * LATENT_PAD = 128.
    w_head = jnp.zeros((hidden, 2 * LATENT_PAD), jnp.float32)
    w_head = w_head.at[:, :latent_dim].set(params["w21"])
    w_head = w_head.at[:, LATENT_PAD:LATENT_PAD + latent_dim].set(params["w22"])
    b_head = jnp.zeros((1, 2 * LATENT_PAD), jnp.float32)
    b_head = b_head.at[:, :latent_dim].set(params["b21"])
    b_head = b_head.at[:, LATENT_PAD:LATENT_PAD + latent_dim].set(params["b22"])

    w3_pad = jnp.zeros((LATENT_PAD, hidden), jnp.float32).at[:latent_dim].set(params["w3"])
    w4_pad = jnp.zeros((hidden, input_pad), jnp.float32).at[:, :input_dim].set(params["w4"])
    b4_pad = jnp.zeros((1, input_pad), jnp.float32).at[:, :input_dim].set(params["b4"])

    # Load-bearing zero-padding invariants:
    #  * head's padded lanes are exactly zero (zero w_head/b_head padding), and
    #  * w3's padded rows are zero, so junk in z's (and eps's) padded lanes never reaches
    #    the decoder.  Do not change this padding without revisiting the kernel.
    assert bool(jnp.all(w_head[:, latent_dim:LATENT_PAD] == 0))
    assert bool(jnp.all(w_head[:, LATENT_PAD + latent_dim:] == 0))
    assert bool(jnp.all(w3_pad[latent_dim:] == 0))

    return dict(
        w1=params["w1"].astype(jnp.bfloat16), b1=params["b1"],
        w_head=w_head.astype(jnp.bfloat16), b_head=b_head,
        w3=w3_pad.astype(jnp.bfloat16), b3=params["b3"],
        w4=w4_pad.astype(jnp.bfloat16), b4=b4_pad,
        input_dim=input_dim, latent_dim=latent_dim,
    )


def vae_forward_padded(x, eps, kparams, *, tile_b=512):
    """Production / hot path.

    x:   (B, input_dim) f32 or bf16 (bf16 from the producer halves the x DMA).
    eps: (B, LATENT_PAD) f32 preferred (no wrapper pad op), or (B, latent_dim) f32.

    Returns padded, lane-dense outputs (no wrapper-side slice copies):
      recon_pad: (B, INPUT_PAD) bfloat16;  recon  = recon_pad[:, :input_dim]
      head:      (B, 2*LATENT_PAD) f32;    mu     = head[:, :latent_dim]
                                           logvar = head[:, LATENT_PAD:LATENT_PAD+latent_dim]
    Downstream losses should mask/slice the padded layout themselves (or consume it
    directly) instead of materializing the slices.
    """
    B, input_dim = x.shape
    hidden = kparams["w1"].shape[1]
    input_pad = kparams["w4"].shape[1]
    two_lp = kparams["w_head"].shape[1]
    lp = two_lp // 2

    # Prefer eps already generated at the padded width; fall back to padding if needed.
    if eps.shape[1] != lp:
        eps = jnp.zeros((B, lp), jnp.float32).at[:, :eps.shape[1]].set(eps)
    eps = eps.astype(jnp.float32)

    tile_b = min(tile_b, B)
    assert B % tile_b == 0, "batch must be a multiple of tile_b"
    nb = B // tile_b
    # NOTE(v5e): if tile_b is pushed >= ~768, also set
    # pltpu.CompilerParams(vmem_limit_bytes=...) above the 16 MiB scoped default.

    batch_spec = lambda shape: pl.BlockSpec(shape, lambda i: (i, 0))   # tiled on batch
    const_spec = lambda shape: pl.BlockSpec(shape, lambda i: (0, 0))   # VMEM-resident

    # Advisory cost estimate so XLA can overlap this small HBM-bound call with neighbors.
    nbytes = lambda a: a.size * a.dtype.itemsize
    weight_bytes = sum(nbytes(kparams[k]) for k in
                       ("w1", "b1", "w_head", "b_head", "w3", "b3", "w4", "b4"))
    io_bytes = (nbytes(x) + nbytes(eps)
                + B * input_pad * 2          # recon_pad (bf16)
                + B * two_lp * 4)            # head (f32)
    cost = pl.CostEstimate(
        flops=2 * B * (input_dim * hidden + hidden * two_lp + lp * hidden + hidden * input_pad),
        transcendentals=B * (lp + input_pad),
        bytes_accessed=int(weight_bytes + io_bytes),
    )

    recon_pad, head = pl.pallas_call(
        vae_kernel,
        grid=(nb,),
        in_specs=[
            batch_spec((tile_b, input_dim)),
            batch_spec((tile_b, lp)),
            const_spec((input_dim, hidden)), const_spec((1, hidden)),
            const_spec((hidden, two_lp)),    const_spec((1, two_lp)),
            const_spec((lp, hidden)),        const_spec((1, hidden)),
            const_spec((hidden, input_pad)), const_spec((1, input_pad)),
        ],
        out_specs=(
            batch_spec((tile_b, input_pad)),
            batch_spec((tile_b, two_lp)),
        ),
        out_shape=(
            jax.ShapeDtypeStruct((B, input_pad), jnp.bfloat16),
            jax.ShapeDtypeStruct((B, two_lp), jnp.float32),
        ),
        compiler_params=pltpu.CompilerParams(dimension_semantics=("parallel",)),
        cost_estimate=cost,
    )(x, eps,
      kparams["w1"], kparams["b1"],
      kparams["w_head"], kparams["b_head"],
      kparams["w3"], kparams["b3"],
      kparams["w4"], kparams["b4"])
    return recon_pad, head


def vae_forward(x, eps, kparams, *, tile_b=512):
    """Torch-equivalent convenience wrapper: returns (recon, mu, logvar).

    NOTE: the slicing below is an extra XLA copy; performance-critical callers should
    use vae_forward_padded() and consume the padded layout directly.
    """
    recon_pad, head = vae_forward_padded(x, eps, kparams, tile_b=tile_b)
    input_dim = kparams["input_dim"]
    latent_dim = kparams["latent_dim"]
    lp = kparams["w_head"].shape[1] // 2
    recon = recon_pad[:, :input_dim]
    mu = head[:, :latent_dim]
    logvar = head[:, lp:lp + latent_dim]
    return recon, mu, logvar


if __name__ == "__main__":
    batch = 256   # with tile_b=512 capped at B -> grid=(1,), a single grid step

    key = jax.random.PRNGKey(0)
    k_params, k_x, k_eps = jax.random.split(key, 3)

    params = init_params(k_params)
    kparams = prepare_params(params)

    # Input images as NCHW (B, 1, 28, 28), flattened exactly like x.view(-1, input_dim).
    x_img = jax.random.uniform(k_x, (batch, 1, 28, 28), jnp.float32)
    x = x_img.reshape(-1, INPUT_DIM)
    # eps plays the role of torch.randn_like(std) (deterministic here).  Generated
    # directly at the padded width 64: lanes >= LATENT cannot affect recon because w3's
    # padded rows are zero, and mu/logvar do not depend on eps.
    eps_pad = jax.random.normal(k_eps, (batch, LATENT_PAD), jnp.float32)
    eps = eps_pad[:, :LATENT]      # the "true" 20-wide noise, used only by the references

    # Production path: padded, lane-dense outputs; no wrapper slice copies.
    recon_pad, head = vae_forward_padded(x, eps_pad, kparams)
    jax.block_until_ready((recon_pad, head))

    # Views below are verification-only (test code, not the hot path).
    recon = recon_pad[:, :INPUT_DIM].astype(jnp.float32)
    mu = head[:, :LATENT]
    logvar = head[:, LATENT_PAD:LATENT_PAD + LATENT]

    # --- Reference 1: mirror the kernel's bf16 math in plain JAX (tight check). ---
    xb = x.astype(jnp.bfloat16)
    h1 = jnp.maximum(jnp.dot(xb, kparams["w1"], preferred_element_type=jnp.float32)
                     + kparams["b1"], 0.0)
    head_m = jnp.dot(h1.astype(jnp.bfloat16), kparams["w_head"],
                     preferred_element_type=jnp.float32) + kparams["b_head"]
    mu_m = head_m[:, :LATENT]
    logvar_m = head_m[:, LATENT_PAD:LATENT_PAD + LATENT]
    z_pad_m = head_m[:, :LATENT_PAD] + eps_pad * jnp.exp(0.5 * head_m[:, LATENT_PAD:])
    h3_m = jnp.maximum(jnp.dot(z_pad_m.astype(jnp.bfloat16), kparams["w3"],
                               preferred_element_type=jnp.float32) + kparams["b3"], 0.0)
    logits_m = jnp.dot(h3_m.astype(jnp.bfloat16), kparams["w4"],
                       preferred_element_type=jnp.float32) + kparams["b4"]
    recon_m = jax.nn.sigmoid(logits_m)[:, :INPUT_DIM]

    assert jnp.allclose(mu, mu_m, atol=2e-3), "mu mismatch (bf16 mirror)"
    assert jnp.allclose(logvar, logvar_m, atol=2e-3), "logvar mismatch (bf16 mirror)"
    assert jnp.allclose(recon, recon_m, atol=1e-2), "recon mismatch (bf16 mirror)"

    # --- Reference 2: full-f32 semantics check (loose tolerance for bf16 weights). ---
    h1f = jnp.maximum(x @ params["w1"] + params["b1"], 0.0)
    mu_f = h1f @ params["w21"] + params["b21"]
    logvar_f = h1f @ params["w22"] + params["b22"]
    z_f = mu_f + eps * jnp.exp(0.5 * logvar_f)
    h3f = jnp.maximum(z_f @ params["w3"] + params["b3"], 0.0)
    recon_f = jax.nn.sigmoid(h3f @ params["w4"] + params["b4"])

    assert jnp.allclose(mu, mu_f, atol=5e-2), "mu mismatch (f32 ref)"
    assert jnp.allclose(logvar, logvar_f, atol=5e-2), "logvar mismatch (f32 ref)"
    assert jnp.allclose(recon, recon_f, atol=5e-2), "recon mismatch (f32 ref)"

    print("KERNEL_OK")
</pallas_src>

<mosaic_0001>
module attributes {stable_mosaic.version = 11 : i64} {
  func.func @vae_kernel(%arg0: i32, %arg1: memref<256x784xf32, #tpu.memory_space<vmem>>, %arg2: memref<256x64xf32, #tpu.memory_space<vmem>>, %arg3: memref<784x400xbf16, #tpu.memory_space<vmem>>, %arg4: memref<1x400xf32, #tpu.memory_space<vmem>>, %arg5: memref<400x128xbf16, #tpu.memory_space<vmem>>, %arg6: memref<1x128xf32, #tpu.memory_space<vmem>>, %arg7: memref<64x400xbf16, #tpu.memory_space<vmem>>, %arg8: memref<1x400xf32, #tpu.memory_space<vmem>>, %arg9: memref<400x896xbf16, #tpu.memory_space<vmem>>, %arg10: memref<1x896xf32, #tpu.memory_space<vmem>>, %arg11: memref<256x896xbf16, #tpu.memory_space<vmem>>, %arg12: memref<256x128xf32, #tpu.memory_space<vmem>>) attributes {dimension_semantics = [#tpu.dimension_semantics<parallel>], iteration_bounds = array<i64: 1>, scalar_prefetch = 0 : i64, scratch_operands = 0 : i64, tpu.core_type = #tpu.core_type<tc>, window_params = [{transform_indices = @transform_0, window_bounds = array<i64: 256, 784>}, {transform_indices = @transform_1, window_bounds = array<i64: 256, 64>}, {pipeline_mode = #tpu.pipeline_mode<synchronous>, transform_indices = @transform_2, window_bounds = array<i64: 784, 400>}, {pipeline_mode = #tpu.pipeline_mode<synchronous>, transform_indices = @transform_3, window_bounds = array<i64: 1, 400>}, {pipeline_mode = #tpu.pipeline_mode<synchronous>, transform_indices = @transform_4, window_bounds = array<i64: 400, 128>}, {pipeline_mode = #tpu.pipeline_mode<synchronous>, transform_indices = @transform_5, window_bounds = array<i64: 1, 128>}, {pipeline_mode = #tpu.pipeline_mode<synchronous>, transform_indices = @transform_6, window_bounds = array<i64: 64, 400>}, {pipeline_mode = #tpu.pipeline_mode<synchronous>, transform_indices = @transform_7, window_bounds = array<i64: 1, 400>}, {pipeline_mode = #tpu.pipeline_mode<synchronous>, transform_indices = @transform_8, window_bounds = array<i64: 400, 896>}, {pipeline_mode = #tpu.pipeline_mode<synchronous>, transform_indices = @transform_9, window_bounds = array<i64: 1, 896>}, {transform_indices = @transform_10, window_bounds = array<i64: 256, 896>}, {transform_indices = @transform_11, window_bounds = array<i64: 256, 128>}]} {
    %c0 = arith.constant 0 : index
    %c0_0 = arith.constant 0 : index
    %0 = vector.load %arg1[%c0, %c0_0] : memref<256x784xf32, #tpu.memory_space<vmem>>, vector<256x784xf32>
    %1 = arith.truncf %0 : vector<256x784xf32> to vector<256x784xbf16>
    %c0_1 = arith.constant 0 : index
    %c0_2 = arith.constant 0 : index
    %2 = vector.load %arg3[%c0_1, %c0_2] : memref<784x400xbf16, #tpu.memory_space<vmem>>, vector<784x400xbf16>
    %cst = arith.constant dense<0.000000e+00> : vector<256x400xf32>
    %3 = tpu.matmul %1, %2, %cst {dimension_numbers = #tpu.dot_dimension_numbers<[1], [0], [0], [1], [0, 0, 1, 1], [], []>} : vector<256x784xbf16>, vector<784x400xbf16>, vector<256x400xf32> -> vector<256x400xf32>
    %c0_3 = arith.constant 0 : index
    %c0_4 = arith.constant 0 : index
    %4 = vector.load %arg4[%c0_3, %c0_4] : memref<1x400xf32, #tpu.memory_space<vmem>>, vector<1x400xf32>
    %5 = vector.broadcast %4 : vector<1x400xf32> to vector<256x400xf32>
    %6 = arith.addf %3, %5 : vector<256x400xf32>
    %cst_5 = arith.constant 0.000000e+00 : f32
    %7 = vector.broadcast %cst_5 : f32 to vector<256x400xf32>
    %8 = arith.maximumf %6, %7 : vector<256x400xf32>
    %9 = arith.truncf %8 : vector<256x400xf32> to vector<256x400xbf16>
    %c0_6 = arith.constant 0 : index
    %c0_7 = arith.constant 0 : index
    %10 = vector.load %arg5[%c0_6, %c0_7] : memref<400x128xbf16, #tpu.memory_space<vmem>>, vector<400x128xbf16>
    %cst_8 = arith.constant dense<0.000000e+00> : vector<256x128xf32>
    %11 = tpu.matmul %9, %10, %cst_8 {dimension_numbers = #tpu.dot_dimension_numbers<[1], [0], [0], [1], [0, 0, 1, 1], [], []>} : vector<256x400xbf16>, vector<400x128xbf16>, vector<256x128xf32> -> vector<256x128xf32>
    %c0_9 = arith.constant 0 : index
    %c0_10 = arith.constant 0 : index
    %12 = vector.load %arg6[%c0_9, %c0_10] : memref<1x128xf32, #tpu.memory_space<vmem>>, vector<1x128xf32>
    %13 = vector.broadcast %12 : vector<1x128xf32> to vector<256x128xf32>
    %14 = arith.addf %11, %13 : vector<256x128xf32>
    %c0_11 = arith.constant 0 : index
    %c0_12 = arith.constant 0 : index
    %15 = vector.load %arg12[%c0_11, %c0_12] : memref<256x128xf32, #tpu.memory_space<vmem>>, vector<256x128xf32>
    tpu.vector_store %arg12[%c0_11, %c0_12], %14 {strides = array<i32>} : memref<256x128xf32, #tpu.memory_space<vmem>>, vector<256x128xf32>,
    %16 = vector.extract_strided_slice %14 {offsets = [0, 0], sizes = [256, 64], strides = [1, 1]} : vector<256x128xf32> to vector<256x64xf32>
    %17 = vector.extract_strided_slice %14 {offsets = [0, 64], sizes = [256, 64], strides = [1, 1]} : vector<256x128xf32> to vector<256x64xf32>
    %c0_13 = arith.constant 0 : index
    %c0_14 = arith.constant 0 : index
    %18 = vector.load %arg2[%c0_13, %c0_14] : memref<256x64xf32, #tpu.memory_space<vmem>>, vector<256x64xf32>
    %cst_15 = arith.constant 5.000000e-01 : f32
    %19 = vector.broadcast %cst_15 : f32 to vector<256x64xf32>
    %20 = arith.mulf %19, %17 : vector<256x64xf32>
    %21 = math.exp %20 : vector<256x64xf32>
    %22 = arith.mulf %18, %21 : vector<256x64xf32>
    %23 = arith.addf %16, %22 : vector<256x64xf32>
    %24 = arith.truncf %23 : vector<256x64xf32> to vector<256x64xbf16>
    %c0_16 = arith.constant 0 : index
    %c0_17 = arith.constant 0 : index
    %25 = vector.load %arg7[%c0_16, %c0_17] : memref<64x400xbf16, #tpu.memory_space<vmem>>, vector<64x400xbf16>
    %cst_18 = arith.constant dense<0.000000e+00> : vector<256x400xf32>
    %26 = tpu.matmul %24, %25, %cst_18 {dimension_numbers = #tpu.dot_dimension_numbers<[1], [0], [0], [1], [0, 0, 1, 1], [], []>} : vector<256x64xbf16>, vector<64x400xbf16>, vector<256x400xf32> -> vector<256x400xf32>
    %c0_19 = arith.constant 0 : index
    %c0_20 = arith.constant 0 : index
    %27 = vector.load %arg8[%c0_19, %c0_20] : memref<1x400xf32, #tpu.memory_space<vmem>>, vector<1x400xf32>
    %28 = vector.broadcast %27 : vector<1x400xf32> to vector<256x400xf32>
    %29 = arith.addf %26, %28 : vector<256x400xf32>
    %cst_21 = arith.constant 0.000000e+00 : f32
    %30 = vector.broadcast %cst_21 : f32 to vector<256x400xf32>
    %31 = arith.maximumf %29, %30 : vector<256x400xf32>
    %32 = arith.truncf %31 : vector<256x400xf32> to vector<256x400xbf16>
    %c0_22 = arith.constant 0 : index
    %c0_23 = arith.constant 0 : index
    %33 = vector.load %arg9[%c0_22, %c0_23] : memref<400x896xbf16, #tpu.memory_space<vmem>>, vector<400x896xbf16>
    %cst_24 = arith.constant dense<0.000000e+00> : vector<256x896xf32>
    %34 = tpu.matmul %32, %33, %cst_24 {dimension_numbers = #tpu.dot_dimension_numbers<[1], [0], [0], [1], [0, 0, 1, 1], [], []>} : vector<256x400xbf16>, vector<400x896xbf16>, vector<256x896xf32> -> vector<256x896xf32>
    %c0_25 = arith.constant 0 : index
    %c0_26 = arith.constant 0 : index
    %35 = vector.load %arg10[%c0_25, %c0_26] : memref<1x896xf32, #tpu.memory_space<vmem>>, vector<1x896xf32>
    %36 = vector.broadcast %35 : vector<1x896xf32> to vector<256x896xf32>
    %37 = arith.addf %34, %36 : vector<256x896xf32>
    %cst_27 = arith.constant 0.000000e+00 : f32
    %38 = vector.broadcast %cst_27 : f32 to vector<256x896xf32>
    %39 = arith.subf %38, %37 : vector<256x896xf32>
    %40 = math.exp %39 : vector<256x896xf32>
    %cst_28 = arith.constant 1.000000e+00 : f32
    %41 = vector.broadcast %cst_28 : f32 to vector<256x896xf32>
    %42 = arith.addf %41, %40 : vector<256x896xf32>
    %43 = tpu.reciprocal %42 {approx = true} : vector<256x896xf32> -> vector<256x896xf32>
    %44 = arith.truncf %43 : vector<256x896xf32> to vector<256x896xbf16>
    %c0_29 = arith.constant 0 : index
    %c0_30 = arith.constant 0 : index
    %45 = vector.load %arg11[%c0_29, %c0_30] : memref<256x896xbf16, #tpu.memory_space<vmem>>, vector<256x896xbf16>
    tpu.vector_store %arg11[%c0_29, %c0_30], %44 {strides = array<i32>} : memref<256x896xbf16, #tpu.memory_space<vmem>>, vector<256x896xbf16>,
    return
  }
  func.func @transform_0(%arg0: i32) -> (i32, i32) {
    %c0_i32 = arith.constant 0 : i32
    %c0_i32_0 = arith.constant 0 : i32
    return %arg0, %c0_i32 : i32, i32
  }
  func.func @transform_1(%arg0: i32) -> (i32, i32) {
    %c0_i32 = arith.constant 0 : i32
    %c0_i32_0 = arith.constant 0 : i32
    return %arg0, %c0_i32 : i32, i32
  }
  func.func @transform_2(%arg0: i32) -> (i32, i32) {
    %c0_i32 = arith.constant 0 : i32
    %c0_i32_0 = arith.constant 0 : i32
    %c0_i32_1 = arith.constant 0 : i32
    return %c0_i32, %c0_i32_0 : i32, i32
  }
  func.func @transform_3(%arg0: i32) -> (i32, i32) {
    %c0_i32 = arith.constant 0 : i32
    %c0_i32_0 = arith.constant 0 : i32
    %c0_i32_1 = arith.constant 0 : i32
    return %c0_i32, %c0_i32_0 : i32, i32
  }
  func.func @transform_4(%arg0: i32) -> (i32, i32) {
    %c0_i32 = arith.constant 0 : i32
    %c0_i32_0 = arith.constant 0 : i32
    %c0_i32_1 = arith.constant 0 : i32
    return %c0_i32, %c0_i32_0 : i32, i32
  }
  func.func @transform_5(%arg0: i32) -> (i32, i32) {
    %c0_i32 = arith.constant 0 : i32
    %c0_i32_0 = arith.constant 0 : i32
    %c0_i32_1 = arith.constant 0 : i32
    return %c0_i32, %c0_i32_0 : i32, i32
  }
  func.func @transform_6(%arg0: i32) -> (i32, i32) {
    %c0_i32 = arith.constant 0 : i32
    %c0_i32_0 = arith.constant 0 : i32
    %c0_i32_1 = arith.constant 0 : i32
    return %c0_i32, %c0_i32_0 : i32, i32
  }
  func.func @transform_7(%arg0: i32) -> (i32, i32) {
    %c0_i32 = arith.constant 0 : i32
    %c0_i32_0 = arith.constant 0 : i32
    %c0_i32_1 = arith.constant 0 : i32
    return %c0_i32, %c0_i32_0 : i32, i32
  }
  func.func @transform_8(%arg0: i32) -> (i32, i32) {
    %c0_i32 = arith.constant 0 : i32
    %c0_i32_0 = arith.constant 0 : i32
    %c0_i32_1 = arith.constant 0 : i32
    return %c0_i32, %c0_i32_0 : i32, i32
  }
  func.func @transform_9(%arg0: i32) -> (i32, i32) {
    %c0_i32 = arith.constant 0 : i32
    %c0_i32_0 = arith.constant 0 : i32
    %c0_i32_1 = arith.constant 0 : i32
    return %c0_i32, %c0_i32_0 : i32, i32
  }
  func.func @transform_10(%arg0: i32) -> (i32, i32) {
    %c0_i32 = arith.constant 0 : i32
    %c0_i32_0 = arith.constant 0 : i32
    return %arg0, %c0_i32 : i32, i32
  }
  func.func @transform_11(%arg0: i32) -> (i32, i32) {
    %c0_i32 = arith.constant 0 : i32
    %c0_i32_0 = arith.constant 0 : i32
    return %arg0, %c0_i32 : i32, i32
  }
}

</mosaic_0001>

<bundles_post_ra>
// kernel: tpu_custom_call.1
= control target key start
LH: loop header
LB: loop body
LE: loop exit
PB: predicated region body
PF: predicated region fallthrough
CT: control target
= control target key end

     0   :  { %17 = vsyncpa [#allocation3], 0  ;;  %s17451_s0 = inlined_call_operand.vmem [shape: f32[256,784], index: 0, kind: input, shape index: {}]   ;;  %s17452_s1 = inlined_call_operand.vmem [shape: f32[256,64], index: 1, kind: input, shape index: {}]   ;;  %s17453_s2 = inlined_call_operand.vmem [shape: bf16[784,400], index: 2, kind: input, shape index: {}]   ;;  %s17454_s3 = inlined_call_operand.vmem [shape: f32[1,400], index: 3, kind: input, shape index: {}]   ;;  %s17455_s4 = inlined_call_operand.vmem [shape: bf16[400,128], index: 4, kind: input, shape index: {}]   ;;  %s17456_s5 = inlined_call_operand.vmem [shape: f32[1,128], index: 5, kind: input, shape index: {}]   ;;  %s17457_s6 = inlined_call_operand.vmem [shape: bf16[64,400], index: 6, kind: input, shape index: {}]   ;;  %s17458_s7 = inlined_call_operand.vmem [shape: f32[1,400], index: 7, kind: input, shape index: {}]   ;;  %s17459_s8 = inlined_call_operand.vmem [shape: bf16[400,896], index: 8, kind: input, shape index: {}]   ;;  %s17460_s9 = inlined_call_operand.vmem [shape: f32[1,896], index: 9, kind: input, shape index: {}]   ;;  %s17461_s10 = inlined_call_operand.hbm [shape: bf16[256,896], index: 10, kind: output, shape index: {0}]   ;;  %s17462_s11 = inlined_call_operand.hbm [shape: f32[256,128], index: 11, kind: output, shape index: {1}]  }
   0x1   :  { %v11639_v0 = vld [vmem:[%s17453_s2 + $0x4] ss:$16 sps:$4 sm:$0xff]   ;;  %v11641_v1 = vld [vmem:[%s17453_s2 + $0xc] ss:$16 sps:$4 sm:$0xff]   ;;  %v11643_v2 = vld [vmem:[%s17453_s2] ss:$16 sps:$4 sm:$0xff]  }
   0x2   :  { %1623 = vmatprep.subr.bf16.mxu0 %v11639_v0  ;;  %v11644_v3 = vld [vmem:[%s17453_s2 + $0x8] ss:$16 sps:$4 sm:$0xff]   ;;  %2395 = vmatprep.subr.bf16.mxu1 %v11641_v1  ;;  %v11645_v4 = vld [vmem:[%s17453_s2 + $0x24] ss:$16 sps:$4 sm:$0xff]   ;;  %v11647_v5 = vld [vmem:[%s17453_s2 + $0x2c] ss:$16 sps:$4 sm:$0xff]  }
   0x3   :  { %1624 = vmatpush1.bf16.msra.mxu0 %v11643_v2  ;;  %2396 = vmatpush1.bf16.msra.mxu1 %v11644_v3  ;;  %v11649_v6 = vld [vmem:[%s17453_s2 + $0x20] ss:$16 sps:$4 sm:$0xff]   ;;  %v11650_v7 = vld [vmem:[%s17453_s2 + $0x28] ss:$16 sps:$4 sm:$0xff]   ;;  %v11651_v8 = vld [vmem:[%s17453_s2 + $0x44] ss:$16 sps:$4 sm:$0xff]  }
   0x4   :  { %1625 = vmatprep.subr.bf16.mxu0 %v11645_v4  ;;  %2397 = vmatprep.subr.bf16.mxu1 %v11647_v5  ;;  %v11653_v9 = vld [vmem:[%s17453_s2 + $0x4c] ss:$16 sps:$4 sm:$0xff]   ;;  %v11655_v10 = vld [vmem:[%s17453_s2 + $0x40] ss:$16 sps:$4 sm:$0xff]   ;;  %v11656_v11 = vld [vmem:[%s17453_s2 + $0x48] ss:$16 sps:$4 sm:$0xff]  }
   0x5   :  { %v11657_v12 = vld [vmem:[%s17453_s2 + $0x64] ss:$16 sps:$4 sm:$0xff]   ;;  %v11659_v13 = vld [vmem:[%s17453_s2 + $0x6c] ss:$16 sps:$4 sm:$0xff]   ;;  %v11661_v14 = vld [vmem:[%s17453_s2 + $0x60] ss:$16 sps:$4 sm:$0xff]  }
   0x6   :  { %v11662_v15 = vld [vmem:[%s17453_s2 + $0x68] ss:$16 sps:$4 sm:$0xff]   ;;  %v11663_v16 = vld [vmem:[%s17453_s2 + $0x84] ss:$16 sps:$4 sm:$0xff]   ;;  %v11665_v17 = vld [vmem:[%s17453_s2 + $0x8c] ss:$16 sps:$4 sm:$0xff]  }
   0x7   :  { %1626 = vmatpush1.bf16.msra.mxu0 %v11649_v6  ;;  %2398 = vmatpush1.bf16.msra.mxu1 %v11650_v7  ;;  %v11667_v18 = vld [vmem:[%s17453_s2 + $0x80] ss:$16 sps:$4 sm:$0xff]   ;;  %v11668_v19 = vld [vmem:[%s17453_s2 + $0x88] ss:$16 sps:$4 sm:$0xff]   ;;  %v11669_v20 = vld [vmem:[%s17453_s2 + $0xa4] ss:$16 sps:$4 sm:$0xff]  }
   0x8   :  { %1627 = vmatprep.subr.bf16.mxu0 %v11651_v8  ;;  %2399 = vmatprep.subr.bf16.mxu1 %v11653_v9  ;;  %v11671_v21 = vld [vmem:[%s17453_s2 + $0xac] ss:$16 sps:$4 sm:$0xff]   ;;  %v11673_v22 = vld [vmem:[%s17453_s2 + $0xa0] ss:$16 sps:$4 sm:$0xff]   ;;  %v11674_v23 = vld [vmem:[%s17453_s2 + $0xa8] ss:$16 sps:$4 sm:$0xff]  }
   0x9   :  { %v11675_v24 = vld [vmem:[%s17453_s2 + $0xc4] ss:$16 sps:$4 sm:$0xff]   ;;  %v11677_v25 = vld [vmem:[%s17453_s2 + $0xcc] ss:$16 sps:$4 sm:$0xff]   ;;  %v11679_v26 = vld [vmem:[%s17453_s2 + $0xc0] ss:$16 sps:$4 sm:$0xff]  }
   0xa   :  { %v11680_v27 = vld [vmem:[%s17453_s2 + $0xc8] ss:$16 sps:$4 sm:$0xff]   ;;  %v11681_v28 = vld [vmem:[%s17453_s2 + $0xe4] ss:$16 sps:$4 sm:$0xff]   ;;  %v11683_v29 = vld [vmem:[%s17453_s2 + $0xec] ss:$16 sps:$4 sm:$0xff]  }
   0xb   :  { %1628 = vmatpush1.bf16.msra.mxu0 %v11655_v10  ;;  %2400 = vmatpush1.bf16.msra.mxu1 %v11656_v11  ;;  %v11685_v30 = vld [vmem:[%s17453_s2 + $0xe0] ss:$16 sps:$4 sm:$0xff]   ;;  %v11686_v31 = vld [vmem:[%s17453_s2 + $0xe8] ss:$16 sps:$4 sm:$0xff]   ;;  %v11687_v32 = vld [vmem:[%s17453_s2 + $0x104] ss:$16 sps:$4 sm:$0xff]  }
   0xc   :  { %1629 = vmatprep.subr.bf16.mxu0 %v11657_v12  ;;  %2401 = vmatprep.subr.bf16.mxu1 %v11659_v13  ;;  %v11689_v33 = vld [vmem:[%s17453_s2 + $0x10c] ss:$16 sps:$4 sm:$0xff]   ;;  %v11691_v34 = vld [vmem:[%s17453_s2 + $0x100] ss:$16 sps:$4 sm:$0xff]   ;;  %v11692_v35 = vld [vmem:[%s17453_s2 + $0x108] ss:$16 sps:$4 sm:$0xff]  }
   0xd   :  { %v11693_v36 = vld [vmem:[%s17453_s2 + $0x124] ss:$16 sps:$4 sm:$0xff]   ;;  %v11695_v37 = vld [vmem:[%s17453_s2 + $0x12c] ss:$16 sps:$4 sm:$0xff]   ;;  %v11697_v38 = vld [vmem:[%s17453_s2 + $0x120] ss:$16 sps:$4 sm:$0xff]  }
   0xe   :  { %v11698_v39 = vld [vmem:[%s17453_s2 + $0x128] ss:$16 sps:$4 sm:$0xff]   ;;  %v11699_v40 = vld [vmem:[%s17453_s2 + $0x144] ss:$16 sps:$4 sm:$0xff]   ;;  %v11701_v41 = vld [vmem:[%s17453_s2 + $0x14c] ss:$16 sps:$4 sm:$0xff]  }
   0xf   :  { %1630 = vmatpush1.bf16.msra.mxu0 %v11661_v14  ;;  %2402 = vmatpush1.bf16.msra.mxu1 %v11662_v15  ;;  %v11703_v42 = vld [vmem:[%s17453_s2 + $0x140] ss:$16 sps:$4 sm:$0xff]   ;;  %v11704_v43 = vld [vmem:[%s17453_s2 + $0x148] ss:$16 sps:$4 sm:$0xff]   ;;  %v11705_v44 = vld [vmem:[%s17453_s2 + $0x164] ss:$16 sps:$4 sm:$0xff]  }
  0x10   :  { %1631 = vmatprep.subr.bf16.mxu0 %v11663_v16  ;;  %2403 = vmatprep.subr.bf16.mxu1 %v11665_v17  ;;  %v11707_v45 = vld [vmem:[%s17453_s2 + $0x16c] ss:$16 sps:$4 sm:$0xff]   ;;  %v11709_v47 = vld [vmem:[%s17453_s2 + $0x160] ss:$16 sps:$4 sm:$0xff]   ;;  %v11710_v48 = vld [vmem:[%s17453_s2 + $0x168] ss:$16 sps:$4 sm:$0xff]  }
  0x11   :  { %v41_v46 = vld [vmem:[%s17451_s0 + $0x8] sm:$0xff]  ;;  %v48_v49 = vld [vmem:[%s17451_s0 + $0x40] sm:$0xff]  ;;  %v47_v4 = vld [vmem:[%s17451_s0 + $0x38] sm:$0xff] }
  0x12   :  { %v11711_v50 = vld [vmem:[%s17453_s2 + $0x184] ss:$16 sps:$4 sm:$0xff]   ;;  %v265_v51 = vpack.c.bf16 %v48_v49, %v41_v46  ;;  %v11713_v52 = vld [vmem:[%s17453_s2 + $0x18c] ss:$16 sps:$4 sm:$0xff]   ;;  %v11715_v53 = vld [vmem:[%s17453_s2 + $0x180] ss:$16 sps:$4 sm:$0xff]  }
  0x13   :  { %1632 = vmatpush1.bf16.msra.mxu0 %v11667_v18  ;;  %2404 = vmatpush1.bf16.msra.mxu1 %v11668_v19  ;;  %v11716_v54 = vld [vmem:[%s17453_s2 + $0x188] ss:$16 sps:$4 sm:$0xff]   ;;  %v11717_v55 = vld [vmem:[%s17453_s2 + $0x1a4] ss:$16 sps:$4 sm:$0xff]   ;;  %v11719_v56 = vld [vmem:[%s17453_s2 + $0x1ac] ss:$16 sps:$4 sm:$0xff]  }
  0x14   :  { %1633 = vmatprep.subr.bf16.mxu0 %v11669_v20  ;;  %2405 = vmatprep.subr.bf16.mxu1 %v11671_v21  ;;  %v11721_v57 = vld [vmem:[%s17453_s2 + $0x1a0] ss:$16 sps:$4 sm:$0xff]   ;;  %v11722_v58 = vld [vmem:[%s17453_s2 + $0x1a8] ss:$16 sps:$4 sm:$0xff]   ;;  %v11723_v59 = vld [vmem:[%s17453_s2 + $0x1c4] ss:$16 sps:$4 sm:$0xff]  }
  0x15   :  { %1655 = vmatprep.mubr.bf16.mxu0 %v265_v51  ;;  %2427 = vmatprep.mubr.bf16.mxu1 %v265_v51  ;;  %v11725_v60 = vld [vmem:[%s17453_s2 + $0x1cc] ss:$16 sps:$4 sm:$0xff]   ;;  %v11727_v61 = vld [vmem:[%s17453_s2 + $0x1c0] ss:$16 sps:$4 sm:$0xff]   ;;  %v11728_v62 = vld [vmem:[%s17453_s2 + $0x1c8] ss:$16 sps:$4 sm:$0xff]  }
  0x16   :  { %v11729_v63 = vld [vmem:[%s17453_s2 + $0x1e4] ss:$16 sps:$4 sm:$0xff]   ;;  %v11731_v0 = vld [vmem:[%s17453_s2 + $0x1ec] ss:$16 sps:$4 sm:$0xff]   ;;  %v11733_v1 = vld [vmem:[%s17453_s2 + $0x1e0] ss:$16 sps:$4 sm:$0xff]  }
  0x17   :  { %1634 = vmatpush1.bf16.msra.mxu0 %v11673_v22  ;;  %2406 = vmatpush1.bf16.msra.mxu1 %v11674_v23  ;;  %v11734_v2 = vld [vmem:[%s17453_s2 + $0x1e8] ss:$16 sps:$4 sm:$0xff]   ;;  %v40_v3 = vld [vmem:[%s17451_s0] sm:$0xff]  ;;  %v11740_v6 = vld [vmem:[%s17453_s2 + $0x20c] ss:$16 sps:$4 sm:$0xff]  }
  0x18   :  { %1635 = vmatprep.subr.bf16.mxu0 %v11675_v24  ;;  %2407 = vmatprep.subr.bf16.mxu1 %v11677_v25  ;;  %v11737_v5 = vld [vmem:[%s17453_s2 + $0x204] ss:$16 sps:$4 sm:$0xff]   ;;  %v55_v7 = vld [vmem:[%s17451_s0 + $0x78] sm:$0xff]  ;;  %v264_v9 = vpack.c.bf16 %v47_v4, %v40_v3  ;;  %v11735_v10 = vld [vmem:[%s17453_s2 + $0x200] ss:$16 sps:$4 sm:$0xff]  }
  0x19   :  { %v62_v8 = vld [vmem:[%s17451_s0 + $0xb0] sm:$0xff]  ;;  %v11738_v11 = vld [vmem:[%s17453_s2 + $0x208] ss:$16 sps:$4 sm:$0xff]   ;;  %v11746_v17 = vld [vmem:[%s17453_s2 + $0x22c] ss:$16 sps:$4 sm:$0xff]  }
  0x1a   :  { %v272_v12 = vpack.c.bf16 %v62_v8, %v55_v7  ;;  %v54_v13 = vld [vmem:[%s17451_s0 + $0x70] sm:$0xff]  ;;  %v61_v14 = vld [vmem:[%s17451_s0 + $0xa8] sm:$0xff]  ;;  %v76_v20 = vld [vmem:[%s17451_s0 + $0x120] sm:$0xff] }
  0x1b   :  { %1636 = vmatpush1.bf16.msra.mxu0 %v11679_v26  ;;  %2408 = vmatpush1.bf16.msra.mxu1 %v11680_v27  ;;  %v11741_v15 = vld [vmem:[%s17453_s2 + $0x220] ss:$16 sps:$4 sm:$0xff]   ;;  %v11743_v16 = vld [vmem:[%s17453_s2 + $0x224] ss:$16 sps:$4 sm:$0xff]   ;;  %v11744_v18 = vld [vmem:[%s17453_s2 + $0x228] ss:$16 sps:$4 sm:$0xff]   ;;  %v271_v23 = vpack.c.bf16 %v61_v14, %v54_v13 }
  0x1c   :  { %1637 = vmatprep.subr.bf16.mxu0 %v11681_v28  ;;  %2409 = vmatprep.subr.bf16.mxu1 %v11683_v29  ;;  %v69_v19 = vld [vmem:[%s17451_s0 + $0xe8] sm:$0xff]  ;;  %v11749_v21 = vld [vmem:[%s17453_s2 + $0x244] ss:$16 sps:$4 sm:$0xff]   ;;  %v11747_v25 = vld [vmem:[%s17453_s2 + $0x240] ss:$16 sps:$4 sm:$0xff]  }
  0x1d   :  { %v11752_v22 = vld [vmem:[%s17453_s2 + $0x24c] ss:$16 sps:$4 sm:$0xff]   ;;  %v279_v24 = vpack.c.bf16 %v76_v20, %v69_v19  ;;  %v11750_v26 = vld [vmem:[%s17453_s2 + $0x248] ss:$16 sps:$4 sm:$0xff]   ;;  %v68_v27 = vld [vmem:[%s17451_s0 + $0xe0] sm:$0xff] }
  0x1e   :  { %v11755_v28 = vld [vmem:[%s17453_s2 + $0x264] ss:$16 sps:$4 sm:$0xff]   ;;  %v11758_v29 = vld [vmem:[%s17453_s2 + $0x26c] ss:$16 sps:$4 sm:$0xff]   ;;  %v11783_v3 = vld [vmem:[%s17453_s2 + $0x300] ss:$16 sps:$4 sm:$0xff]  }
  0x1f   :  { %1638 = vmatpush1.bf16.msra.mxu0 %v11685_v30  ;;  %2410 = vmatpush1.bf16.msra.mxu1 %v11686_v31  ;;  %v75_v30 = vld [vmem:[%s17451_s0 + $0x118] sm:$0xff]  ;;  %v104_v46 = vld [vmem:[%s17451_s0 + $0x200] sm:$0xff]  ;;  %v117_v8 = vld [vmem:[%s17451_s0 + $0x268] sm:$0xff] }
  0x20   :  { %1639 = vmatprep.subr.bf16.mxu0 %v11687_v32  ;;  %2411 = vmatprep.subr.bf16.mxu1 %v11689_v33  ;;  %v83_v31 = vld [vmem:[%s17451_s0 + $0x158] sm:$0xff]  ;;  %v90_v32 = vld [vmem:[%s17451_s0 + $0x190] sm:$0xff]  ;;  %v124_v19 = vld [vmem:[%s17451_s0 + $0x2a0] sm:$0xff] }
  0x21   :  { %v11753_v33 = vld [vmem:[%s17453_s2 + $0x260] ss:$16 sps:$4 sm:$0xff]   ;;  %v11773_v49 = vld [vmem:[%s17453_s2 + $0x2c4] ss:$16 sps:$4 sm:$0xff]   ;;  %v11786_v4 = vld [vmem:[%s17453_s2 + $0x308] ss:$16 sps:$4 sm:$0xff]  }
  0x22   :  { %v11794_v7 = vld [vmem:[%s17453_s2 + $0x32c] ss:$16 sps:$4 sm:$0xff]   ;;  %v11797_v13 = vld [vmem:[%s17453_s2 + $0x344] ss:$16 sps:$4 sm:$0xff]  }
  0x23   :  { %1640 = vmatpush1.bf16.msra.mxu0 %v11691_v34  ;;  %2412 = vmatpush1.bf16.msra.mxu1 %v11692_v35  ;;  %v11756_v34 = vld [vmem:[%s17453_s2 + $0x268] ss:$16 sps:$4 sm:$0xff]   ;;  %v11761_v35 = vld [vmem:[%s17453_s2 + $0x284] ss:$16 sps:$4 sm:$0xff]   ;;  %v11800_v14 = vld [vmem:[%s17453_s2 + $0x34c] ss:$16 sps:$4 sm:$0xff]  }
  0x24   :  { %1641 = vmatprep.subr.bf16.mxu0 %v11693_v36  ;;  %2413 = vmatprep.subr.bf16.mxu1 %v11695_v37  ;;  %v11764_v36 = vld [vmem:[%s17453_s2 + $0x28c] ss:$16 sps:$4 sm:$0xff]   ;;  %v278_v37 = vpack.c.bf16 %v75_v30, %v68_v27  ;;  %v11803_v20 = vld [vmem:[%s17453_s2 + $0x364] ss:$16 sps:$4 sm:$0xff]  }
  0x25   :  { %v11809_v27 = vld [vmem:[%s17453_s2 + $0x384] ss:$16 sps:$4 sm:$0xff]  }
  0x27   :  { %1642 = vmatpush1.bf16.msra.mxu0 %v11697_v38  ;;  %2414 = vmatpush1.bf16.msra.mxu1 %v11698_v39  ;;  %v286_v38 = vpack.c.bf16 %v90_v32, %v83_v31  ;;  %v11759_v39 = vld [vmem:[%s17453_s2 + $0x280] ss:$16 sps:$4 sm:$0xff]   ;;  %v11810_v32 = vld [vmem:[%s17453_s2 + $0x388] ss:$16 sps:$4 sm:$0xff]  }
  0x28   :  { %1643 = vmatprep.subr.bf16.mxu0 %v11699_v40  ;;  %2415 = vmatprep.subr.bf16.mxu1 %v11701_v41  ;;  %v11762_v40 = vld [vmem:[%s17453_s2 + $0x288] ss:$16 sps:$4 sm:$0xff]   ;;  %v82_v41 = vld [vmem:[%s17451_s0 + $0x150] sm:$0xff] }
  0x29   :  { %v11807_v31 = vld [vmem:[%s17453_s2 + $0x380] ss:$16 sps:$4 sm:$0xff]  }
  0x2b   :  { %1644 = vmatpush1.bf16.msra.mxu0 %v11703_v42  ;;  %2416 = vmatpush1.bf16.msra.mxu1 %v11704_v43  ;;  %v11767_v42 = vld [vmem:[%s17453_s2 + $0x2a4] ss:$16 sps:$4 sm:$0xff]   ;;  %v11770_v43 = vld [vmem:[%s17453_s2 + $0x2ac] ss:$16 sps:$4 sm:$0xff]  }
  0x2c   :  { %1645 = vmatprep.subr.bf16.mxu0 %v11705_v44  ;;  %2417 = vmatprep.subr.bf16.mxu1 %v11707_v45  ;;  %v89_v44 = vld [vmem:[%s17451_s0 + $0x188] sm:$0xff] }
  0x2d   :  { %v97_v45 = vld [vmem:[%s17451_s0 + $0x1c8] sm:$0xff]  ;;  %v285_v51 = vpack.c.bf16 %v89_v44, %v82_v41  ;;  %v11821_v41 = vld [vmem:[%s17453_s2 + $0x3c4] ss:$16 sps:$4 sm:$0xff]  }
  0x2f   :  { %1646 = vmatpush1.bf16.msra.mxu0 %v11709_v47  ;;  %2418 = vmatpush1.bf16.msra.mxu1 %v11710_v48  ;;  %v11765_v47 = vld [vmem:[%s17453_s2 + $0x2a0] ss:$16 sps:$4 sm:$0xff]   ;;  %v11768_v48 = vld [vmem:[%s17453_s2 + $0x2a8] ss:$16 sps:$4 sm:$0xff]  }
  0x30   :  { %1647 = vmatprep.subr.bf16.mxu0 %v11711_v50  ;;  %2419 = vmatprep.subr.bf16.mxu1 %v11713_v52  ;;  %v11776_v50 = vld [vmem:[%s17453_s2 + $0x2cc] ss:$16 sps:$4 sm:$0xff]   ;;  %v293_v52 = vpack.c.bf16 %v104_v46, %v97_v45  ;;  %v11819_v45 = vld [vmem:[%s17453_s2 + $0x3c0] ss:$16 sps:$4 sm:$0xff]   ;;  %v11822_v46 = vld [vmem:[%s17453_s2 + $0x3c8] ss:$16 sps:$4 sm:$0xff]  }
  0x33   :  { %1648 = vmatpush1.bf16.msra.mxu0 %v11715_v53  ;;  %2420 = vmatpush1.bf16.msra.mxu1 %v11716_v54  ;;  %v11771_v53 = vld [vmem:[%s17453_s2 + $0x2c0] ss:$16 sps:$4 sm:$0xff]   ;;  %v11774_v54 = vld [vmem:[%s17453_s2 + $0x2c8] ss:$16 sps:$4 sm:$0xff]  }
  0x34   :  { %1649 = vmatprep.subr.bf16.mxu0 %v11717_v55  ;;  %2421 = vmatprep.subr.bf16.mxu1 %v11719_v56  ;;  %v96_v55 = vld [vmem:[%s17451_s0 + $0x1c0] sm:$0xff] }
  0x35   :  { %v11779_v56 = vld [vmem:[%s17453_s2 + $0x2e4] ss:$16 sps:$4 sm:$0xff]  }
  0x37   :  { %1650 = vmatpush1.bf16.msra.mxu0 %v11721_v57  ;;  %2422 = vmatpush1.bf16.msra.mxu1 %v11722_v58  ;;  %v11782_v57 = vld [vmem:[%s17453_s2 + $0x2ec] ss:$16 sps:$4 sm:$0xff]  }
  0x38   :  { %1651 = vmatprep.subr.bf16.mxu0 %v11723_v59  ;;  %2423 = vmatprep.subr.bf16.mxu1 %v11725_v60  ;;  %v103_v58 = vld [vmem:[%s17451_s0 + $0x1f8] sm:$0xff]  ;;  %v118_v60 = vld [vmem:[%s17451_s0 + $0x270] sm:$0xff] }
  0x39   :  { %v111_v59 = vld [vmem:[%s17451_s0 + $0x238] sm:$0xff] }
  0x3b   :  { %1652 = vmatpush1.bf16.msra.mxu0 %v11727_v61  ;;  %2424 = vmatpush1.bf16.msra.mxu1 %v11728_v62  ;;  %v11777_v61 = vld [vmem:[%s17453_s2 + $0x2e0] ss:$16 sps:$4 sm:$0xff]   ;;  %v11780_v62 = vld [vmem:[%s17453_s2 + $0x2e8] ss:$16 sps:$4 sm:$0xff]  }
  0x3c   :  { %1653 = vmatprep.subr.bf16.mxu0 %v11729_v63  ;;  %2425 = vmatprep.subr.bf16.mxu1 %v11731_v0  ;;  %v11785_v63 = vld [vmem:[%s17453_s2 + $0x304] ss:$16 sps:$4 sm:$0xff]   ;;  %v11788_v0 = vld [vmem:[%s17453_s2 + $0x30c] ss:$16 sps:$4 sm:$0xff]  }
  0x3f   :  { %1654 = vmatpush1.bf16.msra.mxu0 %v11733_v1  ;;  %2426 = vmatpush1.bf16.msra.mxu1 %v11734_v2  ;;  %v292_v1 = vpack.c.bf16 %v103_v58, %v96_v55  ;;  %v300_v2 = vpack.c.bf16 %v118_v60, %v111_v59  ;;  %v11833_v55 = vld [vmem:[%s17453_s2 + $0x404] ss:$16 sps:$4 sm:$0xff]   ;;  %v173_v60 = vld [vmem:[%s17451_s0 + $0x428] sm:$0xff] }
  0x40   :  { %1816 = vmatprep.subr.bf16.mxu0 %v11737_v5  ;;  %2588 = vmatprep.subr.bf16.mxu1 %v11740_v6  ;;  %v110_v5 = vld [vmem:[%s17451_s0 + $0x230] sm:$0xff] }
  0x41   :  { %v11791_v6 = vld [vmem:[%s17453_s2 + $0x324] ss:$16 sps:$4 sm:$0xff]  }
  0x42   :  { %1656 = vmatmul.mubr.bf16.vlgmr.msra.gmra.mrb[0].mxu0 %v264_v9  ;;  %2428 = vmatmul.mubr.bf16.vlgmr.msra.gmra.mrb[0].mxu1 %v264_v9  ;;  %v125_v9 = vld [vmem:[%s17451_s0 + $0x2a8] sm:$0xff]  ;;  %v166_v59 = vld [vmem:[%s17451_s0 + $0x3f0] sm:$0xff] }
  0x43   :  { %1817 = vmatpush1.bf16.msra.mxu0 %v11735_v10  ;;  %2589 = vmatpush1.bf16.msra.mxu1 %v11738_v11  ;;  %v132_v10 = vld [vmem:[%s17451_s0 + $0x2e0] sm:$0xff] }
  0x44   :  { %1665 = vmatprep.mubr.bf16.mxu0 %v272_v12  ;;  %2437 = vmatprep.mubr.bf16.mxu1 %v272_v12  ;;  %v11789_v11 = vld [vmem:[%s17453_s2 + $0x320] ss:$16 sps:$4 sm:$0xff]   ;;  %v11792_v12 = vld [vmem:[%s17453_s2 + $0x328] ss:$16 sps:$4 sm:$0xff]  }
  0x45   :  { %1818 = vmatprep.subr.bf16.mxu0 %v11743_v16  ;;  %2590 = vmatprep.subr.bf16.mxu1 %v11746_v17  ;;  %v307_v16 = vpack.c.bf16 %v132_v10, %v125_v9  ;;  %v11795_v17 = vld [vmem:[%s17453_s2 + $0x340] ss:$16 sps:$4 sm:$0xff]   ;;  %v209_v9 = vld [vmem:[%s17451_s0 + $0x548] sm:$0xff] }
  0x46   :  { %v216_v10 = vld [vmem:[%s17451_s0 + $0x580] sm:$0xff] }
  0x47   :  { %1819 = vmatpush1.bf16.msra.mxu0 %v11741_v15  ;;  %2591 = vmatpush1.bf16.msra.mxu1 %v11744_v18  ;;  %v299_v15 = vpack.c.bf16 %v117_v8, %v110_v5  ;;  %v11798_v18 = vld [vmem:[%s17453_s2 + $0x348] ss:$16 sps:$4 sm:$0xff]  }
  0x48   :  { %1820 = vmatprep.subr.bf16.mxu0 %v11749_v21  ;;  %2592 = vmatprep.subr.bf16.mxu1 %v11752_v22  ;;  %v11806_v21 = vld [vmem:[%s17453_s2 + $0x36c] ss:$16 sps:$4 sm:$0xff]  }
  0x49   :  { %v131_v22 = vld [vmem:[%s17451_s0 + $0x2d8] sm:$0xff]  ;;  %v201_v8 = vld [vmem:[%s17451_s0 + $0x508] sm:$0xff] }
  0x4a   :  { %1666 = vmatmul.mubr.bf16.gmra.mrb[4].mxu0 %v271_v23  ;;  %2438 = vmatmul.mubr.bf16.gmra.mrb[4].mxu1 %v271_v23  ;;  %v139_v23 = vld [vmem:[%s17451_s0 + $0x318] sm:$0xff] }
  0x4b   :  { %1675 = vmatprep.mubr.bf16.mxu0 %v279_v24  ;;  %2447 = vmatprep.mubr.bf16.mxu1 %v279_v24  ;;  %v146_v24 = vld [vmem:[%s17451_s0 + $0x350] sm:$0xff] }
  0x4c   :  { %1821 = vmatpush1.bf16.msra.mxu0 %v11747_v25  ;;  %2593 = vmatpush1.bf16.msra.mxu1 %v11750_v26  ;;  %v11801_v25 = vld [vmem:[%s17453_s2 + $0x360] ss:$16 sps:$4 sm:$0xff]   ;;  %v11804_v26 = vld [vmem:[%s17453_s2 + $0x368] ss:$16 sps:$4 sm:$0xff]   ;;  %v314_v30 = vpack.c.bf16 %v146_v24, %v139_v23 }
  0x4d   :  { %1822 = vmatprep.subr.bf16.mxu0 %v11755_v28  ;;  %2594 = vmatprep.subr.bf16.mxu1 %v11758_v29  ;;  %v11812_v28 = vld [vmem:[%s17453_s2 + $0x38c] ss:$16 sps:$4 sm:$0xff]   ;;  %v306_v29 = vpack.c.bf16 %v131_v22, %v124_v19  ;;  %v222_v19 = vld [vmem:[%s17451_s0 + $0x5b0] sm:$0xff]  ;;  %v244_v22 = vld [vmem:[%s17451_s0 + $0x660] sm:$0xff] }
  0x50   :  { %1823 = vmatpush1.bf16.msra.mxu0 %v11753_v33  ;;  %2595 = vmatpush1.bf16.msra.mxu1 %v11756_v34  ;;  %v138_v33 = vld [vmem:[%s17451_s0 + $0x310] sm:$0xff] }
  0x51   :  { %1824 = vmatprep.subr.bf16.mxu0 %v11761_v35  ;;  %2596 = vmatprep.subr.bf16.mxu1 %v11764_v36  ;;  %v11815_v34 = vld [vmem:[%s17453_s2 + $0x3a4] ss:$16 sps:$4 sm:$0xff]   ;;  %v11818_v35 = vld [vmem:[%s17453_s2 + $0x3ac] ss:$16 sps:$4 sm:$0xff]  }
  0x52   :  { %1676 = vmatmul.mubr.bf16.gmra.mrb[8].mxu0 %v278_v37  ;;  %2448 = vmatmul.mubr.bf16.gmra.mrb[8].mxu1 %v278_v37  ;;  %v145_v36 = vld [vmem:[%s17451_s0 + $0x348] sm:$0xff] }
  0x53   :  { %1685 = vmatprep.mubr.bf16.mxu0 %v286_v38  ;;  %2457 = vmatprep.mubr.bf16.mxu1 %v286_v38  ;;  %v153_v37 = vld [vmem:[%s17451_s0 + $0x388] sm:$0xff]  ;;  %v160_v38 = vld [vmem:[%s17451_s0 + $0x3c0] sm:$0xff] }
  0x54   :  { %1825 = vmatpush1.bf16.msra.mxu0 %v11759_v39  ;;  %2597 = vmatpush1.bf16.msra.mxu1 %v11762_v40  ;;  %v11813_v39 = vld [vmem:[%s17453_s2 + $0x3a0] ss:$16 sps:$4 sm:$0xff]   ;;  %v11816_v40 = vld [vmem:[%s17453_s2 + $0x3a8] ss:$16 sps:$4 sm:$0xff]   ;;  %v321_v44 = vpack.c.bf16 %v160_v38, %v153_v37 }
  0x55   :  { %1826 = vmatprep.subr.bf16.mxu0 %v11767_v42  ;;  %2598 = vmatprep.subr.bf16.mxu1 %v11770_v43  ;;  %v11824_v42 = vld [vmem:[%s17453_s2 + $0x3cc] ss:$16 sps:$4 sm:$0xff]   ;;  %v313_v43 = vpack.c.bf16 %v145_v36, %v138_v33  ;;  %v42_v37 = vld [vmem:[%s17451_s0 + $0x10] sm:$0xff] }
  0x56   :  { %v43_v33 = vld [vmem:[%s17451_s0 + $0x18] sm:$0xff]  ;;  %v49_v38 = vld [vmem:[%s17451_s0 + $0x48] sm:$0xff] }
  0x58   :  { %1827 = vmatpush1.bf16.msra.mxu0 %v11765_v47  ;;  %2599 = vmatpush1.bf16.msra.mxu1 %v11768_v48  ;;  %v152_v47 = vld [vmem:[%s17451_s0 + $0x380] sm:$0xff] }
  0x59   :  { %1828 = vmatprep.subr.bf16.mxu0 %v11773_v49  ;;  %2600 = vmatprep.subr.bf16.mxu1 %v11776_v50  ;;  %v11827_v48 = vld [vmem:[%s17453_s2 + $0x3e4] ss:$16 sps:$4 sm:$0xff]   ;;  %v11830_v49 = vld [vmem:[%s17453_s2 + $0x3ec] ss:$16 sps:$4 sm:$0xff]  }
  0x5a   :  { %1686 = vmatmul.mubr.bf16.gmra.mrb[12].mxu0 %v285_v51  ;;  %2458 = vmatmul.mubr.bf16.gmra.mrb[12].mxu1 %v285_v51  ;;  %v159_v50 = vld [vmem:[%s17451_s0 + $0x3b8] sm:$0xff] }
  0x5b   :  { %1695 = vmatprep.mubr.bf16.mxu0 %v293_v52  ;;  %2467 = vmatprep.mubr.bf16.mxu1 %v293_v52  ;;  %v167_v51 = vld [vmem:[%s17451_s0 + $0x3f8] sm:$0xff]  ;;  %v174_v52 = vld [vmem:[%s17451_s0 + $0x430] sm:$0xff] }
  0x5c   :  { %1829 = vmatpush1.bf16.msra.mxu0 %v11771_v53  ;;  %2601 = vmatpush1.bf16.msra.mxu1 %v11774_v54  ;;  %v11825_v53 = vld [vmem:[%s17453_s2 + $0x3e0] ss:$16 sps:$4 sm:$0xff]   ;;  %v11828_v54 = vld [vmem:[%s17453_s2 + $0x3e8] ss:$16 sps:$4 sm:$0xff]   ;;  %v328_v58 = vpack.c.bf16 %v174_v52, %v167_v51 }
  0x5d   :  { %1830 = vmatprep.subr.bf16.mxu0 %v11779_v56  ;;  %2602 = vmatprep.subr.bf16.mxu1 %v11782_v57  ;;  %v11836_v56 = vld [vmem:[%s17453_s2 + $0x40c] ss:$16 sps:$4 sm:$0xff]   ;;  %v320_v57 = vpack.c.bf16 %v159_v50, %v152_v47  ;;  %v56_v47 = vld [vmem:[%s17451_s0 + $0x80] sm:$0xff]  ;;  %v11840_v50 = vld [vmem:[%s17453_s2 + $0x428] ss:$16 sps:$4 sm:$0xff]  }
  0x5e   :  { %v71_v51 = vld [vmem:[%s17451_s0 + $0xf8] sm:$0xff]  ;;  %v78_v52 = vld [vmem:[%s17451_s0 + $0x130] sm:$0xff] }
  0x60   :  { %1831 = vmatpush1.bf16.msra.mxu0 %v11777_v61  ;;  %2603 = vmatpush1.bf16.msra.mxu1 %v11780_v62  ;;  %v181_v61 = vld [vmem:[%s17451_s0 + $0x468] sm:$0xff]  ;;  %v188_v62 = vld [vmem:[%s17451_s0 + $0x4a0] sm:$0xff] }
  0x61   :  { %1832 = vmatprep.subr.bf16.mxu0 %v11785_v63  ;;  %2604 = vmatprep.subr.bf16.mxu1 %v11788_v0  ;;  %v327_v63 = vpack.c.bf16 %v173_v60, %v166_v59  ;;  %v335_v0 = vpack.c.bf16 %v188_v62, %v181_v61  ;;  %v11851_v59 = vld [vmem:[%s17453_s2 + $0x464] ss:$16 sps:$4 sm:$0xff]   ;;  %v11854_v60 = vld [vmem:[%s17453_s2 + $0x46c] ss:$16 sps:$4 sm:$0xff]  }
  0x62   :  { %1696 = vmatmul.mubr.bf16.gmra.mrb[16].mxu0 %v292_v1  ;;  %2468 = vmatmul.mubr.bf16.gmra.mrb[16].mxu1 %v292_v1  ;;  %v180_v1 = vld [vmem:[%s17451_s0 + $0x460] sm:$0xff]  ;;  %v70_v61 = vld [vmem:[%s17451_s0 + $0xf0] sm:$0xff]  ;;  %v77_v62 = vld [vmem:[%s17451_s0 + $0x128] sm:$0xff] }
  0x63   :  { %1705 = vmatprep.mubr.bf16.mxu0 %v300_v2  ;;  %2477 = vmatprep.mubr.bf16.mxu1 %v300_v2  ;;  %v187_v2 = vld [vmem:[%s17451_s0 + $0x498] sm:$0xff] }
  0x64   :  { %1833 = vmatpush1.bf16.msra.mxu0 %v11783_v3  ;;  %2605 = vmatpush1.bf16.msra.mxu1 %v11786_v4  ;;  %v195_v3 = vld [vmem:[%s17451_s0 + $0x4d8] sm:$0xff]  ;;  %v202_v4 = vld [vmem:[%s17451_s0 + $0x510] sm:$0xff]  ;;  %v334_v5 = vpack.c.bf16 %v187_v2, %v180_v1 }
  0x65   :  { %1834 = vmatprep.subr.bf16.mxu0 %v11791_v6  ;;  %2606 = vmatprep.subr.bf16.mxu1 %v11794_v7  ;;  %v342_v6 = vpack.c.bf16 %v202_v4, %v195_v3  ;;  %v194_v7 = vld [vmem:[%s17451_s0 + $0x4d0] sm:$0xff]  ;;  %v11852_v2 = vld [vmem:[%s17453_s2 + $0x468] ss:$16 sps:$4 sm:$0xff]   ;;  %v11860_v4 = vld [vmem:[%s17453_s2 + $0x48c] ss:$16 sps:$4 sm:$0xff]  }
  0x66   :  { %v11849_v1 = vld [vmem:[%s17453_s2 + $0x460] ss:$16 sps:$4 sm:$0xff]   ;;  %v11857_v3 = vld [vmem:[%s17453_s2 + $0x484] ss:$16 sps:$4 sm:$0xff]  }
  0x68   :  { %1835 = vmatpush1.bf16.msra.mxu0 %v11789_v11  ;;  %2607 = vmatpush1.bf16.msra.mxu1 %v11792_v12  ;;  %v341_v11 = vpack.c.bf16 %v201_v8, %v194_v7  ;;  %v349_v12 = vpack.c.bf16 %v216_v10, %v209_v9  ;;  %v11858_v7 = vld [vmem:[%s17453_s2 + $0x488] ss:$16 sps:$4 sm:$0xff]   ;;  %v11863_v9 = vld [vmem:[%s17453_s2 + $0x4a4] ss:$16 sps:$4 sm:$0xff]   ;;  %v11866_v10 = vld [vmem:[%s17453_s2 + $0x4ac] ss:$16 sps:$4 sm:$0xff]  }
  0x69   :  { %1836 = vmatprep.subr.bf16.mxu0 %v11797_v13  ;;  %2608 = vmatprep.subr.bf16.mxu1 %v11800_v14  ;;  %v208_v13 = vld [vmem:[%s17451_s0 + $0x540] sm:$0xff]  ;;  %v215_v14 = vld [vmem:[%s17451_s0 + $0x578] sm:$0xff] }
  0x6a   :  { %1706 = vmatmul.mubr.bf16.gmra.mrb[20].mxu0 %v299_v15  ;;  %2478 = vmatmul.mubr.bf16.gmra.mrb[20].mxu1 %v299_v15  ;;  %v223_v15 = vld [vmem:[%s17451_s0 + $0x5b8] sm:$0xff] }
  0x6b   :  { %1715 = vmatprep.mubr.bf16.mxu0 %v307_v16  ;;  %2487 = vmatprep.mubr.bf16.mxu1 %v307_v16  ;;  %v230_v16 = vld [vmem:[%s17451_s0 + $0x5f0] sm:$0xff] }
  0x6c   :  { %1837 = vmatpush1.bf16.msra.mxu0 %v11795_v17  ;;  %2609 = vmatpush1.bf16.msra.mxu1 %v11798_v18  ;;  %v348_v17 = vpack.c.bf16 %v215_v14, %v208_v13  ;;  %v356_v18 = vpack.c.bf16 %v230_v16, %v223_v15  ;;  %v99_v13 = vld [vmem:[%s17451_s0 + $0x1d8] sm:$0xff]  ;;  %v106_v14 = vld [vmem:[%s17451_s0 + $0x210] sm:$0xff] }
  0x6d   :  { %1838 = vmatprep.subr.bf16.mxu0 %v11803_v20  ;;  %2610 = vmatprep.subr.bf16.mxu1 %v11806_v21  ;;  %v229_v20 = vld [vmem:[%s17451_s0 + $0x5e8] sm:$0xff]  ;;  %v11861_v15 = vld [vmem:[%s17453_s2 + $0x4a0] ss:$16 sps:$4 sm:$0xff]  }
  0x6e   :  { %v237_v21 = vld [vmem:[%s17451_s0 + $0x628] sm:$0xff]  ;;  %v355_v23 = vpack.c.bf16 %v229_v20, %v222_v19  ;;  %v11867_v20 = vld [vmem:[%s17453_s2 + $0x4c0] ss:$16 sps:$4 sm:$0xff]  }
  0x6f   :  { %v363_v24 = vpack.c.bf16 %v244_v22, %v237_v21  ;;  %v11864_v16 = vld [vmem:[%s17453_s2 + $0x4a8] ss:$16 sps:$4 sm:$0xff]   ;;  %v295_v22 = vpack.c.bf16 %v106_v14, %v99_v13 }
  0x70   :  { %1839 = vmatpush1.bf16.msra.mxu0 %v11801_v25  ;;  %2611 = vmatpush1.bf16.msra.mxu1 %v11804_v26  ;;  %v236_v25 = vld [vmem:[%s17451_s0 + $0x620] sm:$0xff]  ;;  %v243_v26 = vld [vmem:[%s17451_s0 + $0x658] sm:$0xff] }
  0x71   :  { %1840 = vmatprep.subr.bf16.mxu0 %v11809_v27  ;;  %2612 = vmatprep.subr.bf16.mxu1 %v11812_v28  ;;  %v251_v27 = vld [vmem:[%s17451_s0 + $0x698] sm:$0xff]  ;;  %v258_v28 = vld [vmem:[%s17451_s0 + $0x6d0] sm:$0xff] }
  0x72   :  { %1716 = vmatmul.mubr.bf16.gmra.mrb[24].mxu0 %v306_v29  ;;  %2488 = vmatmul.mubr.bf16.gmra.mrb[24].mxu1 %v306_v29  ;;  %v362_v29 = vpack.c.bf16 %v243_v26, %v236_v25  ;;  %v11870_v21 = vld [vmem:[%s17453_s2 + $0x4c8] ss:$16 sps:$4 sm:$0xff]   ;;  %v98_v25 = vld [vmem:[%s17451_s0 + $0x1d0] sm:$0xff] }
  0x73   :  { %1725 = vmatprep.mubr.bf16.mxu0 %v314_v30  ;;  %2497 = vmatprep.mubr.bf16.mxu1 %v314_v30  ;;  %v370_v30 = vpack.c.bf16 %v258_v28, %v251_v27  ;;  %v105_v26 = vld [vmem:[%s17451_s0 + $0x208] sm:$0xff]  ;;  %v120_v28 = vld [vmem:[%s17451_s0 + $0x280] sm:$0xff] }
  0x74   :  { %1841 = vmatpush1.bf16.msra.mxu0 %v11807_v31  ;;  %2613 = vmatpush1.bf16.msra.mxu1 %v11810_v32  ;;  %v250_v31 = vld [vmem:[%s17451_s0 + $0x690] sm:$0xff]  ;;  %v257_v32 = vld [vmem:[%s17451_s0 + $0x6c8] sm:$0xff] }
  0x75   :  { %1842 = vmatprep.subr.bf16.mxu0 %v11815_v34  ;;  %2614 = vmatprep.subr.bf16.mxu1 %v11818_v35  ;;  %v50_v34 = vld [vmem:[%s17451_s0 + $0x50] sm:$0xff]  ;;  %v369_v35 = vpack.c.bf16 %v257_v32, %v250_v31  ;;  %v113_v27 = vld [vmem:[%s17451_s0 + $0x248] sm:$0xff] }
  0x76   :  { %v267_v36 = vpack.c.bf16 %v50_v34, %v43_v33  ;;  %v11881_v31 = vld [vmem:[%s17453_s2 + $0x504] ss:$16 sps:$4 sm:$0xff]   ;;  %v11884_v32 = vld [vmem:[%s17453_s2 + $0x50c] ss:$16 sps:$4 sm:$0xff]   ;;  %v294_v33 = vpack.c.bf16 %v105_v26, %v98_v25  ;;  %v11879_v34 = vld [vmem:[%s17453_s2 + $0x500] ss:$16 sps:$4 sm:$0xff]  }
  0x77   :  { %v11918_v13 = vld [vmem:[%s17453_s2 + $0x5c8] ss:$16 sps:$4 sm:$0xff]  }
  0x78   :  { %1843 = vmatpush1.bf16.msra.mxu0 %v11813_v39  ;;  %2615 = vmatpush1.bf16.msra.mxu1 %v11816_v40  ;;  %v57_v39 = vld [vmem:[%s17451_s0 + $0x88] sm:$0xff]  ;;  %v64_v40 = vld [vmem:[%s17451_s0 + $0xc0] sm:$0xff] }
  0x79   :  { %1844 = vmatprep.subr.bf16.mxu0 %v11821_v41  ;;  %2616 = vmatprep.subr.bf16.mxu1 %v11824_v42  ;;  %v11831_v41 = vld [vmem:[%s17453_s2 + $0x400] ss:$16 sps:$4 sm:$0xff]   ;;  %v11834_v42 = vld [vmem:[%s17453_s2 + $0x408] ss:$16 sps:$4 sm:$0xff]  }
  0x7a   :  { %1726 = vmatmul.mubr.bf16.gmra.mrb[28].mxu0 %v313_v43  ;;  %2498 = vmatmul.mubr.bf16.gmra.mrb[28].mxu1 %v313_v43  ;;  %v266_v43 = vpack.c.bf16 %v49_v38, %v42_v37  ;;  %v11887_v37 = vld [vmem:[%s17453_s2 + $0x524] ss:$16 sps:$4 sm:$0xff]   ;;  %v11890_v38 = vld [vmem:[%s17453_s2 + $0x52c] ss:$16 sps:$4 sm:$0xff]  }
  0x7b   :  { %1735 = vmatprep.mubr.bf16.mxu0 %v321_v44  ;;  %2507 = vmatprep.mubr.bf16.mxu1 %v321_v44  ;;  %v11839_v44 = vld [vmem:[%s17453_s2 + $0x424] ss:$16 sps:$4 sm:$0xff]  }
  0x7c   :  { %1845 = vmatpush1.bf16.msra.mxu0 %v11819_v45  ;;  %2617 = vmatpush1.bf16.msra.mxu1 %v11822_v46  ;;  %v11842_v45 = vld [vmem:[%s17453_s2 + $0x42c] ss:$16 sps:$4 sm:$0xff]   ;;  %v274_v46 = vpack.c.bf16 %v64_v40, %v57_v39  ;;  %v112_v39 = vld [vmem:[%s17451_s0 + $0x240] sm:$0xff] }
  0x7d   :  { %1846 = vmatprep.subr.bf16.mxu0 %v11827_v48  ;;  %2618 = vmatprep.subr.bf16.mxu1 %v11830_v49  ;;  %v63_v48 = vld [vmem:[%s17451_s0 + $0xb8] sm:$0xff]  ;;  %v11837_v49 = vld [vmem:[%s17453_s2 + $0x420] ss:$16 sps:$4 sm:$0xff]  }
  0x7e   :  { %v119_v40 = vld [vmem:[%s17451_s0 + $0x278] sm:$0xff] }
  0x80   :  { %1847 = vmatpush1.bf16.msra.mxu0 %v11825_v53  ;;  %2619 = vmatpush1.bf16.msra.mxu1 %v11828_v54  ;;  %v11845_v53 = vld [vmem:[%s17453_s2 + $0x444] ss:$16 sps:$4 sm:$0xff]   ;;  %v11848_v54 = vld [vmem:[%s17453_s2 + $0x44c] ss:$16 sps:$4 sm:$0xff]  }
  0x81   :  { %2009 = vmatprep.subr.bf16.mxu0 %v11833_v55  ;;  %2781 = vmatprep.subr.bf16.mxu1 %v11836_v56  ;;  %v273_v55 = vpack.c.bf16 %v63_v48, %v56_v47  ;;  %v11843_v56 = vld [vmem:[%s17453_s2 + $0x440] ss:$16 sps:$4 sm:$0xff]   ;;  %v301_v47 = vpack.c.bf16 %v119_v40, %v112_v39  ;;  %v203_v40 = vld [vmem:[%s17451_s0 + $0x518] sm:$0xff] }
  0x82   :  { %1736 = vmatmul.mubr.bf16.gmra.mrb[32].mxu0 %v320_v57  ;;  %2508 = vmatmul.mubr.bf16.gmra.mrb[32].mxu1 %v320_v57  ;;  %v11846_v57 = vld [vmem:[%s17453_s2 + $0x448] ss:$16 sps:$4 sm:$0xff]   ;;  %v11891_v48 = vld [vmem:[%s17453_s2 + $0x540] ss:$16 sps:$4 sm:$0xff]  }
  0x83   :  { %1745 = vmatprep.mubr.bf16.mxu0 %v328_v58  ;;  %2517 = vmatprep.mubr.bf16.mxu1 %v328_v58  ;;  %v281_v58 = vpack.c.bf16 %v78_v52, %v71_v51  ;;  %v11899_v51 = vld [vmem:[%s17453_s2 + $0x564] ss:$16 sps:$4 sm:$0xff]   ;;  %v11902_v52 = vld [vmem:[%s17453_s2 + $0x56c] ss:$16 sps:$4 sm:$0xff]  }
  0x84   :  { %v196_v39 = vld [vmem:[%s17451_s0 + $0x4e0] sm:$0xff] }
  0x8a   :  { %1746 = vmatmul.mubr.bf16.gmra.mrb[36].mxu0 %v327_v63  ;;  %2518 = vmatmul.mubr.bf16.gmra.mrb[36].mxu1 %v327_v63  ;;  %v85_v63 = vld [vmem:[%s17451_s0 + $0x168] sm:$0xff] }
  0x8b   :  { %1755 = vmatprep.mubr.bf16.mxu0 %v335_v0  ;;  %2527 = vmatprep.mubr.bf16.mxu1 %v335_v0  ;;  %v92_v0 = vld [vmem:[%s17451_s0 + $0x1a0] sm:$0xff] }
  0x8c   :  { %v288_v8 = vpack.c.bf16 %v92_v0, %v85_v63  ;;  %v11906_v63 = vld [vmem:[%s17453_s2 + $0x588] ss:$16 sps:$4 sm:$0xff]  }
  0x92   :  { %1756 = vmatmul.mubr.bf16.gmra.mrb[40].mxu0 %v334_v5  ;;  %2528 = vmatmul.mubr.bf16.gmra.mrb[40].mxu1 %v334_v5  ;;  %v280_v5 = vpack.c.bf16 %v77_v62, %v70_v61  ;;  %v11903_v62 = vld [vmem:[%s17453_s2 + $0x580] ss:$16 sps:$4 sm:$0xff]  }
  0x93   :  { %1765 = vmatprep.mubr.bf16.mxu0 %v342_v6  ;;  %2537 = vmatprep.mubr.bf16.mxu1 %v342_v6  ;;  %v11855_v6 = vld [vmem:[%s17453_s2 + $0x480] ss:$16 sps:$4 sm:$0xff]  }
  0x9a   :  { %1766 = vmatmul.mubr.bf16.gmra.mrb[44].mxu0 %v341_v11  ;;  %2538 = vmatmul.mubr.bf16.gmra.mrb[44].mxu1 %v341_v11  ;;  %v84_v11 = vld [vmem:[%s17451_s0 + $0x160] sm:$0xff] }
  0x9b   :  { %1775 = vmatprep.mubr.bf16.mxu0 %v349_v12  ;;  %2547 = vmatprep.mubr.bf16.mxu1 %v349_v12  ;;  %v91_v12 = vld [vmem:[%s17451_s0 + $0x198] sm:$0xff] }
  0x9c   :  { %v287_v19 = vpack.c.bf16 %v91_v12, %v84_v11  ;;  %v11915_v12 = vld [vmem:[%s17453_s2 + $0x5c0] ss:$16 sps:$4 sm:$0xff]  }
  0xa2   :  { %1776 = vmatmul.mubr.bf16.gmra.mrb[48].mxu0 %v348_v17  ;;  %2548 = vmatmul.mubr.bf16.gmra.mrb[48].mxu1 %v348_v17  ;;  %v11869_v17 = vld [vmem:[%s17453_s2 + $0x4c4] ss:$16 sps:$4 sm:$0xff]  }
  0xa3   :  { %1785 = vmatprep.mubr.bf16.mxu0 %v356_v18  ;;  %2557 = vmatprep.mubr.bf16.mxu1 %v356_v18  ;;  %v11872_v18 = vld [vmem:[%s17453_s2 + $0x4cc] ss:$16 sps:$4 sm:$0xff]  }
  0xaa   :  { %1786 = vmatmul.mubr.bf16.gmra.mrb[52].mxu0 %v355_v23  ;;  %2558 = vmatmul.mubr.bf16.gmra.mrb[52].mxu1 %v355_v23  ;;  %v11875_v23 = vld [vmem:[%s17453_s2 + $0x4e4] ss:$16 sps:$4 sm:$0xff]  }
  0xab   :  { %1795 = vmatprep.mubr.bf16.mxu0 %v363_v24  ;;  %2567 = vmatprep.mubr.bf16.mxu1 %v363_v24  ;;  %v11878_v24 = vld [vmem:[%s17453_s2 + $0x4ec] ss:$16 sps:$4 sm:$0xff]  }
  0xb2   :  { %1796 = vmatmul.mubr.bf16.gmra.mrb[56].mxu0 %v362_v29  ;;  %2568 = vmatmul.mubr.bf16.gmra.mrb[56].mxu1 %v362_v29  ;;  %v11873_v29 = vld [vmem:[%s17453_s2 + $0x4e0] ss:$16 sps:$4 sm:$0xff]  }
  0xb3   :  { %1805 = vmatprep.mubr.bf16.mxu0 %v370_v30  ;;  %2577 = vmatprep.mubr.bf16.mxu1 %v370_v30  ;;  %v11876_v30 = vld [vmem:[%s17453_s2 + $0x4e8] ss:$16 sps:$4 sm:$0xff]  }
  0xba   :  { %1806 = vmatmul.mubr.bf16.gmra.mrb[60].mxu0 %v369_v35  ;;  %2578 = vmatmul.mubr.bf16.gmra.mrb[60].mxu1 %v369_v35  ;;  %v11882_v35 = vld [vmem:[%s17453_s2 + $0x508] ss:$16 sps:$4 sm:$0xff]  }
  0xbb   :  { %1848 = vmatprep.mubr.bf16.mxu0 %v267_v36  ;;  %2620 = vmatprep.mubr.bf16.mxu1 %v267_v36  ;;  %v302_v36 = vpack.c.bf16 %v120_v28, %v113_v27  ;;  %v168_v27 = vld [vmem:[%s17451_s0 + $0x400] sm:$0xff]  ;;  %v175_v28 = vld [vmem:[%s17451_s0 + $0x438] sm:$0xff] }
  0xc2   :  { %1849 = vmatmul.mubr.bf16.vlgmr.msra.gmra.mrb[0].mxu0 %v266_v43  ;;  %2621 = vmatmul.mubr.bf16.vlgmr.msra.gmra.mrb[0].mxu1 %v266_v43  ;;  %v11885_v43 = vld [vmem:[%s17453_s2 + $0x520] ss:$16 sps:$4 sm:$0xff]  }
  0xc3   :  { %2010 = vmatpush1.bf16.msra.mxu0 %v11831_v41  ;;  %2782 = vmatpush1.bf16.msra.mxu1 %v11834_v42  ;;  %v127_v41 = vld [vmem:[%s17451_s0 + $0x2b8] sm:$0xff]  ;;  %v134_v42 = vld [vmem:[%s17451_s0 + $0x2f0] sm:$0xff] }
  0xc4   :  { %1858 = vmatprep.mubr.bf16.mxu0 %v274_v46  ;;  %2630 = vmatprep.mubr.bf16.mxu1 %v274_v46  ;;  %v11896_v46 = vld [vmem:[%s17453_s2 + $0x54c] ss:$16 sps:$4 sm:$0xff]  }
  0xc5   :  { %2011 = vmatprep.subr.bf16.mxu0 %v11839_v44  ;;  %2783 = vmatprep.subr.bf16.mxu1 %v11842_v45  ;;  %v11888_v44 = vld [vmem:[%s17453_s2 + $0x528] ss:$16 sps:$4 sm:$0xff]   ;;  %v11893_v45 = vld [vmem:[%s17453_s2 + $0x544] ss:$16 sps:$4 sm:$0xff]  }
  0xc7   :  { %2012 = vmatpush1.bf16.msra.mxu0 %v11837_v49  ;;  %2784 = vmatpush1.bf16.msra.mxu1 %v11840_v50  ;;  %v11894_v49 = vld [vmem:[%s17453_s2 + $0x548] ss:$16 sps:$4 sm:$0xff]   ;;  %v309_v50 = vpack.c.bf16 %v134_v42, %v127_v41  ;;  %v218_v42 = vld [vmem:[%s17451_s0 + $0x590] sm:$0xff] }
  0xc8   :  { %2013 = vmatprep.subr.bf16.mxu0 %v11845_v53  ;;  %2785 = vmatprep.subr.bf16.mxu1 %v11848_v54  ;;  %v126_v53 = vld [vmem:[%s17451_s0 + $0x2b0] sm:$0xff]  ;;  %v133_v54 = vld [vmem:[%s17451_s0 + $0x2e8] sm:$0xff]  ;;  %v211_v41 = vld [vmem:[%s17451_s0 + $0x558] sm:$0xff] }
  0xc9   :  { %v308_v61 = vpack.c.bf16 %v133_v54, %v126_v53 }
  0xca   :  { %1859 = vmatmul.mubr.bf16.gmra.mrb[4].mxu0 %v273_v55  ;;  %2631 = vmatmul.mubr.bf16.gmra.mrb[4].mxu1 %v273_v55  ;;  %v141_v55 = vld [vmem:[%s17451_s0 + $0x328] sm:$0xff] }
  0xcb   :  { %1868 = vmatprep.mubr.bf16.mxu0 %v281_v58  ;;  %2640 = vmatprep.mubr.bf16.mxu1 %v281_v58  ;;  %v11900_v58 = vld [vmem:[%s17453_s2 + $0x568] ss:$16 sps:$4 sm:$0xff]  }
  0xcc   :  { %2014 = vmatpush1.bf16.msra.mxu0 %v11843_v56  ;;  %2786 = vmatpush1.bf16.msra.mxu1 %v11846_v57  ;;  %v148_v56 = vld [vmem:[%s17451_s0 + $0x360] sm:$0xff] }
  0xcd   :  { %2015 = vmatprep.subr.bf16.mxu0 %v11851_v59  ;;  %2787 = vmatprep.subr.bf16.mxu1 %v11854_v60  ;;  %v11897_v57 = vld [vmem:[%s17453_s2 + $0x560] ss:$16 sps:$4 sm:$0xff]   ;;  %v11905_v59 = vld [vmem:[%s17453_s2 + $0x584] ss:$16 sps:$4 sm:$0xff]   ;;  %v11908_v60 = vld [vmem:[%s17453_s2 + $0x58c] ss:$16 sps:$4 sm:$0xff]   ;;  %v316_v0 = vpack.c.bf16 %v148_v56, %v141_v55 }
  0xd0   :  { %2016 = vmatpush1.bf16.msra.mxu0 %v11849_v1  ;;  %2788 = vmatpush1.bf16.msra.mxu1 %v11852_v2  ;;  %v11911_v1 = vld [vmem:[%s17453_s2 + $0x5a4] ss:$16 sps:$4 sm:$0xff]   ;;  %v11914_v2 = vld [vmem:[%s17453_s2 + $0x5ac] ss:$16 sps:$4 sm:$0xff]  }
  0xd1   :  { %2017 = vmatprep.subr.bf16.mxu0 %v11857_v3  ;;  %2789 = vmatprep.subr.bf16.mxu1 %v11860_v4  ;;  %v140_v3 = vld [vmem:[%s17451_s0 + $0x320] sm:$0xff]  ;;  %v147_v4 = vld [vmem:[%s17451_s0 + $0x358] sm:$0xff] }
  0xd2   :  { %1869 = vmatmul.mubr.bf16.gmra.mrb[8].mxu0 %v280_v5  ;;  %2641 = vmatmul.mubr.bf16.gmra.mrb[8].mxu1 %v280_v5  ;;  %v155_v5 = vld [vmem:[%s17451_s0 + $0x398] sm:$0xff]  ;;  %v315_v11 = vpack.c.bf16 %v147_v4, %v140_v3 }
  0xd3   :  { %1878 = vmatprep.mubr.bf16.mxu0 %v288_v8  ;;  %2650 = vmatprep.mubr.bf16.mxu1 %v288_v8  ;;  %v11912_v8 = vld [vmem:[%s17453_s2 + $0x5a8] ss:$16 sps:$4 sm:$0xff]  }
  0xd4   :  { %2018 = vmatpush1.bf16.msra.mxu0 %v11855_v6  ;;  %2790 = vmatpush1.bf16.msra.mxu1 %v11858_v7  ;;  %v162_v6 = vld [vmem:[%s17451_s0 + $0x3d0] sm:$0xff] }
  0xd5   :  { %2019 = vmatprep.subr.bf16.mxu0 %v11863_v9  ;;  %2791 = vmatprep.subr.bf16.mxu1 %v11866_v10  ;;  %v11909_v7 = vld [vmem:[%s17453_s2 + $0x5a0] ss:$16 sps:$4 sm:$0xff]   ;;  %v11917_v9 = vld [vmem:[%s17453_s2 + $0x5c4] ss:$16 sps:$4 sm:$0xff]   ;;  %v11920_v10 = vld [vmem:[%s17453_s2 + $0x5cc] ss:$16 sps:$4 sm:$0xff]   ;;  %v323_v14 = vpack.c.bf16 %v162_v6, %v155_v5 }
  0xd8   :  { %2020 = vmatpush1.bf16.msra.mxu0 %v11861_v15  ;;  %2792 = vmatpush1.bf16.msra.mxu1 %v11864_v16  ;;  %v11923_v15 = vld [vmem:[%s17453_s2 + $0x5e4] ss:$16 sps:$4 sm:$0xff]   ;;  %v11926_v16 = vld [vmem:[%s17453_s2 + $0x5ec] ss:$16 sps:$4 sm:$0xff]  }
  0xd9   :  { %2021 = vmatprep.subr.bf16.mxu0 %v11869_v17  ;;  %2793 = vmatprep.subr.bf16.mxu1 %v11872_v18  ;;  %v154_v17 = vld [vmem:[%s17451_s0 + $0x390] sm:$0xff]  ;;  %v161_v18 = vld [vmem:[%s17451_s0 + $0x3c8] sm:$0xff] }
  0xda   :  { %1879 = vmatmul.mubr.bf16.gmra.mrb[12].mxu0 %v287_v19  ;;  %2651 = vmatmul.mubr.bf16.gmra.mrb[12].mxu1 %v287_v19  ;;  %v169_v19 = vld [vmem:[%s17451_s0 + $0x408] sm:$0xff]  ;;  %v322_v25 = vpack.c.bf16 %v161_v18, %v154_v17 }
  0xdb   :  { %1888 = vmatprep.mubr.bf16.mxu0 %v295_v22  ;;  %2660 = vmatprep.mubr.bf16.mxu1 %v295_v22  ;;  %v11924_v22 = vld [vmem:[%s17453_s2 + $0x5e8] ss:$16 sps:$4 sm:$0xff]  }
  0xdc   :  { %2022 = vmatpush1.bf16.msra.mxu0 %v11867_v20  ;;  %2794 = vmatpush1.bf16.msra.mxu1 %v11870_v21  ;;  %v176_v20 = vld [vmem:[%s17451_s0 + $0x440] sm:$0xff] }
  0xdd   :  { %2023 = vmatprep.subr.bf16.mxu0 %v11875_v23  ;;  %2795 = vmatprep.subr.bf16.mxu1 %v11878_v24  ;;  %v11921_v21 = vld [vmem:[%s17453_s2 + $0x5e0] ss:$16 sps:$4 sm:$0xff]   ;;  %v11929_v23 = vld [vmem:[%s17453_s2 + $0x604] ss:$16 sps:$4 sm:$0xff]   ;;  %v11932_v24 = vld [vmem:[%s17453_s2 + $0x60c] ss:$16 sps:$4 sm:$0xff]   ;;  %v330_v26 = vpack.c.bf16 %v176_v20, %v169_v19 }
  0xe0   :  { %2024 = vmatpush1.bf16.msra.mxu0 %v11873_v29  ;;  %2796 = vmatpush1.bf16.msra.mxu1 %v11876_v30  ;;  %v183_v29 = vld [vmem:[%s17451_s0 + $0x478] sm:$0xff]  ;;  %v190_v30 = vld [vmem:[%s17451_s0 + $0x4b0] sm:$0xff] }
  0xe1   :  { %2025 = vmatprep.subr.bf16.mxu0 %v11881_v31  ;;  %2797 = vmatprep.subr.bf16.mxu1 %v11884_v32  ;;  %v329_v31 = vpack.c.bf16 %v175_v28, %v168_v27  ;;  %v337_v32 = vpack.c.bf16 %v190_v30, %v183_v29 }
  0xe2   :  { %1889 = vmatmul.mubr.bf16.gmra.mrb[16].mxu0 %v294_v33  ;;  %2661 = vmatmul.mubr.bf16.gmra.mrb[16].mxu1 %v294_v33  ;;  %v182_v33 = vld [vmem:[%s17451_s0 + $0x470] sm:$0xff] }
  0xe3   :  { %1898 = vmatprep.mubr.bf16.mxu0 %v302_v36  ;;  %2670 = vmatprep.mubr.bf16.mxu1 %v302_v36  ;;  %v204_v36 = vld [vmem:[%s17451_s0 + $0x520] sm:$0xff] }
  0xe4   :  { %2026 = vmatpush1.bf16.msra.mxu0 %v11879_v34  ;;  %2798 = vmatpush1.bf16.msra.mxu1 %v11882_v35  ;;  %v189_v34 = vld [vmem:[%s17451_s0 + $0x4a8] sm:$0xff] }
  0xe5   :  { %2027 = vmatprep.subr.bf16.mxu0 %v11887_v37  ;;  %2799 = vmatprep.subr.bf16.mxu1 %v11890_v38  ;;  %v197_v35 = vld [vmem:[%s17451_s0 + $0x4e8] sm:$0xff]  ;;  %v336_v37 = vpack.c.bf16 %v189_v34, %v182_v33 }
  0xe6   :  { %v344_v38 = vpack.c.bf16 %v204_v36, %v197_v35 }
  0xe8   :  { %2028 = vmatpush1.bf16.msra.mxu0 %v11885_v43  ;;  %2800 = vmatpush1.bf16.msra.mxu1 %v11888_v44 }
  0xe9   :  { %2029 = vmatprep.subr.bf16.mxu0 %v11893_v45  ;;  %2801 = vmatprep.subr.bf16.mxu1 %v11896_v46 }
  0xea   :  { %1899 = vmatmul.mubr.bf16.gmra.mrb[20].mxu0 %v301_v47  ;;  %2671 = vmatmul.mubr.bf16.gmra.mrb[20].mxu1 %v301_v47 }
  0xeb   :  { %1908 = vmatprep.mubr.bf16.mxu0 %v309_v50  ;;  %2680 = vmatprep.mubr.bf16.mxu1 %v309_v50 }
  0xec   :  { %2030 = vmatpush1.bf16.msra.mxu0 %v11891_v48  ;;  %2802 = vmatpush1.bf16.msra.mxu1 %v11894_v49 }
  0xed   :  { %2031 = vmatprep.subr.bf16.mxu0 %v11899_v51  ;;  %2803 = vmatprep.subr.bf16.mxu1 %v11902_v52 }
  0xf0   :  { %2032 = vmatpush1.bf16.msra.mxu0 %v11897_v57  ;;  %2804 = vmatpush1.bf16.msra.mxu1 %v11900_v58 }
  0xf1   :  { %2033 = vmatprep.subr.bf16.mxu0 %v11905_v59  ;;  %2805 = vmatprep.subr.bf16.mxu1 %v11908_v60 }
  0xf2   :  { %1909 = vmatmul.mubr.bf16.gmra.mrb[24].mxu0 %v308_v61  ;;  %2681 = vmatmul.mubr.bf16.gmra.mrb[24].mxu1 %v308_v61 }
  0xf3   :  { %1918 = vmatprep.mubr.bf16.mxu0 %v316_v0  ;;  %2690 = vmatprep.mubr.bf16.mxu1 %v316_v0 }
  0xf4   :  { %2034 = vmatpush1.bf16.msra.mxu0 %v11903_v62  ;;  %2806 = vmatpush1.bf16.msra.mxu1 %v11906_v63 }
  0xf5   :  { %2035 = vmatprep.subr.bf16.mxu0 %v11911_v1  ;;  %2807 = vmatprep.subr.bf16.mxu1 %v11914_v2 }
  0xf8   :  { %2036 = vmatpush1.bf16.msra.mxu0 %v11909_v7  ;;  %2808 = vmatpush1.bf16.msra.mxu1 %v11912_v8 }
  0xf9   :  { %2037 = vmatprep.subr.bf16.mxu0 %v11917_v9  ;;  %2809 = vmatprep.subr.bf16.mxu1 %v11920_v10 }
  0xfa   :  { %1919 = vmatmul.mubr.bf16.gmra.mrb[28].mxu0 %v315_v11  ;;  %2691 = vmatmul.mubr.bf16.gmra.mrb[28].mxu1 %v315_v11 }
  0xfb   :  { %1928 = vmatprep.mubr.bf16.mxu0 %v323_v14  ;;  %2700 = vmatprep.mubr.bf16.mxu1 %v323_v14 }
  0xfc   :  { %2038 = vmatpush1.bf16.msra.mxu0 %v11915_v12  ;;  %2810 = vmatpush1.bf16.msra.mxu1 %v11918_v13 }
  0xfd   :  { %2039 = vmatprep.subr.bf16.mxu0 %v11923_v15  ;;  %2811 = vmatprep.subr.bf16.mxu1 %v11926_v16 }
 0x100   :  { %2040 = vmatpush1.bf16.msra.mxu0 %v11921_v21  ;;  %2812 = vmatpush1.bf16.msra.mxu1 %v11924_v22 }
 0x101   :  { %2202 = vmatprep.subr.bf16.mxu0 %v11929_v23  ;;  %2974 = vmatprep.subr.bf16.mxu1 %v11932_v24 }
 0x102   :  { %1929 = vmatmul.mubr.bf16.gmra.mrb[32].mxu0 %v322_v25  ;;  %2701 = vmatmul.mubr.bf16.gmra.mrb[32].mxu1 %v322_v25 }
 0x103   :  { %1938 = vmatprep.mubr.bf16.mxu0 %v330_v26  ;;  %2710 = vmatprep.mubr.bf16.mxu1 %v330_v26 }
 0x10a   :  { %1939 = vmatmul.mubr.bf16.gmra.mrb[36].mxu0 %v329_v31  ;;  %2711 = vmatmul.mubr.bf16.gmra.mrb[36].mxu1 %v329_v31 }
 0x10b   :  { %1948 = vmatprep.mubr.bf16.mxu0 %v337_v32  ;;  %2720 = vmatprep.mubr.bf16.mxu1 %v337_v32 }
 0x112   :  { %1949 = vmatmul.mubr.bf16.gmra.mrb[40].mxu0 %v336_v37  ;;  %2721 = vmatmul.mubr.bf16.gmra.mrb[40].mxu1 %v336_v37 }
 0x113   :  { %1958 = vmatprep.mubr.bf16.mxu0 %v344_v38  ;;  %2730 = vmatprep.mubr.bf16.mxu1 %v344_v38 }
 0x114   :  { %18 = vsyncpa [#allocation5], 0  ;;  %v343_v43 = vpack.c.bf16 %v203_v40, %v196_v39  ;;  %v351_v44 = vpack.c.bf16 %v218_v42, %v211_v41  ;;  %v210_v45 = vld [vmem:[%s17451_s0 + $0x550] sm:$0xff]  ;;  %v217_v46 = vld [vmem:[%s17451_s0 + $0x588] sm:$0xff]  ;;  %v17463_v17 = vmov 0   ;;  %vm1574_vm0 = vcmask 130048  }
 0x115   :  { %v225_v47 = vld [vmem:[%s17451_s0 + $0x5c8] sm:$0xff]  ;;  %v232_v48 = vld [vmem:[%s17451_s0 + $0x600] sm:$0xff]  ;;  %v350_v49 = vpack.c.bf16 %v217_v46, %v210_v45  ;;  %v231_v52 = vld [vmem:[%s17451_s0 + $0x5f8] sm:$0xff]  ;;  %vm4422_vm1 = vcmask 523264  }
 0x116   :  { %v358_v50 = vpack.c.bf16 %v232_v48, %v225_v47  ;;  %v224_v51 = vld [vmem:[%s17451_s0 + $0x5c0] sm:$0xff]  ;;  %v239_v53 = vld [vmem:[%s17451_s0 + $0x638] sm:$0xff]  ;;  %v246_v54 = vld [vmem:[%s17451_s0 + $0x670] sm:$0xff] }
 0x117   :  { %v357_v55 = vpack.c.bf16 %v231_v52, %v224_v51  ;;  %v365_v56 = vpack.c.bf16 %v246_v54, %v239_v53  ;;  %v238_v57 = vld [vmem:[%s17451_s0 + $0x630] sm:$0xff]  ;;  %v245_v58 = vld [vmem:[%s17451_s0 + $0x668] sm:$0xff]  ;;  %v260_v60 = vld [vmem:[%s17451_s0 + $0x6e0] sm:$0xff] }
 0x118   :  { %v253_v59 = vld [vmem:[%s17451_s0 + $0x6a8] sm:$0xff]  ;;  %v364_v61 = vpack.c.bf16 %v245_v58, %v238_v57  ;;  %v252_v63 = vld [vmem:[%s17451_s0 + $0x6a0] sm:$0xff]  ;;  %v259_v0 = vld [vmem:[%s17451_s0 + $0x6d8] sm:$0xff] }
 0x119   :  { %v372_v62 = vpack.c.bf16 %v260_v60, %v253_v59  ;;  %v45_v1 = vld [vmem:[%s17451_s0 + $0x28] sm:$0xff]  ;;  %v52_v2 = vld [vmem:[%s17451_s0 + $0x60] sm:$0xff]  ;;  %v371_v3 = vpack.c.bf16 %v259_v0, %v252_v63  ;;  %v51_v6 = vld [vmem:[%s17451_s0 + $0x58] sm:$0xff] }
 0x11a   :  { %1959 = vmatmul.mubr.bf16.gmra.mrb[44].mxu0 %v343_v43  ;;  %2731 = vmatmul.mubr.bf16.gmra.mrb[44].mxu1 %v343_v43  ;;  %v269_v4 = vpack.c.bf16 %v52_v2, %v45_v1  ;;  %v44_v5 = vld [vmem:[%s17451_s0 + $0x20] sm:$0xff]  ;;  %v59_v7 = vld [vmem:[%s17451_s0 + $0x98] sm:$0xff]  ;;  %v66_v8 = vld [vmem:[%s17451_s0 + $0xd0] sm:$0xff] }
 0x11b   :  { %1968 = vmatprep.mubr.bf16.mxu0 %v351_v44  ;;  %2740 = vmatprep.mubr.bf16.mxu1 %v351_v44  ;;  %v268_v9 = vpack.c.bf16 %v51_v6, %v44_v5  ;;  %v11927_v10 = vld [vmem:[%s17453_s2 + $0x600] ss:$16 sps:$4 sm:$0xff]   ;;  %v11930_v11 = vld [vmem:[%s17453_s2 + $0x608] ss:$16 sps:$4 sm:$0xff]   ;;  %v276_v12 = vpack.c.bf16 %v66_v8, %v59_v7 }
 0x11c   :  { %v58_v13 = vld [vmem:[%s17451_s0 + $0x90] sm:$0xff]  ;;  %v65_v14 = vld [vmem:[%s17451_s0 + $0xc8] sm:$0xff]  ;;  %v80_v16 = vld [vmem:[%s17451_s0 + $0x140] sm:$0xff] }
 0x11d   :  { %v73_v15 = vld [vmem:[%s17451_s0 + $0x108] sm:$0xff]  ;;  %v275_v18 = vpack.c.bf16 %v65_v14, %v58_v13  ;;  %v72_v20 = vld [vmem:[%s17451_s0 + $0x100] sm:$0xff]  ;;  %v79_v21 = vld [vmem:[%s17451_s0 + $0x138] sm:$0xff] }
 0x11e   :  { %v283_v19 = vpack.c.bf16 %v80_v16, %v73_v15  ;;  %v87_v22 = vld [vmem:[%s17451_s0 + $0x178] sm:$0xff]  ;;  %v94_v23 = vld [vmem:[%s17451_s0 + $0x1b0] sm:$0xff]  ;;  %v282_v24 = vpack.c.bf16 %v79_v21, %v72_v20  ;;  %v93_v27 = vld [vmem:[%s17451_s0 + $0x1a8] sm:$0xff] }
 0x11f   :  { %v290_v25 = vpack.c.bf16 %v94_v23, %v87_v22  ;;  %v86_v26 = vld [vmem:[%s17451_s0 + $0x170] sm:$0xff]  ;;  %v101_v28 = vld [vmem:[%s17451_s0 + $0x1e8] sm:$0xff]  ;;  %v108_v29 = vld [vmem:[%s17451_s0 + $0x220] sm:$0xff] }
 0x120   :  { %v289_v30 = vpack.c.bf16 %v93_v27, %v86_v26  ;;  %v297_v31 = vpack.c.bf16 %v108_v29, %v101_v28  ;;  %v100_v32 = vld [vmem:[%s17451_s0 + $0x1e0] sm:$0xff]  ;;  %v107_v33 = vld [vmem:[%s17451_s0 + $0x218] sm:$0xff]  ;;  %v122_v35 = vld [vmem:[%s17451_s0 + $0x290] sm:$0xff] }
 0x121   :  { %v115_v34 = vld [vmem:[%s17451_s0 + $0x258] sm:$0xff]  ;;  %v296_v36 = vpack.c.bf16 %v107_v33, %v100_v32  ;;  %v114_v38 = vld [vmem:[%s17451_s0 + $0x250] sm:$0xff]  ;;  %v121_v39 = vld [vmem:[%s17451_s0 + $0x288] sm:$0xff] }
 0x122   :  { %1969 = vmatmul.mubr.bf16.gmra.mrb[48].mxu0 %v350_v49  ;;  %2741 = vmatmul.mubr.bf16.gmra.mrb[48].mxu1 %v350_v49  ;;  %v304_v37 = vpack.c.bf16 %v122_v35, %v115_v34  ;;  %v129_v40 = vld [vmem:[%s17451_s0 + $0x2c8] sm:$0xff]  ;;  %v136_v41 = vld [vmem:[%s17451_s0 + $0x300] sm:$0xff]  ;;  %v303_v42 = vpack.c.bf16 %v121_v39, %v114_v38  ;;  %v135_v45 = vld [vmem:[%s17451_s0 + $0x2f8] sm:$0xff] }
 0x123   :  { %1978 = vmatprep.mubr.bf16.mxu0 %v358_v50  ;;  %2750 = vmatprep.mubr.bf16.mxu1 %v358_v50  ;;  %v311_v43 = vpack.c.bf16 %v136_v41, %v129_v40  ;;  %v128_v44 = vld [vmem:[%s17451_s0 + $0x2c0] sm:$0xff]  ;;  %v143_v46 = vld [vmem:[%s17451_s0 + $0x338] sm:$0xff]  ;;  %v150_v47 = vld [vmem:[%s17451_s0 + $0x370] sm:$0xff] }
 0x124   :  { %v310_v48 = vpack.c.bf16 %v135_v45, %v128_v44  ;;  %v318_v49 = vpack.c.bf16 %v150_v47, %v143_v46  ;;  %v142_v50 = vld [vmem:[%s17451_s0 + $0x330] sm:$0xff]  ;;  %v149_v51 = vld [vmem:[%s17451_s0 + $0x368] sm:$0xff]  ;;  %v164_v53 = vld [vmem:[%s17451_s0 + $0x3e0] sm:$0xff] }
 0x125   :  { %v157_v52 = vld [vmem:[%s17451_s0 + $0x3a8] sm:$0xff]  ;;  %v317_v54 = vpack.c.bf16 %v149_v51, %v142_v50  ;;  %v163_v57 = vld [vmem:[%s17451_s0 + $0x3d8] sm:$0xff]  ;;  %v178_v59 = vld [vmem:[%s17451_s0 + $0x450] sm:$0xff] }
 0x126   :  { %v171_v58 = vld [vmem:[%s17451_s0 + $0x418] sm:$0xff]  ;;  %v177_v63 = vld [vmem:[%s17451_s0 + $0x448] sm:$0xff]  ;;  %v192_v1 = vld [vmem:[%s17451_s0 + $0x4c0] sm:$0xff] }
 0x127   :  { %v185_v0 = vld [vmem:[%s17451_s0 + $0x488] sm:$0xff]  ;;  %v191_v5 = vld [vmem:[%s17451_s0 + $0x4b8] sm:$0xff]  ;;  %v206_v7 = vld [vmem:[%s17451_s0 + $0x530] sm:$0xff] }
 0x128   :  { %v199_v6 = vld [vmem:[%s17451_s0 + $0x4f8] sm:$0xff]  ;;  %v220_v13 = vld [vmem:[%s17451_s0 + $0x5a0] sm:$0xff]  ;;  %v234_v21 = vld [vmem:[%s17451_s0 + $0x610] sm:$0xff] }
 0x129   :  { %v11933_v16 = vld [vmem:[%s17455_s4 + $0x40] sm:$0xff]   ;;  %v227_v20 = vld [vmem:[%s17451_s0 + $0x5d8] sm:$0xff]  ;;  %v241_v26 = vld [vmem:[%s17451_s0 + $0x648] sm:$0xff] }
 0x12a   :  { %1979 = vmatmul.mubr.bf16.gmra.mrb[52].mxu0 %v357_v55  ;;  %2751 = vmatmul.mubr.bf16.gmra.mrb[52].mxu1 %v357_v55  ;;  %v325_v55 = vpack.c.bf16 %v164_v53, %v157_v52  ;;  %v360_v23 = vpack.c.bf16 %v234_v21, %v227_v20  ;;  %v248_v27 = vld [vmem:[%s17451_s0 + $0x680] sm:$0xff]  ;;  %v255_v32 = vld [vmem:[%s17451_s0 + $0x6b8] sm:$0xff]  ;;  %v262_v33 = vld [vmem:[%s17451_s0 + $0x6f0] sm:$0xff] }
 0x12b   :  { %1988 = vmatprep.mubr.bf16.mxu0 %v365_v56  ;;  %2760 = vmatprep.mubr.bf16.mxu1 %v365_v56  ;;  %v156_v56 = vld [vmem:[%s17451_s0 + $0x3a0] sm:$0xff]  ;;  %v367_v29 = vpack.c.bf16 %v248_v27, %v241_v26  ;;  %v374_v35 = vpack.c.bf16 %v262_v33, %v255_v32  ;;  %v46_v39 = vld [vmem:[%s17451_s0 + $0x30] sm:$0xff]  ;;  %v53_v40 = vld [vmem:[%s17451_s0 + $0x68] sm:$0xff] }
 0x12c   :  { %v324_v60 = vpack.c.bf16 %v163_v57, %v156_v56  ;;  %v270_v41 = vpack.c.bf16 %v53_v40, %v46_v39  ;;  %v11936_v44 = vld [vmem:[%s17455_s4 + $0x48] sm:$0xff]   ;;  %v60_v45 = vld [vmem:[%s17451_s0 + $0xa0] sm:$0xff]  ;;  %v67_v46 = vld [vmem:[%s17451_s0 + $0xd8] sm:$0xff] }
 0x12d   :  { %v11937_v47 = vld [vmem:[%s17455_s4 + $0x8] sm:$0xff]   ;;  %v277_v50 = vpack.c.bf16 %v67_v46, %v60_v45  ;;  %v11940_v51 = vld [vmem:[%s17455_s4 + $0x10] sm:$0xff]   ;;  %v11942_v53 = vld [vmem:[%s17455_s4 + $0x58] sm:$0xff]  }
 0x12e   :  { %v11941_v52 = vld [vmem:[%s17455_s4 + $0x90] sm:$0xff]   ;;  %v11943_v56 = vld [vmem:[%s17455_s4 + $0x18] sm:$0xff]   ;;  %v144_v20 = vld [vmem:[%s17451_s0 + $0x340] sm:$0xff] }
 0x12f   :  { %v11944_v57 = vld [vmem:[%s17455_s4 + $0x98] sm:$0xff]   ;;  %v172_v26 = vld [vmem:[%s17451_s0 + $0x420] sm:$0xff] }
 0x130   :  { %v151_v21 = vld [vmem:[%s17451_s0 + $0x378] sm:$0xff]  ;;  %v200_v32 = vld [vmem:[%s17451_s0 + $0x500] sm:$0xff] }
 0x131   :  { %v179_v27 = vld [vmem:[%s17451_s0 + $0x458] sm:$0xff]  ;;  %v228_v39 = vld [vmem:[%s17451_s0 + $0x5e0] sm:$0xff] }
 0x132   :  { %1989 = vmatmul.mubr.bf16.gmra.mrb[56].mxu0 %v364_v61  ;;  %2761 = vmatmul.mubr.bf16.gmra.mrb[56].mxu1 %v364_v61  ;;  %v332_v61 = vpack.c.bf16 %v178_v59, %v171_v58  ;;  %v11946_v58 = vld [vmem:[%s17455_s4 + $0x60] sm:$0xff]   ;;  %v207_v33 = vld [vmem:[%s17451_s0 + $0x538] sm:$0xff] }
 0x133   :  { %1998 = vmatprep.mubr.bf16.mxu0 %v372_v62  ;;  %2770 = vmatprep.mubr.bf16.mxu1 %v372_v62  ;;  %v170_v62 = vld [vmem:[%s17451_s0 + $0x410] sm:$0xff]  ;;  %v235_v40 = vld [vmem:[%s17451_s0 + $0x618] sm:$0xff]  ;;  %v256_v45 = vld [vmem:[%s17451_s0 + $0x6c0] sm:$0xff] }
 0x134   :  { %v331_v2 = vpack.c.bf16 %v177_v63, %v170_v62  ;;  %v11949_v62 = vld [vmem:[%s17455_s4 + $0x68] sm:$0xff]   ;;  %v88_v63 = vld [vmem:[%s17451_s0 + $0x180] sm:$0xff]  ;;  %v263_v46 = vld [vmem:[%s17451_s0 + $0x6f8] sm:$0xff] }
 0x13a   :  { %1999 = vmatmul.mubr.bf16.gmra.mrb[60].mxu0 %v371_v3  ;;  %2771 = vmatmul.mubr.bf16.gmra.mrb[60].mxu1 %v371_v3  ;;  %v339_v3 = vpack.c.bf16 %v192_v1, %v185_v0  ;;  %v95_v0 = vld [vmem:[%s17451_s0 + $0x1b8] sm:$0xff]  ;;  %v11948_v1 = vld [vmem:[%s17455_s4 + $0xa8] sm:$0xff]  }
 0x13b   :  { %2041 = vmatprep.mubr.bf16.mxu0 %v269_v4  ;;  %2813 = vmatprep.mubr.bf16.mxu1 %v269_v4  ;;  %v184_v4 = vld [vmem:[%s17451_s0 + $0x480] sm:$0xff] }
 0x13c   :  { %v338_v8 = vpack.c.bf16 %v191_v5, %v184_v4  ;;  %v291_v4 = vpack.c.bf16 %v95_v0, %v88_v63  ;;  %v11951_v5 = vld [vmem:[%s17455_s4 + $0xb0] sm:$0xff]  }
 0x142   :  { %2042 = vmatmul.mubr.bf16.vlgmr.msra.gmra.mrb[0].mxu0 %v268_v9  ;;  %2814 = vmatmul.mubr.bf16.vlgmr.msra.gmra.mrb[0].mxu1 %v268_v9  ;;  %v346_v9 = vpack.c.bf16 %v206_v7, %v199_v6  ;;  %v11953_v6 = vld [vmem:[%s17455_s4 + $0x30] sm:$0xff]   ;;  %v11955_v7 = vld [vmem:[%s17455_s4 + $0x78] sm:$0xff]  }
 0x143   :  { %2203 = vmatpush1.bf16.msra.mxu0 %v11927_v10  ;;  %2975 = vmatpush1.bf16.msra.mxu1 %v11930_v11  ;;  %v198_v10 = vld [vmem:[%s17451_s0 + $0x4f0] sm:$0xff]  ;;  %v205_v11 = vld [vmem:[%s17451_s0 + $0x528] sm:$0xff] }
 0x144   :  { %2051 = vmatprep.mubr.bf16.mxu0 %v276_v12  ;;  %2823 = vmatprep.mubr.bf16.mxu1 %v276_v12  ;;  %v213_v12 = vld [vmem:[%s17451_s0 + $0x568] sm:$0xff]  ;;  %v345_v14 = vpack.c.bf16 %v205_v11, %v198_v10  ;;  %v11954_v10 = vld [vmem:[%s17455_s4 + $0xb8] sm:$0xff]  }
 0x145   :  { %3775 = vmatprep.subr.bf16.mxu1 %v17463_v17  ;;  %v353_v15 = vpack.c.bf16 %v220_v13, %v213_v12  ;;  %10511 = vmatprep.subr.bf16.mxu0 %v11933_v16  ;;  %v11956_v11 = vld [vmem:[%s17455_s4 + $0x38] sm:$0xff]   ;;  %v116_v13 = vld [vmem:[%s17451_s0 + $0x260] sm:$0xff]  ;;  %v130_v16 = vld [vmem:[%s17451_s0 + $0x2d0] sm:$0xff] }
 0x14a   :  { %2052 = vmatmul.mubr.bf16.gmra.mrb[4].mxu0 %v275_v18  ;;  %2824 = vmatmul.mubr.bf16.gmra.mrb[4].mxu1 %v275_v18  ;;  %v212_v18 = vld [vmem:[%s17451_s0 + $0x560] sm:$0xff] }
 0x14b   :  { %2061 = vmatprep.mubr.bf16.mxu0 %v283_v19  ;;  %2833 = vmatprep.mubr.bf16.mxu1 %v283_v19  ;;  %v219_v19 = vld [vmem:[%s17451_s0 + $0x598] sm:$0xff] }
 0x14c   :  { %v352_v22 = vpack.c.bf16 %v219_v19, %v212_v18  ;;  %v137_v18 = vld [vmem:[%s17451_s0 + $0x308] sm:$0xff] }
 0x14d   :  { %v312_v19 = vpack.c.bf16 %v137_v18, %v130_v16 }
 0x152   :  { %2062 = vmatmul.mubr.bf16.gmra.mrb[8].mxu0 %v282_v24  ;;  %2834 = vmatmul.mubr.bf16.gmra.mrb[8].mxu1 %v282_v24  ;;  %v226_v24 = vld [vmem:[%s17451_s0 + $0x5d0] sm:$0xff] }
 0x153   :  { %2071 = vmatprep.mubr.bf16.mxu0 %v290_v25  ;;  %2843 = vmatprep.mubr.bf16.mxu1 %v290_v25  ;;  %v233_v25 = vld [vmem:[%s17451_s0 + $0x608] sm:$0xff] }
 0x154   :  { %v359_v28 = vpack.c.bf16 %v233_v25, %v226_v24  ;;  %v165_v24 = vld [vmem:[%s17451_s0 + $0x3e8] sm:$0xff] }
 0x15a   :  { %2072 = vmatmul.mubr.bf16.gmra.mrb[12].mxu0 %v289_v30  ;;  %2844 = vmatmul.mubr.bf16.gmra.mrb[12].mxu1 %v289_v30  ;;  %v240_v30 = vld [vmem:[%s17451_s0 + $0x640] sm:$0xff] }
 0x15b   :  { %2081 = vmatprep.mubr.bf16.mxu0 %v297_v31  ;;  %2853 = vmatprep.mubr.bf16.mxu1 %v297_v31  ;;  %v247_v31 = vld [vmem:[%s17451_s0 + $0x678] sm:$0xff] }
 0x15c   :  { %v366_v34 = vpack.c.bf16 %v247_v31, %v240_v30  ;;  %v193_v30 = vld [vmem:[%s17451_s0 + $0x4c8] sm:$0xff] }
 0x162   :  { %2082 = vmatmul.mubr.bf16.gmra.mrb[16].mxu0 %v296_v36  ;;  %2854 = vmatmul.mubr.bf16.gmra.mrb[16].mxu1 %v296_v36  ;;  %v254_v36 = vld [vmem:[%s17451_s0 + $0x6b0] sm:$0xff] }
 0x163   :  { %2091 = vmatprep.mubr.bf16.mxu0 %v304_v37  ;;  %2863 = vmatprep.mubr.bf16.mxu1 %v304_v37  ;;  %v261_v37 = vld [vmem:[%s17451_s0 + $0x6e8] sm:$0xff] }
 0x164   :  { %v373_v38 = vpack.c.bf16 %v261_v37, %v254_v36  ;;  %v221_v36 = vld [vmem:[%s17451_s0 + $0x5a8] sm:$0xff]  ;;  %v11957_v37 = vld [vmem:[%s17455_s4 + $0xc0] sm:$0xff]  }
 0x16a   :  { %2092 = vmatmul.mubr.bf16.gmra.mrb[20].mxu0 %v303_v42  ;;  %2864 = vmatmul.mubr.bf16.gmra.mrb[20].mxu1 %v303_v42  ;;  %v11934_v42 = vld [vmem:[%s17455_s4] sm:$0xff]  }
 0x16b   :  { %2101 = vmatprep.mubr.bf16.mxu0 %v311_v43  ;;  %2873 = vmatprep.mubr.bf16.mxu1 %v311_v43  ;;  %v11935_v43 = vld [vmem:[%s17455_s4 + $0x80] sm:$0xff]  }
 0x172   :  { %2102 = vmatmul.mubr.bf16.gmra.mrb[24].mxu0 %v310_v48  ;;  %2874 = vmatmul.mubr.bf16.gmra.mrb[24].mxu1 %v310_v48  ;;  %v11938_v48 = vld [vmem:[%s17455_s4 + $0x88] sm:$0xff]  }
 0x173   :  { %2111 = vmatprep.mubr.bf16.mxu0 %v318_v49  ;;  %2883 = vmatprep.mubr.bf16.mxu1 %v318_v49  ;;  %v11939_v49 = vld [vmem:[%s17455_s4 + $0x50] sm:$0xff]  }
 0x17a   :  { %2112 = vmatmul.mubr.bf16.gmra.mrb[28].mxu0 %v317_v54  ;;  %2884 = vmatmul.mubr.bf16.gmra.mrb[28].mxu1 %v317_v54  ;;  %v74_v54 = vld [vmem:[%s17451_s0 + $0x110] sm:$0xff] }
 0x17b   :  { %2121 = vmatprep.mubr.bf16.mxu0 %v325_v55  ;;  %2893 = vmatprep.mubr.bf16.mxu1 %v325_v55  ;;  %v81_v55 = vld [vmem:[%s17451_s0 + $0x148] sm:$0xff] }
 0x17c   :  { %v284_v59 = vpack.c.bf16 %v81_v55, %v74_v54 }
 0x182   :  { %2122 = vmatmul.mubr.bf16.gmra.mrb[32].mxu0 %v324_v60  ;;  %2894 = vmatmul.mubr.bf16.gmra.mrb[32].mxu1 %v324_v60  ;;  %v11945_v60 = vld [vmem:[%s17455_s4 + $0xa0] sm:$0xff]  }
 0x183   :  { %2131 = vmatprep.mubr.bf16.mxu0 %v332_v61  ;;  %2903 = vmatprep.mubr.bf16.mxu1 %v332_v61  ;;  %v11947_v61 = vld [vmem:[%s17455_s4 + $0x20] sm:$0xff]  }
 0x18a   :  { %2132 = vmatmul.mubr.bf16.gmra.mrb[36].mxu0 %v331_v2  ;;  %2904 = vmatmul.mubr.bf16.gmra.mrb[36].mxu1 %v331_v2  ;;  %v11950_v2 = vld [vmem:[%s17455_s4 + $0x28] sm:$0xff]  }
 0x18b   :  { %2141 = vmatprep.mubr.bf16.mxu0 %v339_v3  ;;  %2913 = vmatprep.mubr.bf16.mxu1 %v339_v3  ;;  %v11952_v3 = vld [vmem:[%s17455_s4 + $0x70] sm:$0xff]  }
 0x192   :  { %2142 = vmatmul.mubr.bf16.gmra.mrb[40].mxu0 %v338_v8  ;;  %2914 = vmatmul.mubr.bf16.gmra.mrb[40].mxu1 %v338_v8  ;;  %v102_v8 = vld [vmem:[%s17451_s0 + $0x1f0] sm:$0xff] }
 0x193   :  { %2151 = vmatprep.mubr.bf16.mxu0 %v346_v9  ;;  %2923 = vmatprep.mubr.bf16.mxu1 %v346_v9  ;;  %v109_v9 = vld [vmem:[%s17451_s0 + $0x228] sm:$0xff] }
 0x194   :  { %v298_v12 = vpack.c.bf16 %v109_v9, %v102_v8 }
 0x19a   :  { %2152 = vmatmul.mubr.bf16.gmra.mrb[44].mxu0 %v345_v14  ;;  %2924 = vmatmul.mubr.bf16.gmra.mrb[44].mxu1 %v345_v14  ;;  %v123_v14 = vld [vmem:[%s17451_s0 + $0x298] sm:$0xff] }
 0x19b   :  { %2161 = vmatprep.mubr.bf16.mxu0 %v353_v15  ;;  %2933 = vmatprep.mubr.bf16.mxu1 %v353_v15  ;;  %v305_v15 = vpack.c.bf16 %v123_v14, %v116_v13 }
 0x1a2   :  { %2162 = vmatmul.mubr.bf16.gmra.mrb[48].mxu0 %v352_v22  ;;  %2934 = vmatmul.mubr.bf16.gmra.mrb[48].mxu1 %v352_v22  ;;  %v319_v22 = vpack.c.bf16 %v151_v21, %v144_v20 }
 0x1a3   :  { %2171 = vmatprep.mubr.bf16.mxu0 %v360_v23  ;;  %2943 = vmatprep.mubr.bf16.mxu1 %v360_v23  ;;  %v158_v23 = vld [vmem:[%s17451_s0 + $0x3b0] sm:$0xff] }
 0x1a4   :  { %v326_v25 = vpack.c.bf16 %v165_v24, %v158_v23 }
 0x1aa   :  { %2172 = vmatmul.mubr.bf16.gmra.mrb[52].mxu0 %v359_v28  ;;  %2944 = vmatmul.mubr.bf16.gmra.mrb[52].mxu1 %v359_v28  ;;  %v333_v28 = vpack.c.bf16 %v179_v27, %v172_v26 }
 0x1ab   :  { %2181 = vmatprep.mubr.bf16.mxu0 %v367_v29  ;;  %2953 = vmatprep.mubr.bf16.mxu1 %v367_v29  ;;  %v186_v29 = vld [vmem:[%s17451_s0 + $0x490] sm:$0xff] }
 0x1ac   :  { %v340_v31 = vpack.c.bf16 %v193_v30, %v186_v29 }
 0x1b2   :  { %2182 = vmatmul.mubr.bf16.gmra.mrb[56].mxu0 %v366_v34  ;;  %2954 = vmatmul.mubr.bf16.gmra.mrb[56].mxu1 %v366_v34  ;;  %v347_v34 = vpack.c.bf16 %v207_v33, %v200_v32 }
 0x1b3   :  { %2191 = vmatprep.mubr.bf16.mxu0 %v374_v35  ;;  %2963 = vmatprep.mubr.bf16.mxu1 %v374_v35  ;;  %v214_v35 = vld [vmem:[%s17451_s0 + $0x570] sm:$0xff] }
 0x1ba   :  { %2192 = vmatmul.mubr.bf16.gmra.mrb[60].mxu0 %v373_v38  ;;  %2964 = vmatmul.mubr.bf16.gmra.mrb[60].mxu1 %v373_v38  ;;  %v354_v38 = vpack.c.bf16 %v221_v36, %v214_v35 }
 0x1bb   :  { %2234 = vmatprep.mubr.bf16.mxu0 %v17463_v17  ;;  %3006 = vmatprep.mubr.bf16.mxu1 %v17463_v17 }
 0x1c2   :  { %9894 = vmatmul.mubr.msk.bf16.vlgmr.msra.gmra.mrb[0].mxu0 %vm1574_vm0, %v270_v41  ;;  %9910 = vmatmul.mubr.msk.bf16.vlgmr.msra.gmra.mrb[0].mxu1 %vm1574_vm0, %v270_v41  ;;  %v361_v41 = vpack.c.bf16 %v235_v40, %v228_v39 }
 0x1c3   :  { %2244 = vmatprep.mubr.bf16.mxu0 %v17463_v17  ;;  %3016 = vmatprep.mubr.bf16.mxu1 %v17463_v17 }
 0x1c4   :  { %10512 = vmatpush3.bf16.msra.mxu0 %v11934_v42  ;;  %3776 = vmatpush1.bf16.msra.mxu1 %v11935_v43  ;;  %v242_v42 = vld [vmem:[%s17451_s0 + $0x650] sm:$0xff]  ;;  %v249_v43 = vld [vmem:[%s17451_s0 + $0x688] sm:$0xff] }
 0x1c5   :  { %10513 = vmatprep.subr.bf16.mxu0 %v11936_v44  ;;  %3777 = vmatprep.subr.bf16.mxu1 %v17463_v17  ;;  %v368_v44 = vpack.c.bf16 %v249_v43, %v242_v42 }
 0x1c8   :  { %10514 = vmatpush3.bf16.msra.mxu0 %v11937_v47  ;;  %3778 = vmatpush1.bf16.msra.mxu1 %v11938_v48  ;;  %v375_v47 = vpack.c.bf16 %v263_v46, %v256_v45  ;;  %v574_v48 = vlaneseq }
 0x1c9   :  { %10515 = vmatprep.subr.bf16.mxu0 %v11939_v49  ;;  %3779 = vmatprep.subr.bf16.mxu1 %v17463_v17 }
 0x1ca   :  { %9895 = vmatmul.mubr.msk.bf16.gmra.mrb[4].mxu0 %vm1574_vm0, %v277_v50  ;;  %9911 = vmatmul.mubr.msk.bf16.gmra.mrb[4].mxu1 %vm1574_vm0, %v277_v50  ;;  %v14717_v49 = vshrl.u32 %v574_v48, 7 }
 0x1cb   :  { %2254 = vmatprep.mubr.bf16.mxu0 %v17463_v17  ;;  %3026 = vmatprep.mubr.bf16.mxu1 %v17463_v17 }
 0x1cc   :  { %10516 = vmatpush3.bf16.msra.mxu0 %v11940_v51  ;;  %3780 = vmatpush1.bf16.msra.mxu1 %v11941_v52  ;;  %17541 = vst [vmem:[#allocation8_spill] sm:$0xff] %v14717_v49  ;;  %v14720_v50 = vsub.s32 0, %v14717_v49  ;;  %v14723_v51 = vsub.s32 2, %v14717_v49  ;;  %v572_v52 = vld [vmem:[%s17454_s3] sm:$0xf]  ;;  %v14732_v54 = vsub.s32 3, %v14717_v49 }
 0x1cd   :  { %10517 = vmatprep.subr.bf16.mxu0 %v11942_v53  ;;  %3781 = vmatprep.subr.bf16.mxu1 %v17463_v17  ;;  %v14729_v53 = vsub.s32 1, %v14717_v49 }
 0x1ce   :  { %17542 = vst [vmem:[#allocation9_spill] sm:$0xff] %v14720_v50  ;;  %17543 = vst [vmem:[#allocation10_spill] sm:$0xff] %v14723_v51  ;;  %v14735_v55 = vrot.slane %v572_v52, %v14720_v50 }
 0x1cf   :  { %17544 = vst [vmem:[#allocation11_spill] sm:$0xff] %v14729_v53  ;;  %17545 = vst [vmem:[#allocation12_spill] sm:$0xff] %v14732_v54 }
 0x1d0   :  { %10518 = vmatpush3.bf16.msra.mxu0 %v11943_v56  ;;  %3782 = vmatpush1.bf16.msra.mxu1 %v11944_v57  ;;  %v14738_v56 = vrot.slane %v572_v52, %v14723_v51  ;;  %v14741_v57 = vrot.slane %v572_v52, %v14729_v53 }
 0x1d1   :  { %3783 = vmatprep.subr.bf16.mxu1 %v17463_v17  ;;  %10519 = vmatprep.subr.bf16.mxu0 %v11946_v58  ;;  %v14744_v58 = vrot.slane %v572_v52, %v14732_v54 }
 0x1d2   :  { %9896 = vmatmul.mubr.msk.bf16.gmra.mrb[8].mxu0 %vm1574_vm0, %v284_v59  ;;  %9912 = vmatmul.mubr.msk.bf16.gmra.mrb[8].mxu1 %vm1574_vm0, %v284_v59 }
 0x1d3   :  { %2264 = vmatprep.mubr.bf16.mxu0 %v17463_v17  ;;  %3036 = vmatprep.mubr.bf16.mxu1 %v17463_v17 }
 0x1d4   :  { %3784 = vmatpush1.bf16.msra.mxu1 %v11945_v60  ;;  %10520 = vmatpush3.bf16.msra.mxu0 %v11947_v61 }
 0x1d5   :  { %3785 = vmatprep.subr.bf16.mxu1 %v17463_v17  ;;  %10521 = vmatprep.subr.bf16.mxu0 %v11949_v62 }
 0x1d8   :  { %3786 = vmatpush1.bf16.msra.mxu1 %v11948_v1  ;;  %10522 = vmatpush3.bf16.msra.mxu0 %v11950_v2 }
 0x1d9   :  { %3787 = vmatprep.subr.bf16.mxu1 %v17463_v17  ;;  %10523 = vmatprep.subr.bf16.mxu0 %v11952_v3 }
 0x1da   :  { %9897 = vmatmul.mubr.msk.bf16.gmra.mrb[12].mxu0 %vm1574_vm0, %v291_v4  ;;  %9913 = vmatmul.mubr.msk.bf16.gmra.mrb[12].mxu1 %vm1574_vm0, %v291_v4 }
 0x1db   :  { %2274 = vmatprep.mubr.bf16.mxu0 %v17463_v17  ;;  %3046 = vmatprep.mubr.bf16.mxu1 %v17463_v17 }
 0x1dc   :  { %3788 = vmatpush1.bf16.msra.mxu1 %v11951_v5  ;;  %10524 = vmatpush3.bf16.msra.mxu0 %v11953_v6 }
 0x1dd   :  { %3789 = vmatprep.subr.bf16.mxu1 %v17463_v17  ;;  %10525 = vmatprep.subr.bf16.mxu0 %v11955_v7 }
 0x1e0   :  { %3790 = vmatpush1.bf16.msra.mxu1 %v11954_v10  ;;  %10526 = vmatpush3.bf16.msra.mxu0 %v11956_v11 }
 0x1e1   :  { %3791 = vmatprep.subr.bf16.mxu1 %v17463_v17 }
 0x1e2   :  { %9898 = vmatmul.mubr.msk.bf16.gmra.mrb[16].mxu0 %vm1574_vm0, %v298_v12  ;;  %9914 = vmatmul.mubr.msk.bf16.gmra.mrb[16].mxu1 %vm1574_vm0, %v298_v12 }
 0x1e3   :  { %2284 = vmatprep.mubr.bf16.mxu0 %v17463_v17  ;;  %3056 = vmatprep.mubr.bf16.mxu1 %v17463_v17 }
 0x1e4   :  { %3792 = vmatpush1.bf16.msra.mxu1 %v11957_v37 }
 0x1ea   :  { %9899 = vmatmul.mubr.msk.bf16.gmra.mrb[20].mxu0 %vm1574_vm0, %v305_v15  ;;  %9915 = vmatmul.mubr.msk.bf16.gmra.mrb[20].mxu1 %vm1574_vm0, %v305_v15 }
 0x1eb   :  { %2294 = vmatprep.mubr.bf16.mxu0 %v17463_v17  ;;  %3066 = vmatprep.mubr.bf16.mxu1 %v17463_v17 }
 0x1f2   :  { %9900 = vmatmul.mubr.msk.bf16.gmra.mrb[24].mxu0 %vm1574_vm0, %v312_v19  ;;  %9916 = vmatmul.mubr.msk.bf16.gmra.mrb[24].mxu1 %vm1574_vm0, %v312_v19 }
 0x1f3   :  { %2304 = vmatprep.mubr.bf16.mxu0 %v17463_v17  ;;  %3076 = vmatprep.mubr.bf16.mxu1 %v17463_v17 }
 0x1fa   :  { %9901 = vmatmul.mubr.msk.bf16.gmra.mrb[28].mxu0 %vm1574_vm0, %v319_v22  ;;  %9917 = vmatmul.mubr.msk.bf16.gmra.mrb[28].mxu1 %vm1574_vm0, %v319_v22 }
 0x1fb   :  { %2314 = vmatprep.mubr.bf16.mxu0 %v17463_v17  ;;  %3086 = vmatprep.mubr.bf16.mxu1 %v17463_v17 }
 0x202   :  { %9902 = vmatmul.mubr.msk.bf16.gmra.mrb[32].mxu0 %vm1574_vm0, %v326_v25  ;;  %9918 = vmatmul.mubr.msk.bf16.gmra.mrb[32].mxu1 %vm1574_vm0, %v326_v25 }
 0x203   :  { %2324 = vmatprep.mubr.bf16.mxu0 %v17463_v17  ;;  %3096 = vmatprep.mubr.bf16.mxu1 %v17463_v17 }
 0x20a   :  { %9903 = vmatmul.mubr.msk.bf16.gmra.mrb[36].mxu0 %vm1574_vm0, %v333_v28  ;;  %9919 = vmatmul.mubr.msk.bf16.gmra.mrb[36].mxu1 %vm1574_vm0, %v333_v28 }
 0x20b   :  { %2334 = vmatprep.mubr.bf16.mxu0 %v17463_v17  ;;  %3106 = vmatprep.mubr.bf16.mxu1 %v17463_v17 }
 0x212   :  { %9904 = vmatmul.mubr.msk.bf16.gmra.mrb[40].mxu0 %vm1574_vm0, %v340_v31  ;;  %9920 = vmatmul.mubr.msk.bf16.gmra.mrb[40].mxu1 %vm1574_vm0, %v340_v31 }
 0x213   :  { %2344 = vmatprep.mubr.bf16.mxu0 %v17463_v17  ;;  %3116 = vmatprep.mubr.bf16.mxu1 %v17463_v17 }
 0x21a   :  { %9905 = vmatmul.mubr.msk.bf16.gmra.mrb[44].mxu0 %vm1574_vm0, %v347_v34  ;;  %9921 = vmatmul.mubr.msk.bf16.gmra.mrb[44].mxu1 %vm1574_vm0, %v347_v34 }
 0x21b   :  { %2354 = vmatprep.mubr.bf16.mxu0 %v17463_v17  ;;  %3126 = vmatprep.mubr.bf16.mxu1 %v17463_v17 }
 0x222   :  { %9906 = vmatmul.mubr.msk.bf16.gmra.mrb[48].mxu0 %vm1574_vm0, %v354_v38  ;;  %9922 = vmatmul.mubr.msk.bf16.gmra.mrb[48].mxu1 %vm1574_vm0, %v354_v38 }
 0x223   :  { %2364 = vmatprep.mubr.bf16.mxu0 %v17463_v17  ;;  %3136 = vmatprep.mubr.bf16.mxu1 %v17463_v17 }
 0x22a   :  { %9907 = vmatmul.mubr.msk.bf16.gmra.mrb[52].mxu0 %vm1574_vm0, %v361_v41  ;;  %9923 = vmatmul.mubr.msk.bf16.gmra.mrb[52].mxu1 %vm1574_vm0, %v361_v41 }
 0x22b   :  { %2374 = vmatprep.mubr.bf16.mxu0 %v17463_v17  ;;  %3146 = vmatprep.mubr.bf16.mxu1 %v17463_v17 }
 0x232   :  { %9908 = vmatmul.mubr.msk.bf16.gmra.mrb[56].mxu0 %vm1574_vm0, %v368_v44  ;;  %9924 = vmatmul.mubr.msk.bf16.gmra.mrb[56].mxu1 %vm1574_vm0, %v368_v44 }
 0x233   :  { %2384 = vmatprep.mubr.bf16.mxu0 %v17463_v17  ;;  %3156 = vmatprep.mubr.bf16.mxu1 %v17463_v17 }
 0x23a   :  { %9909 = vmatmul.mubr.msk.bf16.gmra.mrb[60].mxu0 %vm1574_vm0, %v375_v47  ;;  %9925 = vmatmul.mubr.msk.bf16.gmra.mrb[60].mxu1 %vm1574_vm0, %v375_v47 }
 0x295   :  { %v2236_v59 = vpop.f32.mrb[0].mxu0  ;;  %v3008_v60 = vpop.f32.mrb[0].mxu1 }
 0x296   :  { %v10735_v61 = vadd.f32 %v2236_v59, %v14735_v55  ;;  %v10799_v62 = vadd.f32 %v3008_v60, %v14738_v56  ;;  %v2238_v63 = vpop.f32.mrb[1].mxu0  ;;  %v3010_v0 = vpop.f32.mrb[1].mxu1 }
 0x297   :  { %v10736_v1 = vadd.f32 %v2238_v63, %v14741_v57  ;;  %v10800_v2 = vadd.f32 %v3010_v0, %v14744_v58  ;;  %v2240_v3 = vpop.f32.mrb[2].mxu0  ;;  %v3012_v4 = vpop.f32.mrb[2].mxu1 }
 0x298   :  { %v10737_v5 = vadd.f32 %v2240_v3, %v14735_v55  ;;  %v10801_v6 = vadd.f32 %v3012_v4, %v14738_v56  ;;  %v2242_v7 = vpop.f32.mrb[3].mxu0  ;;  %v3014_v8 = vpop.f32.mrb[3].mxu1  ;;  %v3167_v11 = vmax.f32 %v10735_v61, 0.0  ;;  %v3169_v12 = vmax.f32 %v10799_v62, 0.0 }
 0x299   :  { %v10738_v9 = vadd.f32 %v2242_v7, %v14741_v57  ;;  %v10802_v10 = vadd.f32 %v3014_v8, %v14744_v58  ;;  %v3170_v15 = vmax.f32 %v10800_v2, 0.0  ;;  %v3168_v18 = vmax.f32 %v10736_v1, 0.0 }
 0x29a   :  { %v3171_v13 = vmax.f32 %v10737_v5, 0.0  ;;  %v3173_v14 = vmax.f32 %v10801_v6, 0.0 }
 0x29b   :  { %v3174_v16 = vmax.f32 %v10802_v10, 0.0  ;;  %v3172_v19 = vmax.f32 %v10738_v9, 0.0 }
 0x29c   :  { %v3295_v20 = vpack.c.bf16 %v3171_v13, %v3167_v11  ;;  %v3297_v21 = vpack.c.bf16 %v3173_v14, %v3169_v12 }
 0x29d   :  { %v3298_v22 = vpack.c.bf16 %v3174_v16, %v3170_v15  ;;  %v2246_v23 = vpop.f32.mrb[4].mxu0  ;;  %v3018_v24 = vpop.f32.mrb[4].mxu1  ;;  %v3296_v25 = vpack.c.bf16 %v3172_v19, %v3168_v18 }
 0x29e   :  { %v10739_v26 = vadd.f32 %v2246_v23, %v14735_v55  ;;  %v10803_v27 = vadd.f32 %v3018_v24, %v14738_v56  ;;  %v2248_v28 = vpop.f32.mrb[5].mxu0  ;;  %v3020_v29 = vpop.f32.mrb[5].mxu1 }
 0x29f   :  { %v10740_v30 = vadd.f32 %v2248_v28, %v14741_v57  ;;  %v10804_v31 = vadd.f32 %v3020_v29, %v14744_v58  ;;  %v2250_v32 = vpop.f32.mrb[6].mxu0  ;;  %v3022_v33 = vpop.f32.mrb[6].mxu1  ;;  %3646 = vmatprep.mubr.bf16.mxu0 %v3296_v25  ;;  %9952 = vmatprep.mubr.msk.bf16.mxu1 %vm1574_vm0, %v3298_v22 }
 0x2a0   :  { %v10741_v34 = vadd.f32 %v2250_v32, %v14735_v55  ;;  %v10805_v35 = vadd.f32 %v3022_v33, %v14738_v56  ;;  %v2252_v36 = vpop.f32.mrb[7].mxu0  ;;  %v3024_v37 = vpop.f32.mrb[7].mxu1  ;;  %3647 = vmatmul.mubr.bf16.vlgmr.msra.gmra.mrb[64].mxu0 %v3295_v20  ;;  %3808 = vmatmul.mubr.bf16.vlgmr.msra.gmra.mrb[64].mxu1 %v3297_v21  ;;  %v3177_v40 = vmax.f32 %v10803_v27, 0.0  ;;  %v3175_v42 = vmax.f32 %v10739_v26, 0.0 }
 0x2a1   :  { %v10742_v38 = vadd.f32 %v2252_v36, %v14741_v57  ;;  %v10806_v39 = vadd.f32 %v3024_v37, %v14744_v58  ;;  %v3178_v44 = vmax.f32 %v10804_v31, 0.0  ;;  %v3176_v46 = vmax.f32 %v10740_v30, 0.0 }
 0x2a2   :  { %v3181_v41 = vmax.f32 %v10805_v35, 0.0  ;;  %v3179_v43 = vmax.f32 %v10741_v34, 0.0 }
 0x2a3   :  { %v3182_v45 = vmax.f32 %v10806_v39, 0.0  ;;  %v3180_v47 = vmax.f32 %v10742_v38, 0.0 }
 0x2a4   :  { %v3299_v48 = vpack.c.bf16 %v3179_v43, %v3175_v42  ;;  %v3301_v52 = vpack.c.bf16 %v3181_v41, %v3177_v40 }
 0x2a5   :  { %v3302_v59 = vpack.c.bf16 %v3182_v45, %v3178_v44  ;;  %v2256_v60 = vpop.f32.mrb[8].mxu0  ;;  %v3028_v61 = vpop.f32.mrb[8].mxu1  ;;  %v3300_v62 = vpack.c.bf16 %v3180_v47, %v3176_v46 }
 0x2a6   :  { %v10743_v63 = vadd.f32 %v2256_v60, %v14735_v55  ;;  %v10807_v0 = vadd.f32 %v3028_v61, %v14738_v56  ;;  %v2258_v1 = vpop.f32.mrb[9].mxu0  ;;  %v3030_v2 = vpop.f32.mrb[9].mxu1 }
 0x2a7   :  { %v10744_v3 = vadd.f32 %v2258_v1, %v14741_v57  ;;  %v10808_v4 = vadd.f32 %v3030_v2, %v14744_v58  ;;  %v2260_v5 = vpop.f32.mrb[10].mxu0  ;;  %v3032_v6 = vpop.f32.mrb[10].mxu1  ;;  %3654 = vmatprep.mubr.bf16.mxu0 %v3300_v62  ;;  %9953 = vmatprep.mubr.msk.bf16.mxu1 %vm1574_vm0, %v3302_v59 }
 0x2a8   :  { %v10745_v7 = vadd.f32 %v2260_v5, %v14735_v55  ;;  %v10809_v8 = vadd.f32 %v3032_v6, %v14738_v56  ;;  %v2262_v9 = vpop.f32.mrb[11].mxu0  ;;  %v3034_v10 = vpop.f32.mrb[11].mxu1  ;;  %3655 = vmatmul.mubr.bf16.gmra.mrb[68].mxu0 %v3299_v48  ;;  %3816 = vmatmul.mubr.bf16.gmra.mrb[68].mxu1 %v3301_v52  ;;  %v3185_v13 = vmax.f32 %v10807_v0, 0.0  ;;  %v3183_v15 = vmax.f32 %v10743_v63, 0.0 }
 0x2a9   :  { %v10746_v11 = vadd.f32 %v2262_v9, %v14741_v57  ;;  %v10810_v12 = vadd.f32 %v3034_v10, %v14744_v58  ;;  %v3186_v18 = vmax.f32 %v10808_v4, 0.0  ;;  %v3184_v20 = vmax.f32 %v10744_v3, 0.0 }
 0x2aa   :  { %v3189_v14 = vmax.f32 %v10809_v8, 0.0  ;;  %v3187_v16 = vmax.f32 %v10745_v7, 0.0 }
 0x2ab   :  { %v3190_v19 = vmax.f32 %v10810_v12, 0.0  ;;  %v3188_v21 = vmax.f32 %v10746_v11, 0.0 }
 0x2ac   :  { %v3303_v22 = vpack.c.bf16 %v3187_v16, %v3183_v15  ;;  %v3305_v23 = vpack.c.bf16 %v3189_v14, %v3185_v13 }
 0x2ad   :  { %v3306_v24 = vpack.c.bf16 %v3190_v19, %v3186_v18  ;;  %v2266_v25 = vpop.f32.mrb[12].mxu0  ;;  %v3038_v26 = vpop.f32.mrb[12].mxu1  ;;  %v3304_v27 = vpack.c.bf16 %v3188_v21, %v3184_v20 }
 0x2ae   :  { %v10747_v28 = vadd.f32 %v2266_v25, %v14735_v55  ;;  %v10811_v29 = vadd.f32 %v3038_v26, %v14738_v56  ;;  %v2268_v30 = vpop.f32.mrb[13].mxu0  ;;  %v3040_v31 = vpop.f32.mrb[13].mxu1 }
 0x2af   :  { %v10748_v32 = vadd.f32 %v2268_v30, %v14741_v57  ;;  %v10812_v33 = vadd.f32 %v3040_v31, %v14744_v58  ;;  %v2270_v34 = vpop.f32.mrb[14].mxu0  ;;  %v3042_v35 = vpop.f32.mrb[14].mxu1  ;;  %3662 = vmatprep.mubr.bf16.mxu0 %v3304_v27  ;;  %9954 = vmatprep.mubr.msk.bf16.mxu1 %vm1574_vm0, %v3306_v24 }
 0x2b0   :  { %v10749_v36 = vadd.f32 %v2270_v34, %v14735_v55  ;;  %v10813_v37 = vadd.f32 %v3042_v35, %v14738_v56  ;;  %v2272_v38 = vpop.f32.mrb[15].mxu0  ;;  %v3044_v39 = vpop.f32.mrb[15].mxu1  ;;  %3663 = vmatmul.mubr.bf16.gmra.mrb[72].mxu0 %v3303_v22  ;;  %3824 = vmatmul.mubr.bf16.gmra.mrb[72].mxu1 %v3305_v23  ;;  %v3193_v42 = vmax.f32 %v10811_v29, 0.0  ;;  %v3191_v44 = vmax.f32 %v10747_v28, 0.0 }
 0x2b1   :  { %v10750_v40 = vadd.f32 %v2272_v38, %v14741_v57  ;;  %v10814_v41 = vadd.f32 %v3044_v39, %v14744_v58  ;;  %v3194_v46 = vmax.f32 %v10812_v33, 0.0  ;;  %v3192_v48 = vmax.f32 %v10748_v32, 0.0 }
 0x2b2   :  { %v3197_v43 = vmax.f32 %v10813_v37, 0.0  ;;  %v3195_v45 = vmax.f32 %v10749_v36, 0.0 }
 0x2b3   :  { %v3198_v47 = vmax.f32 %v10814_v41, 0.0  ;;  %v3196_v52 = vmax.f32 %v10750_v40, 0.0 }
 0x2b4   :  { %v3307_v59 = vpack.c.bf16 %v3195_v45, %v3191_v44  ;;  %v3309_v60 = vpack.c.bf16 %v3197_v43, %v3193_v42 }
 0x2b5   :  { %v3310_v61 = vpack.c.bf16 %v3198_v47, %v3194_v46  ;;  %v2276_v62 = vpop.f32.mrb[16].mxu0  ;;  %v3048_v63 = vpop.f32.mrb[16].mxu1  ;;  %v3308_v0 = vpack.c.bf16 %v3196_v52, %v3192_v48 }
 0x2b6   :  { %v10751_v1 = vadd.f32 %v2276_v62, %v14735_v55  ;;  %v10815_v2 = vadd.f32 %v3048_v63, %v14738_v56  ;;  %v2278_v3 = vpop.f32.mrb[17].mxu0  ;;  %v3050_v4 = vpop.f32.mrb[17].mxu1 }
 0x2b7   :  { %v10752_v5 = vadd.f32 %v2278_v3, %v14741_v57  ;;  %v10816_v6 = vadd.f32 %v3050_v4, %v14744_v58  ;;  %v2280_v7 = vpop.f32.mrb[18].mxu0  ;;  %v3052_v8 = vpop.f32.mrb[18].mxu1  ;;  %3670 = vmatprep.mubr.bf16.mxu0 %v3308_v0  ;;  %9955 = vmatprep.mubr.msk.bf16.mxu1 %vm1574_vm0, %v3310_v61 }
 0x2b8   :  { %v10753_v9 = vadd.f32 %v2280_v7, %v14735_v55  ;;  %v10817_v10 = vadd.f32 %v3052_v8, %v14738_v56  ;;  %v2282_v11 = vpop.f32.mrb[19].mxu0  ;;  %v3054_v12 = vpop.f32.mrb[19].mxu1  ;;  %3671 = vmatmul.mubr.bf16.gmra.mrb[76].mxu0 %v3307_v59  ;;  %3832 = vmatmul.mubr.bf16.gmra.mrb[76].mxu1 %v3309_v60  ;;  %v3201_v15 = vmax.f32 %v10815_v2, 0.0  ;;  %v3199_v18 = vmax.f32 %v10751_v1, 0.0 }
 0x2b9   :  { %v10754_v13 = vadd.f32 %v2282_v11, %v14741_v57  ;;  %v10818_v14 = vadd.f32 %v3054_v12, %v14744_v58  ;;  %v3202_v20 = vmax.f32 %v10816_v6, 0.0  ;;  %v3200_v22 = vmax.f32 %v10752_v5, 0.0 }
 0x2ba   :  { %v3205_v16 = vmax.f32 %v10817_v10, 0.0  ;;  %v3203_v19 = vmax.f32 %v10753_v9, 0.0 }
 0x2bb   :  { %v3206_v21 = vmax.f32 %v10818_v14, 0.0  ;;  %v3204_v23 = vmax.f32 %v10754_v13, 0.0 }
 0x2bc   :  { %v3311_v24 = vpack.c.bf16 %v3203_v19, %v3199_v18  ;;  %v3313_v25 = vpack.c.bf16 %v3205_v16, %v3201_v15 }
 0x2bd   :  { %v3314_v26 = vpack.c.bf16 %v3206_v21, %v3202_v20  ;;  %v2286_v27 = vpop.f32.mrb[20].mxu0  ;;  %v3058_v28 = vpop.f32.mrb[20].mxu1  ;;  %v3312_v29 = vpack.c.bf16 %v3204_v23, %v3200_v22 }
 0x2be   :  { %v10755_v30 = vadd.f32 %v2286_v27, %v14735_v55  ;;  %v10819_v31 = vadd.f32 %v3058_v28, %v14738_v56  ;;  %v2288_v32 = vpop.f32.mrb[21].mxu0  ;;  %v3060_v33 = vpop.f32.mrb[21].mxu1 }
 0x2bf   :  { %v10756_v34 = vadd.f32 %v2288_v32, %v14741_v57  ;;  %v10820_v35 = vadd.f32 %v3060_v33, %v14744_v58  ;;  %v2290_v36 = vpop.f32.mrb[22].mxu0  ;;  %v3062_v37 = vpop.f32.mrb[22].mxu1  ;;  %3678 = vmatprep.mubr.bf16.mxu0 %v3312_v29  ;;  %9956 = vmatprep.mubr.msk.bf16.mxu1 %vm1574_vm0, %v3314_v26 }
 0x2c0   :  { %v10757_v38 = vadd.f32 %v2290_v36, %v14735_v55  ;;  %v10821_v39 = vadd.f32 %v3062_v37, %v14738_v56  ;;  %v2292_v40 = vpop.f32.mrb[23].mxu0  ;;  %v3064_v41 = vpop.f32.mrb[23].mxu1  ;;  %3679 = vmatmul.mubr.bf16.gmra.mrb[80].mxu0 %v3311_v24  ;;  %3840 = vmatmul.mubr.bf16.gmra.mrb[80].mxu1 %v3313_v25  ;;  %v3209_v44 = vmax.f32 %v10819_v31, 0.0  ;;  %v3207_v46 = vmax.f32 %v10755_v30, 0.0 }
 0x2c1   :  { %v10758_v42 = vadd.f32 %v2292_v40, %v14741_v57  ;;  %v10822_v43 = vadd.f32 %v3064_v41, %v14744_v58  ;;  %v3210_v48 = vmax.f32 %v10820_v35, 0.0  ;;  %v3208_v59 = vmax.f32 %v10756_v34, 0.0 }
 0x2c2   :  { %v3213_v45 = vmax.f32 %v10821_v39, 0.0  ;;  %v3211_v47 = vmax.f32 %v10757_v38, 0.0 }
 0x2c3   :  { %v3214_v52 = vmax.f32 %v10822_v43, 0.0  ;;  %v3212_v60 = vmax.f32 %v10758_v42, 0.0 }
 0x2c4   :  { %v3315_v61 = vpack.c.bf16 %v3211_v47, %v3207_v46  ;;  %v3317_v62 = vpack.c.bf16 %v3213_v45, %v3209_v44 }
 0x2c5   :  { %v3318_v63 = vpack.c.bf16 %v3214_v52, %v3210_v48  ;;  %v2296_v0 = vpop.f32.mrb[24].mxu0  ;;  %v3068_v1 = vpop.f32.mrb[24].mxu1  ;;  %v3316_v2 = vpack.c.bf16 %v3212_v60, %v3208_v59 }
 0x2c6   :  { %v10759_v3 = vadd.f32 %v2296_v0, %v14735_v55  ;;  %v10823_v4 = vadd.f32 %v3068_v1, %v14738_v56  ;;  %v2298_v5 = vpop.f32.mrb[25].mxu0  ;;  %v3070_v6 = vpop.f32.mrb[25].mxu1 }
 0x2c7   :  { %v10760_v7 = vadd.f32 %v2298_v5, %v14741_v57  ;;  %v10824_v8 = vadd.f32 %v3070_v6, %v14744_v58  ;;  %v2300_v9 = vpop.f32.mrb[26].mxu0  ;;  %v3072_v10 = vpop.f32.mrb[26].mxu1  ;;  %3686 = vmatprep.mubr.bf16.mxu0 %v3316_v2  ;;  %9957 = vmatprep.mubr.msk.bf16.mxu1 %vm1574_vm0, %v3318_v63 }
 0x2c8   :  { %v10761_v11 = vadd.f32 %v2300_v9, %v14735_v55  ;;  %v10825_v12 = vadd.f32 %v3072_v10, %v14738_v56  ;;  %v2302_v13 = vpop.f32.mrb[27].mxu0  ;;  %v3074_v14 = vpop.f32.mrb[27].mxu1  ;;  %3687 = vmatmul.mubr.bf16.gmra.mrb[84].mxu0 %v3315_v61  ;;  %3848 = vmatmul.mubr.bf16.gmra.mrb[84].mxu1 %v3317_v62  ;;  %v3217_v18 = vmax.f32 %v10823_v4, 0.0  ;;  %v3215_v20 = vmax.f32 %v10759_v3, 0.0 }
 0x2c9   :  { %v10762_v15 = vadd.f32 %v2302_v13, %v14741_v57  ;;  %v10826_v16 = vadd.f32 %v3074_v14, %v14744_v58  ;;  %v3218_v22 = vmax.f32 %v10824_v8, 0.0  ;;  %v3216_v24 = vmax.f32 %v10760_v7, 0.0 }
 0x2ca   :  { %v3221_v19 = vmax.f32 %v10825_v12, 0.0  ;;  %v3219_v21 = vmax.f32 %v10761_v11, 0.0 }
 0x2cb   :  { %v3222_v23 = vmax.f32 %v10826_v16, 0.0  ;;  %v3220_v25 = vmax.f32 %v10762_v15, 0.0 }
 0x2cc   :  { %v3319_v26 = vpack.c.bf16 %v3219_v21, %v3215_v20  ;;  %v3321_v27 = vpack.c.bf16 %v3221_v19, %v3217_v18 }
 0x2cd   :  { %v3322_v28 = vpack.c.bf16 %v3222_v23, %v3218_v22  ;;  %v2306_v29 = vpop.f32.mrb[28].mxu0  ;;  %v3078_v30 = vpop.f32.mrb[28].mxu1  ;;  %v3320_v31 = vpack.c.bf16 %v3220_v25, %v3216_v24 }
 0x2ce   :  { %v10763_v32 = vadd.f32 %v2306_v29, %v14735_v55  ;;  %v10827_v33 = vadd.f32 %v3078_v30, %v14738_v56  ;;  %v2308_v34 = vpop.f32.mrb[29].mxu0  ;;  %v3080_v35 = vpop.f32.mrb[29].mxu1 }
 0x2cf   :  { %v10764_v36 = vadd.f32 %v2308_v34, %v14741_v57  ;;  %v10828_v37 = vadd.f32 %v3080_v35, %v14744_v58  ;;  %v2310_v38 = vpop.f32.mrb[30].mxu0  ;;  %v3082_v39 = vpop.f32.mrb[30].mxu1  ;;  %3694 = vmatprep.mubr.bf16.mxu0 %v3320_v31  ;;  %9958 = vmatprep.mubr.msk.bf16.mxu1 %vm1574_vm0, %v3322_v28 }
 0x2d0   :  { %v10765_v40 = vadd.f32 %v2310_v38, %v14735_v55  ;;  %v10829_v41 = vadd.f32 %v3082_v39, %v14738_v56  ;;  %v2312_v42 = vpop.f32.mrb[31].mxu0  ;;  %v3084_v43 = vpop.f32.mrb[31].mxu1  ;;  %3695 = vmatmul.mubr.bf16.gmra.mrb[88].mxu0 %v3319_v26  ;;  %3856 = vmatmul.mubr.bf16.gmra.mrb[88].mxu1 %v3321_v27  ;;  %v3225_v46 = vmax.f32 %v10827_v33, 0.0  ;;  %v3223_v48 = vmax.f32 %v10763_v32, 0.0 }
 0x2d1   :  { %v10766_v44 = vadd.f32 %v2312_v42, %v14741_v57  ;;  %v10830_v45 = vadd.f32 %v3084_v43, %v14744_v58  ;;  %v3226_v59 = vmax.f32 %v10828_v37, 0.0  ;;  %v3224_v61 = vmax.f32 %v10764_v36, 0.0 }
 0x2d2   :  { %v3229_v47 = vmax.f32 %v10829_v41, 0.0  ;;  %v3227_v52 = vmax.f32 %v10765_v40, 0.0 }
 0x2d3   :  { %v3230_v60 = vmax.f32 %v10830_v45, 0.0  ;;  %v3228_v62 = vmax.f32 %v10766_v44, 0.0 }
 0x2d4   :  { %v3323_v63 = vpack.c.bf16 %v3227_v52, %v3223_v48  ;;  %v3325_v0 = vpack.c.bf16 %v3229_v47, %v3225_v46 }
 0x2d5   :  { %v3326_v1 = vpack.c.bf16 %v3230_v60, %v3226_v59  ;;  %v2316_v2 = vpop.f32.mrb[32].mxu0  ;;  %v3088_v3 = vpop.f32.mrb[32].mxu1  ;;  %v3324_v4 = vpack.c.bf16 %v3228_v62, %v3224_v61 }
 0x2d6   :  { %v10767_v5 = vadd.f32 %v2316_v2, %v14735_v55  ;;  %v10831_v6 = vadd.f32 %v3088_v3, %v14738_v56  ;;  %v2318_v7 = vpop.f32.mrb[33].mxu0  ;;  %v3090_v8 = vpop.f32.mrb[33].mxu1 }
 0x2d7   :  { %v10768_v9 = vadd.f32 %v2318_v7, %v14741_v57  ;;  %v10832_v10 = vadd.f32 %v3090_v8, %v14744_v58  ;;  %v2320_v11 = vpop.f32.mrb[34].mxu0  ;;  %v3092_v12 = vpop.f32.mrb[34].mxu1  ;;  %3702 = vmatprep.mubr.bf16.mxu0 %v3324_v4  ;;  %9959 = vmatprep.mubr.msk.bf16.mxu1 %vm1574_vm0, %v3326_v1 }
 0x2d8   :  { %v10769_v13 = vadd.f32 %v2320_v11, %v14735_v55  ;;  %v10833_v14 = vadd.f32 %v3092_v12, %v14738_v56  ;;  %v2322_v15 = vpop.f32.mrb[35].mxu0  ;;  %v3094_v16 = vpop.f32.mrb[35].mxu1  ;;  %3703 = vmatmul.mubr.bf16.gmra.mrb[92].mxu0 %v3323_v63  ;;  %3864 = vmatmul.mubr.bf16.gmra.mrb[92].mxu1 %v3325_v0  ;;  %v3233_v20 = vmax.f32 %v10831_v6, 0.0  ;;  %v3231_v22 = vmax.f32 %v10767_v5, 0.0 }
 0x2d9   :  { %v10770_v18 = vadd.f32 %v2322_v15, %v14741_v57  ;;  %v10834_v19 = vadd.f32 %v3094_v16, %v14744_v58  ;;  %v3234_v24 = vmax.f32 %v10832_v10, 0.0  ;;  %v3232_v26 = vmax.f32 %v10768_v9, 0.0 }
 0x2da   :  { %v3237_v21 = vmax.f32 %v10833_v14, 0.0  ;;  %v3235_v23 = vmax.f32 %v10769_v13, 0.0 }
 0x2db   :  { %v3238_v25 = vmax.f32 %v10834_v19, 0.0  ;;  %v3236_v27 = vmax.f32 %v10770_v18, 0.0 }
 0x2dc   :  { %v3327_v28 = vpack.c.bf16 %v3235_v23, %v3231_v22  ;;  %v3329_v29 = vpack.c.bf16 %v3237_v21, %v3233_v20 }
 0x2dd   :  { %v3330_v30 = vpack.c.bf16 %v3238_v25, %v3234_v24  ;;  %v2326_v31 = vpop.f32.mrb[36].mxu0  ;;  %v3098_v32 = vpop.f32.mrb[36].mxu1  ;;  %v3328_v33 = vpack.c.bf16 %v3236_v27, %v3232_v26 }
 0x2de   :  { %v10771_v34 = vadd.f32 %v2326_v31, %v14735_v55  ;;  %v10835_v35 = vadd.f32 %v3098_v32, %v14738_v56  ;;  %v2328_v36 = vpop.f32.mrb[37].mxu0  ;;  %v3100_v37 = vpop.f32.mrb[37].mxu1 }
 0x2df   :  { %v10772_v38 = vadd.f32 %v2328_v36, %v14741_v57  ;;  %v10836_v39 = vadd.f32 %v3100_v37, %v14744_v58  ;;  %v2330_v40 = vpop.f32.mrb[38].mxu0  ;;  %v3102_v41 = vpop.f32.mrb[38].mxu1  ;;  %3710 = vmatprep.mubr.bf16.mxu0 %v3328_v33  ;;  %9960 = vmatprep.mubr.msk.bf16.mxu1 %vm1574_vm0, %v3330_v30 }
 0x2e0   :  { %v10773_v42 = vadd.f32 %v2330_v40, %v14735_v55  ;;  %v10837_v43 = vadd.f32 %v3102_v41, %v14738_v56  ;;  %v2332_v44 = vpop.f32.mrb[39].mxu0  ;;  %v3104_v45 = vpop.f32.mrb[39].mxu1  ;;  %3711 = vmatmul.mubr.bf16.gmra.mrb[96].mxu0 %v3327_v28  ;;  %3872 = vmatmul.mubr.bf16.gmra.mrb[96].mxu1 %v3329_v29  ;;  %v3241_v48 = vmax.f32 %v10835_v35, 0.0  ;;  %v3239_v59 = vmax.f32 %v10771_v34, 0.0 }
 0x2e1   :  { %v10774_v46 = vadd.f32 %v2332_v44, %v14741_v57  ;;  %v10838_v47 = vadd.f32 %v3104_v45, %v14744_v58  ;;  %v3242_v61 = vmax.f32 %v10836_v39, 0.0  ;;  %v3240_v63 = vmax.f32 %v10772_v38, 0.0 }
 0x2e2   :  { %v3245_v52 = vmax.f32 %v10837_v43, 0.0  ;;  %v3243_v60 = vmax.f32 %v10773_v42, 0.0 }
 0x2e3   :  { %v3246_v62 = vmax.f32 %v10838_v47, 0.0  ;;  %v3244_v0 = vmax.f32 %v10774_v46, 0.0 }
 0x2e4   :  { %v3331_v1 = vpack.c.bf16 %v3243_v60, %v3239_v59  ;;  %v3333_v2 = vpack.c.bf16 %v3245_v52, %v3241_v48 }
 0x2e5   :  { %v3334_v3 = vpack.c.bf16 %v3246_v62, %v3242_v61  ;;  %v2336_v4 = vpop.f32.mrb[40].mxu0  ;;  %v3108_v5 = vpop.f32.mrb[40].mxu1  ;;  %v3332_v6 = vpack.c.bf16 %v3244_v0, %v3240_v63 }
 0x2e6   :  { %v10775_v7 = vadd.f32 %v2336_v4, %v14735_v55  ;;  %v10839_v8 = vadd.f32 %v3108_v5, %v14738_v56  ;;  %v2338_v9 = vpop.f32.mrb[41].mxu0  ;;  %v3110_v10 = vpop.f32.mrb[41].mxu1 }
 0x2e7   :  { %v10776_v11 = vadd.f32 %v2338_v9, %v14741_v57  ;;  %v10840_v12 = vadd.f32 %v3110_v10, %v14744_v58  ;;  %v2340_v13 = vpop.f32.mrb[42].mxu0  ;;  %v3112_v14 = vpop.f32.mrb[42].mxu1  ;;  %3718 = vmatprep.mubr.bf16.mxu0 %v3332_v6  ;;  %9961 = vmatprep.mubr.msk.bf16.mxu1 %vm1574_vm0, %v3334_v3 }
 0x2e8   :  { %v10777_v15 = vadd.f32 %v2340_v13, %v14735_v55  ;;  %v10841_v16 = vadd.f32 %v3112_v14, %v14738_v56  ;;  %v2342_v18 = vpop.f32.mrb[43].mxu0  ;;  %v3114_v19 = vpop.f32.mrb[43].mxu1  ;;  %3719 = vmatmul.mubr.bf16.gmra.mrb[100].mxu0 %v3331_v1  ;;  %3880 = vmatmul.mubr.bf16.gmra.mrb[100].mxu1 %v3333_v2  ;;  %v3249_v22 = vmax.f32 %v10839_v8, 0.0  ;;  %v3247_v24 = vmax.f32 %v10775_v7, 0.0 }
 0x2e9   :  { %v10778_v20 = vadd.f32 %v2342_v18, %v14741_v57  ;;  %v10842_v21 = vadd.f32 %v3114_v19, %v14744_v58  ;;  %v3250_v26 = vmax.f32 %v10840_v12, 0.0  ;;  %v3248_v28 = vmax.f32 %v10776_v11, 0.0 }
 0x2ea   :  { %v3253_v23 = vmax.f32 %v10841_v16, 0.0  ;;  %v3251_v25 = vmax.f32 %v10777_v15, 0.0 }
 0x2eb   :  { %v3254_v27 = vmax.f32 %v10842_v21, 0.0  ;;  %v3252_v29 = vmax.f32 %v10778_v20, 0.0 }
 0x2ec   :  { %v3335_v30 = vpack.c.bf16 %v3251_v25, %v3247_v24  ;;  %v3337_v31 = vpack.c.bf16 %v3253_v23, %v3249_v22 }
 0x2ed   :  { %v3338_v32 = vpack.c.bf16 %v3254_v27, %v3250_v26  ;;  %v2346_v33 = vpop.f32.mrb[44].mxu0  ;;  %v3118_v34 = vpop.f32.mrb[44].mxu1  ;;  %v3336_v35 = vpack.c.bf16 %v3252_v29, %v3248_v28 }
 0x2ee   :  { %v10779_v36 = vadd.f32 %v2346_v33, %v14735_v55  ;;  %v10843_v37 = vadd.f32 %v3118_v34, %v14738_v56  ;;  %v2348_v38 = vpop.f32.mrb[45].mxu0  ;;  %v3120_v39 = vpop.f32.mrb[45].mxu1 }
 0x2ef   :  { %v10780_v40 = vadd.f32 %v2348_v38, %v14741_v57  ;;  %v10844_v41 = vadd.f32 %v3120_v39, %v14744_v58  ;;  %v2350_v42 = vpop.f32.mrb[46].mxu0  ;;  %v3122_v43 = vpop.f32.mrb[46].mxu1  ;;  %3726 = vmatprep.mubr.bf16.mxu0 %v3336_v35  ;;  %9962 = vmatprep.mubr.msk.bf16.mxu1 %vm1574_vm0, %v3338_v32 }
 0x2f0   :  { %v10781_v44 = vadd.f32 %v2350_v42, %v14735_v55  ;;  %v10845_v45 = vadd.f32 %v3122_v43, %v14738_v56  ;;  %v2352_v46 = vpop.f32.mrb[47].mxu0  ;;  %v3124_v47 = vpop.f32.mrb[47].mxu1  ;;  %3727 = vmatmul.mubr.bf16.gmra.mrb[104].mxu0 %v3335_v30  ;;  %3888 = vmatmul.mubr.bf16.gmra.mrb[104].mxu1 %v3337_v31  ;;  %v3257_v59 = vmax.f32 %v10843_v37, 0.0  ;;  %v3255_v61 = vmax.f32 %v10779_v36, 0.0 }
 0x2f1   :  { %v10782_v48 = vadd.f32 %v2352_v46, %v14741_v57  ;;  %v10846_v52 = vadd.f32 %v3124_v47, %v14744_v58  ;;  %v3258_v63 = vmax.f32 %v10844_v41, 0.0  ;;  %v3256_v1 = vmax.f32 %v10780_v40, 0.0 }
 0x2f2   :  { %v3261_v60 = vmax.f32 %v10845_v45, 0.0  ;;  %v3259_v62 = vmax.f32 %v10781_v44, 0.0 }
 0x2f3   :  { %v3262_v0 = vmax.f32 %v10846_v52, 0.0  ;;  %v3260_v2 = vmax.f32 %v10782_v48, 0.0 }
 0x2f4   :  { %v3339_v3 = vpack.c.bf16 %v3259_v62, %v3255_v61  ;;  %v3341_v4 = vpack.c.bf16 %v3261_v60, %v3257_v59 }
 0x2f5   :  { %v3342_v5 = vpack.c.bf16 %v3262_v0, %v3258_v63  ;;  %v2356_v6 = vpop.f32.mrb[48].mxu0  ;;  %v3128_v7 = vpop.f32.mrb[48].mxu1  ;;  %v3340_v8 = vpack.c.bf16 %v3260_v2, %v3256_v1 }
 0x2f6   :  { %v10783_v9 = vadd.f32 %v2356_v6, %v14735_v55  ;;  %v10847_v10 = vadd.f32 %v3128_v7, %v14738_v56  ;;  %v2358_v11 = vpop.f32.mrb[49].mxu0  ;;  %v3130_v12 = vpop.f32.mrb[49].mxu1 }
 0x2f7   :  { %v10784_v13 = vadd.f32 %v2358_v11, %v14741_v57  ;;  %v10848_v14 = vadd.f32 %v3130_v12, %v14744_v58  ;;  %v2360_v15 = vpop.f32.mrb[50].mxu0  ;;  %v3132_v16 = vpop.f32.mrb[50].mxu1  ;;  %3734 = vmatprep.mubr.bf16.mxu0 %v3340_v8  ;;  %9963 = vmatprep.mubr.msk.bf16.mxu1 %vm1574_vm0, %v3342_v5 }
 0x2f8   :  { %v10785_v18 = vadd.f32 %v2360_v15, %v14735_v55  ;;  %v10849_v19 = vadd.f32 %v3132_v16, %v14738_v56  ;;  %v2362_v20 = vpop.f32.mrb[51].mxu0  ;;  %v3134_v21 = vpop.f32.mrb[51].mxu1  ;;  %3735 = vmatmul.mubr.bf16.gmra.mrb[108].mxu0 %v3339_v3  ;;  %3896 = vmatmul.mubr.bf16.gmra.mrb[108].mxu1 %v3341_v4  ;;  %v3265_v24 = vmax.f32 %v10847_v10, 0.0  ;;  %v3263_v26 = vmax.f32 %v10783_v9, 0.0 }
 0x2f9   :  { %v10786_v22 = vadd.f32 %v2362_v20, %v14741_v57  ;;  %v10850_v23 = vadd.f32 %v3134_v21, %v14744_v58  ;;  %v3266_v28 = vmax.f32 %v10848_v14, 0.0  ;;  %v3264_v30 = vmax.f32 %v10784_v13, 0.0 }
 0x2fa   :  { %v3269_v25 = vmax.f32 %v10849_v19, 0.0  ;;  %v3267_v27 = vmax.f32 %v10785_v18, 0.0 }
 0x2fb   :  { %v3270_v29 = vmax.f32 %v10850_v23, 0.0  ;;  %v3268_v31 = vmax.f32 %v10786_v22, 0.0 }
 0x2fc   :  { %v3343_v32 = vpack.c.bf16 %v3267_v27, %v3263_v26  ;;  %v3345_v33 = vpack.c.bf16 %v3269_v25, %v3265_v24 }
 0x2fd   :  { %v3346_v34 = vpack.c.bf16 %v3270_v29, %v3266_v28  ;;  %v2366_v35 = vpop.f32.mrb[52].mxu0  ;;  %v3138_v36 = vpop.f32.mrb[52].mxu1  ;;  %v3344_v37 = vpack.c.bf16 %v3268_v31, %v3264_v30 }
 0x2fe   :  { %v10787_v38 = vadd.f32 %v2366_v35, %v14735_v55  ;;  %v10851_v39 = vadd.f32 %v3138_v36, %v14738_v56  ;;  %v2368_v40 = vpop.f32.mrb[53].mxu0  ;;  %v3140_v41 = vpop.f32.mrb[53].mxu1 }
 0x2ff   :  { %v10788_v42 = vadd.f32 %v2368_v40, %v14741_v57  ;;  %v10852_v43 = vadd.f32 %v3140_v41, %v14744_v58  ;;  %v2370_v44 = vpop.f32.mrb[54].mxu0  ;;  %v3142_v45 = vpop.f32.mrb[54].mxu1  ;;  %3742 = vmatprep.mubr.bf16.mxu0 %v3344_v37  ;;  %9964 = vmatprep.mubr.msk.bf16.mxu1 %vm1574_vm0, %v3346_v34 }
 0x300   :  { %v10789_v46 = vadd.f32 %v2370_v44, %v14735_v55  ;;  %v10853_v47 = vadd.f32 %v3142_v45, %v14738_v56  ;;  %v2372_v48 = vpop.f32.mrb[55].mxu0  ;;  %v3144_v52 = vpop.f32.mrb[55].mxu1  ;;  %3743 = vmatmul.mubr.bf16.gmra.mrb[112].mxu0 %v3343_v32  ;;  %3904 = vmatmul.mubr.bf16.gmra.mrb[112].mxu1 %v3345_v33  ;;  %v3273_v61 = vmax.f32 %v10851_v39, 0.0  ;;  %v3271_v63 = vmax.f32 %v10787_v38, 0.0 }
 0x301   :  { %v10790_v59 = vadd.f32 %v2372_v48, %v14741_v57  ;;  %v10854_v60 = vadd.f32 %v3144_v52, %v14744_v58  ;;  %v3274_v1 = vmax.f32 %v10852_v43, 0.0  ;;  %v3272_v3 = vmax.f32 %v10788_v42, 0.0 }
 0x302   :  { %v3277_v62 = vmax.f32 %v10853_v47, 0.0  ;;  %v3275_v0 = vmax.f32 %v10789_v46, 0.0 }
 0x303   :  { %v3278_v2 = vmax.f32 %v10854_v60, 0.0  ;;  %v3276_v4 = vmax.f32 %v10790_v59, 0.0 }
 0x304   :  { %v3347_v5 = vpack.c.bf16 %v3275_v0, %v3271_v63  ;;  %v3349_v6 = vpack.c.bf16 %v3277_v62, %v3273_v61  ;;  %v11958_v63 = vld [vmem:[%s17457_s6] ss:$16 sps:$4 sm:$0xff]   ;;  %v11960_v0 = vld [vmem:[%s17457_s6 + $0x4] ss:$16 sps:$4 sm:$0xff]  }
 0x305   :  { %v3350_v7 = vpack.c.bf16 %v3278_v2, %v3274_v1  ;;  %v2376_v8 = vpop.f32.mrb[56].mxu0  ;;  %v3148_v9 = vpop.f32.mrb[56].mxu1  ;;  %v3348_v10 = vpack.c.bf16 %v3276_v4, %v3272_v3  ;;  %4471 = vmatprep.subr.bf16.mxu0 %v11960_v0  ;;  %v11979_v0 = vld [vmem:[%s17457_s6 + $0x68] ss:$16 sps:$4 sm:$0xff]  }
 0x306   :  { %v10791_v11 = vadd.f32 %v2376_v8, %v14735_v55  ;;  %v10855_v12 = vadd.f32 %v3148_v9, %v14738_v56  ;;  %v2378_v13 = vpop.f32.mrb[57].mxu0  ;;  %v3150_v14 = vpop.f32.mrb[57].mxu1  ;;  %4472 = vmatpush1.bf16.msra.mxu0 %v11958_v63  ;;  %v11961_v9 = vld [vmem:[%s17457_s6 + $0x20] ss:$16 sps:$4 sm:$0xff]   ;;  %v11981_v63 = vld [vmem:[%s17457_s6 + $0x6c] ss:$16 sps:$4 sm:$0xff]  }
 0x307   :  { %v10792_v15 = vadd.f32 %v2378_v13, %v14741_v57  ;;  %v10856_v16 = vadd.f32 %v3150_v14, %v14744_v58  ;;  %v2380_v18 = vpop.f32.mrb[58].mxu0  ;;  %v3152_v19 = vpop.f32.mrb[58].mxu1  ;;  %3750 = vmatprep.mubr.bf16.mxu0 %v3348_v10  ;;  %9965 = vmatprep.mubr.msk.bf16.mxu1 %vm1574_vm0, %v3350_v7  ;;  %v11963_v10 = vld [vmem:[%s17457_s6 + $0x24] ss:$16 sps:$4 sm:$0xff]   ;;  %v11967_v13 = vld [vmem:[%s17457_s6 + $0x8] ss:$16 sps:$4 sm:$0xff]  }
 0x308   :  { %v10793_v20 = vadd.f32 %v2380_v18, %v14735_v55  ;;  %v10857_v21 = vadd.f32 %v3152_v19, %v14738_v56  ;;  %v2382_v22 = vpop.f32.mrb[59].mxu0  ;;  %v3154_v23 = vpop.f32.mrb[59].mxu1  ;;  %3751 = vmatmul.mubr.bf16.gmra.mrb[116].mxu0 %v3347_v5  ;;  %3912 = vmatmul.mubr.bf16.gmra.mrb[116].mxu1 %v3349_v6  ;;  %v3281_v26 = vmax.f32 %v10855_v12, 0.0  ;;  %v3279_v28 = vmax.f32 %v10791_v11, 0.0  ;;  %v11964_v11 = vld [vmem:[%s17457_s6 + $0x40] ss:$16 sps:$4 sm:$0xff]  }
 0x309   :  { %v10794_v24 = vadd.f32 %v2382_v22, %v14741_v57  ;;  %v10858_v25 = vadd.f32 %v3154_v23, %v14744_v58  ;;  %v3282_v30 = vmax.f32 %v10856_v16, 0.0  ;;  %v3280_v32 = vmax.f32 %v10792_v15, 0.0  ;;  %4473 = vmatprep.subr.bf16.mxu0 %v11963_v10  ;;  %v11966_v12 = vld [vmem:[%s17457_s6 + $0x44] ss:$16 sps:$4 sm:$0xff]   ;;  %v11969_v14 = vld [vmem:[%s17457_s6 + $0xc] ss:$16 sps:$4 sm:$0xff]  }
 0x30a   :  { %v3285_v27 = vmax.f32 %v10857_v21, 0.0  ;;  %v3283_v29 = vmax.f32 %v10793_v20, 0.0  ;;  %4474 = vmatpush1.bf16.msra.mxu0 %v11961_v9  ;;  %v11970_v15 = vld [vmem:[%s17457_s6 + $0x60] ss:$16 sps:$4 sm:$0xff]   ;;  %v11972_v16 = vld [vmem:[%s17457_s6 + $0x64] ss:$16 sps:$4 sm:$0xff]   ;;  %4664 = vmatprep.subr.bf16.mxu1 %v11969_v14 }
 0x30b   :  { %v3286_v31 = vmax.f32 %v10858_v25, 0.0  ;;  %v3284_v33 = vmax.f32 %v10794_v24, 0.0  ;;  %4475 = vmatprep.subr.bf16.mxu0 %v11966_v12  ;;  %v14925_v20 = vld [vmem:[%s17456_s5] ss:$0 sm:$0xff]  ;;  %4665 = vmatpush1.bf16.msra.mxu1 %v11967_v13 }
 0x30c   :  { %v3351_v34 = vpack.c.bf16 %v3283_v29, %v3279_v28  ;;  %v3353_v35 = vpack.c.bf16 %v3285_v27, %v3281_v26 }
 0x30d   :  { %v3354_v36 = vpack.c.bf16 %v3286_v31, %v3282_v30  ;;  %v2386_v37 = vpop.f32.mrb[60].mxu0  ;;  %v3158_v38 = vpop.f32.mrb[60].mxu1  ;;  %v3352_v39 = vpack.c.bf16 %v3284_v33, %v3280_v32  ;;  %v11975_v32 = vld [vmem:[%s17457_s6 + $0x2c] ss:$16 sps:$4 sm:$0xff]   ;;  %v11973_v33 = vld [vmem:[%s17457_s6 + $0x28] ss:$16 sps:$4 sm:$0xff]  }
 0x30e   :  { %v10795_v40 = vadd.f32 %v2386_v37, %v14735_v55  ;;  %v10859_v41 = vadd.f32 %v3158_v38, %v14738_v56  ;;  %v2388_v42 = vpop.f32.mrb[61].mxu0  ;;  %v3160_v43 = vpop.f32.mrb[61].mxu1  ;;  %4476 = vmatpush1.bf16.msra.mxu0 %v11964_v11  ;;  %4666 = vmatprep.subr.bf16.mxu1 %v11975_v32 }
 0x30f   :  { %v10796_v44 = vadd.f32 %v2388_v42, %v14741_v57  ;;  %v10860_v45 = vadd.f32 %v3160_v43, %v14744_v58  ;;  %v2390_v46 = vpop.f32.mrb[62].mxu0  ;;  %v3162_v47 = vpop.f32.mrb[62].mxu1  ;;  %3758 = vmatprep.mubr.bf16.mxu0 %v3352_v39  ;;  %9966 = vmatprep.mubr.msk.bf16.mxu1 %vm1574_vm0, %v3354_v36 }
 0x310   :  { %v10797_v48 = vadd.f32 %v2390_v46, %v14735_v55  ;;  %v10861_v52 = vadd.f32 %v3162_v47, %v14738_v56  ;;  %v2392_v59 = vpop.f32.mrb[63].mxu0  ;;  %v3164_v60 = vpop.f32.mrb[63].mxu1  ;;  %3759 = vmatmul.mubr.bf16.gmra.mrb[120].mxu0 %v3351_v34  ;;  %3920 = vmatmul.mubr.bf16.gmra.mrb[120].mxu1 %v3353_v35  ;;  %v3289_v1 = vmax.f32 %v10859_v41, 0.0  ;;  %v3287_v2 = vmax.f32 %v10795_v40, 0.0  ;;  %v11976_v47 = vld [vmem:[%s17457_s6 + $0x48] ss:$16 sps:$4 sm:$0xff]  }
 0x311   :  { %v10798_v61 = vadd.f32 %v2392_v59, %v14741_v57  ;;  %v10862_v62 = vadd.f32 %v3164_v60, %v14744_v58  ;;  %v3290_v3 = vmax.f32 %v10860_v45, 0.0  ;;  %v3288_v5 = vmax.f32 %v10796_v44, 0.0  ;;  %4477 = vmatprep.subr.bf16.mxu0 %v11972_v16  ;;  %4667 = vmatpush1.bf16.msra.mxu1 %v11973_v33 }
 0x312   :  { %v3293_v55 = vmax.f32 %v10861_v52, 0.0  ;;  %v3291_v56 = vmax.f32 %v10797_v48, 0.0  ;;  %4478 = vmatpush1.bf16.msra.mxu0 %v11970_v15  ;;  %v11978_v48 = vld [vmem:[%s17457_s6 + $0x4c] ss:$16 sps:$4 sm:$0xff]   ;;  %s13242_s6 = smov 64  }
 0x313   :  { %v3294_v4 = vmax.f32 %v10862_v62, 0.0  ;;  %v3292_v6 = vmax.f32 %v10798_v61, 0.0  ;;  %4668 = vmatprep.subr.bf16.mxu1 %v11978_v48 }
 0x314   :  { %v3355_v57 = vpack.c.bf16 %v3291_v56, %v3287_v2  ;;  %v3357_v7 = vpack.c.bf16 %v3293_v55, %v3289_v1 }
 0x315   :  { %v3358_v58 = vpack.c.bf16 %v3294_v4, %v3290_v3  ;;  %v3356_v8 = vpack.c.bf16 %v3292_v6, %v3288_v5  ;;  %4669 = vmatpush1.bf16.msra.mxu1 %v11976_v47 }
 0x316   :  { %4670 = vmatprep.subr.bf16.mxu1 %v11981_v63 }
 0x317   :  { %3766 = vmatprep.mubr.bf16.mxu0 %v3356_v8  ;;  %9967 = vmatprep.mubr.msk.bf16.mxu1 %vm1574_vm0, %v3358_v58 }
 0x318   :  { %3767 = vmatmul.mubr.bf16.gmra.mrb[124].mxu0 %v3355_v57  ;;  %3928 = vmatmul.mubr.bf16.gmra.mrb[124].mxu1 %v3357_v7 }
 0x319   :  { %4503 = vmatprep.mubr.bf16.mxu0 %v17463_v17  ;;  %4696 = vmatprep.mubr.bf16.mxu1 %v17463_v17 }
 0x31a   :  { %4671 = vmatpush1.bf16.msra.mxu1 %v11979_v0 }
 0x373   :  { %v10527_v18 = vpop.f32.mrb[64].mxu0  ;;  %v3809_v19 = vpop.f32.mrb[64].mxu1 }
 0x374   :  { %v10528_v21 = vpop.f32.mrb[65].mxu0  ;;  %v3811_v22 = vpop.f32.mrb[65].mxu1 }
 0x375   :  { %v10529_v23 = vadd.f32 %v10528_v21, %v10527_v18  ;;  %v10530_v24 = vpop.f32.mrb[66].mxu0  ;;  %v3812_v25 = vpop.f32.mrb[66].mxu1 }
 0x376   :  { %v10531_v26 = vpop.f32.mrb[67].mxu0  ;;  %v3814_v27 = vpop.f32.mrb[67].mxu1 }
 0x377   :  { %v3649_v28 = vadd.f32 %v10529_v23, %v14925_v20  ;;  %v10532_v29 = vadd.f32 %v10531_v26, %v10530_v24 }
 0x379   :  { %v14928_v30 = vadd.f32 %v3809_v19, %v3649_v28  ;;  %v3652_v31 = vadd.f32 %v10532_v29, %v14925_v20 }
 0x37b   :  { %3936 = vst [vmem:[#allocation4] sm:$0xff] %v14928_v30  ;;  %v4000_v34 = vmul.f32 0.5, %v14928_v30  ;;  %v14939_v35 = vadd.f32 %v3812_v25, %v3652_v31  ;;  %v10533_v36 = vpop.f32.mrb[68].mxu0  ;;  %v3817_v37 = vpop.f32.mrb[68].mxu1 }
 0x37c   :  { %v10534_v38 = vpop.f32.mrb[69].mxu0  ;;  %v3819_v39 = vpop.f32.mrb[69].mxu1 }
 0x37d   :  { %v4032_v40 = vmul.f32 1.442695, %v4000_v34  ;;  %3937 = vst [vmem:[#allocation4 + $0x8] sm:$0xff] %v14939_v35  ;;  %v4001_v41 = vmul.f32 0.5, %v14939_v35  ;;  %v10535_v42 = vadd.f32 %v10534_v38, %v10533_v36  ;;  %v10536_v43 = vpop.f32.mrb[70].mxu0  ;;  %v3820_v44 = vpop.f32.mrb[70].mxu1 }
 0x37e   :  { %v10537_v45 = vpop.f32.mrb[71].mxu0  ;;  %v3822_v46 = vpop.f32.mrb[71].mxu1 }
 0x37f   :  { %12232 = vpow2.f32 %v4032_v40  ;;  %v4034_v52 = vmul.f32 1.442695, %v4001_v41  ;;  %v3657_v59 = vadd.f32 %v10535_v42, %v14925_v20  ;;  %v10538_v60 = vadd.f32 %v10537_v45, %v10536_v43 }
 0x381   :  { %v14950_v61 = vadd.f32 %v3817_v37, %v3657_v59  ;;  %v3660_v62 = vadd.f32 %v10538_v60, %v14925_v20  ;;  %12234 = vpow2.f32 %v4034_v52 }
 0x383   :  { %3938 = vst [vmem:[#allocation4 + $0x10] sm:$0xff] %v14950_v61  ;;  %v4002_v1 = vmul.f32 0.5, %v14950_v61  ;;  %v14961_v55 = vadd.f32 %v3820_v44, %v3660_v62  ;;  %v10539_v2 = vpop.f32.mrb[72].mxu0  ;;  %v3825_v56 = vpop.f32.mrb[72].mxu1 }
 0x384   :  { %v10540_v3 = vpop.f32.mrb[73].mxu0  ;;  %v3827_v4 = vpop.f32.mrb[73].mxu1 }
 0x385   :  { %v4036_v5 = vmul.f32 1.442695, %v4002_v1  ;;  %3939 = vst [vmem:[#allocation4 + $0x18] sm:$0xff] %v14961_v55  ;;  %v4003_v6 = vmul.f32 0.5, %v14961_v55  ;;  %v10541_v57 = vadd.f32 %v10540_v3, %v10539_v2  ;;  %v10542_v7 = vpop.f32.mrb[74].mxu0  ;;  %v3828_v58 = vpop.f32.mrb[74].mxu1 }
 0x386   :  { %v10543_v8 = vpop.f32.mrb[75].mxu0  ;;  %v3830_v9 = vpop.f32.mrb[75].mxu1 }
 0x387   :  { %12236 = vpow2.f32 %v4036_v5  ;;  %v4038_v10 = vmul.f32 1.442695, %v4003_v6  ;;  %v3665_v11 = vadd.f32 %v10541_v57, %v14925_v20  ;;  %v10544_v12 = vadd.f32 %v10543_v8, %v10542_v7 }
 0x389   :  { %v12233_v13 = vpop.eup %12232  ;;  %v14966_v14 = vadd.f32 %v3825_v56, %v3665_v11  ;;  %v3668_v15 = vadd.f32 %v10544_v12, %v14925_v20  ;;  %12238 = vpow2.f32 %v4038_v10 }
 0x38a   :  { %4128 = vrot.lane.b32.xlu0 %v12233_v13, %s13242_s6 }
 0x38b   :  { %3940 = vst [vmem:[#allocation4 + $0x20] sm:$0xff] %v14966_v14  ;;  %v4004_v16 = vmul.f32 0.5, %v14966_v14  ;;  %v14972_v18 = vadd.f32 %v3828_v58, %v3668_v15  ;;  %v10545_v19 = vpop.f32.mrb[76].mxu0  ;;  %v3833_v21 = vpop.f32.mrb[76].mxu1 }
 0x38c   :  { %v10546_v22 = vpop.f32.mrb[77].mxu0  ;;  %v3835_v23 = vpop.f32.mrb[77].mxu1 }
 0x38d   :  { %v12235_v24 = vpop.eup %12234  ;;  %v4040_v25 = vmul.f32 1.442695, %v4004_v16  ;;  %3941 = vst [vmem:[#allocation4 + $0x28] sm:$0xff] %v14972_v18  ;;  %v4005_v26 = vmul.f32 0.5, %v14972_v18  ;;  %v10547_v27 = vadd.f32 %v10546_v22, %v10545_v19  ;;  %v10548_v28 = vpop.f32.mrb[78].mxu0 }
 0x38e   :  { %v3836_v29 = vpop.f32.mrb[78].mxu1  ;;  %v10549_v31 = vpop.f32.mrb[79].mxu0  ;;  %4130 = vrot.lane.b32.xlu0 %v12235_v24, %s13242_s6 }
 0x38f   :  { %v3838_v32 = vpop.f32.mrb[79].mxu1  ;;  %12240 = vpow2.f32 %v4040_v25  ;;  %v4042_v33 = vmul.f32 1.442695, %v4005_v26  ;;  %v3673_v34 = vadd.f32 %v10547_v27, %v14925_v20  ;;  %v10550_v36 = vadd.f32 %v10549_v31, %v10548_v28 }
 0x391   :  { %v12237_v37 = vpop.eup %12236  ;;  %12242 = vpow2.f32 %v4042_v33  ;;  %v14978_v38 = vadd.f32 %v3833_v21, %v3673_v34  ;;  %v3676_v39 = vadd.f32 %v10550_v36, %v14925_v20 }
 0x392   :  { %4132 = vrot.lane.b32.xlu1 %v12237_v37, %s13242_s6 }
 0x393   :  { %3942 = vst [vmem:[#allocation4 + $0x30] sm:$0xff] %v14978_v38  ;;  %v4006_v40 = vmul.f32 0.5, %v14978_v38  ;;  %v14984_v41 = vadd.f32 %v3836_v29, %v3676_v39  ;;  %v10551_v42 = vpop.f32.mrb[80].mxu0  ;;  %v3841_v43 = vpop.f32.mrb[80].mxu1 }
 0x394   :  { %v10552_v44 = vpop.f32.mrb[81].mxu0  ;;  %v3843_v45 = vpop.f32.mrb[81].mxu1 }
 0x395   :  { %v12239_v46 = vpop.eup %12238  ;;  %v4044_v47 = vmul.f32 1.442695, %v4006_v40  ;;  %3943 = vst [vmem:[#allocation4 + $0x38] sm:$0xff] %v14984_v41  ;;  %v4007_v48 = vmul.f32 0.5, %v14984_v41  ;;  %v10553_v52 = vadd.f32 %v10552_v44, %v10551_v42  ;;  %v10554_v59 = vpop.f32.mrb[82].mxu0 }
 0x396   :  { %v3844_v60 = vpop.f32.mrb[82].mxu1  ;;  %v10555_v62 = vpop.f32.mrb[83].mxu0  ;;  %4134 = vrot.lane.b32.xlu1 %v12239_v46, %s13242_s6 }
 0x397   :  { %v3846_v63 = vpop.f32.mrb[83].mxu1  ;;  %12244 = vpow2.f32 %v4044_v47  ;;  %v4046_v0 = vmul.f32 1.442695, %v4007_v48  ;;  %v3681_v1 = vadd.f32 %v10553_v52, %v14925_v20  ;;  %v10556_v2 = vadd.f32 %v10555_v62, %v10554_v59 }
 0x399   :  { %v12241_v56 = vpop.eup %12240  ;;  %12246 = vpow2.f32 %v4046_v0  ;;  %v14990_v3 = vadd.f32 %v3841_v43, %v3681_v1  ;;  %v3684_v4 = vadd.f32 %v10556_v2, %v14925_v20 }
 0x39a   :  { %4136 = vrot.lane.b32.xlu0 %v12241_v56, %s13242_s6 }
 0x39b   :  { %v12243_v5 = vpop.eup %12242  ;;  %3944 = vst [vmem:[#allocation4 + $0x40] sm:$0xff] %v14990_v3  ;;  %v4008_v6 = vmul.f32 0.5, %v14990_v3  ;;  %v14996_v57 = vadd.f32 %v3844_v60, %v3684_v4  ;;  %v10557_v7 = vpop.f32.mrb[84].mxu0 }
 0x39c   :  { %v3849_v58 = vpop.f32.mrb[84].mxu1  ;;  %v10558_v8 = vpop.f32.mrb[85].mxu0  ;;  %4138 = vrot.lane.b32.xlu1 %v12243_v5, %s13242_s6 }
 0x39d   :  { %v3851_v9 = vpop.f32.mrb[85].mxu1  ;;  %v4048_v10 = vmul.f32 1.442695, %v4008_v6  ;;  %3945 = vst [vmem:[#allocation4 + $0x48] sm:$0xff] %v14996_v57  ;;  %v4009_v11 = vmul.f32 0.5, %v14996_v57  ;;  %v10559_v12 = vadd.f32 %v10558_v8, %v10557_v7  ;;  %v10560_v13 = vpop.f32.mrb[86].mxu0 }
 0x39e   :  { %v3852_v15 = vpop.f32.mrb[86].mxu1  ;;  %v10561_v16 = vpop.f32.mrb[87].mxu0 }
 0x39f   :  { %v3854_v19 = vpop.f32.mrb[87].mxu1  ;;  %12248 = vpow2.f32 %v4048_v10  ;;  %v4050_v21 = vmul.f32 1.442695, %v4009_v11  ;;  %v3689_v22 = vadd.f32 %v10559_v12, %v14925_v20  ;;  %v10562_v23 = vadd.f32 %v10561_v16, %v10560_v13 }
 0x3a1   :  { %v12245_v24 = vpop.eup %12244  ;;  %12250 = vpow2.f32 %v4050_v21  ;;  %v15002_v25 = vadd.f32 %v3849_v58, %v3689_v22  ;;  %v3692_v26 = vadd.f32 %v10562_v23, %v14925_v20 }
 0x3a2   :  { %4140 = vrot.lane.b32.xlu0 %v12245_v24, %s13242_s6 }
 0x3a3   :  { %v12247_v27 = vpop.eup %12246  ;;  %3946 = vst [vmem:[#allocation4 + $0x50] sm:$0xff] %v15002_v25  ;;  %v4010_v28 = vmul.f32 0.5, %v15002_v25  ;;  %v15008_v29 = vadd.f32 %v3852_v15, %v3692_v26  ;;  %v10563_v31 = vpop.f32.mrb[88].mxu0 }
 0x3a4   :  { %v3857_v32 = vpop.f32.mrb[88].mxu1  ;;  %v10564_v33 = vpop.f32.mrb[89].mxu0  ;;  %4142 = vrot.lane.b32.xlu1 %v12247_v27, %s13242_s6 }
 0x3a5   :  { %v3859_v34 = vpop.f32.mrb[89].mxu1  ;;  %v4052_v36 = vmul.f32 1.442695, %v4010_v28  ;;  %3947 = vst [vmem:[#allocation4 + $0x58] sm:$0xff] %v15008_v29  ;;  %v4011_v37 = vmul.f32 0.5, %v15008_v29  ;;  %v10565_v39 = vadd.f32 %v10564_v33, %v10563_v31  ;;  %v10566_v40 = vpop.f32.mrb[90].mxu0 }
 0x3a6   :  { %v3860_v42 = vpop.f32.mrb[90].mxu1  ;;  %v10567_v43 = vpop.f32.mrb[91].mxu0 }
 0x3a7   :  { %v3862_v44 = vpop.f32.mrb[91].mxu1  ;;  %12252 = vpow2.f32 %v4052_v36  ;;  %v4054_v45 = vmul.f32 1.442695, %v4011_v37  ;;  %v3697_v46 = vadd.f32 %v10565_v39, %v14925_v20  ;;  %v10568_v47 = vadd.f32 %v10567_v43, %v10566_v40 }
 0x3a9   :  { %v12249_v48 = vpop.eup %12248  ;;  %12254 = vpow2.f32 %v4054_v45  ;;  %v15014_v52 = vadd.f32 %v3857_v32, %v3697_v46  ;;  %v3700_v59 = vadd.f32 %v10568_v47, %v14925_v20 }
 0x3aa   :  { %4144 = vrot.lane.b32.xlu0 %v12249_v48, %s13242_s6 }
 0x3ab   :  { %v12251_v60 = vpop.eup %12250  ;;  %3948 = vst [vmem:[#allocation4 + $0x60] sm:$0xff] %v15014_v52  ;;  %v4012_v62 = vmul.f32 0.5, %v15014_v52  ;;  %v15020_v63 = vadd.f32 %v3860_v42, %v3700_v59  ;;  %v10569_v0 = vpop.f32.mrb[92].mxu0 }
 0x3ac   :  { %v3865_v1 = vpop.f32.mrb[92].mxu1  ;;  %v10570_v2 = vpop.f32.mrb[93].mxu0  ;;  %4146 = vrot.lane.b32.xlu1 %v12251_v60, %s13242_s6 }
 0x3ad   :  { %v3867_v56 = vpop.f32.mrb[93].mxu1  ;;  %v4056_v4 = vmul.f32 1.442695, %v4012_v62  ;;  %3949 = vst [vmem:[#allocation4 + $0x68] sm:$0xff] %v15020_v63  ;;  %v4013_v5 = vmul.f32 0.5, %v15020_v63  ;;  %v10571_v6 = vadd.f32 %v10570_v2, %v10569_v0  ;;  %v10572_v7 = vpop.f32.mrb[94].mxu0 }
 0x3ae   :  { %v3868_v58 = vpop.f32.mrb[94].mxu1  ;;  %v10573_v8 = vpop.f32.mrb[95].mxu0 }
 0x3af   :  { %v3870_v9 = vpop.f32.mrb[95].mxu1  ;;  %12256 = vpow2.f32 %v4056_v4  ;;  %v4058_v10 = vmul.f32 1.442695, %v4013_v5  ;;  %v3705_v11 = vadd.f32 %v10571_v6, %v14925_v20  ;;  %v10574_v12 = vadd.f32 %v10573_v8, %v10572_v7 }
 0x3b1   :  { %v12253_v13 = vpop.eup %12252  ;;  %12258 = vpow2.f32 %v4058_v10  ;;  %v15026_v15 = vadd.f32 %v3865_v1, %v3705_v11  ;;  %v3708_v16 = vadd.f32 %v10574_v12, %v14925_v20 }
 0x3b2   :  { %4148 = vrot.lane.b32.xlu0 %v12253_v13, %s13242_s6 }
 0x3b3   :  { %v12255_v19 = vpop.eup %12254  ;;  %3950 = vst [vmem:[#allocation4 + $0x70] sm:$0xff] %v15026_v15  ;;  %v4014_v21 = vmul.f32 0.5, %v15026_v15  ;;  %v15032_v22 = vadd.f32 %v3868_v58, %v3708_v16  ;;  %v10575_v23 = vpop.f32.mrb[96].mxu0 }
 0x3b4   :  { %v3873_v24 = vpop.f32.mrb[96].mxu1  ;;  %v10576_v26 = vpop.f32.mrb[97].mxu0  ;;  %4150 = vrot.lane.b32.xlu1 %v12255_v19, %s13242_s6 }
 0x3b5   :  { %v3875_v27 = vpop.f32.mrb[97].mxu1  ;;  %v4060_v28 = vmul.f32 1.442695, %v4014_v21  ;;  %3951 = vst [vmem:[#allocation4 + $0x78] sm:$0xff] %v15032_v22  ;;  %v4015_v31 = vmul.f32 0.5, %v15032_v22  ;;  %v10577_v32 = vadd.f32 %v10576_v26, %v10575_v23  ;;  %v10578_v33 = vpop.f32.mrb[98].mxu0 }
 0x3b6   :  { %v3876_v34 = vpop.f32.mrb[98].mxu1  ;;  %v10579_v36 = vpop.f32.mrb[99].mxu0 }
 0x3b7   :  { %v3878_v37 = vpop.f32.mrb[99].mxu1  ;;  %12260 = vpow2.f32 %v4060_v28  ;;  %v4062_v39 = vmul.f32 1.442695, %v4015_v31  ;;  %v3713_v40 = vadd.f32 %v10577_v32, %v14925_v20  ;;  %v10580_v42 = vadd.f32 %v10579_v36, %v10578_v33 }
 0x3b9   :  { %v12257_v43 = vpop.eup %12256  ;;  %12262 = vpow2.f32 %v4062_v39  ;;  %v15038_v44 = vadd.f32 %v3873_v24, %v3713_v40  ;;  %v3716_v45 = vadd.f32 %v10580_v42, %v14925_v20 }
 0x3ba   :  { %4152 = vrot.lane.b32.xlu0 %v12257_v43, %s13242_s6 }
 0x3bb   :  { %v12259_v46 = vpop.eup %12258  ;;  %3952 = vst [vmem:[#allocation4 + $0x80] sm:$0xff] %v15038_v44  ;;  %v4016_v47 = vmul.f32 0.5, %v15038_v44  ;;  %v15044_v48 = vadd.f32 %v3876_v34, %v3716_v45  ;;  %v10581_v59 = vpop.f32.mrb[100].mxu0 }
 0x3bc   :  { %v3881_v60 = vpop.f32.mrb[100].mxu1  ;;  %v10582_v62 = vpop.f32.mrb[101].mxu0  ;;  %4154 = vrot.lane.b32.xlu1 %v12259_v46, %s13242_s6 }
 0x3bd   :  { %v3883_v0 = vpop.f32.mrb[101].mxu1  ;;  %v4064_v1 = vmul.f32 1.442695, %v4016_v47  ;;  %3953 = vst [vmem:[#allocation4 + $0x88] sm:$0xff] %v15044_v48  ;;  %v4017_v2 = vmul.f32 0.5, %v15044_v48  ;;  %v10583_v56 = vadd.f32 %v10582_v62, %v10581_v59  ;;  %v10584_v4 = vpop.f32.mrb[102].mxu0 }
 0x3be   :  { %v3884_v5 = vpop.f32.mrb[102].mxu1  ;;  %v10585_v6 = vpop.f32.mrb[103].mxu0 }
 0x3bf   :  { %v3886_v7 = vpop.f32.mrb[103].mxu1  ;;  %12264 = vpow2.f32 %v4064_v1  ;;  %v4066_v58 = vmul.f32 1.442695, %v4017_v2  ;;  %v3721_v8 = vadd.f32 %v10583_v56, %v14925_v20  ;;  %v10586_v9 = vadd.f32 %v10585_v6, %v10584_v4 }
 0x3c1   :  { %v12261_v10 = vpop.eup %12260  ;;  %12266 = vpow2.f32 %v4066_v58  ;;  %v15050_v11 = vadd.f32 %v3881_v60, %v3721_v8  ;;  %v3724_v12 = vadd.f32 %v10586_v9, %v14925_v20 }
 0x3c2   :  { %4156 = vrot.lane.b32.xlu0 %v12261_v10, %s13242_s6 }
 0x3c3   :  { %v12263_v13 = vpop.eup %12262  ;;  %3954 = vst [vmem:[#allocation4 + $0x90] sm:$0xff] %v15050_v11  ;;  %v4018_v16 = vmul.f32 0.5, %v15050_v11  ;;  %v15056_v19 = vadd.f32 %v3884_v5, %v3724_v12  ;;  %v10587_v21 = vpop.f32.mrb[104].mxu0 }
 0x3c4   :  { %v3889_v23 = vpop.f32.mrb[104].mxu1  ;;  %v10588_v24 = vpop.f32.mrb[105].mxu0  ;;  %4158 = vrot.lane.b32.xlu1 %v12263_v13, %s13242_s6 }
 0x3c5   :  { %v3891_v26 = vpop.f32.mrb[105].mxu1  ;;  %v4068_v27 = vmul.f32 1.442695, %v4018_v16  ;;  %3955 = vst [vmem:[#allocation4 + $0x98] sm:$0xff] %v15056_v19  ;;  %v4019_v28 = vmul.f32 0.5, %v15056_v19  ;;  %v10589_v31 = vadd.f32 %v10588_v24, %v10587_v21  ;;  %v10590_v32 = vpop.f32.mrb[106].mxu0 }
 0x3c6   :  { %v3892_v33 = vpop.f32.mrb[106].mxu1  ;;  %v10591_v34 = vpop.f32.mrb[107].mxu0 }
 0x3c7   :  { %v3894_v36 = vpop.f32.mrb[107].mxu1  ;;  %12268 = vpow2.f32 %v4068_v27  ;;  %v4070_v37 = vmul.f32 1.442695, %v4019_v28  ;;  %v3729_v39 = vadd.f32 %v10589_v31, %v14925_v20  ;;  %v10592_v40 = vadd.f32 %v10591_v34, %v10590_v32 }
 0x3c9   :  { %v12265_v42 = vpop.eup %12264  ;;  %12270 = vpow2.f32 %v4070_v37  ;;  %v15062_v43 = vadd.f32 %v3889_v23, %v3729_v39  ;;  %v3732_v45 = vadd.f32 %v10592_v40, %v14925_v20 }
 0x3ca   :  { %4160 = vrot.lane.b32.xlu0 %v12265_v42, %s13242_s6 }
 0x3cb   :  { %v12267_v46 = vpop.eup %12266  ;;  %3956 = vst [vmem:[#allocation4 + $0xa0] sm:$0xff] %v15062_v43  ;;  %v4020_v47 = vmul.f32 0.5, %v15062_v43  ;;  %v15068_v59 = vadd.f32 %v3892_v33, %v3732_v45  ;;  %v10593_v60 = vpop.f32.mrb[108].mxu0 }
 0x3cc   :  { %v3897_v62 = vpop.f32.mrb[108].mxu1  ;;  %v10594_v0 = vpop.f32.mrb[109].mxu0  ;;  %4162 = vrot.lane.b32.xlu1 %v12267_v46, %s13242_s6 }
 0x3cd   :  { %v3899_v1 = vpop.f32.mrb[109].mxu1  ;;  %v4072_v2 = vmul.f32 1.442695, %v4020_v47  ;;  %3957 = vst [vmem:[#allocation4 + $0xa8] sm:$0xff] %v15068_v59  ;;  %v4021_v56 = vmul.f32 0.5, %v15068_v59  ;;  %v10595_v4 = vadd.f32 %v10594_v0, %v10593_v60  ;;  %v10596_v5 = vpop.f32.mrb[110].mxu0 }
 0x3ce   :  { %v3900_v6 = vpop.f32.mrb[110].mxu1  ;;  %v10597_v7 = vpop.f32.mrb[111].mxu0 }
 0x3cf   :  { %v3902_v58 = vpop.f32.mrb[111].mxu1  ;;  %12272 = vpow2.f32 %v4072_v2  ;;  %v4074_v8 = vmul.f32 1.442695, %v4021_v56  ;;  %v3737_v9 = vadd.f32 %v10595_v4, %v14925_v20  ;;  %v10598_v10 = vadd.f32 %v10597_v7, %v10596_v5 }
 0x3d1   :  { %v12269_v12 = vpop.eup %12268  ;;  %12274 = vpow2.f32 %v4074_v8  ;;  %v15074_v13 = vadd.f32 %v3897_v62, %v3737_v9  ;;  %v3740_v16 = vadd.f32 %v10598_v10, %v14925_v20 }
 0x3d2   :  { %4164 = vrot.lane.b32.xlu0 %v12269_v12, %s13242_s6 }
 0x3d3   :  { %v12271_v21 = vpop.eup %12270  ;;  %3958 = vst [vmem:[#allocation4 + $0xb0] sm:$0xff] %v15074_v13  ;;  %v4022_v23 = vmul.f32 0.5, %v15074_v13  ;;  %v15080_v24 = vadd.f32 %v3900_v6, %v3740_v16  ;;  %v10599_v26 = vpop.f32.mrb[112].mxu0 }
 0x3d4   :  { %v3905_v27 = vpop.f32.mrb[112].mxu1  ;;  %v10600_v28 = vpop.f32.mrb[113].mxu0  ;;  %4166 = vrot.lane.b32.xlu1 %v12271_v21, %s13242_s6 }
 0x3d5   :  { %v3907_v31 = vpop.f32.mrb[113].mxu1  ;;  %v4076_v32 = vmul.f32 1.442695, %v4022_v23  ;;  %3959 = vst [vmem:[#allocation4 + $0xb8] sm:$0xff] %v15080_v24  ;;  %v4023_v33 = vmul.f32 0.5, %v15080_v24  ;;  %v10601_v34 = vadd.f32 %v10600_v28, %v10599_v26  ;;  %v10602_v36 = vpop.f32.mrb[114].mxu0 }
 0x3d6   :  { %v3908_v37 = vpop.f32.mrb[114].mxu1  ;;  %v10603_v39 = vpop.f32.mrb[115].mxu0 }
 0x3d7   :  { %v3910_v40 = vpop.f32.mrb[115].mxu1  ;;  %12276 = vpow2.f32 %v4076_v32  ;;  %v4078_v42 = vmul.f32 1.442695, %v4023_v33  ;;  %v3745_v45 = vadd.f32 %v10601_v34, %v14925_v20  ;;  %v10604_v46 = vadd.f32 %v10603_v39, %v10602_v36 }
 0x3d9   :  { %v12273_v47 = vpop.eup %12272  ;;  %12278 = vpow2.f32 %v4078_v42  ;;  %v15086_v60 = vadd.f32 %v3905_v27, %v3745_v45  ;;  %v3748_v62 = vadd.f32 %v10604_v46, %v14925_v20 }
 0x3da   :  { %4168 = vrot.lane.b32.xlu0 %v12273_v47, %s13242_s6 }
 0x3db   :  { %v12275_v0 = vpop.eup %12274  ;;  %3960 = vst [vmem:[#allocation4 + $0xc0] sm:$0xff] %v15086_v60  ;;  %v4024_v1 = vmul.f32 0.5, %v15086_v60  ;;  %v15092_v2 = vadd.f32 %v3908_v37, %v3748_v62  ;;  %v10605_v56 = vpop.f32.mrb[116].mxu0 }
 0x3dc   :  { %v3913_v4 = vpop.f32.mrb[116].mxu1  ;;  %v10606_v5 = vpop.f32.mrb[117].mxu0  ;;  %4170 = vrot.lane.b32.xlu1 %v12275_v0, %s13242_s6 }
 0x3dd   :  { %v3915_v6 = vpop.f32.mrb[117].mxu1  ;;  %v4080_v7 = vmul.f32 1.442695, %v4024_v1  ;;  %3961 = vst [vmem:[#allocation4 + $0xc8] sm:$0xff] %v15092_v2  ;;  %v4025_v58 = vmul.f32 0.5, %v15092_v2  ;;  %v10607_v8 = vadd.f32 %v10606_v5, %v10605_v56  ;;  %v10608_v9 = vpop.f32.mrb[118].mxu0 }
 0x3de   :  { %v3916_v10 = vpop.f32.mrb[118].mxu1  ;;  %v10609_v12 = vpop.f32.mrb[119].mxu0  ;;  %v11984_v6 = vld [vmem:[%s17459_s8 + $0x4] ss:$28 sps:$4 sm:$0xff]  }
 0x3df   :  { %v3918_v16 = vpop.f32.mrb[119].mxu1  ;;  %12280 = vpow2.f32 %v4080_v7  ;;  %v4082_v21 = vmul.f32 1.442695, %v4025_v58  ;;  %v3753_v23 = vadd.f32 %v10607_v8, %v14925_v20  ;;  %v10610_v26 = vadd.f32 %v10609_v12, %v10608_v9  ;;  %v11987_v7 = vld [vmem:[%s17459_s8 + $0xc] ss:$28 sps:$4 sm:$0xff]   ;;  %6234 = vmatprep.subr.bf16.mxu0 %v11984_v6 }
 0x3e0   :  { %6620 = vmatprep.subr.bf16.mxu1 %v11987_v7 }
 0x3e1   :  { %v12277_v27 = vpop.eup %12276  ;;  %12282 = vpow2.f32 %v4082_v21  ;;  %v15098_v28 = vadd.f32 %v3913_v4, %v3753_v23  ;;  %v3756_v31 = vadd.f32 %v10610_v26, %v14925_v20 }
 0x3e2   :  { %4172 = vrot.lane.b32.xlu0 %v12277_v27, %s13242_s6 }
 0x3e3   :  { %v12279_v32 = vpop.eup %12278  ;;  %3962 = vst [vmem:[#allocation4 + $0xd0] sm:$0xff] %v15098_v28  ;;  %v4026_v33 = vmul.f32 0.5, %v15098_v28  ;;  %v15104_v34 = vadd.f32 %v3916_v10, %v3756_v31  ;;  %v10611_v36 = vpop.f32.mrb[120].mxu0 }
 0x3e4   :  { %v3921_v37 = vpop.f32.mrb[120].mxu1  ;;  %v10612_v39 = vpop.f32.mrb[121].mxu0  ;;  %4174 = vrot.lane.b32.xlu1 %v12279_v32, %s13242_s6 }
 0x3e5   :  { %v3923_v40 = vpop.f32.mrb[121].mxu1  ;;  %v4084_v42 = vmul.f32 1.442695, %v4026_v33  ;;  %3963 = vst [vmem:[#allocation4 + $0xd8] sm:$0xff] %v15104_v34  ;;  %v4027_v45 = vmul.f32 0.5, %v15104_v34  ;;  %v10613_v46 = vadd.f32 %v10612_v39, %v10611_v36  ;;  %v10614_v47 = vpop.f32.mrb[122].mxu0 }
 0x3e6   :  { %v3924_v62 = vpop.f32.mrb[122].mxu1  ;;  %v10615_v0 = vpop.f32.mrb[123].mxu0 }
 0x3e7   :  { %v3926_v1 = vpop.f32.mrb[123].mxu1  ;;  %12284 = vpow2.f32 %v4084_v42  ;;  %v4086_v56 = vmul.f32 1.442695, %v4027_v45  ;;  %v3761_v4 = vadd.f32 %v10613_v46, %v14925_v20  ;;  %v10616_v5 = vadd.f32 %v10615_v0, %v10614_v47 }
 0x3e9   :  { %v12281_v58 = vpop.eup %12280  ;;  %12286 = vpow2.f32 %v4086_v56  ;;  %v15116_v8 = vadd.f32 %v3921_v37, %v3761_v4  ;;  %v3764_v9 = vadd.f32 %v10616_v5, %v14925_v20 }
 0x3ea   :  { %4176 = vrot.lane.b32.xlu0 %v12281_v58, %s13242_s6 }
 0x3eb   :  { %v12283_v10 = vpop.eup %12282  ;;  %3964 = vst [vmem:[#allocation4 + $0xe0] sm:$0xff] %v15116_v8  ;;  %v4028_v12 = vmul.f32 0.5, %v15116_v8  ;;  %v15122_v16 = vadd.f32 %v3924_v62, %v3764_v9  ;;  %v10617_v21 = vpop.f32.mrb[124].mxu0  ;;  %v3968_v9 = vld [vmem:[%s17452_s1] sm:$0xff] }
 0x3ec   :  { %v3929_v23 = vpop.f32.mrb[124].mxu1  ;;  %v10618_v26 = vpop.f32.mrb[125].mxu0  ;;  %4178 = vrot.lane.b32.xlu1 %v12283_v10, %s13242_s6 }
 0x3ed   :  { %v3931_v27 = vpop.f32.mrb[125].mxu1  ;;  %v4088_v31 = vmul.f32 1.442695, %v4028_v12  ;;  %3965 = vst [vmem:[#allocation4 + $0xe8] sm:$0xff] %v15122_v16  ;;  %v4029_v32 = vmul.f32 0.5, %v15122_v16  ;;  %v10619_v33 = vadd.f32 %v10618_v26, %v10617_v21  ;;  %v10620_v36 = vpop.f32.mrb[126].mxu0 }
 0x3ee   :  { %v3932_v37 = vpop.f32.mrb[126].mxu1  ;;  %v10621_v39 = vpop.f32.mrb[127].mxu0  ;;  %v3969_v12 = vld [vmem:[%s17452_s1 + $0x8] sm:$0xff] }
 0x3ef   :  { %v3934_v40 = vpop.f32.mrb[127].mxu1  ;;  %12288 = vpow2.f32 %v4088_v31  ;;  %v4090_v42 = vmul.f32 1.442695, %v4029_v32  ;;  %v3769_v45 = vadd.f32 %v10619_v33, %v14925_v20  ;;  %v10622_v46 = vadd.f32 %v10621_v39, %v10620_v36  ;;  %v3970_v36 = vld [vmem:[%s17452_s1 + $0x10] sm:$0xff] }
 0x3f0   :  { %v11982_v40 = vld [vmem:[%s17459_s8] ss:$28 sps:$4 sm:$0xff]  }
 0x3f1   :  { %v12285_v47 = vpop.eup %12284  ;;  %12290 = vpow2.f32 %v4090_v42  ;;  %v15128_v62 = vadd.f32 %v3929_v23, %v3769_v45  ;;  %v3772_v0 = vadd.f32 %v10622_v46, %v14925_v20  ;;  %v11985_v42 = vld [vmem:[%s17459_s8 + $0x8] ss:$28 sps:$4 sm:$0xff]  }
 0x3f2   :  { %4180 = vrot.lane.b32.xlu0 %v12285_v47, %s13242_s6  ;;  %v11993_v45 = vld [vmem:[%s17459_s8 + $0x44] ss:$28 sps:$4 sm:$0xff]  }
 0x3f3   :  { %v12287_v1 = vpop.eup %12286  ;;  %3966 = vst [vmem:[#allocation4 + $0xf0] sm:$0xff] %v15128_v62  ;;  %v4030_v56 = vmul.f32 0.5, %v15128_v62  ;;  %v15134_v4 = vadd.f32 %v3932_v37, %v3772_v0 }
 0x3f4   :  { %4182 = vrot.lane.b32.xlu1 %v12287_v1, %s13242_s6  ;;  %v11988_v1 = vld [vmem:[%s17459_s8 + $0x38] ss:$28 sps:$4 sm:$0xff]  }
 0x3f5   :  { %v4092_v5 = vmul.f32 1.442695, %v4030_v56  ;;  %3967 = vst [vmem:[#allocation4 + $0xf8] sm:$0xff] %v15134_v4  ;;  %v4031_v6 = vmul.f32 0.5, %v15134_v4  ;;  %v11991_v56 = vld [vmem:[%s17459_s8 + $0x40] ss:$28 sps:$4 sm:$0xff]  }
 0x3f7   :  { %12292 = vpow2.f32 %v4092_v5  ;;  %v4094_v7 = vmul.f32 1.442695, %v4031_v6  ;;  %v11996_v5 = vld [vmem:[%s17459_s8 + $0x74] ss:$28 sps:$4 sm:$0xff]   ;;  %v11999_v6 = vld [vmem:[%s17459_s8 + $0x7c] ss:$28 sps:$4 sm:$0xff]  }
 0x3f9   :  { %v12289_v58 = vpop.eup %12288  ;;  %12294 = vpow2.f32 %v4094_v7 }
 0x3fa   :  { %4184 = vrot.lane.b32.xlu0 %v12289_v58, %s13242_s6 }
 0x3fb   :  { %v12291_v20 = vpop.eup %12290 }
 0x3fc   :  { %4186 = vrot.lane.b32.xlu1 %v12291_v20, %s13242_s6  ;;  %v4129_v10 = vpop.permute.xlu0 %4128  ;;  %v3972_v20 = vld [vmem:[%s17452_s1 + $0x20] sm:$0xff] }
 0x3fd   :  { %v4224_v21 = vmul.f32 %v4129_v10, %v3968_v9  ;;  %v3973_v10 = vld [vmem:[%s17452_s1 + $0x28] sm:$0xff] }
 0x3ff   :  { %v4256_v32 = vadd.f32 %v4224_v21, %v14928_v30  ;;  %v3971_v30 = vld [vmem:[%s17452_s1 + $0x18] sm:$0xff]  ;;  %v11994_v21 = vld [vmem:[%s17459_s8 + $0x70] ss:$28 sps:$4 sm:$0xff]  }
 0x400   :  { %v4131_v23 = vpop.permute.xlu0 %4130 }
 0x401   :  { %v12293_v26 = vpop.eup %12292  ;;  %v4225_v27 = vmul.f32 %v4131_v23, %v3969_v12  ;;  %v12002_v23 = vld [vmem:[%s17459_s8 + $0xac] ss:$28 sps:$4 sm:$0xff]  }
 0x402   :  { %4188 = vrot.lane.b32.xlu0 %v12293_v26, %s13242_s6  ;;  %v12005_v26 = vld [vmem:[%s17459_s8 + $0xb4] ss:$28 sps:$4 sm:$0xff]  }
 0x403   :  { %v12295_v31 = vpop.eup %12294  ;;  %v4257_v33 = vadd.f32 %v4225_v27, %v14939_v35  ;;  %v11990_v35 = vld [vmem:[%s17459_s8 + $0x3c] ss:$28 sps:$4 sm:$0xff]  }
 0x404   :  { %4190 = vrot.lane.b32.xlu1 %v12295_v31, %s13242_s6  ;;  %v4133_v37 = vpop.permute.xlu1 %4132 }
 0x405   :  { %v4288_v39 = vpack.c.bf16 %v4257_v33, %v4256_v32  ;;  %v4226_v46 = vmul.f32 %v4133_v37, %v3970_v36  ;;  %v12000_v33 = vld [vmem:[%s17459_s8 + $0xa8] ss:$28 sps:$4 sm:$0xff]   ;;  %v12003_v36 = vld [vmem:[%s17459_s8 + $0xb0] ss:$28 sps:$4 sm:$0xff]  }
 0x406   :  { %v12008_v37 = vld [vmem:[%s17459_s8 + $0xe4] ss:$28 sps:$4 sm:$0xff]  }
 0x407   :  { %9984 = vmatmul.mubr.msk.bf16.vlgmr.msra.gmra.mrb[128].mxu0 %vm4422_vm1, %v4288_v39  ;;  %10000 = vmatmul.mubr.msk.bf16.vlgmr.msra.gmra.mrb[128].mxu1 %vm4422_vm1, %v4288_v39  ;;  %v4258_v7 = vadd.f32 %v4226_v46, %v14950_v61  ;;  %v11997_v61 = vld [vmem:[%s17459_s8 + $0x78] ss:$28 sps:$4 sm:$0xff]  }
 0x408   :  { %v4135_v47 = vpop.permute.xlu1 %4134  ;;  %4513 = vmatprep.mubr.bf16.mxu0 %v17463_v17  ;;  %4706 = vmatprep.mubr.bf16.mxu1 %v17463_v17 }
 0x409   :  { %v4227_v0 = vmul.f32 %v4135_v47, %v3971_v30  ;;  %6235 = vmatpush1.bf16.msra.mxu0 %v11982_v40  ;;  %6621 = vmatpush1.bf16.msra.mxu1 %v11985_v42  ;;  %v3974_v40 = vld [vmem:[%s17452_s1 + $0x30] sm:$0xff]  ;;  %v3975_v30 = vld [vmem:[%s17452_s1 + $0x38] sm:$0xff] }
 0x40a   :  { %6236 = vmatprep.subr.bf16.mxu0 %v11990_v35  ;;  %6622 = vmatprep.subr.bf16.mxu1 %v11993_v45  ;;  %v12006_v45 = vld [vmem:[%s17459_s8 + $0xe0] ss:$28 sps:$4 sm:$0xff]  }
 0x40b   :  { %v4259_v58 = vadd.f32 %v4227_v0, %v14961_v55  ;;  %v12014_v47 = vld [vmem:[%s17459_s8 + $0x11c] ss:$28 sps:$4 sm:$0xff]   ;;  %v12017_v0 = vld [vmem:[%s17459_s8 + $0x124] ss:$28 sps:$4 sm:$0xff]  }
 0x40c   :  { %v4137_v9 = vpop.permute.xlu0 %4136 }
 0x40d   :  { %v4289_v12 = vpack.c.bf16 %v4259_v58, %v4258_v7  ;;  %6237 = vmatpush1.bf16.msra.mxu0 %v11988_v1  ;;  %6623 = vmatpush1.bf16.msra.mxu1 %v11991_v56  ;;  %v4228_v27 = vmul.f32 %v4137_v9, %v3972_v20  ;;  %v12015_v7 = vld [vmem:[%s17459_s8 + $0x120] ss:$28 sps:$4 sm:$0xff]   ;;  %v12020_v58 = vld [vmem:[%s17459_s8 + $0x154] ss:$28 sps:$4 sm:$0xff]  }
 0x40e   :  { %v4139_v55 = vpop.permute.xlu1 %4138  ;;  %6238 = vmatprep.subr.bf16.mxu0 %v11996_v5  ;;  %6624 = vmatprep.subr.bf16.mxu1 %v11999_v6  ;;  %v12012_v6 = vld [vmem:[%s17459_s8 + $0x118] ss:$28 sps:$4 sm:$0xff]   ;;  %v3976_v9 = vld [vmem:[%s17452_s1 + $0x40] sm:$0xff] }
 0x40f   :  { %v4229_v31 = vmul.f32 %v4139_v55, %v3973_v10  ;;  %9985 = vmatmul.mubr.msk.bf16.gmra.mrb[132].mxu0 %vm4422_vm1, %v4289_v12  ;;  %10001 = vmatmul.mubr.msk.bf16.gmra.mrb[132].mxu1 %vm4422_vm1, %v4289_v12  ;;  %v4260_v39 = vadd.f32 %v4228_v27, %v14966_v14  ;;  %v12009_v14 = vld [vmem:[%s17459_s8 + $0xe8] ss:$28 sps:$4 sm:$0xff]  }
 0x410   :  { %4523 = vmatprep.mubr.bf16.mxu0 %v17463_v17  ;;  %4716 = vmatprep.mubr.bf16.mxu1 %v17463_v17  ;;  %v3977_v12 = vld [vmem:[%s17452_s1 + $0x48] sm:$0xff] }
 0x411   :  { %v4261_v32 = vadd.f32 %v4229_v31, %v14972_v18  ;;  %6239 = vmatpush1.bf16.msra.mxu0 %v11994_v21  ;;  %6625 = vmatpush1.bf16.msra.mxu1 %v11997_v61  ;;  %v12011_v18 = vld [vmem:[%s17459_s8 + $0xec] ss:$28 sps:$4 sm:$0xff]  }
 0x412   :  { %6240 = vmatprep.subr.bf16.mxu0 %v12002_v23  ;;  %6626 = vmatprep.subr.bf16.mxu1 %v12005_v26  ;;  %v12018_v61 = vld [vmem:[%s17459_s8 + $0x150] ss:$28 sps:$4 sm:$0xff]  }
 0x413   :  { %v4290_v35 = vpack.c.bf16 %v4261_v32, %v4260_v39  ;;  %v12026_v23 = vld [vmem:[%s17459_s8 + $0x18c] ss:$28 sps:$4 sm:$0xff]   ;;  %v12029_v26 = vld [vmem:[%s17459_s8 + $0x194] ss:$28 sps:$4 sm:$0xff]  }
 0x414   :  { %v4141_v42 = vpop.permute.xlu0 %4140  ;;  %v3978_v39 = vld [vmem:[%s17452_s1 + $0x50] sm:$0xff] }
 0x415   :  { %6241 = vmatpush1.bf16.msra.mxu0 %v12000_v33  ;;  %6627 = vmatpush1.bf16.msra.mxu1 %v12003_v36  ;;  %v4230_v1 = vmul.f32 %v4141_v42, %v3974_v40  ;;  %v12024_v33 = vld [vmem:[%s17459_s8 + $0x188] ss:$28 sps:$4 sm:$0xff]   ;;  %v12027_v36 = vld [vmem:[%s17459_s8 + $0x190] ss:$28 sps:$4 sm:$0xff]   ;;  %v3979_v42 = vld [vmem:[%s17452_s1 + $0x58] sm:$0xff] }
 0x416   :  { %v4143_v46 = vpop.permute.xlu1 %4142  ;;  %6242 = vmatprep.subr.bf16.mxu0 %v12008_v37  ;;  %6628 = vmatprep.subr.bf16.mxu1 %v12011_v18  ;;  %v12032_v37 = vld [vmem:[%s17459_s8 + $0x1c4] ss:$28 sps:$4 sm:$0xff]  }
 0x417   :  { %v4231_v56 = vmul.f32 %v4143_v46, %v3975_v30  ;;  %9986 = vmatmul.mubr.msk.bf16.gmra.mrb[136].mxu0 %vm4422_vm1, %v4290_v35  ;;  %10002 = vmatmul.mubr.msk.bf16.gmra.mrb[136].mxu1 %vm4422_vm1, %v4290_v35  ;;  %v4262_v20 = vadd.f32 %v4230_v1, %v14978_v38  ;;  %v12021_v38 = vld [vmem:[%s17459_s8 + $0x158] ss:$28 sps:$4 sm:$0xff]   ;;  %v12030_v35 = vld [vmem:[%s17459_s8 + $0x1c0] ss:$28 sps:$4 sm:$0xff]  }
 0x418   :  { %4533 = vmatprep.mubr.bf16.mxu0 %v17463_v17  ;;  %4726 = vmatprep.mubr.bf16.mxu1 %v17463_v17  ;;  %v12041_v46 = vld [vmem:[%s17459_s8 + $0x204] ss:$28 sps:$4 sm:$0xff]  }
 0x419   :  { %v4263_v5 = vadd.f32 %v4231_v56, %v14984_v41  ;;  %6243 = vmatpush1.bf16.msra.mxu0 %v12006_v45  ;;  %6629 = vmatpush1.bf16.msra.mxu1 %v12009_v14  ;;  %v12023_v41 = vld [vmem:[%s17459_s8 + $0x15c] ss:$28 sps:$4 sm:$0xff]  }
 0x41a   :  { %6244 = vmatprep.subr.bf16.mxu0 %v12014_v47  ;;  %6630 = vmatprep.subr.bf16.mxu1 %v12017_v0  ;;  %v12038_v14 = vld [vmem:[%s17459_s8 + $0x1fc] ss:$28 sps:$4 sm:$0xff]  }
 0x41b   :  { %v4291_v21 = vpack.c.bf16 %v4263_v5, %v4262_v20  ;;  %v12036_v56 = vld [vmem:[%s17459_s8 + $0x1f8] ss:$28 sps:$4 sm:$0xff]   ;;  %v12039_v5 = vld [vmem:[%s17459_s8 + $0x200] ss:$28 sps:$4 sm:$0xff]   ;;  %v3981_v20 = vld [vmem:[%s17452_s1 + $0x68] sm:$0xff] }
 0x41c   :  { %v4145_v10 = vpop.permute.xlu0 %4144 }
 0x41d   :  { %6245 = vmatpush1.bf16.msra.mxu0 %v12012_v6  ;;  %6631 = vmatpush1.bf16.msra.mxu1 %v12015_v7  ;;  %v4232_v27 = vmul.f32 %v4145_v10, %v3976_v9  ;;  %v12044_v6 = vld [vmem:[%s17459_s8 + $0x234] ss:$28 sps:$4 sm:$0xff]  }
 0x41e   :  { %v4147_v55 = vpop.permute.xlu1 %4146  ;;  %6246 = vmatprep.subr.bf16.mxu0 %v12020_v58  ;;  %6632 = vmatprep.subr.bf16.mxu1 %v12023_v41  ;;  %v3980_v58 = vld [vmem:[%s17452_s1 + $0x60] sm:$0xff]  ;;  %v12042_v10 = vld [vmem:[%s17459_s8 + $0x230] ss:$28 sps:$4 sm:$0xff]  }
 0x41f   :  { %v4233_v31 = vmul.f32 %v4147_v55, %v3977_v12  ;;  %9987 = vmatmul.mubr.msk.bf16.gmra.mrb[140].mxu0 %vm4422_vm1, %v4291_v21  ;;  %10003 = vmatmul.mubr.msk.bf16.gmra.mrb[140].mxu1 %vm4422_vm1, %v4291_v21  ;;  %v4264_v18 = vadd.f32 %v4232_v27, %v14990_v3  ;;  %v12033_v3 = vld [vmem:[%s17459_s8 + $0x1c8] ss:$28 sps:$4 sm:$0xff]   ;;  %v12051_v27 = vld [vmem:[%s17459_s8 + $0x270] ss:$28 sps:$4 sm:$0xff]  }
 0x420   :  { %4543 = vmatprep.mubr.bf16.mxu0 %v17463_v17  ;;  %4736 = vmatprep.mubr.bf16.mxu1 %v17463_v17  ;;  %v12050_v21 = vld [vmem:[%s17459_s8 + $0x26c] ss:$28 sps:$4 sm:$0xff]  }
 0x421   :  { %v4265_v32 = vadd.f32 %v4233_v31, %v14996_v57  ;;  %6247 = vmatpush1.bf16.msra.mxu0 %v12018_v61  ;;  %6633 = vmatpush1.bf16.msra.mxu1 %v12021_v38  ;;  %v12035_v57 = vld [vmem:[%s17459_s8 + $0x1cc] ss:$28 sps:$4 sm:$0xff]   ;;  %v12053_v61 = vld [vmem:[%s17459_s8 + $0x274] ss:$28 sps:$4 sm:$0xff]   ;;  %v12056_v31 = vld [vmem:[%s17459_s8 + $0x2a4] ss:$28 sps:$4 sm:$0xff]  }
 0x422   :  { %6248 = vmatprep.subr.bf16.mxu0 %v12026_v23  ;;  %6634 = vmatprep.subr.bf16.mxu1 %v12029_v26  ;;  %v12048_v26 = vld [vmem:[%s17459_s8 + $0x268] ss:$28 sps:$4 sm:$0xff]  }
 0x423   :  { %v4292_v30 = vpack.c.bf16 %v4265_v32, %v4264_v18  ;;  %v12054_v18 = vld [vmem:[%s17459_s8 + $0x2a0] ss:$28 sps:$4 sm:$0xff]  }
 0x424   :  { %v4149_v40 = vpop.permute.xlu0 %4148 }
 0x425   :  { %6249 = vmatpush1.bf16.msra.mxu0 %v12024_v33  ;;  %6635 = vmatpush1.bf16.msra.mxu1 %v12027_v36  ;;  %v4234_v47 = vmul.f32 %v4149_v40, %v3978_v39  ;;  %v3982_v33 = vld [vmem:[%s17452_s1 + $0x70] sm:$0xff]  ;;  %v12062_v40 = vld [vmem:[%s17459_s8 + $0x2dc] ss:$28 sps:$4 sm:$0xff]  }
 0x426   :  { %v4151_v45 = vpop.permute.xlu1 %4150  ;;  %6250 = vmatprep.subr.bf16.mxu0 %v12032_v37  ;;  %6636 = vmatprep.subr.bf16.mxu1 %v12035_v57  ;;  %v3983_v37 = vld [vmem:[%s17452_s1 + $0x78] sm:$0xff] }
 0x427   :  { %v4235_v0 = vmul.f32 %v4151_v45, %v3979_v42  ;;  %9988 = vmatmul.mubr.msk.bf16.gmra.mrb[144].mxu0 %vm4422_vm1, %v4292_v30  ;;  %10004 = vmatmul.mubr.msk.bf16.gmra.mrb[144].mxu1 %vm4422_vm1, %v4292_v30  ;;  %v4266_v7 = vadd.f32 %v4234_v47, %v15002_v25  ;;  %v12045_v25 = vld [vmem:[%s17459_s8 + $0x238] ss:$28 sps:$4 sm:$0xff]   ;;  %v12065_v42 = vld [vmem:[%s17459_s8 + $0x2e4] ss:$28 sps:$4 sm:$0xff]  }
 0x428   :  { %4553 = vmatprep.mubr.bf16.mxu0 %v17463_v17  ;;  %4746 = vmatprep.mubr.bf16.mxu1 %v17463_v17  ;;  %v12060_v45 = vld [vmem:[%s17459_s8 + $0x2d8] ss:$28 sps:$4 sm:$0xff]  }
 0x429   :  { %v4267_v1 = vadd.f32 %v4235_v0, %v15008_v29  ;;  %6251 = vmatpush1.bf16.msra.mxu0 %v12030_v35  ;;  %6637 = vmatpush1.bf16.msra.mxu1 %v12033_v3  ;;  %v12047_v29 = vld [vmem:[%s17459_s8 + $0x23c] ss:$28 sps:$4 sm:$0xff]   ;;  %v3984_v0 = vld [vmem:[%s17452_s1 + $0x80] sm:$0xff] }
 0x42a   :  { %6252 = vmatprep.subr.bf16.mxu0 %v12038_v14  ;;  %6638 = vmatprep.subr.bf16.mxu1 %v12041_v46  ;;  %v12063_v14 = vld [vmem:[%s17459_s8 + $0x2e0] ss:$28 sps:$4 sm:$0xff]   ;;  %v12068_v46 = vld [vmem:[%s17459_s8 + $0x314] ss:$28 sps:$4 sm:$0xff]  }
 0x42b   :  { %v4293_v9 = vpack.c.bf16 %v4267_v1, %v4266_v7 }
 0x42c   :  { %v4153_v41 = vpop.permute.xlu0 %4152 }
 0x42d   :  { %6253 = vmatpush1.bf16.msra.mxu0 %v12036_v56  ;;  %6639 = vmatpush1.bf16.msra.mxu1 %v12039_v5  ;;  %v4236_v38 = vmul.f32 %v4153_v41, %v3980_v58  ;;  %v3985_v56 = vld [vmem:[%s17452_s1 + $0x88] sm:$0xff] }
 0x42e   :  { %v4155_v12 = vpop.permute.xlu1 %4154  ;;  %6254 = vmatprep.subr.bf16.mxu0 %v12044_v6  ;;  %6640 = vmatprep.subr.bf16.mxu1 %v12047_v29  ;;  %v12066_v6 = vld [vmem:[%s17459_s8 + $0x310] ss:$28 sps:$4 sm:$0xff]  }
 0x42f   :  { %v4237_v55 = vmul.f32 %v4155_v12, %v3981_v20  ;;  %9989 = vmatmul.mubr.msk.bf16.gmra.mrb[148].mxu0 %vm4422_vm1, %v4293_v9  ;;  %10005 = vmatmul.mubr.msk.bf16.gmra.mrb[148].mxu1 %vm4422_vm1, %v4293_v9  ;;  %v4268_v32 = vadd.f32 %v4236_v38, %v15014_v52  ;;  %v12057_v52 = vld [vmem:[%s17459_s8 + $0x2a8] ss:$28 sps:$4 sm:$0xff]   ;;  %v3986_v9 = vld [vmem:[%s17452_s1 + $0x90] sm:$0xff] }
 0x430   :  { %4563 = vmatprep.mubr.bf16.mxu0 %v17463_v17  ;;  %4756 = vmatprep.mubr.bf16.mxu1 %v17463_v17 }
 0x431   :  { %v4269_v23 = vadd.f32 %v4237_v55, %v15020_v63  ;;  %6255 = vmatpush1.bf16.msra.mxu0 %v12042_v10  ;;  %6641 = vmatpush1.bf16.msra.mxu1 %v12045_v25  ;;  %v12059_v63 = vld [vmem:[%s17459_s8 + $0x2ac] ss:$28 sps:$4 sm:$0xff]   ;;  %v3987_v25 = vld [vmem:[%s17452_s1 + $0x98] sm:$0xff]  ;;  %v3988_v55 = vld [vmem:[%s17452_s1 + $0xa0] sm:$0xff] }
 0x432   :  { %6256 = vmatprep.subr.bf16.mxu0 %v12050_v21  ;;  %6642 = vmatprep.subr.bf16.mxu1 %v12053_v61 }
 0x433   :  { %v4294_v57 = vpack.c.bf16 %v4269_v23, %v4268_v32 }
 0x434   :  { %v4157_v36 = vpop.permute.xlu0 %4156 }
 0x435   :  { %6257 = vmatpush1.bf16.msra.mxu0 %v12048_v26  ;;  %6643 = vmatpush1.bf16.msra.mxu1 %v12051_v27  ;;  %v4238_v30 = vmul.f32 %v4157_v36, %v3982_v33  ;;  %v3989_v26 = vld [vmem:[%s17452_s1 + $0xa8] sm:$0xff]  ;;  %v3990_v33 = vld [vmem:[%s17452_s1 + $0xb0] sm:$0xff] }
 0x436   :  { %v4159_v39 = vpop.permute.xlu1 %4158  ;;  %6258 = vmatprep.subr.bf16.mxu0 %v12056_v31  ;;  %6644 = vmatprep.subr.bf16.mxu1 %v12059_v63 }
 0x437   :  { %v4239_v35 = vmul.f32 %v4159_v39, %v3983_v37  ;;  %9990 = vmatmul.mubr.msk.bf16.gmra.mrb[152].mxu0 %vm4422_vm1, %v4294_v57  ;;  %10006 = vmatmul.mubr.msk.bf16.gmra.mrb[152].mxu1 %vm4422_vm1, %v4294_v57  ;;  %v4270_v47 = vadd.f32 %v4238_v30, %v15026_v15  ;;  %v12069_v15 = vld [vmem:[%s17459_s8 + $0x318] ss:$28 sps:$4 sm:$0xff]   ;;  %v3993_v30 = vld [vmem:[%s17452_s1 + $0xc8] sm:$0xff] }
 0x438   :  { %4573 = vmatprep.mubr.bf16.mxu0 %v17463_v17  ;;  %4766 = vmatprep.mubr.bf16.mxu1 %v17463_v17  ;;  %v3991_v37 = vld [vmem:[%s17452_s1 + $0xb8] sm:$0xff] }
 0x439   :  { %v4271_v3 = vadd.f32 %v4239_v35, %v15032_v22  ;;  %6259 = vmatpush1.bf16.msra.mxu0 %v12054_v18  ;;  %6645 = vmatpush1.bf16.msra.mxu1 %v12057_v52  ;;  %v12071_v22 = vld [vmem:[%s17459_s8 + $0x31c] ss:$28 sps:$4 sm:$0xff]  }
 0x43a   :  { %6260 = vmatprep.subr.bf16.mxu0 %v12062_v40  ;;  %6646 = vmatprep.subr.bf16.mxu1 %v12065_v42  ;;  %v3992_v40 = vld [vmem:[%s17452_s1 + $0xc0] sm:$0xff] }
 0x43b   :  { %v4295_v5 = vpack.c.bf16 %v4271_v3, %v4270_v47 }
 0x43c   :  { %v4161_v1 = vpop.permute.xlu0 %4160 }
 0x43d   :  { %6261 = vmatpush1.bf16.msra.mxu0 %v12060_v45  ;;  %6647 = vmatpush1.bf16.msra.mxu1 %v12063_v14  ;;  %v4240_v7 = vmul.f32 %v4161_v1, %v3984_v0  ;;  %v3994_v1 = vld [vmem:[%s17452_s1 + $0xd0] sm:$0xff] }
 0x43e   :  { %v4163_v29 = vpop.permute.xlu1 %4162  ;;  %6262 = vmatprep.subr.bf16.mxu0 %v12068_v46  ;;  %6648 = vmatprep.subr.bf16.mxu1 %v12071_v22  ;;  %v12072_v46 = vld [vmem:[%s17459_s8 + $0x348] ss:$28 sps:$4 sm:$0xff]   ;;  %v12075_v22 = vld [vmem:[%s17459_s8 + $0x350] ss:$28 sps:$4 sm:$0xff]  }
 0x43f   :  { %v4241_v58 = vmul.f32 %v4163_v29, %v3985_v56  ;;  %9991 = vmatmul.mubr.msk.bf16.gmra.mrb[156].mxu0 %vm4422_vm1, %v4295_v5  ;;  %10007 = vmatmul.mubr.msk.bf16.gmra.mrb[156].mxu1 %vm4422_vm1, %v4295_v5  ;;  %v4272_v20 = vadd.f32 %v4240_v7, %v15038_v44  ;;  %v3995_v5 = vld [vmem:[%s17452_s1 + $0xd8] sm:$0xff] }
 0x440   :  { %4583 = vmatprep.mubr.bf16.mxu0 %v17463_v17  ;;  %4776 = vmatprep.mubr.bf16.mxu1 %v17463_v17 }
 0x441   :  { %v4273_v41 = vadd.f32 %v4241_v58, %v15044_v48  ;;  %6263 = vmatpush1.bf16.msra.mxu0 %v12066_v6  ;;  %6649 = vmatpush1.bf16.msra.mxu1 %v12069_v15 }
 0x443   :  { %v4296_v12 = vpack.c.bf16 %v4273_v41, %v4272_v20  ;;  %v12083_v41 = vld [vmem:[%s17459_s8 + $0x38c] ss:$28 sps:$4 sm:$0xff]   ;;  %v3996_v20 = vld [vmem:[%s17452_s1 + $0xe0] sm:$0xff] }
 0x444   :  { %v4165_v10 = vpop.permute.xlu0 %4164 }
 0x445   :  { %v4242_v61 = vmul.f32 %v4165_v10, %v3986_v9  ;;  %v3997_v10 = vld [vmem:[%s17452_s1 + $0xe8] sm:$0xff] }
 0x446   :  { %v4167_v21 = vpop.permute.xlu1 %4166 }
 0x447   :  { %v4243_v38 = vmul.f32 %v4167_v21, %v3987_v25  ;;  %9992 = vmatmul.mubr.msk.bf16.gmra.mrb[160].mxu0 %vm4422_vm1, %v4296_v12  ;;  %10008 = vmatmul.mubr.msk.bf16.gmra.mrb[160].mxu1 %vm4422_vm1, %v4296_v12  ;;  %v4274_v48 = vadd.f32 %v4242_v61, %v15050_v11 }
 0x448   :  { %4593 = vmatprep.mubr.bf16.mxu0 %v17463_v17  ;;  %4786 = vmatprep.mubr.bf16.mxu1 %v17463_v17 }
 0x449   :  { %v4275_v44 = vadd.f32 %v4243_v38, %v15056_v19  ;;  %v3998_v38 = vld [vmem:[%s17452_s1 + $0xf0] sm:$0xff] }
 0x44b   :  { %v4297_v27 = vpack.c.bf16 %v4275_v44, %v4274_v48  ;;  %v3999_v48 = vld [vmem:[%s17452_s1 + $0xf8] sm:$0xff] }
 0x44c   :  { %v4169_v23 = vpop.permute.xlu0 %4168 }
 0x44d   :  { %v4244_v63 = vmul.f32 %v4169_v23, %v3988_v55 }
 0x44e   :  { %v4171_v31 = vpop.permute.xlu1 %4170 }
 0x44f   :  { %v4245_v32 = vmul.f32 %v4171_v31, %v3989_v26  ;;  %9993 = vmatmul.mubr.msk.bf16.gmra.mrb[164].mxu0 %vm4422_vm1, %v4297_v27  ;;  %10009 = vmatmul.mubr.msk.bf16.gmra.mrb[164].mxu1 %vm4422_vm1, %v4297_v27  ;;  %v4276_v19 = vadd.f32 %v4244_v63, %v15062_v43  ;;  %v4320_v63 = vld [vmem:[%s17458_s7] sm:$0xf] }
 0x450   :  { %4603 = vmatprep.mubr.bf16.mxu0 %v17463_v17  ;;  %4796 = vmatprep.mubr.bf16.mxu1 %v17463_v17 }
 0x451   :  { %v4277_v11 = vadd.f32 %v4245_v32, %v15068_v59  ;;  %v15529_v32 = vrot.slane %v4320_v63, %v14720_v50 }
 0x453   :  { %v4298_v57 = vpack.c.bf16 %v4277_v11, %v4276_v19  ;;  %v15532_v11 = vrot.slane %v4320_v63, %v14723_v51  ;;  %v15535_v19 = vrot.slane %v4320_v63, %v14729_v53 }
 0x454   :  { %v4173_v36 = vpop.permute.xlu0 %4172 }
 0x455   :  { %v4246_v52 = vmul.f32 %v4173_v36, %v3990_v33 }
 0x456   :  { %v4175_v18 = vpop.permute.xlu1 %4174 }
 0x457   :  { %v4247_v39 = vmul.f32 %v4175_v18, %v3991_v37  ;;  %9994 = vmatmul.mubr.msk.bf16.gmra.mrb[168].mxu0 %vm4422_vm1, %v4298_v57  ;;  %10010 = vmatmul.mubr.msk.bf16.gmra.mrb[168].mxu1 %vm4422_vm1, %v4298_v57  ;;  %v4278_v59 = vadd.f32 %v4246_v52, %v15074_v13  ;;  %v12074_v13 = vld [vmem:[%s17459_s8 + $0x34c] ss:$28 sps:$4 sm:$0xff]  }
 0x458   :  { %4613 = vmatprep.mubr.bf16.mxu0 %v17463_v17  ;;  %4806 = vmatprep.mubr.bf16.mxu1 %v17463_v17 }
 0x459   :  { %v4279_v43 = vadd.f32 %v4247_v39, %v15080_v24  ;;  %v12077_v24 = vld [vmem:[%s17459_s8 + $0x354] ss:$28 sps:$4 sm:$0xff]   ;;  %6264 = vmatprep.subr.bf16.mxu0 %v12074_v13 }
 0x45a   :  { %6650 = vmatprep.subr.bf16.mxu1 %v12077_v24  ;;  %6265 = vmatpush1.bf16.msra.mxu0 %v12072_v46 }
 0x45b   :  { %v4299_v35 = vpack.c.bf16 %v4279_v43, %v4278_v59  ;;  %6651 = vmatpush1.bf16.msra.mxu1 %v12075_v22 }
 0x45c   :  { %v4177_v42 = vpop.permute.xlu0 %4176  ;;  %6813 = vmatprep.subr.bf16.mxu1 %v12083_v41 }
 0x45d   :  { %v4248_v45 = vmul.f32 %v4177_v42, %v3992_v40 }
 0x45e   :  { %v4179_v3 = vpop.permute.xlu1 %4178 }
 0x45f   :  { %v4249_v14 = vmul.f32 %v4179_v3, %v3993_v30  ;;  %9995 = vmatmul.mubr.msk.bf16.gmra.mrb[172].mxu0 %vm4422_vm1, %v4299_v35  ;;  %10011 = vmatmul.mubr.msk.bf16.gmra.mrb[172].mxu1 %vm4422_vm1, %v4299_v35  ;;  %v4280_v0 = vadd.f32 %v4248_v45, %v15086_v60 }
 0x460   :  { %4623 = vmatprep.mubr.bf16.mxu0 %v17463_v17  ;;  %4816 = vmatprep.mubr.bf16.mxu1 %v17463_v17 }
 0x461   :  { %v4281_v47 = vadd.f32 %v4249_v14, %v15092_v2  ;;  %v12080_v2 = vld [vmem:[%s17459_s8 + $0x384] ss:$28 sps:$4 sm:$0xff]  }
 0x462   :  { %6427 = vmatprep.subr.bf16.mxu0 %v12080_v2  ;;  %v12081_v2 = vld [vmem:[%s17459_s8 + $0x388] ss:$28 sps:$4 sm:$0xff]  }
 0x463   :  { %v4300_v6 = vpack.c.bf16 %v4281_v47, %v4280_v0 }
 0x464   :  { %v4181_v56 = vpop.permute.xlu0 %4180 }
 0x465   :  { %v4250_v29 = vmul.f32 %v4181_v56, %v3994_v1 }
 0x466   :  { %v4183_v15 = vpop.permute.xlu1 %4182 }
 0x467   :  { %v4251_v7 = vmul.f32 %v4183_v15, %v3995_v5  ;;  %9996 = vmatmul.mubr.msk.bf16.gmra.mrb[176].mxu0 %vm4422_vm1, %v4300_v6  ;;  %10012 = vmatmul.mubr.msk.bf16.gmra.mrb[176].mxu1 %vm4422_vm1, %v4300_v6  ;;  %v4282_v58 = vadd.f32 %v4250_v29, %v15098_v28 }
 0x468   :  { %4633 = vmatprep.mubr.bf16.mxu0 %v17463_v17  ;;  %4826 = vmatprep.mubr.bf16.mxu1 %v17463_v17 }
 0x469   :  { %v4283_v60 = vadd.f32 %v4251_v7, %v15104_v34 }
 0x46b   :  { %v4301_v34 = vpack.c.bf16 %v4283_v60, %v4282_v58  ;;  %v12078_v60 = vld [vmem:[%s17459_s8 + $0x380] ss:$28 sps:$4 sm:$0xff]  }
 0x46c   :  { %v4185_v9 = vpop.permute.xlu0 %4184 }
 0x46d   :  { %v4252_v12 = vmul.f32 %v4185_v9, %v3996_v20 }
 0x46e   :  { %v4187_v25 = vpop.permute.xlu1 %4186 }
 0x46f   :  { %v4253_v21 = vmul.f32 %v4187_v25, %v3997_v10  ;;  %9997 = vmatmul.mubr.msk.bf16.gmra.mrb[180].mxu0 %vm4422_vm1, %v4301_v34  ;;  %10013 = vmatmul.mubr.msk.bf16.gmra.mrb[180].mxu1 %vm4422_vm1, %v4301_v34  ;;  %v4284_v61 = vadd.f32 %v4252_v12, %v15116_v8  ;;  %v12086_v10 = vld [vmem:[%s17459_s8 + $0x3bc] ss:$28 sps:$4 sm:$0xff]   ;;  %v12089_v34 = vld [vmem:[%s17459_s8 + $0x3c4] ss:$28 sps:$4 sm:$0xff]  }
 0x470   :  { %4643 = vmatprep.mubr.bf16.mxu0 %v17463_v17  ;;  %4836 = vmatprep.mubr.bf16.mxu1 %v17463_v17 }
 0x471   :  { %v4285_v28 = vadd.f32 %v4253_v21, %v15122_v16 }
 0x473   :  { %v4302_v55 = vpack.c.bf16 %v4285_v28, %v4284_v61 }
 0x474   :  { %v4189_v44 = vpop.permute.xlu0 %4188 }
 0x475   :  { %v4254_v26 = vmul.f32 %v4189_v44, %v3998_v38 }
 0x476   :  { %v4191_v23 = vpop.permute.xlu1 %4190 }
 0x477   :  { %v4255_v27 = vmul.f32 %v4191_v23, %v3999_v48  ;;  %9998 = vmatmul.mubr.msk.bf16.gmra.mrb[184].mxu0 %vm4422_vm1, %v4302_v55  ;;  %10014 = vmatmul.mubr.msk.bf16.gmra.mrb[184].mxu1 %vm4422_vm1, %v4302_v55  ;;  %v4286_v16 = vadd.f32 %v4254_v26, %v15128_v62  ;;  %v15538_v62 = vrot.slane %v4320_v63, %v14732_v54  ;;  %v12084_v26 = vld [vmem:[%s17459_s8 + $0x3b8] ss:$28 sps:$4 sm:$0xff]  }
 0x478   :  { %4653 = vmatprep.mubr.bf16.mxu0 %v17463_v17  ;;  %4846 = vmatprep.mubr.bf16.mxu1 %v17463_v17 }
 0x479   :  { %v4287_v8 = vadd.f32 %v4255_v27, %v15134_v4  ;;  %v12087_v27 = vld [vmem:[%s17459_s8 + $0x3c0] ss:$28 sps:$4 sm:$0xff]  }
 0x47b   :  { %v4303_v31 = vpack.c.bf16 %v4287_v8, %v4286_v16  ;;  %v12092_v8 = vld [vmem:[%s17459_s8 + $0x3f4] ss:$28 sps:$4 sm:$0xff]  }
 0x47f   :  { %9999 = vmatmul.mubr.msk.bf16.gmra.mrb[188].mxu0 %vm4422_vm1, %v4303_v31  ;;  %10015 = vmatmul.mubr.msk.bf16.gmra.mrb[188].mxu1 %vm4422_vm1, %v4303_v31 }
 0x4da   :  { %v4505_v4 = vpop.f32.mrb[128].mxu0  ;;  %v4698_v33 = vpop.f32.mrb[128].mxu1 }
 0x4db   :  { %v4506_v36 = vadd.f32 %v4505_v4, %v15529_v32  ;;  %v4699_v37 = vadd.f32 %v4698_v33, %v15532_v11  ;;  %v4507_v57 = vpop.f32.mrb[129].mxu0  ;;  %v4700_v18 = vpop.f32.mrb[129].mxu1  ;;  %v12095_v33 = vld [vmem:[%s17459_s8 + $0x3fc] ss:$28 sps:$4 sm:$0xff]  }
 0x4dc   :  { %v4508_v52 = vadd.f32 %v4507_v57, %v15535_v19  ;;  %v4701_v39 = vadd.f32 %v4700_v18, %v15538_v62  ;;  %v4509_v43 = vpop.f32.mrb[130].mxu0  ;;  %v4702_v59 = vpop.f32.mrb[130].mxu1 }
 0x4dd   :  { %v4510_v40 = vadd.f32 %v4509_v43, %v15529_v32  ;;  %v4703_v42 = vadd.f32 %v4702_v59, %v15532_v11  ;;  %v4511_v30 = vpop.f32.mrb[131].mxu0  ;;  %v4704_v35 = vpop.f32.mrb[131].mxu1  ;;  %v4857_v14 = vmax.f32 %v4506_v36, 0.0  ;;  %v4859_v13 = vmax.f32 %v4699_v37, 0.0 }
 0x4de   :  { %v4512_v3 = vadd.f32 %v4511_v30, %v15535_v19  ;;  %v4705_v45 = vadd.f32 %v4704_v35, %v15538_v62  ;;  %v4858_v22 = vmax.f32 %v4508_v52, 0.0  ;;  %v4860_v47 = vmax.f32 %v4701_v39, 0.0  ;;  %v12090_v30 = vld [vmem:[%s17459_s8 + $0x3f0] ss:$28 sps:$4 sm:$0xff]   ;;  %v12093_v35 = vld [vmem:[%s17459_s8 + $0x3f8] ss:$28 sps:$4 sm:$0xff]  }
 0x4df   :  { %v4861_v24 = vmax.f32 %v4510_v40, 0.0  ;;  %v4863_v46 = vmax.f32 %v4703_v42, 0.0 }
 0x4e0   :  { %v4862_v0 = vmax.f32 %v4512_v3, 0.0  ;;  %v4864_v1 = vmax.f32 %v4705_v45, 0.0 }
 0x4e1   :  { %v15548_v56 = vpack.c.bf16 %v4861_v24, %v4857_v14  ;;  %v15550_v5 = vpack.c.bf16 %v4863_v46, %v4859_v13  ;;  %v12098_v24 = vld [vmem:[%s17459_s8 + $0x42c] ss:$28 sps:$4 sm:$0xff]   ;;  %v12101_v46 = vld [vmem:[%s17459_s8 + $0x434] ss:$28 sps:$4 sm:$0xff]  }
 0x4e2   :  { %v15552_v6 = vpack.c.bf16 %v4862_v0, %v4858_v22  ;;  %v15554_v15 = vpack.c.bf16 %v4864_v1, %v4860_v47  ;;  %v4515_v29 = vpop.f32.mrb[132].mxu0  ;;  %v4708_v7 = vpop.f32.mrb[132].mxu1 }
 0x4e3   :  { %v4516_v58 = vadd.f32 %v4515_v29, %v15529_v32  ;;  %v4709_v41 = vadd.f32 %v4708_v7, %v15532_v11  ;;  %v4517_v20 = vpop.f32.mrb[133].mxu0  ;;  %v4710_v9 = vpop.f32.mrb[133].mxu1 }
 0x4e4   :  { %v4518_v25 = vadd.f32 %v4517_v20, %v15535_v19  ;;  %v4711_v12 = vadd.f32 %v4710_v9, %v15538_v62  ;;  %v4519_v21 = vpop.f32.mrb[134].mxu0  ;;  %v4712_v28 = vpop.f32.mrb[134].mxu1  ;;  %6266 = vmatprep.mubr.bf16.mxu0 %v15552_v6  ;;  %6652 = vmatprep.mubr.bf16.mxu1 %v15552_v6  ;;  %v12096_v20 = vld [vmem:[%s17459_s8 + $0x428] ss:$28 sps:$4 sm:$0xff]   ;;  %v12099_v9 = vld [vmem:[%s17459_s8 + $0x430] ss:$28 sps:$4 sm:$0xff]  }
 0x4e5   :  { %v4520_v61 = vadd.f32 %v4519_v21, %v15529_v32  ;;  %v4713_v38 = vadd.f32 %v4712_v28, %v15532_v11  ;;  %v4521_v44 = vpop.f32.mrb[135].mxu0  ;;  %v4714_v48 = vpop.f32.mrb[135].mxu1  ;;  %6267 = vmatmul.mubr.bf16.vlgmr.msra.gmra.mrb[192].mxu0 %v15548_v56  ;;  %6653 = vmatmul.mubr.bf16.vlgmr.msra.gmra.mrb[192].mxu1 %v15548_v56  ;;  %v4865_v16 = vmax.f32 %v4516_v58, 0.0  ;;  %v4867_v31 = vmax.f32 %v4709_v41, 0.0  ;;  %v12107_v28 = vld [vmem:[%s17459_s8 + $0x46c] ss:$28 sps:$4 sm:$0xff]  }
 0x4e6   :  { %v4522_v55 = vadd.f32 %v4521_v44, %v15535_v19  ;;  %v4715_v23 = vadd.f32 %v4714_v48, %v15538_v62  ;;  %6428 = vmatpush1.bf16.msra.mxu0 %v12078_v60  ;;  %6814 = vmatpush1.bf16.msra.mxu1 %v12081_v2  ;;  %v4866_v36 = vmax.f32 %v4518_v25, 0.0  ;;  %v4868_v37 = vmax.f32 %v4711_v12, 0.0 }
 0x4e7   :  { %v4869_v63 = vmax.f32 %v4520_v61, 0.0  ;;  %v4871_v4 = vmax.f32 %v4713_v38, 0.0  ;;  %6429 = vmatprep.subr.bf16.mxu0 %v12086_v10  ;;  %6815 = vmatprep.subr.bf16.mxu1 %v12089_v34  ;;  %v12104_v10 = vld [vmem:[%s17459_s8 + $0x464] ss:$28 sps:$4 sm:$0xff]  }
 0x4e8   :  { %v4870_v57 = vmax.f32 %v4522_v55, 0.0  ;;  %v4872_v18 = vmax.f32 %v4715_v23, 0.0 }
 0x4e9   :  { %v15592_v52 = vpack.c.bf16 %v4869_v63, %v4865_v16  ;;  %v15594_v39 = vpack.c.bf16 %v4871_v4, %v4867_v31  ;;  %v12102_v31 = vld [vmem:[%s17459_s8 + $0x460] ss:$28 sps:$4 sm:$0xff]   ;;  %v12105_v63 = vld [vmem:[%s17459_s8 + $0x468] ss:$28 sps:$4 sm:$0xff]  }
 0x4ea   :  { %v15596_v43 = vpack.c.bf16 %v4870_v57, %v4866_v36  ;;  %v15598_v59 = vpack.c.bf16 %v4872_v18, %v4868_v37  ;;  %v4525_v40 = vpop.f32.mrb[136].mxu0  ;;  %v4718_v42 = vpop.f32.mrb[136].mxu1  ;;  %6430 = vmatpush1.bf16.msra.mxu0 %v12084_v26  ;;  %6816 = vmatpush1.bf16.msra.mxu1 %v12087_v27  ;;  %v12110_v57 = vld [vmem:[%s17459_s8 + $0x49c] ss:$28 sps:$4 sm:$0xff]   ;;  %v12113_v18 = vld [vmem:[%s17459_s8 + $0x4a4] ss:$28 sps:$4 sm:$0xff]  }
 0x4eb   :  { %v4526_v3 = vadd.f32 %v4525_v40, %v15529_v32  ;;  %v4719_v45 = vadd.f32 %v4718_v42, %v15532_v11  ;;  %v4527_v14 = vpop.f32.mrb[137].mxu0  ;;  %v4720_v13 = vpop.f32.mrb[137].mxu1  ;;  %6431 = vmatprep.subr.bf16.mxu0 %v12092_v8  ;;  %6817 = vmatprep.subr.bf16.mxu1 %v12095_v33 }
 0x4ec   :  { %v4528_v22 = vadd.f32 %v4527_v14, %v15535_v19  ;;  %v4721_v47 = vadd.f32 %v4720_v13, %v15538_v62  ;;  %v4529_v0 = vpop.f32.mrb[138].mxu0  ;;  %v4722_v1 = vpop.f32.mrb[138].mxu1  ;;  %6276 = vmatprep.mubr.bf16.mxu0 %v15596_v43  ;;  %6662 = vmatprep.mubr.bf16.mxu1 %v15596_v43 }
 0x4ed   :  { %v4530_v29 = vadd.f32 %v4529_v0, %v15529_v32  ;;  %v4723_v7 = vadd.f32 %v4722_v1, %v15532_v11  ;;  %v4531_v60 = vpop.f32.mrb[139].mxu0  ;;  %v4724_v2 = vpop.f32.mrb[139].mxu1  ;;  %6277 = vmatmul.mubr.bf16.gmra.mrb[196].mxu0 %v15592_v52  ;;  %6663 = vmatmul.mubr.bf16.gmra.mrb[196].mxu1 %v15592_v52  ;;  %v4873_v34 = vmax.f32 %v4526_v3, 0.0  ;;  %v4875_v25 = vmax.f32 %v4719_v45, 0.0  ;;  %v12116_v0 = vld [vmem:[%s17459_s8 + $0x4d4] ss:$28 sps:$4 sm:$0xff]  }
 0x4ee   :  { %v4532_v58 = vadd.f32 %v4531_v60, %v15535_v19  ;;  %v4725_v41 = vadd.f32 %v4724_v2, %v15538_v62  ;;  %6432 = vmatpush1.bf16.msra.mxu0 %v12090_v30  ;;  %6818 = vmatpush1.bf16.msra.mxu1 %v12093_v35  ;;  %v4874_v61 = vmax.f32 %v4528_v22, 0.0  ;;  %v4876_v38 = vmax.f32 %v4721_v47, 0.0  ;;  %v12108_v22 = vld [vmem:[%s17459_s8 + $0x498] ss:$28 sps:$4 sm:$0xff]   ;;  %v12111_v47 = vld [vmem:[%s17459_s8 + $0x4a0] ss:$28 sps:$4 sm:$0xff]  }
 0x4ef   :  { %v4877_v12 = vmax.f32 %v4530_v29, 0.0  ;;  %v4879_v21 = vmax.f32 %v4723_v7, 0.0  ;;  %6433 = vmatprep.subr.bf16.mxu0 %v12098_v24  ;;  %6819 = vmatprep.subr.bf16.mxu1 %v12101_v46  ;;  %v12119_v2 = vld [vmem:[%s17459_s8 + $0x4dc] ss:$28 sps:$4 sm:$0xff]  }
 0x4f0   :  { %v4878_v44 = vmax.f32 %v4532_v58, 0.0  ;;  %v4880_v48 = vmax.f32 %v4725_v41, 0.0 }
 0x4f1   :  { %v15636_v55 = vpack.c.bf16 %v4877_v12, %v4873_v34  ;;  %v15638_v23 = vpack.c.bf16 %v4879_v21, %v4875_v25 }
 0x4f2   :  { %v15640_v26 = vpack.c.bf16 %v4878_v44, %v4874_v61  ;;  %v15642_v27 = vpack.c.bf16 %v4880_v48, %v4876_v38  ;;  %v4535_v8 = vpop.f32.mrb[140].mxu0  ;;  %v4728_v16 = vpop.f32.mrb[140].mxu1  ;;  %6434 = vmatpush1.bf16.msra.mxu0 %v12096_v20  ;;  %6820 = vmatpush1.bf16.msra.mxu1 %v12099_v9  ;;  %v12114_v61 = vld [vmem:[%s17459_s8 + $0x4d0] ss:$28 sps:$4 sm:$0xff]   ;;  %v12117_v38 = vld [vmem:[%s17459_s8 + $0x4d8] ss:$28 sps:$4 sm:$0xff]  }
 0x4f3   :  { %v4536_v4 = vadd.f32 %v4535_v8, %v15529_v32  ;;  %v4729_v33 = vadd.f32 %v4728_v16, %v15532_v11  ;;  %v4537_v36 = vpop.f32.mrb[141].mxu0  ;;  %v4730_v37 = vpop.f32.mrb[141].mxu1  ;;  %6435 = vmatprep.subr.bf16.mxu0 %v12104_v10  ;;  %6821 = vmatprep.subr.bf16.mxu1 %v12107_v28 }
 0x4f4   :  { %v4538_v40 = vadd.f32 %v4537_v36, %v15535_v19  ;;  %v4731_v42 = vadd.f32 %v4730_v37, %v15538_v62  ;;  %v4539_v30 = vpop.f32.mrb[142].mxu0  ;;  %v4732_v35 = vpop.f32.mrb[142].mxu1  ;;  %6286 = vmatprep.mubr.bf16.mxu0 %v15640_v26  ;;  %6672 = vmatprep.mubr.bf16.mxu1 %v15640_v26 }
 0x4f5   :  { %v4540_v3 = vadd.f32 %v4539_v30, %v15529_v32  ;;  %v4733_v45 = vadd.f32 %v4732_v35, %v15532_v11  ;;  %v4541_v14 = vpop.f32.mrb[143].mxu0  ;;  %v4734_v13 = vpop.f32.mrb[143].mxu1  ;;  %6287 = vmatmul.mubr.bf16.gmra.mrb[200].mxu0 %v15636_v55  ;;  %6673 = vmatmul.mubr.bf16.gmra.mrb[200].mxu1 %v15636_v55  ;;  %v4881_v1 = vmax.f32 %v4536_v4, 0.0  ;;  %v4883_v29 = vmax.f32 %v4729_v33, 0.0 }
 0x4f6   :  { %v4542_v24 = vadd.f32 %v4541_v14, %v15535_v19  ;;  %v4735_v46 = vadd.f32 %v4734_v13, %v15538_v62  ;;  %6436 = vmatpush1.bf16.msra.mxu0 %v12102_v31  ;;  %6822 = vmatpush1.bf16.msra.mxu1 %v12105_v63  ;;  %v4882_v58 = vmax.f32 %v4538_v40, 0.0  ;;  %v4884_v41 = vmax.f32 %v4731_v42, 0.0  ;;  %v12122_v31 = vld [vmem:[%s17459_s8 + $0x50c] ss:$28 sps:$4 sm:$0xff]   ;;  %v12125_v63 = vld [vmem:[%s17459_s8 + $0x514] ss:$28 sps:$4 sm:$0xff]  }
 0x4f7   :  { %v4885_v7 = vmax.f32 %v4540_v3, 0.0  ;;  %v4887_v60 = vmax.f32 %v4733_v45, 0.0  ;;  %6437 = vmatprep.subr.bf16.mxu0 %v12110_v57  ;;  %6823 = vmatprep.subr.bf16.mxu1 %v12113_v18  ;;  %v12120_v3 = vld [vmem:[%s17459_s8 + $0x508] ss:$28 sps:$4 sm:$0xff]   ;;  %v12123_v45 = vld [vmem:[%s17459_s8 + $0x510] ss:$28 sps:$4 sm:$0xff]  }
 0x4f8   :  { %v4886_v20 = vmax.f32 %v4542_v24, 0.0  ;;  %v4888_v9 = vmax.f32 %v4735_v46, 0.0  ;;  %v12128_v14 = vld [vmem:[%s17459_s8 + $0x544] ss:$28 sps:$4 sm:$0xff]  }
 0x4f9   :  { %v15680_v10 = vpack.c.bf16 %v4885_v7, %v4881_v1  ;;  %v15682_v34 = vpack.c.bf16 %v4887_v60, %v4883_v29 }
 0x4fa   :  { %v15684_v25 = vpack.c.bf16 %v4886_v20, %v4882_v58  ;;  %v15686_v12 = vpack.c.bf16 %v4888_v9, %v4884_v41  ;;  %v4545_v21 = vpop.f32.mrb[144].mxu0  ;;  %v4738_v28 = vpop.f32.mrb[144].mxu1  ;;  %6438 = vmatpush1.bf16.msra.mxu0 %v12108_v22  ;;  %6824 = vmatpush1.bf16.msra.mxu1 %v12111_v47  ;;  %v12131_v47 = vld [vmem:[%s17459_s8 + $0x54c] ss:$28 sps:$4 sm:$0xff]  }
 0x4fb   :  { %v4546_v44 = vadd.f32 %v4545_v21, %v15529_v32  ;;  %v4739_v48 = vadd.f32 %v4738_v28, %v15532_v11  ;;  %v4547_v8 = vpop.f32.mrb[145].mxu0  ;;  %v4740_v16 = vpop.f32.mrb[145].mxu1  ;;  %6439 = vmatprep.subr.bf16.mxu0 %v12116_v0  ;;  %6825 = vmatprep.subr.bf16.mxu1 %v12119_v2  ;;  %v12126_v21 = vld [vmem:[%s17459_s8 + $0x540] ss:$28 sps:$4 sm:$0xff]   ;;  %v12129_v28 = vld [vmem:[%s17459_s8 + $0x548] ss:$28 sps:$4 sm:$0xff]  }
 0x4fc   :  { %v4548_v4 = vadd.f32 %v4547_v8, %v15535_v19  ;;  %v4741_v33 = vadd.f32 %v4740_v16, %v15538_v62  ;;  %v4549_v36 = vpop.f32.mrb[146].mxu0  ;;  %v4742_v37 = vpop.f32.mrb[146].mxu1  ;;  %6296 = vmatprep.mubr.bf16.mxu0 %v15684_v25  ;;  %6682 = vmatprep.mubr.bf16.mxu1 %v15684_v25  ;;  %v12134_v8 = vld [vmem:[%s17459_s8 + $0x14] ss:$28 sps:$4 sm:$0xff]  }
 0x4fd   :  { %v4550_v57 = vadd.f32 %v4549_v36, %v15529_v32  ;;  %v4743_v18 = vadd.f32 %v4742_v37, %v15532_v11  ;;  %v4551_v40 = vpop.f32.mrb[147].mxu0  ;;  %v4744_v42 = vpop.f32.mrb[147].mxu1  ;;  %6297 = vmatmul.mubr.bf16.gmra.mrb[204].mxu0 %v15680_v10  ;;  %6683 = vmatmul.mubr.bf16.gmra.mrb[204].mxu1 %v15680_v10  ;;  %v4889_v13 = vmax.f32 %v4546_v44, 0.0  ;;  %v4891_v24 = vmax.f32 %v4739_v48, 0.0  ;;  %v12135_v16 = vld [vmem:[%s17459_s8 + $0x1d8] ss:$28 sps:$4 sm:$0xff]  }
 0x4fe   :  { %v4552_v30 = vadd.f32 %v4551_v40, %v15535_v19  ;;  %v4745_v35 = vadd.f32 %v4744_v42, %v15538_v62  ;;  %6440 = vmatpush1.bf16.msra.mxu0 %v12114_v61  ;;  %6826 = vmatpush1.bf16.msra.mxu1 %v12117_v38  ;;  %v4890_v0 = vmax.f32 %v4548_v4, 0.0  ;;  %v4892_v1 = vmax.f32 %v4741_v33, 0.0 }
 0x4ff   :  { %v4893_v46 = vmax.f32 %v4550_v57, 0.0  ;;  %v4895_v22 = vmax.f32 %v4743_v18, 0.0  ;;  %6441 = vmatprep.subr.bf16.mxu0 %v12122_v31  ;;  %6827 = vmatprep.subr.bf16.mxu1 %v12125_v63 }
 0x500   :  { %v4894_v29 = vmax.f32 %v4552_v30, 0.0  ;;  %v4896_v7 = vmax.f32 %v4745_v35, 0.0 }
 0x501   :  { %v15724_v60 = vpack.c.bf16 %v4893_v46, %v4889_v13  ;;  %v15726_v2 = vpack.c.bf16 %v4895_v22, %v4891_v24 }
 0x502   :  { %v15728_v58 = vpack.c.bf16 %v4894_v29, %v4890_v0  ;;  %v15730_v41 = vpack.c.bf16 %v4896_v7, %v4892_v1  ;;  %v4555_v20 = vpop.f32.mrb[148].mxu0  ;;  %v4748_v9 = vpop.f32.mrb[148].mxu1  ;;  %6442 = vmatpush1.bf16.msra.mxu0 %v12120_v3  ;;  %6828 = vmatpush1.bf16.msra.mxu1 %v12123_v45 }
 0x503   :  { %17546 = vst [vmem:[#allocation13_spill] sm:$0xff] %v15724_v60  ;;  %v4556_v61 = vadd.f32 %v4555_v20, %v15529_v32  ;;  %v4749_v38 = vadd.f32 %v4748_v9, %v15532_v11  ;;  %v4557_v44 = vpop.f32.mrb[149].mxu0  ;;  %v4750_v48 = vpop.f32.mrb[149].mxu1  ;;  %6443 = vmatprep.subr.bf16.mxu0 %v12128_v14  ;;  %6829 = vmatprep.subr.bf16.mxu1 %v12131_v47 }
 0x504   :  { %v4558_v31 = vadd.f32 %v4557_v44, %v15535_v19  ;;  %v4751_v63 = vadd.f32 %v4750_v48, %v15538_v62  ;;  %v4559_v4 = vpop.f32.mrb[150].mxu0  ;;  %v4752_v33 = vpop.f32.mrb[150].mxu1  ;;  %6306 = vmatprep.mubr.bf16.mxu0 %v15728_v58  ;;  %6692 = vmatprep.mubr.bf16.mxu1 %v15728_v58 }
 0x505   :  { %v4560_v36 = vadd.f32 %v4559_v4, %v15529_v32  ;;  %v4753_v37 = vadd.f32 %v4752_v33, %v15532_v11  ;;  %v4561_v57 = vpop.f32.mrb[151].mxu0  ;;  %v4754_v18 = vpop.f32.mrb[151].mxu1  ;;  %6307 = vmatmul.mubr.bf16.gmra.mrb[208].mxu0 %v15724_v60  ;;  %6693 = vmatmul.mubr.bf16.gmra.mrb[208].mxu1 %v15724_v60  ;;  %v4897_v30 = vmax.f32 %v4556_v61, 0.0  ;;  %v4899_v35 = vmax.f32 %v4749_v38, 0.0 }
 0x506   :  { %v4562_v40 = vadd.f32 %v4561_v57, %v15535_v19  ;;  %v4755_v42 = vadd.f32 %v4754_v18, %v15538_v62  ;;  %6444 = vmatpush1.bf16.msra.mxu0 %v12126_v21  ;;  %6830 = vmatpush1.bf16.msra.mxu1 %v12129_v28  ;;  %v4898_v14 = vmax.f32 %v4558_v31, 0.0  ;;  %v4900_v13 = vmax.f32 %v4751_v63, 0.0 }
 0x507   :  { %v4901_v3 = vmax.f32 %v4560_v36, 0.0  ;;  %v4903_v45 = vmax.f32 %v4753_v37, 0.0  ;;  %7006 = vmatprep.subr.bf16.mxu0 %v12134_v8  ;;  %10623 = vmatprep.subr.bf16.mxu1 %v12135_v16 }
 0x508   :  { %v4902_v24 = vmax.f32 %v4562_v40, 0.0  ;;  %v4904_v46 = vmax.f32 %v4755_v42, 0.0 }
 0x509   :  { %v15756_v22 = vpack.c.bf16 %v4901_v3, %v4897_v30  ;;  %v15758_v47 = vpack.c.bf16 %v4903_v45, %v4899_v35 }
 0x50a   :  { %v15760_v0 = vpack.c.bf16 %v4902_v24, %v4898_v14  ;;  %v15762_v1 = vpack.c.bf16 %v4904_v46, %v4900_v13  ;;  %v4565_v29 = vpop.f32.mrb[152].mxu0  ;;  %v4758_v7 = vpop.f32.mrb[152].mxu1 }
 0x50b   :  { %17547 = vst [vmem:[#allocation14_spill] sm:$0xff] %v15756_v22  ;;  %v4566_v20 = vadd.f32 %v4565_v29, %v15529_v32  ;;  %v4759_v9 = vadd.f32 %v4758_v7, %v15532_v11  ;;  %v4567_v21 = vpop.f32.mrb[153].mxu0  ;;  %v4760_v28 = vpop.f32.mrb[153].mxu1 }
 0x50c   :  { %17548 = vst [vmem:[#allocation15_spill] sm:$0xff] %v15760_v0  ;;  %v4568_v61 = vadd.f32 %v4567_v21, %v15535_v19  ;;  %v4761_v38 = vadd.f32 %v4760_v28, %v15538_v62  ;;  %v4569_v44 = vpop.f32.mrb[154].mxu0  ;;  %v4762_v48 = vpop.f32.mrb[154].mxu1  ;;  %6316 = vmatprep.mubr.bf16.mxu0 %v15760_v0  ;;  %6702 = vmatprep.mubr.bf16.mxu1 %v15760_v0 }
 0x50d   :  { %v4570_v8 = vadd.f32 %v4569_v44, %v15529_v32  ;;  %v4763_v16 = vadd.f32 %v4762_v48, %v15532_v11  ;;  %v4571_v31 = vpop.f32.mrb[155].mxu0  ;;  %v4764_v63 = vpop.f32.mrb[155].mxu1  ;;  %6317 = vmatmul.mubr.bf16.gmra.mrb[212].mxu0 %v15756_v22  ;;  %6703 = vmatmul.mubr.bf16.gmra.mrb[212].mxu1 %v15756_v22  ;;  %v4905_v36 = vmax.f32 %v4566_v20, 0.0  ;;  %v4907_v37 = vmax.f32 %v4759_v9, 0.0 }
 0x50e   :  { %v4572_v4 = vadd.f32 %v4571_v31, %v15535_v19  ;;  %v4765_v33 = vadd.f32 %v4764_v63, %v15538_v62  ;;  %v4906_v40 = vmax.f32 %v4568_v61, 0.0  ;;  %v4908_v42 = vmax.f32 %v4761_v38, 0.0 }
 0x50f   :  { %v4909_v57 = vmax.f32 %v4570_v8, 0.0  ;;  %v4911_v18 = vmax.f32 %v4763_v16, 0.0 }
 0x510   :  { %v4910_v30 = vmax.f32 %v4572_v4, 0.0  ;;  %v4912_v35 = vmax.f32 %v4765_v33, 0.0 }
 0x511   :  { %v15776_v3 = vpack.c.bf16 %v4909_v57, %v4905_v36  ;;  %v15778_v45 = vpack.c.bf16 %v4911_v18, %v4907_v37 }
 0x512   :  { %v15780_v14 = vpack.c.bf16 %v4910_v30, %v4906_v40  ;;  %v15782_v13 = vpack.c.bf16 %v4912_v35, %v4908_v42  ;;  %v4575_v24 = vpop.f32.mrb[156].mxu0  ;;  %v4768_v46 = vpop.f32.mrb[156].mxu1 }
 0x513   :  { %17549 = vst [vmem:[#allocation16_spill] sm:$0xff] %v15776_v3  ;;  %v4576_v29 = vadd.f32 %v4575_v24, %v15529_v32  ;;  %v4769_v7 = vadd.f32 %v4768_v46, %v15532_v11  ;;  %v4577_v20 = vpop.f32.mrb[157].mxu0  ;;  %v4770_v9 = vpop.f32.mrb[157].mxu1 }
 0x514   :  { %17550 = vst [vmem:[#allocation17_spill] sm:$0xff] %v15780_v14  ;;  %v4578_v21 = vadd.f32 %v4577_v20, %v15535_v19  ;;  %v4771_v28 = vadd.f32 %v4770_v9, %v15538_v62  ;;  %v4579_v61 = vpop.f32.mrb[158].mxu0  ;;  %v4772_v38 = vpop.f32.mrb[158].mxu1  ;;  %6326 = vmatprep.mubr.bf16.mxu0 %v15780_v14  ;;  %6712 = vmatprep.mubr.bf16.mxu1 %v15780_v14 }
 0x515   :  { %v4580_v44 = vadd.f32 %v4579_v61, %v15529_v32  ;;  %v4773_v48 = vadd.f32 %v4772_v38, %v15532_v11  ;;  %v4581_v8 = vpop.f32.mrb[159].mxu0  ;;  %v4774_v16 = vpop.f32.mrb[159].mxu1  ;;  %6327 = vmatmul.mubr.bf16.gmra.mrb[216].mxu0 %v15776_v3  ;;  %6713 = vmatmul.mubr.bf16.gmra.mrb[216].mxu1 %v15776_v3  ;;  %v4913_v4 = vmax.f32 %v4576_v29, 0.0  ;;  %v4915_v33 = vmax.f32 %v4769_v7, 0.0 }
 0x516   :  { %v4582_v31 = vadd.f32 %v4581_v8, %v15535_v19  ;;  %v4775_v63 = vadd.f32 %v4774_v16, %v15538_v62  ;;  %v4914_v57 = vmax.f32 %v4578_v21, 0.0  ;;  %v4916_v18 = vmax.f32 %v4771_v28, 0.0 }
 0x517   :  { %v4917_v36 = vmax.f32 %v4580_v44, 0.0  ;;  %v4919_v37 = vmax.f32 %v4773_v48, 0.0 }
 0x518   :  { %v4918_v40 = vmax.f32 %v4582_v31, 0.0  ;;  %v4920_v42 = vmax.f32 %v4775_v63, 0.0 }
 0x519   :  { %v15796_v30 = vpack.c.bf16 %v4917_v36, %v4913_v4  ;;  %v15798_v35 = vpack.c.bf16 %v4919_v37, %v4915_v33 }
 0x51a   :  { %v15800_v24 = vpack.c.bf16 %v4918_v40, %v4914_v57  ;;  %v15802_v46 = vpack.c.bf16 %v4920_v42, %v4916_v18  ;;  %v4585_v20 = vpop.f32.mrb[160].mxu0  ;;  %v4778_v9 = vpop.f32.mrb[160].mxu1 }
 0x51b   :  { %17551 = vst [vmem:[#allocation18_spill] sm:$0xff] %v15796_v30  ;;  %v4586_v61 = vadd.f32 %v4585_v20, %v15529_v32  ;;  %v4779_v29 = vadd.f32 %v4778_v9, %v15532_v11  ;;  %v4587_v7 = vpop.f32.mrb[161].mxu0  ;;  %v4780_v38 = vpop.f32.mrb[161].mxu1 }
 0x51c   :  { %17552 = vst [vmem:[#allocation19_spill] sm:$0xff] %v15800_v24  ;;  %v4588_v21 = vadd.f32 %v4587_v7, %v15535_v19  ;;  %v4781_v28 = vadd.f32 %v4780_v38, %v15538_v62  ;;  %v4589_v44 = vpop.f32.mrb[162].mxu0  ;;  %v4782_v48 = vpop.f32.mrb[162].mxu1  ;;  %6336 = vmatprep.mubr.bf16.mxu0 %v15800_v24  ;;  %6722 = vmatprep.mubr.bf16.mxu1 %v15800_v24 }
 0x51d   :  { %v4590_v8 = vadd.f32 %v4589_v44, %v15529_v32  ;;  %v4783_v16 = vadd.f32 %v4782_v48, %v15532_v11  ;;  %v4591_v31 = vpop.f32.mrb[163].mxu0  ;;  %v4784_v63 = vpop.f32.mrb[163].mxu1  ;;  %6337 = vmatmul.mubr.bf16.gmra.mrb[220].mxu0 %v15796_v30  ;;  %6723 = vmatmul.mubr.bf16.gmra.mrb[220].mxu1 %v15796_v30  ;;  %v4921_v36 = vmax.f32 %v4586_v61, 0.0  ;;  %v4923_v37 = vmax.f32 %v4779_v29, 0.0 }
 0x51e   :  { %v4592_v4 = vadd.f32 %v4591_v31, %v15535_v19  ;;  %v4785_v33 = vadd.f32 %v4784_v63, %v15538_v62  ;;  %v4922_v40 = vmax.f32 %v4588_v21, 0.0  ;;  %v4924_v42 = vmax.f32 %v4781_v28, 0.0 }
 0x51f   :  { %v4925_v57 = vmax.f32 %v4590_v8, 0.0  ;;  %v4927_v18 = vmax.f32 %v4783_v16, 0.0 }
 0x520   :  { %v4926_v20 = vmax.f32 %v4592_v4, 0.0  ;;  %v4928_v9 = vmax.f32 %v4785_v33, 0.0 }
 0x521   :  { %v15816_v7 = vpack.c.bf16 %v4925_v57, %v4921_v36  ;;  %v15818_v38 = vpack.c.bf16 %v4927_v18, %v4923_v37 }
 0x522   :  { %v15820_v44 = vpack.c.bf16 %v4926_v20, %v4922_v40  ;;  %v15822_v48 = vpack.c.bf16 %v4928_v9, %v4924_v42  ;;  %v4595_v17 = vpop.f32.mrb[164].mxu0  ;;  %v4788_v31 = vpop.f32.mrb[164].mxu1 }
 0x523   :  { %17553 = vst [vmem:[#allocation20_spill] sm:$0xff] %v15816_v7  ;;  %17554 = vst [vmem:[#allocation21_spill] sm:$0xff] %v15818_v38  ;;  %v4596_v63 = vadd.f32 %v4595_v17, %v15529_v32  ;;  %v4789_v61 = vadd.f32 %v4788_v31, %v15532_v11  ;;  %v4597_v29 = vpop.f32.mrb[165].mxu0  ;;  %v4790_v8 = vpop.f32.mrb[165].mxu1 }
 0x524   :  { %17555 = vst [vmem:[#allocation22_spill] sm:$0xff] %v15820_v44  ;;  %v4598_v21 = vadd.f32 %v4597_v29, %v15535_v19  ;;  %v4791_v28 = vadd.f32 %v4790_v8, %v15538_v62  ;;  %v4599_v16 = vpop.f32.mrb[166].mxu0  ;;  %v4792_v4 = vpop.f32.mrb[166].mxu1  ;;  %6346 = vmatprep.mubr.bf16.mxu0 %v15820_v44  ;;  %6732 = vmatprep.mubr.bf16.mxu1 %v15820_v44 }
 0x525   :  { %v4600_v33 = vadd.f32 %v4599_v16, %v15529_v32  ;;  %v4793_v36 = vadd.f32 %v4792_v4, %v15532_v11  ;;  %v4601_v37 = vpop.f32.mrb[167].mxu0  ;;  %v4794_v17 = vpop.f32.mrb[167].mxu1  ;;  %6347 = vmatmul.mubr.bf16.gmra.mrb[224].mxu0 %v15816_v7  ;;  %6733 = vmatmul.mubr.bf16.gmra.mrb[224].mxu1 %v15816_v7  ;;  %v4929_v40 = vmax.f32 %v4596_v63, 0.0  ;;  %v4931_v42 = vmax.f32 %v4789_v61, 0.0 }
 0x526   :  { %v4602_v57 = vadd.f32 %v4601_v37, %v15535_v19  ;;  %v4795_v18 = vadd.f32 %v4794_v17, %v15538_v62  ;;  %v4930_v31 = vmax.f32 %v4598_v21, 0.0  ;;  %v4932_v29 = vmax.f32 %v4791_v28, 0.0 }
 0x527   :  { %v4933_v20 = vmax.f32 %v4600_v33, 0.0  ;;  %v4935_v9 = vmax.f32 %v4793_v36, 0.0 }
 0x528   :  { %v4934_v8 = vmax.f32 %v4602_v57, 0.0  ;;  %v4936_v16 = vmax.f32 %v4795_v18, 0.0 }
 0x529   :  { %v15836_v49 = vpack.c.bf16 %v4933_v20, %v4929_v40  ;;  %v15838_v4 = vpack.c.bf16 %v4935_v9, %v4931_v42 }
 0x52a   :  { %v15840_v54 = vpack.c.bf16 %v4934_v8, %v4930_v31  ;;  %v15842_v53 = vpack.c.bf16 %v4936_v16, %v4932_v29  ;;  %v4605_v51 = vpop.f32.mrb[168].mxu0  ;;  %v4798_v37 = vpop.f32.mrb[168].mxu1 }
 0x52b   :  { %17556 = vst [vmem:[#allocation23_spill] sm:$0xff] %v15836_v49  ;;  %17557 = vst [vmem:[#allocation24_spill] sm:$0xff] %v15838_v4  ;;  %v4606_v17 = vadd.f32 %v4605_v51, %v15529_v32  ;;  %v4799_v63 = vadd.f32 %v4798_v37, %v15532_v11  ;;  %v4607_v61 = vpop.f32.mrb[169].mxu0  ;;  %v4800_v33 = vpop.f32.mrb[169].mxu1 }
 0x52c   :  { %17558 = vst [vmem:[#allocation25_spill] sm:$0xff] %v15840_v54  ;;  %17559 = vst [vmem:[#allocation26_spill] sm:$0xff] %v15842_v53  ;;  %v4608_v21 = vadd.f32 %v4607_v61, %v15535_v19  ;;  %v4801_v28 = vadd.f32 %v4800_v33, %v15538_v62  ;;  %v4609_v36 = vpop.f32.mrb[170].mxu0  ;;  %v4802_v57 = vpop.f32.mrb[170].mxu1  ;;  %6356 = vmatprep.mubr.bf16.mxu0 %v15840_v54  ;;  %6742 = vmatprep.mubr.bf16.mxu1 %v15840_v54 }
 0x52d   :  { %v4610_v18 = vadd.f32 %v4609_v36, %v15529_v32  ;;  %v4803_v40 = vadd.f32 %v4802_v57, %v15532_v11  ;;  %v4611_v42 = vpop.f32.mrb[171].mxu0  ;;  %v4804_v51 = vpop.f32.mrb[171].mxu1  ;;  %6357 = vmatmul.mubr.bf16.gmra.mrb[228].mxu0 %v15836_v49  ;;  %6743 = vmatmul.mubr.bf16.gmra.mrb[228].mxu1 %v15836_v49  ;;  %v4937_v31 = vmax.f32 %v4606_v17, 0.0  ;;  %v4939_v29 = vmax.f32 %v4799_v63, 0.0 }
 0x52e   :  { %v4612_v20 = vadd.f32 %v4611_v42, %v15535_v19  ;;  %v4805_v9 = vadd.f32 %v4804_v51, %v15538_v62  ;;  %v4938_v37 = vmax.f32 %v4608_v21, 0.0  ;;  %v4940_v61 = vmax.f32 %v4801_v28, 0.0 }
 0x52f   :  { %v4941_v8 = vmax.f32 %v4610_v18, 0.0  ;;  %v4943_v16 = vmax.f32 %v4803_v40, 0.0 }
 0x530   :  { %v4942_v33 = vmax.f32 %v4612_v20, 0.0  ;;  %v4944_v36 = vmax.f32 %v4805_v9, 0.0 }
 0x531   :  { %v15856_v50 = vpack.c.bf16 %v4941_v8, %v4937_v31  ;;  %v15858_v57 = vpack.c.bf16 %v4943_v16, %v4939_v29 }
 0x532   :  { %v15860_v54 = vpack.c.bf16 %v4942_v33, %v4938_v37  ;;  %v15862_v7 = vpack.c.bf16 %v4944_v36, %v4940_v61  ;;  %v4615_v49 = vpop.f32.mrb[172].mxu0  ;;  %v4808_v42 = vpop.f32.mrb[172].mxu1 }
 0x533   :  { %17560 = vst [vmem:[#allocation27_spill] sm:$0xff] %v15856_v50  ;;  %17561 = vst [vmem:[#allocation28_spill] sm:$0xff] %v15858_v57  ;;  %v4616_v51 = vadd.f32 %v4615_v49, %v15529_v32  ;;  %v4809_v17 = vadd.f32 %v4808_v42, %v15532_v11  ;;  %v4617_v63 = vpop.f32.mrb[173].mxu0  ;;  %v4810_v18 = vpop.f32.mrb[173].mxu1 }
 0x534   :  { %17562 = vst [vmem:[#allocation29_spill] sm:$0xff] %v15860_v54  ;;  %17563 = vst [vmem:[#allocation30_spill] sm:$0xff] %v15862_v7  ;;  %v4618_v21 = vadd.f32 %v4617_v63, %v15535_v19  ;;  %v4811_v28 = vadd.f32 %v4810_v18, %v15538_v62  ;;  %v4619_v40 = vpop.f32.mrb[174].mxu0  ;;  %v4812_v20 = vpop.f32.mrb[174].mxu1  ;;  %6366 = vmatprep.mubr.bf16.mxu0 %v15860_v54  ;;  %6752 = vmatprep.mubr.bf16.mxu1 %v15860_v54 }
 0x535   :  { %v4620_v9 = vadd.f32 %v4619_v40, %v15529_v32  ;;  %v4813_v31 = vadd.f32 %v4812_v20, %v15532_v11  ;;  %v4621_v29 = vpop.f32.mrb[175].mxu0  ;;  %v4814_v49 = vpop.f32.mrb[175].mxu1  ;;  %6367 = vmatmul.mubr.bf16.gmra.mrb[232].mxu0 %v15856_v50  ;;  %6753 = vmatmul.mubr.bf16.gmra.mrb[232].mxu1 %v15856_v50  ;;  %v4945_v37 = vmax.f32 %v4616_v51, 0.0  ;;  %v4947_v61 = vmax.f32 %v4809_v17, 0.0 }
 0x536   :  { %v4622_v8 = vadd.f32 %v4621_v29, %v15535_v19  ;;  %v4815_v16 = vadd.f32 %v4814_v49, %v15538_v62  ;;  %v4946_v42 = vmax.f32 %v4618_v21, 0.0  ;;  %v4948_v63 = vmax.f32 %v4811_v28, 0.0 }
 0x537   :  { %v4949_v33 = vmax.f32 %v4620_v9, 0.0  ;;  %v4951_v36 = vmax.f32 %v4813_v31, 0.0 }
 0x538   :  { %v4950_v18 = vmax.f32 %v4622_v8, 0.0  ;;  %v4952_v40 = vmax.f32 %v4815_v16, 0.0 }
 0x539   :  { %v15876_v54 = vpack.c.bf16 %v4949_v33, %v4945_v37  ;;  %v15878_v20 = vpack.c.bf16 %v4951_v36, %v4947_v61 }
 0x53a   :  { %v15880_v44 = vpack.c.bf16 %v4950_v18, %v4946_v42  ;;  %v15882_v30 = vpack.c.bf16 %v4952_v40, %v4948_v63  ;;  %v4625_v50 = vpop.f32.mrb[176].mxu0  ;;  %v4818_v29 = vpop.f32.mrb[176].mxu1 }
 0x53b   :  { %17564 = vst [vmem:[#allocation31_spill] sm:$0xff] %v15876_v54  ;;  %17565 = vst [vmem:[#allocation32_spill] sm:$0xff] %v15878_v20  ;;  %v4626_v49 = vadd.f32 %v4625_v50, %v15529_v32  ;;  %v4819_v51 = vadd.f32 %v4818_v29, %v15532_v11  ;;  %v4627_v17 = vpop.f32.mrb[177].mxu0  ;;  %v4820_v9 = vpop.f32.mrb[177].mxu1 }
 0x53c   :  { %17566 = vst [vmem:[#allocation33_spill] sm:$0xff] %v15880_v44  ;;  %17567 = vst [vmem:[#allocation34_spill] sm:$0xff] %v15882_v30  ;;  %v4628_v21 = vadd.f32 %v4627_v17, %v15535_v19  ;;  %v4821_v28 = vadd.f32 %v4820_v9, %v15538_v62  ;;  %v4629_v31 = vpop.f32.mrb[178].mxu0  ;;  %v4822_v8 = vpop.f32.mrb[178].mxu1  ;;  %6376 = vmatprep.mubr.bf16.mxu0 %v15880_v44  ;;  %6762 = vmatprep.mubr.bf16.mxu1 %v15880_v44 }
 0x53d   :  { %v4630_v16 = vadd.f32 %v4629_v31, %v15529_v32  ;;  %v4823_v37 = vadd.f32 %v4822_v8, %v15532_v11  ;;  %v4631_v61 = vpop.f32.mrb[179].mxu0  ;;  %v4824_v50 = vpop.f32.mrb[179].mxu1  ;;  %6377 = vmatmul.mubr.bf16.gmra.mrb[236].mxu0 %v15876_v54  ;;  %6763 = vmatmul.mubr.bf16.gmra.mrb[236].mxu1 %v15876_v54  ;;  %v4953_v42 = vmax.f32 %v4626_v49, 0.0  ;;  %v4955_v63 = vmax.f32 %v4819_v51, 0.0 }
 0x53e   :  { %v4632_v33 = vadd.f32 %v4631_v61, %v15535_v19  ;;  %v4825_v36 = vadd.f32 %v4824_v50, %v15538_v62  ;;  %v4954_v29 = vmax.f32 %v4628_v21, 0.0  ;;  %v4956_v17 = vmax.f32 %v4821_v28, 0.0 }
 0x53f   :  { %v4957_v18 = vmax.f32 %v4630_v16, 0.0  ;;  %v4959_v40 = vmax.f32 %v4823_v37, 0.0 }
 0x540   :  { %v4958_v9 = vmax.f32 %v4632_v33, 0.0  ;;  %v4960_v31 = vmax.f32 %v4825_v36, 0.0 }
 0x541   :  { %v15896_v44 = vpack.c.bf16 %v4957_v18, %v4953_v42  ;;  %v15898_v8 = vpack.c.bf16 %v4959_v40, %v4955_v63 }
 0x542   :  { %v15900_v24 = vpack.c.bf16 %v4958_v9, %v4954_v29  ;;  %v15902_v3 = vpack.c.bf16 %v4960_v31, %v4956_v17  ;;  %v4635_v54 = vpop.f32.mrb[180].mxu0  ;;  %v4828_v61 = vpop.f32.mrb[180].mxu1 }
 0x543   :  { %17568 = vst [vmem:[#allocation35_spill] sm:$0xff] %v15896_v44  ;;  %17569 = vst [vmem:[#allocation36_spill] sm:$0xff] %v15898_v8  ;;  %v4636_v50 = vadd.f32 %v4635_v54, %v15529_v32  ;;  %v4829_v49 = vadd.f32 %v4828_v61, %v15532_v11  ;;  %v4637_v51 = vpop.f32.mrb[181].mxu0  ;;  %v4830_v16 = vpop.f32.mrb[181].mxu1 }
 0x544   :  { %17570 = vst [vmem:[#allocation37_spill] sm:$0xff] %v15900_v24  ;;  %17571 = vst [vmem:[#allocation38_spill] sm:$0xff] %v15902_v3  ;;  %v4638_v21 = vadd.f32 %v4637_v51, %v15535_v19  ;;  %v4831_v28 = vadd.f32 %v4830_v16, %v15538_v62  ;;  %v4639_v37 = vpop.f32.mrb[182].mxu0  ;;  %v4832_v33 = vpop.f32.mrb[182].mxu1  ;;  %6386 = vmatprep.mubr.bf16.mxu0 %v15900_v24  ;;  %6772 = vmatprep.mubr.bf16.mxu1 %v15900_v24 }
 0x545   :  { %v4640_v36 = vadd.f32 %v4639_v37, %v15529_v32  ;;  %v4833_v42 = vadd.f32 %v4832_v33, %v15532_v11  ;;  %v4641_v63 = vpop.f32.mrb[183].mxu0  ;;  %v4834_v54 = vpop.f32.mrb[183].mxu1  ;;  %6387 = vmatmul.mubr.bf16.gmra.mrb[240].mxu0 %v15896_v44  ;;  %6773 = vmatmul.mubr.bf16.gmra.mrb[240].mxu1 %v15896_v44  ;;  %v4961_v29 = vmax.f32 %v4636_v50, 0.0  ;;  %v4963_v17 = vmax.f32 %v4829_v49, 0.0 }
 0x546   :  { %v4642_v18 = vadd.f32 %v4641_v63, %v15535_v19  ;;  %v4835_v40 = vadd.f32 %v4834_v54, %v15538_v62  ;;  %v4962_v61 = vmax.f32 %v4638_v21, 0.0  ;;  %v4964_v51 = vmax.f32 %v4831_v28, 0.0 }
 0x547   :  { %v4965_v9 = vmax.f32 %v4640_v36, 0.0  ;;  %v4967_v31 = vmax.f32 %v4833_v42, 0.0 }
 0x548   :  { %v4966_v16 = vmax.f32 %v4642_v18, 0.0  ;;  %v4968_v37 = vmax.f32 %v4835_v40, 0.0 }
 0x549   :  { %v15916_v24 = vpack.c.bf16 %v4965_v9, %v4961_v29  ;;  %v15918_v33 = vpack.c.bf16 %v4967_v31, %v4963_v17 }
 0x54a   :  { %v15920_v14 = vpack.c.bf16 %v4966_v16, %v4962_v61  ;;  %v15922_v22 = vpack.c.bf16 %v4968_v37, %v4964_v51  ;;  %v4645_v44 = vpop.f32.mrb[184].mxu0  ;;  %v4838_v63 = vpop.f32.mrb[184].mxu1 }
 0x54b   :  { %17572 = vst [vmem:[#allocation39_spill] sm:$0xff] %v15916_v24  ;;  %17573 = vst [vmem:[#allocation40_spill] sm:$0xff] %v15918_v33  ;;  %v4646_v54 = vadd.f32 %v4645_v44, %v15529_v32  ;;  %v4839_v50 = vadd.f32 %v4838_v63, %v15532_v11  ;;  %v4647_v49 = vpop.f32.mrb[185].mxu0  ;;  %v4840_v36 = vpop.f32.mrb[185].mxu1 }
 0x54c   :  { %17574 = vst [vmem:[#allocation41_spill] sm:$0xff] %v15920_v14  ;;  %17575 = vst [vmem:[#allocation42_spill] sm:$0xff] %v15922_v22  ;;  %v4648_v21 = vadd.f32 %v4647_v49, %v15535_v19  ;;  %v4841_v28 = vadd.f32 %v4840_v36, %v15538_v62  ;;  %v4649_v42 = vpop.f32.mrb[186].mxu0  ;;  %v4842_v18 = vpop.f32.mrb[186].mxu1  ;;  %6396 = vmatprep.mubr.bf16.mxu0 %v15920_v14  ;;  %6782 = vmatprep.mubr.bf16.mxu1 %v15920_v14 }
 0x54d   :  { %v4650_v40 = vadd.f32 %v4649_v42, %v15529_v32  ;;  %v4843_v29 = vadd.f32 %v4842_v18, %v15532_v11  ;;  %v4651_v17 = vpop.f32.mrb[187].mxu0  ;;  %v4844_v44 = vpop.f32.mrb[187].mxu1  ;;  %6397 = vmatmul.mubr.bf16.gmra.mrb[244].mxu0 %v15916_v24  ;;  %6783 = vmatmul.mubr.bf16.gmra.mrb[244].mxu1 %v15916_v24  ;;  %v4969_v61 = vmax.f32 %v4646_v54, 0.0  ;;  %v4971_v51 = vmax.f32 %v4839_v50, 0.0 }
 0x54e   :  { %v4652_v9 = vadd.f32 %v4651_v17, %v15535_v19  ;;  %v4845_v31 = vadd.f32 %v4844_v44, %v15538_v62  ;;  %v4970_v63 = vmax.f32 %v4648_v21, 0.0  ;;  %v4972_v49 = vmax.f32 %v4841_v28, 0.0 }
 0x54f   :  { %v4973_v16 = vmax.f32 %v4650_v40, 0.0  ;;  %v4975_v37 = vmax.f32 %v4843_v29, 0.0 }
 0x550   :  { %v4974_v36 = vmax.f32 %v4652_v9, 0.0  ;;  %v4976_v42 = vmax.f32 %v4845_v31, 0.0 }
 0x551   :  { %v15936_v14 = vpack.c.bf16 %v4973_v16, %v4969_v61  ;;  %v15938_v18 = vpack.c.bf16 %v4975_v37, %v4971_v51 }
 0x552   :  { %v15940_v0 = vpack.c.bf16 %v4974_v36, %v4970_v63  ;;  %v15942_v60 = vpack.c.bf16 %v4976_v42, %v4972_v49  ;;  %v4655_v24 = vpop.f32.mrb[188].mxu0  ;;  %v4848_v17 = vpop.f32.mrb[188].mxu1 }
 0x553   :  { %17576 = vst [vmem:[#allocation43_spill] sm:$0xff] %v15938_v18  ;;  %v4656_v44 = vadd.f32 %v4655_v24, %v15529_v32  ;;  %v4849_v54 = vadd.f32 %v4848_v17, %v15532_v11  ;;  %v4657_v50 = vpop.f32.mrb[189].mxu0  ;;  %v4850_v40 = vpop.f32.mrb[189].mxu1 }
 0x554   :  { %17577 = vst [vmem:[#allocation44_spill] sm:$0xff] %v15940_v0  ;;  %17578 = vst [vmem:[#allocation45_spill] sm:$0xff] %v15942_v60  ;;  %v4658_v21 = vadd.f32 %v4657_v50, %v15535_v19  ;;  %v4851_v28 = vadd.f32 %v4850_v40, %v15538_v62  ;;  %v4659_v29 = vpop.f32.mrb[190].mxu0  ;;  %v4852_v9 = vpop.f32.mrb[190].mxu1  ;;  %6406 = vmatprep.mubr.bf16.mxu0 %v15940_v0  ;;  %6792 = vmatprep.mubr.bf16.mxu1 %v15940_v0 }
 0x555   :  { %v4660_v31 = vadd.f32 %v4659_v29, %v15529_v32  ;;  %v4853_v61 = vadd.f32 %v4852_v9, %v15532_v11  ;;  %v4661_v51 = vpop.f32.mrb[191].mxu0  ;;  %v4854_v24 = vpop.f32.mrb[191].mxu1  ;;  %6407 = vmatmul.mubr.bf16.gmra.mrb[248].mxu0 %v15936_v14  ;;  %6793 = vmatmul.mubr.bf16.gmra.mrb[248].mxu1 %v15936_v14  ;;  %v4977_v63 = vmax.f32 %v4656_v44, 0.0  ;;  %v4979_v49 = vmax.f32 %v4849_v54, 0.0  ;;  %v12139_v44 = vld [vmem:[%s17459_s8 + $0x4c] ss:$28 sps:$4 sm:$0xff]  }
 0x556   :  { %v4662_v16 = vadd.f32 %v4661_v51, %v15535_v19  ;;  %v4855_v37 = vadd.f32 %v4854_v24, %v15538_v62  ;;  %v4978_v17 = vmax.f32 %v4658_v21, 0.0  ;;  %v4980_v50 = vmax.f32 %v4851_v28, 0.0  ;;  %v12132_v19 = vld [vmem:[%s17459_s8 + $0x10] ss:$28 sps:$4 sm:$0xff]   ;;  %v12136_v62 = vld [vmem:[%s17459_s8 + $0x18] ss:$28 sps:$4 sm:$0xff]  }
 0x557   :  { %v4981_v36 = vmax.f32 %v4660_v31, 0.0  ;;  %v4983_v42 = vmax.f32 %v4853_v61, 0.0  ;;  %v12143_v54 = vld [vmem:[%s17459_s8 + $0x210] ss:$28 sps:$4 sm:$0xff]   ;;  %v12137_v21 = vld [vmem:[%s17459_s8 + $0x48] ss:$28 sps:$4 sm:$0xff]  }
 0x558   :  { %v4982_v40 = vmax.f32 %v4662_v16, 0.0  ;;  %v4984_v32 = vmax.f32 %v4855_v37, 0.0  ;;  %v12144_v28 = vld [vmem:[%s17459_s8 + $0x50] ss:$28 sps:$4 sm:$0xff]   ;;  %v12142_v31 = vld [vmem:[%s17459_s8 + $0x84] ss:$28 sps:$4 sm:$0xff]  }
 0x559   :  { %v15956_v29 = vpack.c.bf16 %v4981_v36, %v4977_v63  ;;  %v15958_v11 = vpack.c.bf16 %v4983_v42, %v4979_v49  ;;  %v12151_v61 = vld [vmem:[%s17459_s8 + $0x248] ss:$28 sps:$4 sm:$0xff]   ;;  %v12140_v51 = vld [vmem:[%s17459_s8 + $0x80] ss:$28 sps:$4 sm:$0xff]   ;;  %v12145_v63 = vld [vmem:[%s17459_s8 + $0xb8] ss:$28 sps:$4 sm:$0xff]  }
 0x55a   :  { %v15960_v9 = vpack.c.bf16 %v4982_v40, %v4978_v17  ;;  %v15962_v0 = vpack.c.bf16 %v4984_v32, %v4980_v50  ;;  %v12152_v24 = vld [vmem:[%s17459_s8 + $0x88] ss:$28 sps:$4 sm:$0xff]   ;;  %v12147_v16 = vld [vmem:[%s17459_s8 + $0xbc] ss:$28 sps:$4 sm:$0xff]   ;;  %v12150_v36 = vld [vmem:[%s17459_s8 + $0xf4] ss:$28 sps:$4 sm:$0xff]  }
 0x55b   :  { %17579 = vst [vmem:[#allocation46_spill] sm:$0xff] %v15958_v11  ;;  %v12159_v37 = vld [vmem:[%s17459_s8 + $0x280] ss:$28 sps:$4 sm:$0xff]   ;;  %v12167_v42 = vld [vmem:[%s17459_s8 + $0x2b8] ss:$28 sps:$4 sm:$0xff]  }
 0x55c   :  { %17580 = vst [vmem:[#allocation47_spill] sm:$0xff] %v15962_v0  ;;  %6416 = vmatprep.mubr.bf16.mxu0 %v15960_v9  ;;  %6802 = vmatprep.mubr.bf16.mxu1 %v15960_v9  ;;  %v12160_v49 = vld [vmem:[%s17459_s8 + $0xc0] ss:$28 sps:$4 sm:$0xff]   ;;  %v12148_v17 = vld [vmem:[%s17459_s8 + $0xf0] ss:$28 sps:$4 sm:$0xff]  }
 0x55d   :  { %6417 = vmatmul.mubr.bf16.gmra.mrb[252].mxu0 %v15956_v29  ;;  %6803 = vmatmul.mubr.bf16.gmra.mrb[252].mxu1 %v15956_v29  ;;  %v12168_v50 = vld [vmem:[%s17459_s8 + $0xf8] ss:$28 sps:$4 sm:$0xff]   ;;  %v12155_v40 = vld [vmem:[%s17459_s8 + $0x12c] ss:$28 sps:$4 sm:$0xff]  }
 0x55e   :  { %10191 = vmatprep.mubr.msk.bf16.mxu0 %vm1574_vm0, %v15554_v15  ;;  %10207 = vmatprep.mubr.msk.bf16.mxu1 %vm1574_vm0, %v15554_v15  ;;  %v12175_v32 = vld [vmem:[%s17459_s8 + $0x2f0] ss:$28 sps:$4 sm:$0xff]  }
 0x565   :  { %6460 = vmatmul.mubr.bf16.vlgmr.msra.gmra.mrb[192].mxu0 %v15550_v5  ;;  %6846 = vmatmul.mubr.bf16.vlgmr.msra.gmra.mrb[192].mxu1 %v15550_v5 }
 0x566   :  { %10192 = vmatprep.mubr.msk.bf16.mxu0 %vm1574_vm0, %v15598_v59  ;;  %10208 = vmatprep.mubr.msk.bf16.mxu1 %vm1574_vm0, %v15598_v59 }
 0x567   :  { %7007 = vmatpush1.bf16.msra.mxu0 %v12132_v19  ;;  %10624 = vmatpush3.bf16.msra.mxu1 %v12136_v62  ;;  %v12153_v19 = vld [vmem:[%s17459_s8 + $0x128] ss:$28 sps:$4 sm:$0xff]   ;;  %v12176_v62 = vld [vmem:[%s17459_s8 + $0x130] ss:$28 sps:$4 sm:$0xff]  }
 0x568   :  { %7008 = vmatprep.subr.bf16.mxu0 %v12139_v44  ;;  %10625 = vmatprep.subr.bf16.mxu1 %v12143_v54  ;;  %v12158_v44 = vld [vmem:[%s17459_s8 + $0x164] ss:$28 sps:$4 sm:$0xff]  }
 0x569   :  { %v12183_v54 = vld [vmem:[%s17459_s8 + $0x328] ss:$28 sps:$4 sm:$0xff]  }
 0x56b   :  { %7009 = vmatpush1.bf16.msra.mxu0 %v12137_v21  ;;  %10626 = vmatpush3.bf16.msra.mxu1 %v12144_v28  ;;  %v12156_v21 = vld [vmem:[%s17459_s8 + $0x160] ss:$28 sps:$4 sm:$0xff]   ;;  %v12184_v28 = vld [vmem:[%s17459_s8 + $0x168] ss:$28 sps:$4 sm:$0xff]  }
 0x56c   :  { %7010 = vmatprep.subr.bf16.mxu0 %v12142_v31  ;;  %10627 = vmatprep.subr.bf16.mxu1 %v12151_v61  ;;  %v12163_v31 = vld [vmem:[%s17459_s8 + $0x19c] ss:$28 sps:$4 sm:$0xff]  }
 0x56d   :  { %6470 = vmatmul.mubr.bf16.gmra.mrb[196].mxu0 %v15594_v39  ;;  %6856 = vmatmul.mubr.bf16.gmra.mrb[196].mxu1 %v15594_v39  ;;  %v12191_v61 = vld [vmem:[%s17459_s8 + $0x360] ss:$28 sps:$4 sm:$0xff]  }
 0x56e   :  { %10193 = vmatprep.mubr.msk.bf16.mxu0 %vm1574_vm0, %v15642_v27  ;;  %10209 = vmatprep.mubr.msk.bf16.mxu1 %vm1574_vm0, %v15642_v27 }
 0x56f   :  { %7011 = vmatpush1.bf16.msra.mxu0 %v12140_v51  ;;  %10628 = vmatpush3.bf16.msra.mxu1 %v12152_v24  ;;  %v12161_v51 = vld [vmem:[%s17459_s8 + $0x198] ss:$28 sps:$4 sm:$0xff]   ;;  %v12192_v24 = vld [vmem:[%s17459_s8 + $0x1a0] ss:$28 sps:$4 sm:$0xff]  }
 0x570   :  { %7012 = vmatprep.subr.bf16.mxu0 %v12147_v16  ;;  %10629 = vmatprep.subr.bf16.mxu1 %v12159_v37  ;;  %v12166_v16 = vld [vmem:[%s17459_s8 + $0x1d4] ss:$28 sps:$4 sm:$0xff]  }
 0x571   :  { %v12164_v37 = vld [vmem:[%s17459_s8 + $0x1d0] ss:$28 sps:$4 sm:$0xff]  }
 0x573   :  { %7013 = vmatpush1.bf16.msra.mxu0 %v12145_v63  ;;  %10630 = vmatpush3.bf16.msra.mxu1 %v12160_v49  ;;  %v12171_v63 = vld [vmem:[%s17459_s8 + $0x20c] ss:$28 sps:$4 sm:$0xff]   ;;  %v17581_v49 = vmov 0  }
 0x574   :  { %7014 = vmatprep.subr.bf16.mxu0 %v12150_v36  ;;  %10631 = vmatprep.subr.bf16.mxu1 %v12167_v42  ;;  %v12169_v36 = vld [vmem:[%s17459_s8 + $0x208] ss:$28 sps:$4 sm:$0xff]  }
 0x575   :  { %6480 = vmatmul.mubr.bf16.gmra.mrb[200].mxu0 %v15638_v23  ;;  %6866 = vmatmul.mubr.bf16.gmra.mrb[200].mxu1 %v15638_v23  ;;  %v12174_v42 = vld [vmem:[%s17459_s8 + $0x244] ss:$28 sps:$4 sm:$0xff]  }
 0x576   :  { %10194 = vmatprep.mubr.msk.bf16.mxu0 %vm1574_vm0, %v15686_v12  ;;  %10210 = vmatprep.mubr.msk.bf16.mxu1 %vm1574_vm0, %v15686_v12 }
 0x577   :  { %7015 = vmatpush1.bf16.msra.mxu0 %v12148_v17  ;;  %10632 = vmatpush3.bf16.msra.mxu1 %v12168_v50  ;;  %v12172_v17 = vld [vmem:[%s17459_s8 + $0x240] ss:$28 sps:$4 sm:$0xff]  }
 0x578   :  { %7016 = vmatprep.subr.bf16.mxu0 %v12155_v40  ;;  %10633 = vmatprep.subr.bf16.mxu1 %v12175_v32  ;;  %v12179_v50 = vld [vmem:[%s17459_s8 + $0x27c] ss:$28 sps:$4 sm:$0xff]   ;;  %v12182_v32 = vld [vmem:[%s17459_s8 + $0x2b4] ss:$28 sps:$4 sm:$0xff]  }
 0x579   :  { %v12177_v40 = vld [vmem:[%s17459_s8 + $0x278] ss:$28 sps:$4 sm:$0xff]  }
 0x57b   :  { %7017 = vmatpush1.bf16.msra.mxu0 %v12153_v19  ;;  %10634 = vmatpush3.bf16.msra.mxu1 %v12176_v62  ;;  %v12180_v19 = vld [vmem:[%s17459_s8 + $0x2b0] ss:$28 sps:$4 sm:$0xff]  }
 0x57c   :  { %7018 = vmatprep.subr.bf16.mxu0 %v12158_v44  ;;  %10635 = vmatprep.subr.bf16.mxu1 %v12183_v54  ;;  %v12187_v62 = vld [vmem:[%s17459_s8 + $0x2ec] ss:$28 sps:$4 sm:$0xff]   ;;  %v12190_v54 = vld [vmem:[%s17459_s8 + $0x324] ss:$28 sps:$4 sm:$0xff]  }
 0x57d   :  { %6490 = vmatmul.mubr.bf16.gmra.mrb[204].mxu0 %v15682_v34  ;;  %6876 = vmatmul.mubr.bf16.gmra.mrb[204].mxu1 %v15682_v34  ;;  %v12185_v44 = vld [vmem:[%s17459_s8 + $0x2e8] ss:$28 sps:$4 sm:$0xff]  }
 0x57e   :  { %10195 = vmatprep.mubr.msk.bf16.mxu0 %vm1574_vm0, %v15730_v41  ;;  %10211 = vmatprep.mubr.msk.bf16.mxu1 %vm1574_vm0, %v15730_v41 }
 0x57f   :  { %7019 = vmatpush1.bf16.msra.mxu0 %v12156_v21  ;;  %10636 = vmatpush3.bf16.msra.mxu1 %v12184_v28  ;;  %v12188_v21 = vld [vmem:[%s17459_s8 + $0x320] ss:$28 sps:$4 sm:$0xff]  }
 0x580   :  { %7020 = vmatprep.subr.bf16.mxu0 %v12163_v31  ;;  %10637 = vmatprep.subr.bf16.mxu1 %v12191_v61  ;;  %v12195_v28 = vld [vmem:[%s17459_s8 + $0x35c] ss:$28 sps:$4 sm:$0xff]   ;;  %v12198_v61 = vld [vmem:[%s17459_s8 + $0x394] ss:$28 sps:$4 sm:$0xff]  }
 0x581   :  { %v12193_v31 = vld [vmem:[%s17459_s8 + $0x358] ss:$28 sps:$4 sm:$0xff]  }
 0x583   :  { %7021 = vmatpush1.bf16.msra.mxu0 %v12161_v51  ;;  %10638 = vmatpush3.bf16.msra.mxu1 %v12192_v24  ;;  %v12196_v51 = vld [vmem:[%s17459_s8 + $0x390] ss:$28 sps:$4 sm:$0xff]   ;;  %v12199_v24 = vld [vmem:[%s17459_s8 + $0x398] ss:$28 sps:$4 sm:$0xff]  }
 0x584   :  { %7022 = vmatprep.subr.bf16.mxu0 %v12166_v16  ;;  %7553 = vmatprep.subr.bf16.mxu1 %v17581_v49  ;;  %v12202_v16 = vld [vmem:[%s17459_s8 + $0x3cc] ss:$28 sps:$4 sm:$0xff]  }
 0x585   :  { %6500 = vmatmul.mubr.bf16.gmra.mrb[208].mxu0 %v15726_v2  ;;  %6886 = vmatmul.mubr.bf16.gmra.mrb[208].mxu1 %v15726_v2 }
 0x586   :  { %10196 = vmatprep.mubr.msk.bf16.mxu0 %vm1574_vm0, %v15762_v1  ;;  %10212 = vmatprep.mubr.msk.bf16.mxu1 %vm1574_vm0, %v15762_v1 }
 0x587   :  { %7023 = vmatpush1.bf16.msra.mxu0 %v12164_v37  ;;  %v12203_v37 = vld [vmem:[%s17459_s8 + $0x3d0] ss:$28 sps:$4 sm:$0xff]  }
 0x588   :  { %7024 = vmatprep.subr.bf16.mxu0 %v12171_v63  ;;  %v12206_v63 = vld [vmem:[%s17459_s8 + $0x404] ss:$28 sps:$4 sm:$0xff]  }
 0x58b   :  { %7025 = vmatpush1.bf16.msra.mxu0 %v12169_v36  ;;  %v12210_v36 = vld [vmem:[%s17459_s8 + $0x43c] ss:$28 sps:$4 sm:$0xff]  }
 0x58c   :  { %7026 = vmatprep.subr.bf16.mxu0 %v12174_v42  ;;  %v12208_v42 = vld [vmem:[%s17459_s8 + $0x438] ss:$28 sps:$4 sm:$0xff]  }
 0x58d   :  { %6510 = vmatmul.mubr.bf16.gmra.mrb[212].mxu0 %v15758_v47  ;;  %6896 = vmatmul.mubr.bf16.gmra.mrb[212].mxu1 %v15758_v47 }
 0x58e   :  { %10197 = vmatprep.mubr.msk.bf16.mxu0 %vm1574_vm0, %v15782_v13  ;;  %10213 = vmatprep.mubr.msk.bf16.mxu1 %vm1574_vm0, %v15782_v13 }
 0x58f   :  { %7027 = vmatpush1.bf16.msra.mxu0 %v12172_v17  ;;  %v12211_v17 = vld [vmem:[%s17459_s8 + $0x440] ss:$28 sps:$4 sm:$0xff]  }
 0x590   :  { %7028 = vmatprep.subr.bf16.mxu0 %v12179_v50  ;;  %v12215_v50 = vld [vmem:[%s17459_s8 + $0x478] ss:$28 sps:$4 sm:$0xff]  }
 0x593   :  { %7029 = vmatpush1.bf16.msra.mxu0 %v12177_v40  ;;  %v12218_v40 = vld [vmem:[%s17459_s8 + $0x4ac] ss:$28 sps:$4 sm:$0xff]  }
 0x594   :  { %7030 = vmatprep.subr.bf16.mxu0 %v12182_v32  ;;  %v12216_v32 = vld [vmem:[%s17459_s8 + $0x4a8] ss:$28 sps:$4 sm:$0xff]  }
 0x595   :  { %6520 = vmatmul.mubr.bf16.gmra.mrb[216].mxu0 %v15778_v45  ;;  %6906 = vmatmul.mubr.bf16.gmra.mrb[216].mxu1 %v15778_v45 }
 0x596   :  { %10198 = vmatprep.mubr.msk.bf16.mxu0 %vm1574_vm0, %v15802_v46  ;;  %10214 = vmatprep.mubr.msk.bf16.mxu1 %vm1574_vm0, %v15802_v46 }
 0x597   :  { %7031 = vmatpush1.bf16.msra.mxu0 %v12180_v19  ;;  %v12219_v19 = vld [vmem:[%s17459_s8 + $0x4b0] ss:$28 sps:$4 sm:$0xff]  }
 0x598   :  { %7032 = vmatprep.subr.bf16.mxu0 %v12187_v62  ;;  %v12223_v62 = vld [vmem:[%s17459_s8 + $0x4e8] ss:$28 sps:$4 sm:$0xff]  }
 0x59b   :  { %7033 = vmatpush1.bf16.msra.mxu0 %v12185_v44  ;;  %v12226_v44 = vld [vmem:[%s17459_s8 + $0x51c] ss:$28 sps:$4 sm:$0xff]  }
 0x59c   :  { %7034 = vmatprep.subr.bf16.mxu0 %v12190_v54  ;;  %v12224_v54 = vld [vmem:[%s17459_s8 + $0x518] ss:$28 sps:$4 sm:$0xff]  }
 0x59d   :  { %6530 = vmatmul.mubr.bf16.gmra.mrb[220].mxu0 %v15798_v35  ;;  %6916 = vmatmul.mubr.bf16.gmra.mrb[220].mxu1 %v15798_v35 }
 0x59e   :  { %10199 = vmatprep.mubr.msk.bf16.mxu0 %vm1574_vm0, %v15822_v48  ;;  %10215 = vmatprep.mubr.msk.bf16.mxu1 %vm1574_vm0, %v15822_v48 }
 0x59f   :  { %7035 = vmatpush1.bf16.msra.mxu0 %v12188_v21  ;;  %v12227_v21 = vld [vmem:[%s17459_s8 + $0x520] ss:$28 sps:$4 sm:$0xff]  }
 0x5a0   :  { %7036 = vmatprep.subr.bf16.mxu0 %v12195_v28  ;;  %v12231_v28 = vld [vmem:[%s17459_s8 + $0x558] ss:$28 sps:$4 sm:$0xff]  }
 0x5a3   :  { %7037 = vmatpush1.bf16.msra.mxu0 %v12193_v31  ;;  %v17582_v31 = vld [vmem:[#allocation13_spill] sm:$0xff] }
 0x5a4   :  { %7199 = vmatprep.subr.bf16.mxu0 %v12198_v61  ;;  %v17583_v61 = vld [vmem:[#allocation15_spill] sm:$0xff] }
 0x5a5   :  { %6540 = vmatmul.mubr.bf16.gmra.mrb[224].mxu0 %v15818_v38  ;;  %6926 = vmatmul.mubr.bf16.gmra.mrb[224].mxu1 %v15818_v38 }
 0x5a6   :  { %10200 = vmatprep.mubr.msk.bf16.mxu0 %vm1574_vm0, %v15842_v53  ;;  %10216 = vmatprep.mubr.msk.bf16.mxu1 %vm1574_vm0, %v15842_v53 }
 0x5ad   :  { %6550 = vmatmul.mubr.bf16.gmra.mrb[228].mxu0 %v15838_v4  ;;  %6936 = vmatmul.mubr.bf16.gmra.mrb[228].mxu1 %v15838_v4 }
 0x5ae   :  { %10201 = vmatprep.mubr.msk.bf16.mxu0 %vm1574_vm0, %v15862_v7  ;;  %10217 = vmatprep.mubr.msk.bf16.mxu1 %vm1574_vm0, %v15862_v7 }
 0x5b5   :  { %6560 = vmatmul.mubr.bf16.gmra.mrb[232].mxu0 %v15858_v57  ;;  %6946 = vmatmul.mubr.bf16.gmra.mrb[232].mxu1 %v15858_v57 }
 0x5b6   :  { %10202 = vmatprep.mubr.msk.bf16.mxu0 %vm1574_vm0, %v15882_v30  ;;  %10218 = vmatprep.mubr.msk.bf16.mxu1 %vm1574_vm0, %v15882_v30 }
 0x5bd   :  { %6570 = vmatmul.mubr.bf16.gmra.mrb[236].mxu0 %v15878_v20  ;;  %6956 = vmatmul.mubr.bf16.gmra.mrb[236].mxu1 %v15878_v20 }
 0x5be   :  { %10203 = vmatprep.mubr.msk.bf16.mxu0 %vm1574_vm0, %v15902_v3  ;;  %10219 = vmatprep.mubr.msk.bf16.mxu1 %vm1574_vm0, %v15902_v3 }
 0x5c5   :  { %6580 = vmatmul.mubr.bf16.gmra.mrb[240].mxu0 %v15898_v8  ;;  %6966 = vmatmul.mubr.bf16.gmra.mrb[240].mxu1 %v15898_v8 }
 0x5c6   :  { %10204 = vmatprep.mubr.msk.bf16.mxu0 %vm1574_vm0, %v15922_v22  ;;  %10220 = vmatprep.mubr.msk.bf16.mxu1 %vm1574_vm0, %v15922_v22 }
 0x5cd   :  { %6590 = vmatmul.mubr.bf16.gmra.mrb[244].mxu0 %v15918_v33  ;;  %6976 = vmatmul.mubr.bf16.gmra.mrb[244].mxu1 %v15918_v33 }
 0x5ce   :  { %10205 = vmatprep.mubr.msk.bf16.mxu0 %vm1574_vm0, %v15942_v60  ;;  %10221 = vmatprep.mubr.msk.bf16.mxu1 %vm1574_vm0, %v15942_v60 }
 0x5d5   :  { %6600 = vmatmul.mubr.bf16.gmra.mrb[248].mxu0 %v15938_v18  ;;  %6986 = vmatmul.mubr.bf16.gmra.mrb[248].mxu1 %v15938_v18 }
 0x5d6   :  { %10206 = vmatprep.mubr.msk.bf16.mxu0 %vm1574_vm0, %v15962_v0  ;;  %10222 = vmatprep.mubr.msk.bf16.mxu1 %vm1574_vm0, %v15962_v0 }
 0x5dd   :  { %6610 = vmatmul.mubr.bf16.gmra.mrb[252].mxu0 %v15958_v11  ;;  %6996 = vmatmul.mubr.bf16.gmra.mrb[252].mxu1 %v15958_v11 }
 0x5de   :  { %7038 = vmatprep.mubr.bf16.mxu0 %v15552_v6  ;;  %7424 = vmatprep.mubr.bf16.mxu1 %v15552_v6  ;;  %v12200_v6 = vld [vmem:[%s17459_s8 + $0x3c8] ss:$28 sps:$4 sm:$0xff]  }
 0x5e5   :  { %7039 = vmatmul.mubr.bf16.vlgmr.msra.gmra.mrb[0].mxu0 %v15548_v56  ;;  %7425 = vmatmul.mubr.bf16.vlgmr.msra.gmra.mrb[0].mxu1 %v15548_v56  ;;  %v12204_v56 = vld [vmem:[%s17459_s8 + $0x400] ss:$28 sps:$4 sm:$0xff]  }
 0x5e6   :  { %7048 = vmatprep.mubr.bf16.mxu0 %v15596_v43  ;;  %7200 = vmatpush1.bf16.msra.mxu0 %v12196_v51  ;;  %v17584_v51 = vld [vmem:[#allocation14_spill] sm:$0xff] }
 0x5e7   :  { %7432 = vmatprep.mubr.bf16.mxu1 %v15596_v43  ;;  %7554 = vmatpush1.bf16.msra.mxu1 %v12199_v24  ;;  %v12207_v43 = vld [vmem:[%s17459_s8 + $0x408] ss:$28 sps:$4 sm:$0xff]  }
 0x5e8   :  { %7201 = vmatprep.subr.bf16.mxu0 %v12202_v16  ;;  %7555 = vmatprep.subr.bf16.mxu1 %v17581_v49  ;;  %v17585_v24 = vld [vmem:[#allocation17_spill] sm:$0xff]  ;;  %v17586_v16 = vld [vmem:[#allocation16_spill] sm:$0xff] }
 0x5ea   :  { %7202 = vmatpush1.bf16.msra.mxu0 %v12200_v6  ;;  %v17588_v6 = vld [vmem:[#allocation18_spill] sm:$0xff] }
 0x5eb   :  { %7556 = vmatpush1.bf16.msra.mxu1 %v12203_v37  ;;  %7203 = vmatprep.subr.bf16.mxu0 %v12206_v63  ;;  %v17589_v37 = vld [vmem:[#allocation22_spill] sm:$0xff]  ;;  %v17590_v63 = vld [vmem:[#allocation20_spill] sm:$0xff] }
 0x5ec   :  { %7557 = vmatprep.subr.bf16.mxu1 %v17581_v49 }
 0x5ed   :  { %7049 = vmatmul.mubr.bf16.gmra.mrb[4].mxu0 %v15592_v52  ;;  %7433 = vmatmul.mubr.bf16.gmra.mrb[4].mxu1 %v15592_v52  ;;  %v12214_v52 = vld [vmem:[%s17459_s8 + $0x474] ss:$28 sps:$4 sm:$0xff]  }
 0x5ee   :  { %7058 = vmatprep.mubr.bf16.mxu0 %v15640_v26  ;;  %7440 = vmatprep.mubr.bf16.mxu1 %v15640_v26  ;;  %v12212_v26 = vld [vmem:[%s17459_s8 + $0x470] ss:$28 sps:$4 sm:$0xff]  }
 0x5ef   :  { %7204 = vmatpush1.bf16.msra.mxu0 %v12204_v56  ;;  %7558 = vmatpush1.bf16.msra.mxu1 %v12207_v43  ;;  %v17591_v56 = vld [vmem:[#allocation25_spill] sm:$0xff]  ;;  %v17592_v43 = vld [vmem:[#allocation23_spill] sm:$0xff] }
 0x5f0   :  { %7205 = vmatprep.subr.bf16.mxu0 %v12210_v36  ;;  %7559 = vmatprep.subr.bf16.mxu1 %v17581_v49  ;;  %v17593_v36 = vld [vmem:[#allocation29_spill] sm:$0xff] }
 0x5f3   :  { %7206 = vmatpush1.bf16.msra.mxu0 %v12208_v42  ;;  %7560 = vmatpush1.bf16.msra.mxu1 %v12211_v17  ;;  %v5249_v42 = vld [vmem:[%s17460_s9] sm:$0xff]  ;;  %v17594_v17 = vld [vmem:[#allocation27_spill] sm:$0xff] }
 0x5f4   :  { %7207 = vmatprep.subr.bf16.mxu0 %v12214_v52  ;;  %7561 = vmatprep.subr.bf16.mxu1 %v17581_v49  ;;  %v17595_v52 = vld [vmem:[#allocation9_spill] sm:$0xff] }
 0x5f5   :  { %7059 = vmatmul.mubr.bf16.gmra.mrb[8].mxu0 %v15636_v55  ;;  %7441 = vmatmul.mubr.bf16.gmra.mrb[8].mxu1 %v15636_v55  ;;  %v12222_v55 = vld [vmem:[%s17459_s8 + $0x4e4] ss:$28 sps:$4 sm:$0xff]  }
 0x5f6   :  { %7068 = vmatprep.mubr.bf16.mxu0 %v15684_v25  ;;  %7448 = vmatprep.mubr.bf16.mxu1 %v15684_v25  ;;  %v12220_v25 = vld [vmem:[%s17459_s8 + $0x4e0] ss:$28 sps:$4 sm:$0xff]  }
 0x5f7   :  { %7208 = vmatpush1.bf16.msra.mxu0 %v12212_v26  ;;  %7562 = vmatpush1.bf16.msra.mxu1 %v12215_v50  ;;  %v16340_v26 = vrot.slane %v5249_v42, %v17595_v52  ;;  %v17596_v50 = vld [vmem:[#allocation10_spill] sm:$0xff] }
 0x5f8   :  { %7209 = vmatprep.subr.bf16.mxu0 %v12218_v40  ;;  %7563 = vmatprep.subr.bf16.mxu1 %v17581_v49  ;;  %v16343_v40 = vrot.slane %v5249_v42, %v17596_v50 }
 0x5fb   :  { %7210 = vmatpush1.bf16.msra.mxu0 %v12216_v32  ;;  %7564 = vmatpush1.bf16.msra.mxu1 %v12219_v19  ;;  %v17597_v32 = vld [vmem:[#allocation33_spill] sm:$0xff]  ;;  %v17598_v19 = vld [vmem:[#allocation11_spill] sm:$0xff] }
 0x5fc   :  { %7211 = vmatprep.subr.bf16.mxu0 %v12222_v55  ;;  %7565 = vmatprep.subr.bf16.mxu1 %v17581_v49  ;;  %v16348_v55 = vrot.slane %v5249_v42, %v17598_v19 }
 0x5fd   :  { %7069 = vmatmul.mubr.bf16.gmra.mrb[12].mxu0 %v15680_v10  ;;  %7449 = vmatmul.mubr.bf16.gmra.mrb[12].mxu1 %v15680_v10  ;;  %v12230_v10 = vld [vmem:[%s17459_s8 + $0x554] ss:$28 sps:$4 sm:$0xff]  }
 0x5fe   :  { %7078 = vmatprep.mubr.bf16.mxu0 %v15728_v58  ;;  %7456 = vmatprep.mubr.bf16.mxu1 %v15728_v58  ;;  %v12228_v58 = vld [vmem:[%s17459_s8 + $0x550] ss:$28 sps:$4 sm:$0xff]  }
 0x5ff   :  { %7212 = vmatpush1.bf16.msra.mxu0 %v12220_v25  ;;  %7566 = vmatpush1.bf16.msra.mxu1 %v12223_v62  ;;  %v17599_v25 = vld [vmem:[#allocation12_spill] sm:$0xff] }
 0x600   :  { %7213 = vmatprep.subr.bf16.mxu0 %v12226_v44  ;;  %7567 = vmatprep.subr.bf16.mxu1 %v17581_v49  ;;  %v16351_v62 = vrot.slane %v5249_v42, %v17599_v25  ;;  %v17600_v25 = vld [vmem:[#allocation31_spill] sm:$0xff] }
 0x603   :  { %7214 = vmatpush1.bf16.msra.mxu0 %v12224_v54  ;;  %7568 = vmatpush1.bf16.msra.mxu1 %v12227_v21 }
 0x604   :  { %7215 = vmatprep.subr.bf16.mxu0 %v12230_v10  ;;  %7569 = vmatprep.subr.bf16.mxu1 %v17581_v49  ;;  %v17587_v49 = vld [vmem:[#allocation19_spill] sm:$0xff] }
 0x605   :  { %7079 = vmatmul.mubr.bf16.gmra.mrb[16].mxu0 %v17582_v31  ;;  %7457 = vmatmul.mubr.bf16.gmra.mrb[16].mxu1 %v17582_v31 }
 0x606   :  { %7088 = vmatprep.mubr.bf16.mxu0 %v17583_v61  ;;  %7464 = vmatprep.mubr.bf16.mxu1 %v17583_v61 }
 0x607   :  { %7216 = vmatpush1.bf16.msra.mxu0 %v12228_v58  ;;  %7570 = vmatpush1.bf16.msra.mxu1 %v12231_v28 }
 0x60d   :  { %7089 = vmatmul.mubr.bf16.gmra.mrb[20].mxu0 %v17584_v51  ;;  %7465 = vmatmul.mubr.bf16.gmra.mrb[20].mxu1 %v17584_v51 }
 0x60e   :  { %7098 = vmatprep.mubr.bf16.mxu0 %v17585_v24  ;;  %7472 = vmatprep.mubr.bf16.mxu1 %v17585_v24 }
 0x615   :  { %7099 = vmatmul.mubr.bf16.gmra.mrb[24].mxu0 %v17586_v16  ;;  %7473 = vmatmul.mubr.bf16.gmra.mrb[24].mxu1 %v17586_v16 }
 0x616   :  { %7108 = vmatprep.mubr.bf16.mxu0 %v17587_v49  ;;  %7480 = vmatprep.mubr.bf16.mxu1 %v17587_v49 }
 0x61d   :  { %7109 = vmatmul.mubr.bf16.gmra.mrb[28].mxu0 %v17588_v6  ;;  %7481 = vmatmul.mubr.bf16.gmra.mrb[28].mxu1 %v17588_v6 }
 0x61e   :  { %7118 = vmatprep.mubr.bf16.mxu0 %v17589_v37  ;;  %7488 = vmatprep.mubr.bf16.mxu1 %v17589_v37 }
 0x625   :  { %7119 = vmatmul.mubr.bf16.gmra.mrb[32].mxu0 %v17590_v63  ;;  %7489 = vmatmul.mubr.bf16.gmra.mrb[32].mxu1 %v17590_v63 }
 0x626   :  { %7128 = vmatprep.mubr.bf16.mxu0 %v17591_v56  ;;  %7496 = vmatprep.mubr.bf16.mxu1 %v17591_v56 }
 0x62d   :  { %7129 = vmatmul.mubr.bf16.gmra.mrb[36].mxu0 %v17592_v43  ;;  %7497 = vmatmul.mubr.bf16.gmra.mrb[36].mxu1 %v17592_v43 }
 0x62e   :  { %7138 = vmatprep.mubr.bf16.mxu0 %v17593_v36  ;;  %7504 = vmatprep.mubr.bf16.mxu1 %v17593_v36 }
 0x635   :  { %7139 = vmatmul.mubr.bf16.gmra.mrb[40].mxu0 %v17594_v17  ;;  %7505 = vmatmul.mubr.bf16.gmra.mrb[40].mxu1 %v17594_v17 }
 0x636   :  { %7148 = vmatprep.mubr.bf16.mxu0 %v17597_v32  ;;  %7512 = vmatprep.mubr.bf16.mxu1 %v17597_v32 }
 0x638   :  { %v6461_v44 = vpop.f32.mrb[192].mxu0  ;;  %v6847_v54 = vpop.f32.mrb[192].mxu1 }
 0x639   :  { %v10863_v21 = vadd.f32 %v6461_v44, %v16340_v26  ;;  %v10927_v10 = vadd.f32 %v6847_v54, %v16343_v40  ;;  %v6463_v58 = vpop.f32.mrb[193].mxu0  ;;  %v6849_v28 = vpop.f32.mrb[193].mxu1 }
 0x63a   :  { %v10864_v31 = vadd.f32 %v6463_v58, %v16348_v55  ;;  %v10928_v61 = vadd.f32 %v6849_v28, %v16351_v62  ;;  %v6465_v51 = vpop.f32.mrb[194].mxu0  ;;  %v6851_v24 = vpop.f32.mrb[194].mxu1  ;;  %v17601_v58 = vld [vmem:[#allocation37_spill] sm:$0xff] }
 0x63b   :  { %v7714_v16 = vsub.f32 0.0, %v10863_v21  ;;  %v7716_v49 = vsub.f32 0.0, %v10927_v10  ;;  %v10865_v6 = vadd.f32 %v6465_v51, %v16340_v26  ;;  %v10929_v37 = vadd.f32 %v6851_v24, %v16343_v40  ;;  %v6467_v63 = vpop.f32.mrb[195].mxu0  ;;  %v6853_v56 = vpop.f32.mrb[195].mxu1 }
 0x63c   :  { %v7715_v43 = vsub.f32 0.0, %v10864_v31  ;;  %v7717_v36 = vsub.f32 0.0, %v10928_v61  ;;  %v10866_v42 = vadd.f32 %v6467_v63, %v16348_v55  ;;  %v10930_v17 = vadd.f32 %v6853_v56, %v16351_v62 }
 0x63d   :  { %v7938_v52 = vmul.f32 1.442695, %v7714_v16  ;;  %v7942_v50 = vmul.f32 1.442695, %v7716_v49  ;;  %v7721_v32 = vsub.f32 0.0, %v10865_v6  ;;  %v7723_v19 = vsub.f32 0.0, %v10929_v37  ;;  %7149 = vmatmul.mubr.bf16.gmra.mrb[44].mxu0 %v17600_v25  ;;  %7513 = vmatmul.mubr.bf16.gmra.mrb[44].mxu1 %v17600_v25 }
 0x63e   :  { %v7940_v44 = vmul.f32 1.442695, %v7715_v43  ;;  %v7944_v54 = vmul.f32 1.442695, %v7717_v36  ;;  %v7722_v21 = vsub.f32 0.0, %v10866_v42  ;;  %v7724_v10 = vsub.f32 0.0, %v10930_v17  ;;  %7158 = vmatprep.mubr.bf16.mxu0 %v17601_v58  ;;  %7520 = vmatprep.mubr.bf16.mxu1 %v17601_v58 }
 0x63f   :  { %12296 = vpow2.f32 %v7938_v52  ;;  %v7952_v28 = vmul.f32 1.442695, %v7721_v32  ;;  %v7956_v31 = vmul.f32 1.442695, %v7723_v19  ;;  %v17602_v58 = vld [vmem:[#allocation35_spill] sm:$0xff] }
 0x640   :  { %12298 = vpow2.f32 %v7942_v50  ;;  %v6471_v61 = vpop.f32.mrb[196].mxu0  ;;  %v6857_v51 = vpop.f32.mrb[196].mxu1  ;;  %v7954_v24 = vmul.f32 1.442695, %v7722_v21  ;;  %v7958_v63 = vmul.f32 1.442695, %v7724_v10 }
 0x641   :  { %12300 = vpow2.f32 %v7940_v44  ;;  %v10867_v16 = vadd.f32 %v6471_v61, %v16340_v26  ;;  %v10931_v49 = vadd.f32 %v6857_v51, %v16343_v40  ;;  %v6473_v6 = vpop.f32.mrb[197].mxu0  ;;  %v6859_v37 = vpop.f32.mrb[197].mxu1  ;;  %v17603_v51 = vld [vmem:[#allocation41_spill] sm:$0xff] }
 0x642   :  { %12302 = vpow2.f32 %v7944_v54  ;;  %v10868_v56 = vadd.f32 %v6473_v6, %v16348_v55  ;;  %v10932_v43 = vadd.f32 %v6859_v37, %v16351_v62  ;;  %v6475_v36 = vpop.f32.mrb[198].mxu0  ;;  %v6861_v42 = vpop.f32.mrb[198].mxu1 }
 0x643   :  { %12304 = vpow2.f32 %v7952_v28  ;;  %v7728_v17 = vsub.f32 0.0, %v10867_v16  ;;  %v7730_v52 = vsub.f32 0.0, %v10931_v49  ;;  %v10869_v50 = vadd.f32 %v6475_v36, %v16340_v26  ;;  %v6477_v32 = vpop.f32.mrb[199].mxu0  ;;  %v6863_v19 = vpop.f32.mrb[199].mxu1 }
 0x644   :  { %12306 = vpow2.f32 %v7956_v31  ;;  %v7729_v25 = vsub.f32 0.0, %v10868_v56  ;;  %v7731_v44 = vsub.f32 0.0, %v10932_v43  ;;  %v10933_v6 = vadd.f32 %v6861_v42, %v16343_v40 }
 0x645   :  { %12308 = vpow2.f32 %v7954_v24  ;;  %v7966_v21 = vmul.f32 1.442695, %v7728_v17  ;;  %v7970_v54 = vmul.f32 1.442695, %v7730_v52  ;;  %v7735_v10 = vsub.f32 0.0, %v10869_v50  ;;  %7159 = vmatmul.mubr.bf16.gmra.mrb[48].mxu0 %v17602_v58  ;;  %7521 = vmatmul.mubr.bf16.gmra.mrb[48].mxu1 %v17602_v58 }
 0x646   :  { %12310 = vpow2.f32 %v7958_v63  ;;  %v7968_v61 = vmul.f32 1.442695, %v7729_v25  ;;  %v7972_v28 = vmul.f32 1.442695, %v7731_v44  ;;  %7168 = vmatprep.mubr.bf16.mxu0 %v17603_v51  ;;  %7528 = vmatprep.mubr.bf16.mxu1 %v17603_v51  ;;  %v10870_v63 = vadd.f32 %v6477_v32, %v16348_v55  ;;  %v17604_v51 = vld [vmem:[#allocation39_spill] sm:$0xff] }
 0x647   :  { %12312 = vpow2.f32 %v7966_v21  ;;  %v7980_v16 = vmul.f32 1.442695, %v7735_v10 }
 0x648   :  { %12314 = vpow2.f32 %v7970_v54  ;;  %v6481_v31 = vpop.f32.mrb[200].mxu0  ;;  %v6867_v49 = vpop.f32.mrb[200].mxu1 }
 0x649   :  { %v12297_v24 = vpop.eup %12296  ;;  %12316 = vpow2.f32 %v7968_v61  ;;  %v6483_v37 = vpop.f32.mrb[201].mxu0  ;;  %v7737_v61 = vsub.f32 0.0, %v10933_v6 }
 0x64a   :  { %v6869_v56 = vpop.f32.mrb[201].mxu1  ;;  %v12299_v43 = vpop.eup %12298  ;;  %v8386_v36 = vadd.f32 1.0, %v12297_v24  ;;  %12318 = vpow2.f32 %v7972_v28  ;;  %v10934_v28 = vadd.f32 %v6863_v19, %v16351_v62  ;;  %v7736_v24 = vsub.f32 0.0, %v10870_v63 }
 0x64b   :  { %v6485_v17 = vpop.f32.mrb[202].mxu0  ;;  %v6871_v52 = vpop.f32.mrb[202].mxu1  ;;  %v8388_v25 = vadd.f32 1.0, %v12299_v43  ;;  %12320 = vpow2.f32 %v7980_v16  ;;  %v17605_v43 = vld [vmem:[#allocation44_spill] sm:$0xff]  ;;  %v7984_v63 = vmul.f32 1.442695, %v7737_v61  ;;  %v10936_v61 = vadd.f32 %v6869_v56, %v16351_v62 }
 0x64c   :  { %v12301_v50 = vpop.eup %12300  ;;  %v16376_v44 = vpop.f32.mrb[203].mxu0  ;;  %12322 = vrcp.f32 %v8386_v36 }
 0x64d   :  { %v12303_v21 = vpop.eup %12302  ;;  %v8387_v54 = vadd.f32 1.0, %v12301_v50  ;;  %v16378_v10 = vpop.f32.mrb[203].mxu1  ;;  %12324 = vrcp.f32 %v8388_v25  ;;  %7169 = vmatmul.mubr.bf16.gmra.mrb[52].mxu0 %v17604_v51  ;;  %7529 = vmatmul.mubr.bf16.gmra.mrb[52].mxu1 %v17604_v51  ;;  %v10871_v25 = vadd.f32 %v6481_v31, %v16340_v26  ;;  %v7982_v31 = vmul.f32 1.442695, %v7736_v24 }
 0x64e   :  { %v12305_v42 = vpop.eup %12304  ;;  %v8389_v58 = vadd.f32 1.0, %v12303_v21  ;;  %7178 = vmatprep.mubr.bf16.mxu0 %v17605_v43  ;;  %7536 = vmatprep.mubr.bf16.mxu1 %v17605_v43  ;;  %v10935_v21 = vadd.f32 %v6867_v49, %v16343_v40 }
 0x64f   :  { %v12307_v32 = vpop.eup %12306  ;;  %12326 = vrcp.f32 %v8387_v54  ;;  %v8393_v16 = vadd.f32 1.0, %v12305_v42  ;;  %v7738_v42 = vsub.f32 0.0, %v10934_v28 }
 0x650   :  { %v12309_v36 = vpop.eup %12308  ;;  %12328 = vrcp.f32 %v8389_v58  ;;  %v8395_v50 = vadd.f32 1.0, %v12307_v32  ;;  %v6491_v11 = vpop.f32.mrb[204].mxu0  ;;  %v7744_v24 = vsub.f32 0.0, %v10935_v21  ;;  %v7745_v21 = vsub.f32 0.0, %v10936_v61 }
 0x651   :  { %v12311_v6 = vpop.eup %12310  ;;  %12330 = vrcp.f32 %v8393_v16  ;;  %v8394_v19 = vadd.f32 1.0, %v12309_v36  ;;  %v6877_v51 = vpop.f32.mrb[204].mxu1  ;;  %v10872_v16 = vadd.f32 %v6483_v37, %v16348_v55  ;;  %v10873_v37 = vadd.f32 %v6485_v17, %v16340_v26 }
 0x652   :  { %v12313_v0 = vpop.eup %12312  ;;  %12332 = vrcp.f32 %v8395_v50  ;;  %v8396_v54 = vadd.f32 1.0, %v12311_v6  ;;  %v16387_v18 = vpop.f32.mrb[205].mxu0  ;;  %v7742_v6 = vsub.f32 0.0, %v10871_v25  ;;  %v7986_v3 = vmul.f32 1.442695, %v7738_v42 }
 0x653   :  { %v16389_v43 = vpop.f32.mrb[205].mxu1  ;;  %v12315_v58 = vpop.eup %12314  ;;  %12334 = vrcp.f32 %v8394_v19  ;;  %v8400_v32 = vadd.f32 1.0, %v12313_v0 }
 0x654   :  { %v16392_v36 = vpop.f32.mrb[206].mxu0  ;;  %v16394_v49 = vpop.f32.mrb[206].mxu1  ;;  %12336 = vrcp.f32 %v8396_v54  ;;  %v8402_v50 = vadd.f32 1.0, %v12315_v58  ;;  %v10937_v54 = vadd.f32 %v6871_v52, %v16343_v40  ;;  %v7743_v58 = vsub.f32 0.0, %v10872_v16 }
 0x655   :  { %v12317_v60 = vpop.eup %12316  ;;  %v16397_v28 = vpop.f32.mrb[207].mxu0  ;;  %12338 = vrcp.f32 %v8400_v32  ;;  %7179 = vmatmul.mubr.bf16.gmra.mrb[56].mxu0 %v15936_v14  ;;  %7537 = vmatmul.mubr.bf16.gmra.mrb[56].mxu1 %v15936_v14  ;;  %v10938_v52 = vadd.f32 %v16378_v10, %v16351_v62  ;;  %v7998_v14 = vmul.f32 1.442695, %v7744_v24  ;;  %v7749_v32 = vsub.f32 0.0, %v10873_v37 }
 0x656   :  { %v16399_v33 = vpop.f32.mrb[207].mxu1  ;;  %v12319_v22 = vpop.eup %12318  ;;  %v8401_v0 = vadd.f32 1.0, %v12317_v60  ;;  %12340 = vrcp.f32 %v8402_v50  ;;  %v10874_v60 = vadd.f32 %v16376_v44, %v16348_v55  ;;  %7188 = vmatprep.mubr.bf16.mxu0 %v15960_v9  ;;  %7544 = vmatprep.mubr.bf16.mxu1 %v15960_v9  ;;  %v10875_v16 = vadd.f32 %v6491_v11, %v16340_v26 }
 0x657   :  { %v12321_v19 = vpop.eup %12320  ;;  %v8403_v8 = vadd.f32 1.0, %v12319_v22  ;;  %v7994_v22 = vmul.f32 1.442695, %v7742_v6  ;;  %v7751_v9 = vsub.f32 0.0, %v10937_v54  ;;  %v7996_v24 = vmul.f32 1.442695, %v7743_v58 }
 0x658   :  { %v12323_v56 = vpop.eup %12322  ;;  %12342 = vrcp.f32 %v8401_v0  ;;  %v8407_v25 = vadd.f32 1.0, %v12321_v19  ;;  %v16412_v50 = vpop.f32.mrb[208].mxu0  ;;  %v7750_v37 = vsub.f32 0.0, %v10874_v60  ;;  %v7752_v54 = vsub.f32 0.0, %v10938_v52 }
 0x659   :  { %v12325_v17 = vpop.eup %12324  ;;  %12344 = vrcp.f32 %v8403_v8  ;;  %v16414_v44 = vpop.f32.mrb[208].mxu1  ;;  %v10939_v8 = vadd.f32 %v6877_v51, %v16343_v40  ;;  %v7756_v57 = vsub.f32 0.0, %v10875_v16  ;;  %v8012_v60 = vmul.f32 1.442695, %v7751_v9 }
 0x65a   :  { %v12327_v42 = vpop.eup %12326  ;;  %12346 = vrcp.f32 %v8407_v25  ;;  %v16417_v6 = vpop.f32.mrb[209].mxu0  ;;  %v8010_v52 = vmul.f32 1.442695, %v7750_v37 }
 0x65b   :  { %v12329_v0 = vpop.eup %12328  ;;  %v10383_v19 = vpack.c.bf16 %v12327_v42, %v12323_v56  ;;  %12348 = vpow2.f32 %v7984_v63  ;;  %v16419_v61 = vpop.f32.mrb[209].mxu1  ;;  %v8000_v63 = vmul.f32 1.442695, %v7745_v21  ;;  %v8008_v42 = vmul.f32 1.442695, %v7749_v32 }
 0x65c   :  { %v12331_v10 = vpop.eup %12330  ;;  %v10384_v25 = vpack.c.bf16 %v12329_v0, %v12325_v17  ;;  %12350 = vpow2.f32 %v7982_v31  ;;  %v16421_v11 = vpop.f32.mrb[210].mxu0  ;;  %v7758_v0 = vsub.f32 0.0, %v10939_v8  ;;  %v8022_v16 = vmul.f32 1.442695, %v7756_v57 }
 0x65d   :  { %v16423_v20 = vpop.f32.mrb[210].mxu1  ;;  %v12333_v30 = vpop.eup %12332  ;;  %9538 = vst [vmem:[#allocation2] sm:$0xff] %v10383_v19  ;;  %12352 = vpow2.f32 %v7986_v3  ;;  %7189 = vmatmul.mubr.bf16.gmra.mrb[60].mxu0 %v15956_v29  ;;  %7545 = vmatmul.mubr.bf16.gmra.mrb[60].mxu1 %v15956_v29 }
 0x65e   :  { %v16425_v56 = vpop.f32.mrb[211].mxu0  ;;  %v12335_v51 = vpop.eup %12334  ;;  %9539 = vst [vmem:[#allocation2 + $0x8] sm:$0xff] %v10384_v25  ;;  %12354 = vpow2.f32 %v7994_v22  ;;  %10223 = vmatprep.mubr.msk.bf16.mxu0 %vm1574_vm0, %v15554_v15  ;;  %10239 = vmatprep.mubr.msk.bf16.mxu1 %vm1574_vm0, %v15554_v15  ;;  %v8026_v8 = vmul.f32 1.442695, %v7758_v0 }
 0x65f   :  { %v16427_v17 = vpop.f32.mrb[211].mxu1  ;;  %v12337_v31 = vpop.eup %12336  ;;  %v10387_v58 = vpack.c.bf16 %v12335_v51, %v12331_v10  ;;  %12356 = vpow2.f32 %v7998_v14  ;;  %v8014_v14 = vmul.f32 1.442695, %v7752_v54  ;;  %v10876_v54 = vadd.f32 %v16387_v18, %v16348_v55 }
 0x660   :  { %v12339_v3 = vpop.eup %12338  ;;  %v10388_v21 = vpack.c.bf16 %v12337_v31, %v12333_v30  ;;  %12358 = vpow2.f32 %v7996_v24  ;;  %v16435_v19 = vpop.f32.mrb[212].mxu0  ;;  %v10882_v38 = vadd.f32 %v16425_v56, %v16348_v55 }
 0x661   :  { %v12341_v22 = vpop.eup %12340  ;;  %9542 = vst [vmem:[#allocation2 + $0x1c] sm:$0xff] %v10387_v58  ;;  %12360 = vpow2.f32 %v8000_v63  ;;  %v16437_v29 = vpop.f32.mrb[212].mxu1 }
 0x662   :  { %v12343_v32 = vpop.eup %12342  ;;  %9543 = vst [vmem:[#allocation2 + $0x24] sm:$0xff] %v10388_v21  ;;  %12362 = vpow2.f32 %v8008_v42  ;;  %v16439_v10 = vpop.f32.mrb[213].mxu0 }
 0x663   :  { %v12345_v30 = vpop.eup %12344  ;;  %v10391_v9 = vpack.c.bf16 %v12343_v32, %v12339_v3  ;;  %12364 = vpow2.f32 %v8012_v60  ;;  %v16441_v25 = vpop.f32.mrb[213].mxu1  ;;  %v10940_v60 = vadd.f32 %v16389_v43, %v16351_v62 }
 0x664   :  { %v16443_v15 = vpop.eup %12346  ;;  %v10392_v24 = vpack.c.bf16 %v12345_v30, %v12341_v22  ;;  %12366 = vpow2.f32 %v8010_v52  ;;  %v16445_v37 = vpop.f32.mrb[214].mxu0  ;;  %v10877_v52 = vadd.f32 %v16392_v36, %v16340_v26 }
 0x665   :  { %v16447_v63 = vpop.f32.mrb[214].mxu1  ;;  %v12349_v57 = vpop.eup %12348  ;;  %9546 = vst [vmem:[#allocation2 + $0x38] sm:$0xff] %v10391_v9  ;;  %12368 = vpow2.f32 %v8014_v14  ;;  %7232 = vmatmul.mubr.bf16.vlgmr.msra.gmra.mrb[0].mxu0 %v15550_v5  ;;  %7586 = vmatmul.mubr.bf16.vlgmr.msra.gmra.mrb[64].mxu1 %v15550_v5  ;;  %v7757_v14 = vsub.f32 0.0, %v10876_v54  ;;  %v7759_v5 = vsub.f32 0.0, %v10940_v60 }
 0x666   :  { %v16451_v51 = vpop.f32.mrb[215].mxu0  ;;  %v16453_v42 = vpop.f32.mrb[215].mxu1  ;;  %9547 = vst [vmem:[#allocation2 + $0x40] sm:$0xff] %v10392_v24  ;;  %v8409_v58 = vadd.f32 1.0, %v12349_v57  ;;  %12370 = vpow2.f32 %v8022_v16  ;;  %10224 = vmatprep.mubr.msk.bf16.mxu0 %vm1574_vm0, %v15598_v59  ;;  %10240 = vmatprep.mubr.msk.bf16.mxu1 %vm1574_vm0, %v15598_v59  ;;  %v10941_v24 = vadd.f32 %v16394_v49, %v16343_v40  ;;  %v10878_v59 = vadd.f32 %v16397_v28, %v16348_v55 }
 0x667   :  { %v12351_v31 = vpop.eup %12350  ;;  %12372 = vpow2.f32 %v8026_v8  ;;  %v7763_v60 = vsub.f32 0.0, %v10877_v52  ;;  %v10942_v49 = vadd.f32 %v16399_v33, %v16351_v62  ;;  %v10879_v52 = vadd.f32 %v16412_v50, %v16340_v26 }
 0x668   :  { %v12353_v0 = vpop.eup %12352  ;;  %v8408_v3 = vadd.f32 1.0, %v12351_v31  ;;  %12374 = vrcp.f32 %v8409_v58  ;;  %v16465_v30 = vpop.f32.mrb[216].mxu0 }
 0x669   :  { %v12355_v21 = vpop.eup %12354  ;;  %v8410_v18 = vadd.f32 1.0, %v12353_v0  ;;  %v16467_v9 = vpop.f32.mrb[216].mxu1  ;;  %v8036_v53 = vmul.f32 1.442695, %v7763_v60  ;;  %v7770_v60 = vsub.f32 0.0, %v10879_v52 }
 0x66a   :  { %v12357_v43 = vpop.eup %12356  ;;  %12376 = vrcp.f32 %v8408_v3  ;;  %v8414_v22 = vadd.f32 1.0, %v12355_v21  ;;  %v16473_v57 = vpop.f32.mrb[217].mxu0 }
 0x66b   :  { %v12359_v32 = vpop.eup %12358  ;;  %12378 = vrcp.f32 %v8410_v18  ;;  %v8416_v16 = vadd.f32 1.0, %v12357_v43  ;;  %v16475_v54 = vpop.f32.mrb[217].mxu1  ;;  %v8024_v43 = vmul.f32 1.442695, %v7757_v14 }
 0x66c   :  { %v12361_v8 = vpop.eup %12360  ;;  %12380 = vrcp.f32 %v8414_v22  ;;  %v8415_v36 = vadd.f32 1.0, %v12359_v32  ;;  %v16477_v0 = vpop.f32.mrb[218].mxu0 }
 0x66d   :  { %v12363_v31 = vpop.eup %12362  ;;  %12382 = vrcp.f32 %v8416_v16  ;;  %v8417_v58 = vadd.f32 1.0, %v12361_v8  ;;  %v16479_v3 = vpop.f32.mrb[218].mxu1  ;;  %v8028_v8 = vmul.f32 1.442695, %v7759_v5  ;;  %7242 = vmatmul.mubr.bf16.gmra.mrb[4].mxu0 %v15594_v39  ;;  %7594 = vmatmul.mubr.bf16.gmra.mrb[68].mxu1 %v15594_v39  ;;  %v10880_v39 = vadd.f32 %v16417_v6, %v16348_v55 }
 0x66e   :  { %v12365_v21 = vpop.eup %12364  ;;  %12384 = vrcp.f32 %v8415_v36  ;;  %v8421_v18 = vadd.f32 1.0, %v12363_v31  ;;  %v16483_v28 = vpop.f32.mrb[219].mxu0  ;;  %v7765_v36 = vsub.f32 0.0, %v10941_v24  ;;  %v7764_v31 = vsub.f32 0.0, %v10878_v59  ;;  %10225 = vmatprep.mubr.msk.bf16.mxu0 %vm1574_vm0, %v15642_v27  ;;  %10241 = vmatprep.mubr.msk.bf16.mxu1 %vm1574_vm0, %v15642_v27 }
 0x66f   :  { %v16485_v22 = vpop.f32.mrb[219].mxu1  ;;  %v12367_v32 = vpop.eup %12366  ;;  %12386 = vrcp.f32 %v8417_v58  ;;  %v8423_v16 = vadd.f32 1.0, %v12365_v21  ;;  %v10943_v58 = vadd.f32 %v16414_v44, %v16343_v40  ;;  %v7766_v24 = vsub.f32 0.0, %v10942_v49 }
 0x670   :  { %v12369_v7 = vpop.eup %12368  ;;  %12388 = vrcp.f32 %v8421_v18  ;;  %v8422_v4 = vadd.f32 1.0, %v12367_v32  ;;  %v10944_v44 = vadd.f32 %v16419_v61, %v16351_v62  ;;  %v16501_v21 = vpop.f32.mrb[220].mxu0  ;;  %v8040_v27 = vmul.f32 1.442695, %v7765_v36 }
 0x671   :  { %v12371_v33 = vpop.eup %12370  ;;  %12390 = vrcp.f32 %v8423_v16  ;;  %v8424_v14 = vadd.f32 1.0, %v12369_v7  ;;  %v16503_v18 = vpop.f32.mrb[220].mxu1  ;;  %v10881_v49 = vadd.f32 %v16421_v11, %v16340_v26  ;;  %v7772_v61 = vsub.f32 0.0, %v10943_v58 }
 0x672   :  { %v12373_v50 = vpop.eup %12372  ;;  %12392 = vrcp.f32 %v8422_v4  ;;  %v8428_v5 = vadd.f32 1.0, %v12371_v33  ;;  %v8038_v4 = vmul.f32 1.442695, %v7764_v31  ;;  %v16507_v16 = vpop.f32.mrb[221].mxu0  ;;  %v7771_v11 = vsub.f32 0.0, %v10880_v39 }
 0x673   :  { %v12375_v59 = vpop.eup %12374  ;;  %12394 = vrcp.f32 %v8424_v14  ;;  %v8430_v7 = vadd.f32 1.0, %v12373_v50  ;;  %17606 = vst [vmem:[#allocation13_spill] sm:$0xff] %v16507_v16  ;;  %v16509_v6 = vpop.f32.mrb[221].mxu1  ;;  %v10945_v14 = vadd.f32 %v16423_v20, %v16343_v40  ;;  %v8042_v58 = vmul.f32 1.442695, %v7766_v24 }
 0x674   :  { %v12377_v32 = vpop.eup %12376  ;;  %12396 = vrcp.f32 %v8428_v5  ;;  %17607 = vst [vmem:[#allocation15_spill] sm:$0xff] %v16509_v6  ;;  %v16514_v50 = vpop.f32.mrb[222].mxu0  ;;  %v7773_v20 = vsub.f32 0.0, %v10944_v44  ;;  %v8054_v39 = vmul.f32 1.442695, %v7772_v61 }
 0x675   :  { %v12379_v33 = vpop.eup %12378  ;;  %v10395_v52 = vpack.c.bf16 %v12377_v32, %v16443_v15  ;;  %12398 = vrcp.f32 %v8430_v7  ;;  %v16516_v5 = vpop.f32.mrb[222].mxu1  ;;  %v8050_v32 = vmul.f32 1.442695, %v7770_v60  ;;  %7252 = vmatmul.mubr.bf16.gmra.mrb[8].mxu0 %v15638_v23  ;;  %7602 = vmatmul.mubr.bf16.gmra.mrb[72].mxu1 %v15638_v23  ;;  %v7778_v60 = vsub.f32 0.0, %v10882_v38 }
 0x676   :  { %17608 = vst [vmem:[#allocation14_spill] sm:$0xff] %v16516_v5  ;;  %v12381_v36 = vpop.eup %12380  ;;  %v10396_v31 = vpack.c.bf16 %v12379_v33, %v12375_v59  ;;  %12400 = vpow2.f32 %v8024_v43  ;;  %v16520_v6 = vpop.f32.mrb[223].mxu0  ;;  %v7777_v5 = vsub.f32 0.0, %v10881_v49  ;;  %v7779_v59 = vsub.f32 0.0, %v10945_v14  ;;  %10226 = vmatprep.mubr.msk.bf16.mxu0 %vm1574_vm0, %v15686_v12  ;;  %10242 = vmatprep.mubr.msk.bf16.mxu1 %vm1574_vm0, %v15686_v12 }
 0x677   :  { %v16522_v16 = vpop.f32.mrb[223].mxu1  ;;  %v12383_v15 = vpop.eup %12382  ;;  %9550 = vst [vmem:[#allocation2 + $0x54] sm:$0xff] %v10395_v52  ;;  %12402 = vpow2.f32 %v8028_v8  ;;  %v8056_v23 = vmul.f32 1.442695, %v7773_v20 }
 0x678   :  { %v12385_v7 = vpop.eup %12384  ;;  %9551 = vst [vmem:[#allocation2 + $0x5c] sm:$0xff] %v10396_v31  ;;  %12404 = vpow2.f32 %v8036_v53  ;;  %v8052_v53 = vmul.f32 1.442695, %v7771_v11  ;;  %v16530_v49 = vpop.f32.mrb[224].mxu0  ;;  %v8064_v52 = vmul.f32 1.442695, %v7777_v5 }
 0x679   :  { %v12387_v43 = vpop.eup %12386  ;;  %v10399_v56 = vpack.c.bf16 %v12385_v7, %v12381_v36  ;;  %12406 = vpow2.f32 %v8040_v27  ;;  %v16532_v27 = vpop.f32.mrb[224].mxu1  ;;  %v8068_v38 = vmul.f32 1.442695, %v7779_v59  ;;  %v10883_v59 = vadd.f32 %v16435_v19, %v16340_v26 }
 0x67a   :  { %v12389_v8 = vpop.eup %12388  ;;  %v10400_v24 = vpack.c.bf16 %v12387_v43, %v12383_v15  ;;  %12408 = vpow2.f32 %v8038_v4  ;;  %v16534_v61 = vpop.f32.mrb[225].mxu0  ;;  %v10946_v43 = vadd.f32 %v16427_v17, %v16351_v62  ;;  %v10947_v17 = vadd.f32 %v16437_v29, %v16343_v40 }
 0x67b   :  { %v12391_v44 = vpop.eup %12390  ;;  %9554 = vst [vmem:[#allocation2 + $0x70] sm:$0xff] %v10399_v56  ;;  %12410 = vpow2.f32 %v8042_v58  ;;  %v16536_v12 = vpop.f32.mrb[225].mxu1  ;;  %v8066_v58 = vmul.f32 1.442695, %v7778_v60  ;;  %v10884_v60 = vadd.f32 %v16439_v10, %v16348_v55  ;;  %v7784_v29 = vsub.f32 0.0, %v10883_v59 }
 0x67c   :  { %v12393_v33 = vpop.eup %12392  ;;  %9555 = vst [vmem:[#allocation2 + $0x78] sm:$0xff] %v10400_v24  ;;  %12412 = vpow2.f32 %v8050_v32  ;;  %v16538_v36 = vpop.f32.mrb[226].mxu0 }
 0x67d   :  { %v12395_v14 = vpop.eup %12394  ;;  %v10403_v4 = vpack.c.bf16 %v12393_v33, %v12389_v8  ;;  %12414 = vpow2.f32 %v8054_v39  ;;  %v16540_v31 = vpop.f32.mrb[226].mxu1  ;;  %7262 = vmatmul.mubr.bf16.gmra.mrb[12].mxu0 %v15682_v34  ;;  %7610 = vmatmul.mubr.bf16.gmra.mrb[76].mxu1 %v15682_v34  ;;  %v7780_v33 = vsub.f32 0.0, %v10946_v43 }
 0x67e   :  { %v16542_v11 = vpop.eup %12396  ;;  %v10404_v15 = vpack.c.bf16 %v12395_v14, %v12391_v44  ;;  %12416 = vpow2.f32 %v8052_v53  ;;  %v16544_v20 = vpop.f32.mrb[227].mxu0  ;;  %10227 = vmatprep.mubr.msk.bf16.mxu0 %vm1574_vm0, %v15730_v41  ;;  %10243 = vmatprep.mubr.msk.bf16.mxu1 %vm1574_vm0, %v15730_v41 }
 0x67f   :  { %v16546_v5 = vpop.f32.mrb[227].mxu1  ;;  %v16548_v7 = vpop.eup %12398  ;;  %9558 = vst [vmem:[#allocation2 + $0x8c] sm:$0xff] %v10403_v4  ;;  %12418 = vpow2.f32 %v8056_v23 }
 0x680   :  { %v12401_v32 = vpop.eup %12400  ;;  %9559 = vst [vmem:[#allocation2 + $0x94] sm:$0xff] %v10404_v15  ;;  %12420 = vpow2.f32 %v8064_v52  ;;  %v16564_v44 = vpop.f32.mrb[228].mxu0 }
 0x681   :  { %v12403_v56 = vpop.eup %12402  ;;  %v8429_v39 = vadd.f32 1.0, %v12401_v32  ;;  %12422 = vpow2.f32 %v8068_v38  ;;  %v16566_v52 = vpop.f32.mrb[228].mxu1  ;;  %v7786_v32 = vsub.f32 0.0, %v10947_v17 }
 0x682   :  { %v12405_v8 = vpop.eup %12404  ;;  %v8431_v24 = vadd.f32 1.0, %v12403_v56  ;;  %12424 = vpow2.f32 %v8066_v58  ;;  %v16568_v41 = vpop.f32.mrb[229].mxu0 }
 0x683   :  { %v12407_v53 = vpop.eup %12406  ;;  %12426 = vrcp.f32 %v8429_v39  ;;  %v8435_v34 = vadd.f32 1.0, %v12405_v8  ;;  %v16570_v38 = vpop.f32.mrb[229].mxu1 }
 0x684   :  { %v12409_v19 = vpop.eup %12408  ;;  %12428 = vrcp.f32 %v8431_v24  ;;  %v8437_v23 = vadd.f32 1.0, %v12407_v53  ;;  %v16572_v15 = vpop.f32.mrb[230].mxu0  ;;  %v7785_v24 = vsub.f32 0.0, %v10884_v60  ;;  %v10885_v60 = vadd.f32 %v16445_v37, %v16340_v26 }
 0x685   :  { %v12411_v14 = vpop.eup %12410  ;;  %12430 = vrcp.f32 %v8435_v34  ;;  %v8436_v4 = vadd.f32 1.0, %v12409_v19  ;;  %17609 = vst [vmem:[#allocation17_spill] sm:$0xff] %v16572_v15  ;;  %v16574_v56 = vpop.f32.mrb[230].mxu1  ;;  %v8070_v19 = vmul.f32 1.442695, %v7780_v33  ;;  %v10948_v15 = vadd.f32 %v16441_v25, %v16351_v62  ;;  %7272 = vmatmul.mubr.bf16.gmra.mrb[16].mxu0 %v15726_v2  ;;  %7618 = vmatmul.mubr.bf16.gmra.mrb[80].mxu1 %v15726_v2 }
 0x686   :  { %v12413_v58 = vpop.eup %12412  ;;  %12432 = vrcp.f32 %v8437_v23  ;;  %v8438_v10 = vadd.f32 1.0, %v12411_v14  ;;  %v16576_v39 = vpop.f32.mrb[231].mxu0  ;;  %v8078_v14 = vmul.f32 1.442695, %v7784_v29  ;;  %10228 = vmatprep.mubr.msk.bf16.mxu0 %vm1574_vm0, %v15762_v1  ;;  %10244 = vmatprep.mubr.msk.bf16.mxu1 %vm1574_vm0, %v15762_v1  ;;  %v10949_v2 = vadd.f32 %v16447_v63, %v16343_v40 }
 0x687   :  { %v12415_v43 = vpop.eup %12414  ;;  %12434 = vrcp.f32 %v8436_v4  ;;  %v8442_v8 = vadd.f32 1.0, %v12413_v58  ;;  %v16578_v53 = vpop.f32.mrb[231].mxu1  ;;  %v8082_v4 = vmul.f32 1.442695, %v7786_v32  ;;  %v8080_v29 = vmul.f32 1.442695, %v7785_v24 }
 0x688   :  { %v12417_v34 = vpop.eup %12416  ;;  %12436 = vrcp.f32 %v8438_v10  ;;  %v8444_v59 = vadd.f32 1.0, %v12415_v43  ;;  %v10886_v37 = vadd.f32 %v16451_v51, %v16348_v55  ;;  %v16594_v43 = vpop.f32.mrb[232].mxu0  ;;  %v10950_v32 = vadd.f32 %v16453_v42, %v16351_v62 }
 0x689   :  { %v12419_v17 = vpop.eup %12418  ;;  %12438 = vrcp.f32 %v8442_v8  ;;  %v8443_v23 = vadd.f32 1.0, %v12417_v34  ;;  %17610 = vst [vmem:[#allocation16_spill] sm:$0xff] %v16594_v43  ;;  %v16596_v8 = vpop.f32.mrb[232].mxu1  ;;  %v10887_v51 = vadd.f32 %v16465_v30, %v16340_v26  ;;  %v7793_v42 = vsub.f32 0.0, %v10949_v2 }
 0x68a   :  { %v12421_v33 = vpop.eup %12420  ;;  %12440 = vrcp.f32 %v8444_v59  ;;  %v8445_v25 = vadd.f32 1.0, %v12419_v17  ;;  %17611 = vst [vmem:[#allocation19_spill] sm:$0xff] %v16596_v8  ;;  %v7787_v59 = vsub.f32 0.0, %v10948_v15  ;;  %v16600_v17 = vpop.f32.mrb[233].mxu0  ;;  %v7792_v30 = vsub.f32 0.0, %v10886_v37 }
 0x68b   :  { %v12423_v58 = vpop.eup %12422  ;;  %12442 = vrcp.f32 %v8443_v23  ;;  %v8449_v10 = vadd.f32 1.0, %v12421_v33  ;;  %v16602_v63 = vpop.f32.mrb[233].mxu1  ;;  %v7791_v33 = vsub.f32 0.0, %v10885_v60  ;;  %v7794_v2 = vsub.f32 0.0, %v10950_v32 }
 0x68c   :  { %v12425_v34 = vpop.eup %12424  ;;  %12444 = vrcp.f32 %v8445_v25  ;;  %v8451_v1 = vadd.f32 1.0, %v12423_v58  ;;  %17612 = vst [vmem:[#allocation18_spill] sm:$0xff] %v16602_v63  ;;  %v16606_v43 = vpop.f32.mrb[234].mxu0  ;;  %v10951_v58 = vadd.f32 %v16467_v9, %v16343_v40  ;;  %v10952_v9 = vadd.f32 %v16475_v54, %v16351_v62 }
 0x68d   :  { %v12427_v23 = vpop.eup %12426  ;;  %12446 = vrcp.f32 %v8449_v10  ;;  %v8450_v24 = vadd.f32 1.0, %v12425_v34  ;;  %17613 = vst [vmem:[#allocation22_spill] sm:$0xff] %v16606_v43  ;;  %v16608_v8 = vpop.f32.mrb[234].mxu1  ;;  %7282 = vmatmul.mubr.bf16.gmra.mrb[20].mxu0 %v15758_v47  ;;  %7626 = vmatmul.mubr.bf16.gmra.mrb[84].mxu1 %v15758_v47  ;;  %v7798_v37 = vsub.f32 0.0, %v10887_v51  ;;  %v8094_v47 = vmul.f32 1.442695, %v7792_v30 }
 0x68e   :  { %17614 = vst [vmem:[#allocation20_spill] sm:$0xff] %v16608_v8  ;;  %v12429_v25 = vpop.eup %12428  ;;  %v10407_v15 = vpack.c.bf16 %v12427_v23, %v16542_v11  ;;  %12448 = vrcp.f32 %v8451_v1  ;;  %v16613_v63 = vpop.f32.mrb[235].mxu0  ;;  %v10888_v8 = vadd.f32 %v16473_v57, %v16348_v55  ;;  %v8084_v11 = vmul.f32 1.442695, %v7787_v59  ;;  %10229 = vmatprep.mubr.msk.bf16.mxu0 %vm1574_vm0, %v15782_v13  ;;  %10245 = vmatprep.mubr.msk.bf16.mxu1 %vm1574_vm0, %v15782_v13 }
 0x68f   :  { %v16615_v10 = vpop.f32.mrb[235].mxu1  ;;  %v12431_v60 = vpop.eup %12430  ;;  %v10408_v34 = vpack.c.bf16 %v12429_v25, %v16548_v7  ;;  %12450 = vrcp.f32 %v8450_v24  ;;  %v8092_v7 = vmul.f32 1.442695, %v7791_v33  ;;  %v8096_v59 = vmul.f32 1.442695, %v7793_v42 }
 0x690   :  { %v12433_v43 = vpop.eup %12432  ;;  %9562 = vst [vmem:[#allocation2 + $0xa8] sm:$0xff] %v10407_v15  ;;  %12452 = vpow2.f32 %v8070_v19  ;;  %v7800_v54 = vsub.f32 0.0, %v10951_v58  ;;  %v7799_v24 = vsub.f32 0.0, %v10888_v8  ;;  %v16628_v25 = vpop.f32.mrb[236].mxu0  ;;  %v8098_v51 = vmul.f32 1.442695, %v7794_v2 }
 0x691   :  { %v12435_v1 = vpop.eup %12434  ;;  %9563 = vst [vmem:[#allocation2 + $0xb0] sm:$0xff] %v10408_v34  ;;  %12454 = vpow2.f32 %v8078_v14  ;;  %v16630_v14 = vpop.f32.mrb[236].mxu1  ;;  %v7801_v15 = vsub.f32 0.0, %v10952_v9 }
 0x692   :  { %v12437_v57 = vpop.eup %12436  ;;  %v10411_v19 = vpack.c.bf16 %v12435_v1, %v12431_v60  ;;  %12456 = vpow2.f32 %v8082_v4  ;;  %v16632_v13 = vpop.f32.mrb[237].mxu0  ;;  %v8110_v34 = vmul.f32 1.442695, %v7800_v54  ;;  %v8108_v1 = vmul.f32 1.442695, %v7799_v24 }
 0x693   :  { %v12439_v32 = vpop.eup %12438  ;;  %v10412_v23 = vpack.c.bf16 %v12437_v57, %v12433_v43  ;;  %12458 = vpow2.f32 %v8080_v29  ;;  %v16634_v60 = vpop.f32.mrb[237].mxu1  ;;  %v8106_v43 = vmul.f32 1.442695, %v7798_v37  ;;  %v10889_v54 = vadd.f32 %v16477_v0, %v16340_v26 }
 0x694   :  { %v12441_v33 = vpop.eup %12440  ;;  %9566 = vst [vmem:[#allocation2 + $0xc4] sm:$0xff] %v10411_v19  ;;  %12460 = vpow2.f32 %v8084_v11  ;;  %v16636_v29 = vpop.f32.mrb[238].mxu0 }
 0x695   :  { %v12443_v4 = vpop.eup %12442  ;;  %9567 = vst [vmem:[#allocation2 + $0xcc] sm:$0xff] %v10412_v23  ;;  %12462 = vpow2.f32 %v8092_v7  ;;  %v16638_v8 = vpop.f32.mrb[238].mxu1  ;;  %v8112_v7 = vmul.f32 1.442695, %v7801_v15  ;;  %7292 = vmatmul.mubr.bf16.gmra.mrb[24].mxu0 %v15778_v45  ;;  %7634 = vmatmul.mubr.bf16.gmra.mrb[88].mxu1 %v15778_v45  ;;  %v10953_v45 = vadd.f32 %v16479_v3, %v16343_v40 }
 0x696   :  { %v12445_v42 = vpop.eup %12444  ;;  %v10415_v58 = vpack.c.bf16 %v12443_v4, %v12439_v32  ;;  %12464 = vpow2.f32 %v8096_v59  ;;  %v16640_v30 = vpop.f32.mrb[239].mxu0  ;;  %10230 = vmatprep.mubr.msk.bf16.mxu0 %vm1574_vm0, %v15802_v46  ;;  %10246 = vmatprep.mubr.msk.bf16.mxu1 %vm1574_vm0, %v15802_v46 }
 0x697   :  { %v16642_v11 = vpop.f32.mrb[239].mxu1  ;;  %v12447_v2 = vpop.eup %12446  ;;  %v10416_v9 = vpack.c.bf16 %v12445_v42, %v12441_v33  ;;  %12466 = vpow2.f32 %v8094_v47 }
 0x698   :  { %v16644_v57 = vpop.eup %12448  ;;  %9570 = vst [vmem:[#allocation2 + $0xe0] sm:$0xff] %v10415_v58  ;;  %12468 = vpow2.f32 %v8098_v51  ;;  %v16656_v47 = vpop.f32.mrb[240].mxu0  ;;  %v7805_v58 = vsub.f32 0.0, %v10889_v54 }
 0x699   :  { %v12451_v37 = vpop.eup %12450  ;;  %9571 = vst [vmem:[#allocation2 + $0xe8] sm:$0xff] %v10416_v9  ;;  %12470 = vpow2.f32 %v8106_v43  ;;  %v16658_v24 = vpop.f32.mrb[240].mxu1 }
 0x69a   :  { %v12453_v19 = vpop.eup %12452  ;;  %v10419_v59 = vpack.c.bf16 %v12451_v37, %v12447_v2  ;;  %12472 = vpow2.f32 %v8110_v34  ;;  %v16660_v46 = vpop.f32.mrb[241].mxu0  ;;  %v10890_v34 = vadd.f32 %v16483_v28, %v16348_v55  ;;  %v7807_v37 = vsub.f32 0.0, %v10953_v45 }
 0x69b   :  { %v12455_v32 = vpop.eup %12454  ;;  %v8452_v23 = vadd.f32 1.0, %v12453_v19  ;;  %12474 = vpow2.f32 %v8108_v1  ;;  %v16662_v0 = vpop.f32.mrb[241].mxu1 }
 0x69c   :  { %v12457_v33 = vpop.eup %12456  ;;  %9574 = vst [vmem:[#allocation2 + $0xfc] sm:$0xff] %v10419_v59  ;;  %v8456_v51 = vadd.f32 1.0, %v12455_v32  ;;  %12476 = vpow2.f32 %v8112_v7  ;;  %v16664_v43 = vpop.f32.mrb[242].mxu0 }
 0x69d   :  { %v12459_v15 = vpop.eup %12458  ;;  %12478 = vrcp.f32 %v8452_v23  ;;  %v8458_v4 = vadd.f32 1.0, %v12457_v33  ;;  %v16668_v2 = vpop.f32.mrb[242].mxu1  ;;  %v10954_v23 = vadd.f32 %v16485_v22, %v16351_v62  ;;  %7302 = vmatmul.mubr.bf16.gmra.mrb[28].mxu0 %v15798_v35  ;;  %7642 = vmatmul.mubr.bf16.gmra.mrb[92].mxu1 %v15798_v35  ;;  %v10891_v33 = vadd.f32 %v16501_v21, %v16340_v26 }
 0x69e   :  { %v12461_v42 = vpop.eup %12460  ;;  %12480 = vrcp.f32 %v8456_v51  ;;  %v8457_v3 = vadd.f32 1.0, %v12459_v15  ;;  %17615 = vst [vmem:[#allocation25_spill] sm:$0xff] %v16668_v2  ;;  %v16670_v9 = vpop.f32.mrb[243].mxu0  ;;  %10231 = vmatprep.mubr.msk.bf16.mxu0 %vm1574_vm0, %v15822_v48  ;;  %10247 = vmatprep.mubr.msk.bf16.mxu1 %vm1574_vm0, %v15822_v48  ;;  %v8120_v22 = vmul.f32 1.442695, %v7805_v58  ;;  %v7806_v15 = vsub.f32 0.0, %v10890_v34 }
 0x69f   :  { %17616 = vst [vmem:[#allocation23_spill] sm:$0xff] %v16670_v9  ;;  %v12463_v1 = vpop.eup %12462  ;;  %12482 = vrcp.f32 %v8458_v4  ;;  %v8459_v7 = vadd.f32 1.0, %v12461_v42  ;;  %v16672_v19 = vpop.f32.mrb[243].mxu1  ;;  %v8124_v42 = vmul.f32 1.442695, %v7807_v37  ;;  %v7808_v48 = vsub.f32 0.0, %v10954_v23 }
 0x6a0   :  { %17617 = vst [vmem:[#allocation29_spill] sm:$0xff] %v16672_v19  ;;  %v12465_v59 = vpop.eup %12464  ;;  %12484 = vrcp.f32 %v8457_v3  ;;  %v8463_v32 = vadd.f32 1.0, %v12463_v1  ;;  %v10955_v3 = vadd.f32 %v16503_v18, %v16343_v40  ;;  %v16686_v1 = vpop.f32.mrb[244].mxu0  ;;  %v17623_v18 = vld [vmem:[#allocation15_spill] sm:$0xff] }
 0x6a1   :  { %v12467_v28 = vpop.eup %12466  ;;  %12486 = vrcp.f32 %v8459_v7  ;;  %v8465_v54 = vadd.f32 1.0, %v12465_v59  ;;  %17618 = vst [vmem:[#allocation27_spill] sm:$0xff] %v16686_v1  ;;  %v16688_v21 = vpop.f32.mrb[244].mxu1  ;;  %v10956_v1 = vadd.f32 %v17623_v18, %v16351_v62  ;;  %v17628_v18 = vld [vmem:[#allocation14_spill] sm:$0xff] }
 0x6a2   :  { %v12469_v45 = vpop.eup %12468  ;;  %12488 = vrcp.f32 %v8463_v32  ;;  %v8464_v51 = vadd.f32 1.0, %v12467_v28  ;;  %17619 = vst [vmem:[#allocation9_spill] sm:$0xff] %v16688_v21  ;;  %v17620_v32 = vld [vmem:[#allocation13_spill] sm:$0xff]  ;;  %v16692_v58 = vpop.f32.mrb[245].mxu0 }
 0x6a3   :  { %v12471_v4 = vpop.eup %12470  ;;  %12490 = vrcp.f32 %v8465_v54  ;;  %v8466_v35 = vadd.f32 1.0, %v12469_v45  ;;  %v10892_v28 = vadd.f32 %v17620_v32, %v16348_v55  ;;  %17621 = vst [vmem:[#allocation10_spill] sm:$0xff] %v16692_v58  ;;  %v16694_v34 = vpop.f32.mrb[245].mxu1  ;;  %v7812_v45 = vsub.f32 0.0, %v10891_v33 }
 0x6a4   :  { %v12473_v7 = vpop.eup %12472  ;;  %12492 = vrcp.f32 %v8464_v51  ;;  %v8470_v59 = vadd.f32 1.0, %v12471_v4  ;;  %17622 = vst [vmem:[#allocation33_spill] sm:$0xff] %v16694_v34  ;;  %v16698_v19 = vpop.f32.mrb[246].mxu0  ;;  %v8122_v4 = vmul.f32 1.442695, %v7806_v15  ;;  %v10893_v32 = vadd.f32 %v16514_v50, %v16340_v26  ;;  %v17629_v50 = vld [vmem:[#allocation21_spill] sm:$0xff] }
 0x6a5   :  { %v12475_v54 = vpop.eup %12474  ;;  %12494 = vrcp.f32 %v8466_v35  ;;  %v8472_v37 = vadd.f32 1.0, %v12473_v7  ;;  %17624 = vst [vmem:[#allocation11_spill] sm:$0xff] %v16698_v19  ;;  %v16700_v21 = vpop.f32.mrb[246].mxu1  ;;  %v7814_v7 = vsub.f32 0.0, %v10955_v3  ;;  %v10957_v19 = vadd.f32 %v17628_v18, %v16343_v40  ;;  %7312 = vmatmul.mubr.bf16.gmra.mrb[32].mxu0 %v17629_v50  ;;  %7650 = vmatmul.mubr.bf16.gmra.mrb[96].mxu1 %v17629_v50  ;;  %v17630_v18 = vld [vmem:[#allocation26_spill] sm:$0xff] }
 0x6a6   :  { %17625 = vst [vmem:[#allocation12_spill] sm:$0xff] %v16700_v21  ;;  %v12477_v51 = vpop.eup %12476  ;;  %12496 = vrcp.f32 %v8470_v59  ;;  %v8471_v23 = vadd.f32 1.0, %v12475_v54  ;;  %v16704_v58 = vpop.f32.mrb[247].mxu0  ;;  %v7813_v59 = vsub.f32 0.0, %v10892_v28  ;;  %v10894_v15 = vadd.f32 %v16520_v6, %v16348_v55  ;;  %10232 = vmatprep.mubr.msk.bf16.mxu0 %vm1574_vm0, %v17630_v18  ;;  %10248 = vmatprep.mubr.msk.bf16.mxu1 %vm1574_vm0, %v17630_v18 }
 0x6a7   :  { %17626 = vst [vmem:[#allocation31_spill] sm:$0xff] %v16704_v58  ;;  %v16706_v34 = vpop.f32.mrb[247].mxu1  ;;  %v12479_v35 = vpop.eup %12478  ;;  %12498 = vrcp.f32 %v8472_v37  ;;  %v8473_v33 = vadd.f32 1.0, %v12477_v51  ;;  %v8126_v37 = vmul.f32 1.442695, %v7808_v48  ;;  %v7815_v51 = vsub.f32 0.0, %v10956_v1 }
 0x6a8   :  { %17627 = vst [vmem:[#allocation37_spill] sm:$0xff] %v16706_v34  ;;  %v12481_v9 = vpop.eup %12480  ;;  %v10420_v21 = vpack.c.bf16 %v12479_v35, %v16644_v57  ;;  %12500 = vrcp.f32 %v8471_v23  ;;  %v10958_v3 = vadd.f32 %v16522_v16, %v16351_v62  ;;  %v8134_v6 = vmul.f32 1.442695, %v7812_v45  ;;  %v16723_v16 = vpop.f32.mrb[248].mxu0 }
 0x6a9   :  { %v12483_v54 = vpop.eup %12482  ;;  %12502 = vrcp.f32 %v8473_v33  ;;  %v7819_v28 = vsub.f32 0.0, %v10893_v32  ;;  %v10895_v23 = vadd.f32 %v16530_v49, %v16340_v26  ;;  %v8138_v1 = vmul.f32 1.442695, %v7814_v7  ;;  %17631 = vst [vmem:[#allocation35_spill] sm:$0xff] %v16723_v16  ;;  %v16725_v50 = vpop.f32.mrb[248].mxu1 }
 0x6aa   :  { %v12485_v57 = vpop.eup %12484  ;;  %9575 = vst [vmem:[#allocation2 + $0x104] sm:$0xff] %v10420_v21  ;;  %12504 = vpow2.f32 %v8120_v22  ;;  %v7821_v33 = vsub.f32 0.0, %v10957_v19  ;;  %17632 = vst [vmem:[#allocation41_spill] sm:$0xff] %v16725_v50  ;;  %v8136_v18 = vmul.f32 1.442695, %v7813_v59  ;;  %v7820_v21 = vsub.f32 0.0, %v10894_v15 }
 0x6ab   :  { %v12487_v35 = vpop.eup %12486  ;;  %v10423_v48 = vpack.c.bf16 %v12485_v57, %v12481_v9  ;;  %12506 = vpow2.f32 %v8124_v42  ;;  %v16727_v22 = vpop.f32.mrb[249].mxu0  ;;  %v8140_v49 = vmul.f32 1.442695, %v7815_v51  ;;  %v7822_v9 = vsub.f32 0.0, %v10958_v3 }
 0x6ac   :  { %v12489_v34 = vpop.eup %12488  ;;  %v10424_v58 = vpack.c.bf16 %v12487_v35, %v12483_v54  ;;  %12508 = vpow2.f32 %v8122_v4  ;;  %17633 = vst [vmem:[#allocation39_spill] sm:$0xff] %v16727_v22  ;;  %v16729_v45 = vpop.f32.mrb[249].mxu1  ;;  %v8148_v7 = vmul.f32 1.442695, %v7819_v28  ;;  %v7826_v57 = vsub.f32 0.0, %v10895_v23  ;;  %v17640_v28 = vld [vmem:[#allocation30_spill] sm:$0xff] }
 0x6ad   :  { %17634 = vst [vmem:[#allocation44_spill] sm:$0xff] %v16729_v45  ;;  %v12491_v32 = vpop.eup %12490  ;;  %9578 = vst [vmem:[#allocation2 + $0x118] sm:$0xff] %v10423_v48  ;;  %12510 = vpow2.f32 %v8126_v37  ;;  %v16731_v42 = vpop.f32.mrb[250].mxu0  ;;  %v8152_v35 = vmul.f32 1.442695, %v7821_v33  ;;  %v17639_v48 = vld [vmem:[#allocation24_spill] sm:$0xff] }
 0x6ae   :  { %17635 = vst [vmem:[#allocation13_spill] sm:$0xff] %v16731_v42  ;;  %v12493_v19 = vpop.eup %12492  ;;  %9579 = vst [vmem:[#allocation2 + $0x120] sm:$0xff] %v10424_v58  ;;  %12512 = vpow2.f32 %v8134_v6  ;;  %v16733_v54 = vpop.f32.mrb[250].mxu1  ;;  %v8150_v3 = vmul.f32 1.442695, %v7820_v21  ;;  %7322 = vmatmul.mubr.bf16.gmra.mrb[36].mxu0 %v17639_v48  ;;  %7658 = vmatmul.mubr.bf16.gmra.mrb[100].mxu1 %v17639_v48 }
 0x6af   :  { %17636 = vst [vmem:[#allocation15_spill] sm:$0xff] %v16733_v54  ;;  %v16735_v4 = vpop.f32.mrb[251].mxu0  ;;  %v12495_v59 = vpop.eup %12494  ;;  %v10427_v15 = vpack.c.bf16 %v12493_v19, %v12489_v34  ;;  %12514 = vpow2.f32 %v8138_v1  ;;  %v8154_v6 = vmul.f32 1.442695, %v7822_v9  ;;  %10233 = vmatprep.mubr.msk.bf16.mxu0 %vm1574_vm0, %v17640_v28  ;;  %10249 = vmatprep.mubr.msk.bf16.mxu1 %vm1574_vm0, %v17640_v28  ;;  %v8162_v23 = vmul.f32 1.442695, %v7826_v57 }
 0x6b0   :  { %17637 = vst [vmem:[#allocation14_spill] sm:$0xff] %v16735_v4  ;;  %v16737_v45 = vpop.f32.mrb[251].mxu1  ;;  %v12497_v37 = vpop.eup %12496  ;;  %v10428_v51 = vpack.c.bf16 %v12495_v59, %v12491_v32  ;;  %12516 = vpow2.f32 %v8136_v18  ;;  %v10959_v9 = vadd.f32 %v16532_v27, %v16343_v40  ;;  %v17662_v54 = vld [vmem:[#allocation43_spill] sm:$0xff] }
 0x6b1   :  { %17638 = vst [vmem:[#allocation21_spill] sm:$0xff] %v16737_v45  ;;  %v12499_v58 = vpop.eup %12498  ;;  %9582 = vst [vmem:[#allocation2 + $0x134] sm:$0xff] %v10427_v15  ;;  %12518 = vpow2.f32 %v8140_v49  ;;  %v16745_v18 = vpop.f32.mrb[252].mxu0 }
 0x6b2   :  { %v12501_v34 = vpop.eup %12500  ;;  %9583 = vst [vmem:[#allocation2 + $0x13c] sm:$0xff] %v10428_v51  ;;  %12520 = vpow2.f32 %v8148_v7  ;;  %17641 = vst [vmem:[#allocation26_spill] sm:$0xff] %v16745_v18  ;;  %v16747_v21 = vpop.f32.mrb[252].mxu1 }
 0x6b3   :  { %v12503_v1 = vpop.eup %12502  ;;  %v10431_v33 = vpack.c.bf16 %v12501_v34, %v12497_v37  ;;  %12522 = vpow2.f32 %v8152_v35  ;;  %17642 = vst [vmem:[#allocation24_spill] sm:$0xff] %v16747_v21  ;;  %v16751_v19 = vpop.f32.mrb[253].mxu0 }
 0x6b4   :  { %v12505_v32 = vpop.eup %12504  ;;  %v10432_v49 = vpack.c.bf16 %v12503_v1, %v12499_v58  ;;  %12524 = vpow2.f32 %v8150_v3  ;;  %17643 = vst [vmem:[#allocation30_spill] sm:$0xff] %v16751_v19  ;;  %v16753_v59 = vpop.f32.mrb[253].mxu1  ;;  %v10896_v3 = vadd.f32 %v16534_v61, %v16348_v55  ;;  %v7828_v1 = vsub.f32 0.0, %v10959_v9 }
 0x6b5   :  { %17644 = vst [vmem:[#allocation48_spill] sm:$0xff] %v16753_v59  ;;  %v12507_v15 = vpop.eup %12506  ;;  %9586 = vst [vmem:[#allocation2 + $0x150] sm:$0xff] %v10431_v33  ;;  %v8477_v7 = vadd.f32 1.0, %v12505_v32  ;;  %12526 = vpow2.f32 %v8154_v6  ;;  %v16755_v57 = vpop.f32.mrb[254].mxu0  ;;  %v10960_v33 = vadd.f32 %v16536_v12, %v16351_v62  ;;  %v17649_v32 = vld [vmem:[#allocation28_spill] sm:$0xff] }
 0x6b6   :  { %17645 = vst [vmem:[#allocation49_spill] sm:$0xff] %v16755_v57  ;;  %v16757_v35 = vpop.f32.mrb[254].mxu1  ;;  %v12509_v37 = vpop.eup %12508  ;;  %9587 = vst [vmem:[#allocation2 + $0x158] sm:$0xff] %v10432_v49  ;;  %v8479_v51 = vadd.f32 1.0, %v12507_v15  ;;  %12528 = vpow2.f32 %v8162_v23  ;;  %7332 = vmatmul.mubr.bf16.gmra.mrb[40].mxu0 %v17649_v32  ;;  %7666 = vmatmul.mubr.bf16.gmra.mrb[104].mxu1 %v17649_v32  ;;  %v10897_v49 = vadd.f32 %v16538_v36, %v16340_v26  ;;  %v17650_v15 = vld [vmem:[#allocation34_spill] sm:$0xff]  ;;  %v7827_v12 = vsub.f32 0.0, %v10896_v3 }
 0x6b7   :  { %17646 = vst [vmem:[#allocation50_spill] sm:$0xff] %v16757_v35  ;;  %v16761_v27 = vpop.f32.mrb[255].mxu0  ;;  %v16763_v48 = vpop.f32.mrb[255].mxu1  ;;  %12530 = vrcp.f32 %v8477_v7  ;;  %v8478_v28 = vadd.f32 1.0, %v12509_v37  ;;  %10234 = vmatprep.mubr.msk.bf16.mxu0 %vm1574_vm0, %v17650_v15  ;;  %10250 = vmatprep.mubr.msk.bf16.mxu1 %vm1574_vm0, %v17650_v15  ;;  %v8166_v32 = vmul.f32 1.442695, %v7828_v1  ;;  %v10898_v3 = vadd.f32 %v16544_v20, %v16348_v55 }
 0x6b8   :  { %17647 = vst [vmem:[#allocation51_spill] sm:$0xff] %v16761_v27  ;;  %17648 = vst [vmem:[#allocation52_spill] sm:$0xff] %v16763_v48  ;;  %v12511_v58 = vpop.eup %12510  ;;  %12532 = vrcp.f32 %v8479_v51  ;;  %v7829_v48 = vsub.f32 0.0, %v10960_v33  ;;  %v8164_v35 = vmul.f32 1.442695, %v7827_v12  ;;  %v17651_v12 = vld [vmem:[#allocation32_spill] sm:$0xff] }
 0x6b9   :  { %v12513_v34 = vpop.eup %12512  ;;  %v8480_v6 = vadd.f32 1.0, %v12511_v58  ;;  %12534 = vrcp.f32 %v8478_v28  ;;  %v10961_v58 = vadd.f32 %v16540_v31, %v16343_v40  ;;  %v16777_v28 = vpop.f32.mrb[0].mxu1 }
 0x6ba   :  { %v12515_v23 = vpop.eup %12514  ;;  %v8484_v61 = vadd.f32 1.0, %v12513_v34  ;;  %v16779_v27 = vpop.f32.mrb[1].mxu1  ;;  %v8168_v57 = vmul.f32 1.442695, %v7829_v48 }
 0x6bb   :  { %v12517_v9 = vpop.eup %12516  ;;  %12536 = vrcp.f32 %v8480_v6  ;;  %v8486_v7 = vadd.f32 1.0, %v12515_v23  ;;  %v7833_v23 = vsub.f32 0.0, %v10897_v49  ;;  %v10899_v49 = vadd.f32 %v16564_v44, %v16340_v26 }
 0x6bc   :  { %v12519_v37 = vpop.eup %12518  ;;  %12538 = vrcp.f32 %v8484_v61  ;;  %v8485_v51 = vadd.f32 1.0, %v12517_v9  ;;  %v16783_v61 = vpop.f32.mrb[2].mxu1 }
 0x6bd   :  { %v12521_v34 = vpop.eup %12520  ;;  %12540 = vrcp.f32 %v8486_v7  ;;  %v8487_v36 = vadd.f32 1.0, %v12519_v37  ;;  %v10962_v7 = vadd.f32 %v16546_v5, %v16351_v62  ;;  %v16787_v1 = vpop.f32.mrb[3].mxu1 }
 0x6be   :  { %v12523_v15 = vpop.eup %12522  ;;  %12542 = vrcp.f32 %v8485_v51  ;;  %v8491_v6 = vadd.f32 1.0, %v12521_v34  ;;  %v7835_v51 = vsub.f32 0.0, %v10961_v58  ;;  %7342 = vmatmul.mubr.bf16.gmra.mrb[44].mxu0 %v17651_v12  ;;  %7674 = vmatmul.mubr.bf16.gmra.mrb[108].mxu1 %v17651_v12  ;;  %v10900_v58 = vadd.f32 %v16568_v41, %v16348_v55 }
 0x6bf   :  { %v12525_v9 = vpop.eup %12524  ;;  %12544 = vrcp.f32 %v8487_v36  ;;  %v8493_v31 = vadd.f32 1.0, %v12523_v15  ;;  %v10963_v36 = vadd.f32 %v16566_v52, %v16343_v40  ;;  %v8176_v52 = vmul.f32 1.442695, %v7833_v23 }
 0x6c0   :  { %v12527_v33 = vpop.eup %12526  ;;  %12546 = vrcp.f32 %v8491_v6  ;;  %v8492_v37 = vadd.f32 1.0, %v12525_v9  ;;  %v7834_v6 = vsub.f32 0.0, %v10898_v3  ;;  %v17652_v9 = vld [vmem:[#allocation38_spill] sm:$0xff]  ;;  %v7836_v48 = vsub.f32 0.0, %v10962_v7  ;;  %v16805_v12 = vpop.f32.mrb[4].mxu1 }
 0x6c1   :  { %v12529_v34 = vpop.eup %12528  ;;  %12548 = vrcp.f32 %v8493_v31  ;;  %v8494_v20 = vadd.f32 1.0, %v12527_v33  ;;  %10235 = vmatprep.mubr.msk.bf16.mxu0 %vm1574_vm0, %v17652_v9  ;;  %10251 = vmatprep.mubr.msk.bf16.mxu1 %vm1574_vm0, %v17652_v9  ;;  %v10964_v31 = vadd.f32 %v16570_v38, %v16351_v62  ;;  %v7840_v3 = vsub.f32 0.0, %v10899_v49  ;;  %v16809_v7 = vpop.f32.mrb[5].mxu1 }
 0x6c2   :  { %v12531_v5 = vpop.eup %12530  ;;  %12550 = vrcp.f32 %v8492_v37  ;;  %v8498_v15 = vadd.f32 1.0, %v12529_v34  ;;  %v8180_v37 = vmul.f32 1.442695, %v7835_v51  ;;  %v17653_v34 = vld [vmem:[#allocation17_spill] sm:$0xff]  ;;  %v7842_v9 = vsub.f32 0.0, %v10963_v36  ;;  %v16811_v49 = vpop.f32.mrb[6].mxu1 }
 0x6c3   :  { %v12533_v44 = vpop.eup %12532  ;;  %12552 = vrcp.f32 %v8494_v20  ;;  %v10901_v41 = vadd.f32 %v17653_v34, %v16340_v26  ;;  %v10965_v23 = vadd.f32 %v16574_v56, %v16343_v40  ;;  %v7841_v51 = vsub.f32 0.0, %v10900_v58 }
 0x6c4   :  { %v12535_v33 = vpop.eup %12534  ;;  %12554 = vrcp.f32 %v8498_v15  ;;  %v8178_v15 = vmul.f32 1.442695, %v7834_v6  ;;  %v8182_v34 = vmul.f32 1.442695, %v7836_v48  ;;  %v7843_v18 = vsub.f32 0.0, %v10964_v31  ;;  %v17654_v6 = vld [vmem:[#allocation36_spill] sm:$0xff] }
 0x6c5   :  { %v12537_v59 = vpop.eup %12536  ;;  %v10435_v19 = vpack.c.bf16 %v12535_v33, %v12531_v5  ;;  %12556 = vpow2.f32 %v8166_v32  ;;  %v16813_v5 = vpop.f32.mrb[7].mxu1  ;;  %v8190_v56 = vmul.f32 1.442695, %v7840_v3  ;;  %v7847_v36 = vsub.f32 0.0, %v10901_v41 }
 0x6c6   :  { %v12539_v20 = vpop.eup %12538  ;;  %v10436_v38 = vpack.c.bf16 %v12537_v59, %v12533_v44  ;;  %12558 = vpow2.f32 %v8164_v35  ;;  %v8194_v59 = vmul.f32 1.442695, %v7842_v9  ;;  %v7849_v35 = vsub.f32 0.0, %v10965_v23  ;;  %7352 = vmatmul.mubr.bf16.gmra.mrb[48].mxu0 %v17654_v6  ;;  %7682 = vmatmul.mubr.bf16.gmra.mrb[112].mxu1 %v17654_v6  ;;  %v17655_v44 = vld [vmem:[#allocation42_spill] sm:$0xff] }
 0x6c7   :  { %v12541_v21 = vpop.eup %12540  ;;  %9590 = vst [vmem:[#allocation2 + $0x16c] sm:$0xff] %v10435_v19  ;;  %12560 = vpow2.f32 %v8168_v57  ;;  %v8192_v58 = vmul.f32 1.442695, %v7841_v51  ;;  %10236 = vmatprep.mubr.msk.bf16.mxu0 %vm1574_vm0, %v17655_v44  ;;  %10252 = vmatprep.mubr.msk.bf16.mxu1 %vm1574_vm0, %v17655_v44  ;;  %v8196_v48 = vmul.f32 1.442695, %v7843_v18  ;;  %v10966_v51 = vadd.f32 %v16578_v53, %v16351_v62 }
 0x6c8   :  { %v12543_v32 = vpop.eup %12542  ;;  %9591 = vst [vmem:[#allocation2 + $0x174] sm:$0xff] %v10436_v38  ;;  %12562 = vpow2.f32 %v8176_v52  ;;  %v16821_v3 = vpop.f32.mrb[8].mxu1  ;;  %v8208_v9 = vmul.f32 1.442695, %v7849_v35  ;;  %v17657_v35 = vld [vmem:[#allocation40_spill] sm:$0xff] }
 0x6c9   :  { %v12545_v33 = vpop.eup %12544  ;;  %v10439_v45 = vpack.c.bf16 %v12543_v32, %v12539_v20  ;;  %12564 = vpow2.f32 %v8180_v37  ;;  %v8204_v37 = vmul.f32 1.442695, %v7847_v36  ;;  %v16823_v23 = vpop.f32.mrb[9].mxu1 }
 0x6ca   :  { %v12547_v19 = vpop.eup %12546  ;;  %v10440_v57 = vpack.c.bf16 %v12545_v33, %v12541_v21  ;;  %12566 = vpow2.f32 %v8178_v15  ;;  %v16829_v18 = vpop.f32.mrb[10].mxu1 }
 0x6cb   :  { %v12549_v52 = vpop.eup %12548  ;;  %9594 = vst [vmem:[#allocation2 + $0x188] sm:$0xff] %v10439_v45  ;;  %12568 = vpow2.f32 %v8182_v34  ;;  %v10902_v45 = vadd.f32 %v16576_v39, %v16348_v55  ;;  %v16833_v34 = vpop.f32.mrb[11].mxu1 }
 0x6cc   :  { %v12551_v31 = vpop.eup %12550  ;;  %9595 = vst [vmem:[#allocation2 + $0x190] sm:$0xff] %v10440_v57  ;;  %12570 = vpow2.f32 %v8190_v56  ;;  %v17658_v57 = vld [vmem:[#allocation45_spill] sm:$0xff] }
 0x6cd   :  { %v12553_v41 = vpop.eup %12552  ;;  %v10443_v21 = vpack.c.bf16 %v12551_v31, %v12547_v19  ;;  %12572 = vpow2.f32 %v8194_v59  ;;  %v17656_v59 = vld [vmem:[#allocation16_spill] sm:$0xff]  ;;  %v7848_v53 = vsub.f32 0.0, %v10902_v45 }
 0x6ce   :  { %v16825_v20 = vpop.eup %12554  ;;  %v10444_v38 = vpack.c.bf16 %v12553_v41, %v12549_v52  ;;  %12574 = vpow2.f32 %v8192_v58  ;;  %v10903_v39 = vadd.f32 %v17656_v59, %v16340_v26  ;;  %7362 = vmatmul.mubr.bf16.gmra.mrb[52].mxu0 %v17657_v35  ;;  %7690 = vmatmul.mubr.bf16.gmra.mrb[116].mxu1 %v17657_v35  ;;  %v7850_v52 = vsub.f32 0.0, %v10966_v51 }
 0x6cf   :  { %v12557_v15 = vpop.eup %12556  ;;  %9598 = vst [vmem:[#allocation2 + $0x1a4] sm:$0xff] %v10443_v21  ;;  %12576 = vpow2.f32 %v8196_v48  ;;  %10237 = vmatprep.mubr.msk.bf16.mxu0 %vm1574_vm0, %v17658_v57  ;;  %10253 = vmatprep.mubr.msk.bf16.mxu1 %vm1574_vm0, %v17658_v57  ;;  %v17659_v48 = vld [vmem:[#allocation19_spill] sm:$0xff]  ;;  %v10904_v21 = vadd.f32 %v16600_v17, %v16348_v55  ;;  %v8206_v59 = vmul.f32 1.442695, %v7848_v53 }
 0x6d0   :  { %v12559_v32 = vpop.eup %12558  ;;  %9599 = vst [vmem:[#allocation2 + $0x1ac] sm:$0xff] %v10444_v38  ;;  %v8500_v56 = vadd.f32 1.0, %v12557_v15  ;;  %12578 = vpow2.f32 %v8204_v37  ;;  %v10967_v31 = vadd.f32 %v17659_v48, %v16343_v40  ;;  %v7854_v15 = vsub.f32 0.0, %v10903_v39 }
 0x6d1   :  { %v12561_v36 = vpop.eup %12560  ;;  %v8499_v33 = vadd.f32 1.0, %v12559_v32  ;;  %12580 = vpow2.f32 %v8208_v9  ;;  %v16847_v9 = vpop.f32.mrb[12].mxu1  ;;  %v17660_v32 = vld [vmem:[#allocation18_spill] sm:$0xff]  ;;  %v7855_v48 = vsub.f32 0.0, %v10904_v21  ;;  %v10906_v21 = vadd.f32 %v16613_v63, %v16348_v55 }
 0x6d2   :  { %v12563_v6 = vpop.eup %12562  ;;  %12582 = vrcp.f32 %v8500_v56  ;;  %v8501_v19 = vadd.f32 1.0, %v12561_v36  ;;  %v16851_v56 = vadd.f32 %v17660_v32, %v16351_v62  ;;  %v16853_v51 = vpop.f32.mrb[13].mxu1  ;;  %v7856_v57 = vsub.f32 0.0, %v10967_v31 }
 0x6d3   :  { %v12565_v58 = vpop.eup %12564  ;;  %12584 = vrcp.f32 %v8499_v33  ;;  %v8505_v44 = vadd.f32 1.0, %v12563_v6  ;;  %v16855_v35 = vpop.f32.mrb[14].mxu1  ;;  %v8218_v53 = vmul.f32 1.442695, %v7854_v15 }
 0x6d4   :  { %v12567_v37 = vpop.eup %12566  ;;  %12586 = vrcp.f32 %v8501_v19  ;;  %v8507_v41 = vadd.f32 1.0, %v12565_v58  ;;  %v8210_v19 = vmul.f32 1.442695, %v7850_v52  ;;  %v16857_v58 = vpop.f32.mrb[15].mxu1 }
 0x6d5   :  { %v12569_v38 = vpop.eup %12568  ;;  %12588 = vrcp.f32 %v8505_v44  ;;  %v8506_v45 = vadd.f32 1.0, %v12567_v37  ;;  %v17661_v37 = vld [vmem:[#allocation22_spill] sm:$0xff] }
 0x6d6   :  { %v12571_v36 = vpop.eup %12570  ;;  %12590 = vrcp.f32 %v8507_v41  ;;  %v8508_v33 = vadd.f32 1.0, %v12569_v38  ;;  %v10905_v32 = vadd.f32 %v17661_v37, %v16340_v26  ;;  %v7857_v38 = vsub.f32 0.0, %v16851_v56  ;;  %7372 = vmatmul.mubr.bf16.gmra.mrb[56].mxu0 %v17662_v54  ;;  %7698 = vmatmul.mubr.bf16.gmra.mrb[120].mxu1 %v17662_v54 }
 0x6d7   :  { %v12573_v6 = vpop.eup %12572  ;;  %12592 = vrcp.f32 %v8506_v45  ;;  %v8512_v17 = vadd.f32 1.0, %v12571_v36  ;;  %v17663_v45 = vld [vmem:[#allocation20_spill] sm:$0xff]  ;;  %v10970_v54 = vadd.f32 %v16615_v10, %v16351_v62 }
 0x6d8   :  { %v12575_v39 = vpop.eup %12574  ;;  %12594 = vrcp.f32 %v8508_v33  ;;  %v8514_v44 = vadd.f32 1.0, %v12573_v6  ;;  %v10969_v36 = vadd.f32 %v17663_v45, %v16343_v40  ;;  %v17664_v33 = vld [vmem:[#allocation47_spill] sm:$0xff]  ;;  %v7861_v63 = vsub.f32 0.0, %v10905_v32 }
 0x6d9   :  { %v12577_v4 = vpop.eup %12576  ;;  %12596 = vrcp.f32 %v8512_v17  ;;  %v8513_v41 = vadd.f32 1.0, %v12575_v39  ;;  %10238 = vmatprep.mubr.msk.bf16.mxu0 %vm1574_vm0, %v17664_v33  ;;  %10254 = vmatprep.mubr.msk.bf16.mxu1 %vm1574_vm0, %v17664_v33  ;;  %v8222_v39 = vmul.f32 1.442695, %v7856_v57  ;;  %v8220_v45 = vmul.f32 1.442695, %v7855_v48 }
 0x6da   :  { %v12579_v52 = vpop.eup %12578  ;;  %12598 = vrcp.f32 %v8514_v44  ;;  %v8515_v31 = vadd.f32 1.0, %v12577_v4  ;;  %v10907_v4 = vadd.f32 %v16628_v25, %v16340_v26  ;;  %v16876_v44 = vpop.f32.mrb[16].mxu1  ;;  %v7864_v22 = vsub.f32 0.0, %v10970_v54 }
 0x6db   :  { %v12581_v15 = vpop.eup %12580  ;;  %12600 = vrcp.f32 %v8513_v41  ;;  %v8519_v56 = vadd.f32 1.0, %v12579_v52  ;;  %v10971_v41 = vadd.f32 %v16630_v14, %v16343_v40  ;;  %v10908_v52 = vadd.f32 %v16632_v13, %v16348_v55  ;;  %v10664_v10 = vpop.f32.mrb[17].mxu1 }
 0x6dc   :  { %v12583_v6 = vpop.eup %12582  ;;  %12602 = vrcp.f32 %v8515_v31  ;;  %v8521_v17 = vadd.f32 1.0, %v12581_v15  ;;  %v7863_v31 = vsub.f32 0.0, %v10969_v36  ;;  %v7862_v15 = vsub.f32 0.0, %v10906_v21  ;;  %v10666_v57 = vpop.f32.mrb[18].mxu1  ;;  %v17665_v21 = vld [vmem:[#allocation46_spill] sm:$0xff] }
 0x6dd   :  { %v12585_v37 = vpop.eup %12584  ;;  %12604 = vrcp.f32 %v8519_v56  ;;  %v7868_v56 = vsub.f32 0.0, %v10907_v4  ;;  %v10667_v48 = vpop.f32.mrb[19].mxu1  ;;  %v8224_v14 = vmul.f32 1.442695, %v7857_v38  ;;  %v8232_v16 = vmul.f32 1.442695, %v7861_v63 }
 0x6de   :  { %v12587_v33 = vpop.eup %12586  ;;  %v10447_v25 = vpack.c.bf16 %v12585_v37, %v16825_v20  ;;  %12606 = vrcp.f32 %v8521_v17  ;;  %v7870_v2 = vsub.f32 0.0, %v10971_v41  ;;  %v7869_v20 = vsub.f32 0.0, %v10908_v52  ;;  %7382 = vmatmul.mubr.bf16.gmra.mrb[60].mxu0 %v17665_v21  ;;  %7706 = vmatmul.mubr.bf16.gmra.mrb[124].mxu1 %v17665_v21 }
 0x6df   :  { %v12589_v32 = vpop.eup %12588  ;;  %v10448_v42 = vpack.c.bf16 %v12587_v33, %v12583_v6  ;;  %12608 = vpow2.f32 %v8206_v59  ;;  %v16885_v36 = vadd.f32 %v16779_v27, %v16777_v28  ;;  %v8236_v4 = vmul.f32 1.442695, %v7863_v31 }
 0x6e0   :  { %v12591_v50 = vpop.eup %12590  ;;  %9602 = vst [vmem:[#allocation2 + $0x1c0] sm:$0xff] %v10447_v25  ;;  %12610 = vpow2.f32 %v8210_v19  ;;  %v8234_v19 = vmul.f32 1.442695, %v7862_v15  ;;  %v16891_v27 = vadd.f32 %v16787_v1, %v16783_v61  ;;  %v16895_v28 = vadd.f32 %v16809_v7, %v16805_v12  ;;  %v10669_v63 = vpop.f32.mrb[20].mxu1 }
 0x6e1   :  { %v12593_v13 = vpop.eup %12592  ;;  %9603 = vst [vmem:[#allocation2 + $0x1c8] sm:$0xff] %v10448_v42  ;;  %12612 = vpow2.f32 %v8218_v53  ;;  %v8238_v42 = vmul.f32 1.442695, %v7864_v22  ;;  %v8246_v53 = vmul.f32 1.442695, %v7868_v56  ;;  %v10670_v61 = vpop.f32.mrb[21].mxu1  ;;  %v16907_v12 = vadd.f32 %v16833_v34, %v16829_v18 }
 0x6e2   :  { %v12595_v59 = vpop.eup %12594  ;;  %v10451_v54 = vpack.c.bf16 %v12593_v13, %v12589_v32  ;;  %12614 = vpow2.f32 %v8222_v39  ;;  %v16899_v39 = vadd.f32 %v16813_v5, %v16811_v49  ;;  %v8250_v22 = vmul.f32 1.442695, %v7870_v2  ;;  %v10672_v49 = vpop.f32.mrb[22].mxu1 }
 0x6e3   :  { %v12597_v38 = vpop.eup %12596  ;;  %v10452_v6 = vpack.c.bf16 %v12595_v59, %v12591_v50  ;;  %12616 = vpow2.f32 %v8220_v45  ;;  %v8248_v37 = vmul.f32 1.442695, %v7869_v20  ;;  %v16903_v45 = vadd.f32 %v16823_v23, %v16821_v3  ;;  %v10673_v23 = vpop.f32.mrb[23].mxu1 }
 0x6e4   :  { %v12599_v17 = vpop.eup %12598  ;;  %9606 = vst [vmem:[#allocation2 + $0x1dc] sm:$0xff] %v10451_v54  ;;  %12618 = vpow2.f32 %v8224_v14  ;;  %v16911_v7 = vadd.f32 %v16853_v51, %v16847_v9  ;;  %v16917_v5 = vadd.f32 %v16857_v58, %v16855_v35  ;;  %v16920_v3 = vadd.f32 %v10664_v10, %v16876_v44 }
 0x6e5   :  { %v12601_v50 = vpop.eup %12600  ;;  %9607 = vst [vmem:[#allocation2 + $0x1e4] sm:$0xff] %v10452_v6  ;;  %12620 = vpow2.f32 %v8232_v16  ;;  %v16924_v18 = vadd.f32 %v10667_v48, %v10666_v57  ;;  %v16926_v34 = vadd.f32 %v10670_v61, %v10669_v63  ;;  %v16928_v9 = vadd.f32 %v10673_v23, %v10672_v49 }
 0x6e6   :  { %v12603_v1 = vpop.eup %12602  ;;  %v10455_v41 = vpack.c.bf16 %v12601_v50, %v12597_v38  ;;  %12622 = vpow2.f32 %v8236_v4  ;;  %v10972_v35 = vadd.f32 %v16634_v60, %v16351_v62  ;;  %v10909_v58 = vadd.f32 %v16636_v29, %v16340_v26 }
 0x6e7   :  { %v16913_v16 = vpop.eup %12604  ;;  %v10456_v2 = vpack.c.bf16 %v12603_v1, %v12599_v17  ;;  %12624 = vpow2.f32 %v8234_v19  ;;  %v10973_v33 = vadd.f32 %v16638_v8, %v16343_v40  ;;  %v10910_v15 = vadd.f32 %v16640_v30, %v16348_v55 }
 0x6e8   :  { %v16922_v52 = vpop.eup %12606  ;;  %9610 = vst [vmem:[#allocation2 + $0x1f8] sm:$0xff] %v10455_v41  ;;  %12626 = vpow2.f32 %v8238_v42  ;;  %v10675_v56 = vpop.f32.mrb[24].mxu1  ;;  %v7871_v29 = vsub.f32 0.0, %v10972_v35  ;;  %v7875_v14 = vsub.f32 0.0, %v10909_v58  ;;  %v10974_v38 = vadd.f32 %v16642_v11, %v16351_v62 }
 0x6e9   :  { %v12609_v51 = vpop.eup %12608  ;;  %9611 = vst [vmem:[#allocation2 + $0x200] sm:$0xff] %v10456_v2  ;;  %12628 = vpow2.f32 %v8246_v53  ;;  %v10676_v13 = vpop.f32.mrb[25].mxu1  ;;  %v7877_v8 = vsub.f32 0.0, %v10973_v33  ;;  %v7876_v19 = vsub.f32 0.0, %v10910_v15  ;;  %v10911_v17 = vadd.f32 %v16656_v47, %v16340_v26 }
 0x6ea   :  { %v12611_v44 = vpop.eup %12610  ;;  %v8520_v10 = vadd.f32 1.0, %v12609_v51  ;;  %12630 = vpow2.f32 %v8250_v22  ;;  %v16938_v59 = vadd.f32 %v10676_v13, %v10675_v56  ;;  %v10678_v54 = vpop.f32.mrb[26].mxu1  ;;  %v10975_v61 = vadd.f32 %v16658_v24, %v16343_v40 }
 0x6eb   :  { %v12613_v25 = vpop.eup %12612  ;;  %v8522_v31 = vadd.f32 1.0, %v12611_v44  ;;  %12632 = vpow2.f32 %v8248_v37  ;;  %v10679_v6 = vpop.f32.mrb[27].mxu1  ;;  %v8252_v37 = vmul.f32 1.442695, %v7871_v29  ;;  %v8260_v11 = vmul.f32 1.442695, %v7875_v14 }
 0x6ec   :  { %v12615_v57 = vpop.eup %12614  ;;  %12634 = vrcp.f32 %v8520_v10  ;;  %v8526_v32 = vadd.f32 1.0, %v12613_v25  ;;  %v16944_v63 = vadd.f32 %v10679_v6, %v10678_v54  ;;  %v8264_v49 = vmul.f32 1.442695, %v7877_v8  ;;  %v17668_v6 = vld [vmem:[#allocation29_spill] sm:$0xff] }
 0x6ed   :  { %v12617_v60 = vpop.eup %12616  ;;  %12636 = vrcp.f32 %v8522_v31  ;;  %v8528_v48 = vadd.f32 1.0, %v12615_v57  ;;  %v8262_v51 = vmul.f32 1.442695, %v7876_v19  ;;  %v10912_v47 = vadd.f32 %v16660_v46, %v16348_v55 }
 0x6ee   :  { %v12619_v20 = vpop.eup %12618  ;;  %12638 = vrcp.f32 %v8526_v32  ;;  %v8527_v21 = vadd.f32 1.0, %v12617_v60  ;;  %v7878_v44 = vsub.f32 0.0, %v10974_v38  ;;  %v7882_v10 = vsub.f32 0.0, %v10911_v17 }
 0x6ef   :  { %v12621_v4 = vpop.eup %12620  ;;  %12640 = vrcp.f32 %v8528_v48  ;;  %v8529_v30 = vadd.f32 1.0, %v12619_v20  ;;  %v7884_v31 = vsub.f32 0.0, %v10975_v61  ;;  %v10976_v15 = vadd.f32 %v16662_v0, %v16351_v62  ;;  %v17666_v20 = vld [vmem:[#allocation25_spill] sm:$0xff] }
 0x6f0   :  { %v12623_v42 = vpop.eup %12622  ;;  %12642 = vrcp.f32 %v8527_v21  ;;  %v8533_v53 = vadd.f32 1.0, %v12621_v4  ;;  %v10681_v33 = vpop.f32.mrb[28].mxu1  ;;  %v10913_v46 = vadd.f32 %v16664_v43, %v16340_v26  ;;  %v7883_v13 = vsub.f32 0.0, %v10912_v47  ;;  %v17667_v4 = vld [vmem:[#allocation23_spill] sm:$0xff] }
 0x6f1   :  { %v12625_v50 = vpop.eup %12624  ;;  %12644 = vrcp.f32 %v8529_v30  ;;  %v8535_v22 = vadd.f32 1.0, %v12623_v42  ;;  %v10682_v57 = vpop.f32.mrb[29].mxu1  ;;  %v10977_v21 = vadd.f32 %v17666_v20, %v16343_v40  ;;  %v10914_v30 = vadd.f32 %v17667_v4, %v16348_v55  ;;  %v17671_v4 = vld [vmem:[#allocation10_spill] sm:$0xff] }
 0x6f2   :  { %v12627_v1 = vpop.eup %12626  ;;  %12646 = vrcp.f32 %v8533_v53  ;;  %v8534_v41 = vadd.f32 1.0, %v12625_v50  ;;  %v16954_v60 = vadd.f32 %v10682_v57, %v10681_v33  ;;  %v10684_v48 = vpop.f32.mrb[30].mxu1  ;;  %v8266_v38 = vmul.f32 1.442695, %v7878_v44 }
 0x6f3   :  { %v12629_v2 = vpop.eup %12628  ;;  %12648 = vrcp.f32 %v8535_v22  ;;  %v8536_v23 = vadd.f32 1.0, %v12627_v1  ;;  %v10685_v8 = vpop.f32.mrb[31].mxu1  ;;  %v10978_v42 = vadd.f32 %v17668_v6, %v16351_v62  ;;  %v8274_v17 = vmul.f32 1.442695, %v7882_v10 }
 0x6f4   :  { %v12631_v35 = vpop.eup %12630  ;;  %12650 = vrcp.f32 %v8534_v41  ;;  %v8540_v58 = vadd.f32 1.0, %v12629_v2  ;;  %v16962_v43 = vadd.f32 %v10685_v8, %v10684_v48  ;;  %v7889_v50 = vsub.f32 0.0, %v10913_v46 }
 0x6f5   :  { %v12633_v25 = vpop.eup %12632  ;;  %12652 = vrcp.f32 %v8536_v23  ;;  %v8542_v24 = vadd.f32 1.0, %v12631_v35  ;;  %v8278_v61 = vmul.f32 1.442695, %v7884_v31  ;;  %v7891_v1 = vsub.f32 0.0, %v10977_v21 }
 0x6f6   :  { %v12635_v32 = vpop.eup %12634  ;;  %12654 = vrcp.f32 %v8540_v58  ;;  %v8541_v56 = vadd.f32 1.0, %v12633_v25  ;;  %v8276_v23 = vmul.f32 1.442695, %v7883_v13  ;;  %v7892_v44 = vsub.f32 0.0, %v10978_v42  ;;  %v17669_v13 = vld [vmem:[#allocation27_spill] sm:$0xff] }
 0x6f7   :  { %v12637_v29 = vpop.eup %12636  ;;  %v10459_v14 = vpack.c.bf16 %v12635_v32, %v16913_v16  ;;  %12656 = vrcp.f32 %v8542_v24  ;;  %v7885_v16 = vsub.f32 0.0, %v10976_v15  ;;  %v8288_v10 = vmul.f32 1.442695, %v7889_v50 }
 0x6f8   :  { %v12639_v0 = vpop.eup %12638  ;;  %v10460_v54 = vpack.c.bf16 %v12637_v29, %v16922_v52  ;;  %12658 = vrcp.f32 %v8541_v56  ;;  %v10687_v47 = vpop.f32.mrb[32].mxu1  ;;  %v8294_v29 = vmul.f32 1.442695, %v7892_v44  ;;  %v10915_v20 = vadd.f32 %v17669_v13, %v16340_v26 }
 0x6f9   :  { %v12641_v19 = vpop.eup %12640  ;;  %9614 = vst [vmem:[#allocation2 + $0x214] sm:$0xff] %v10459_v14  ;;  %12660 = vpow2.f32 %v8252_v37  ;;  %v7890_v37 = vsub.f32 0.0, %v10914_v30  ;;  %v8280_v58 = vmul.f32 1.442695, %v7885_v16  ;;  %v10688_v33 = vpop.f32.mrb[33].mxu1  ;;  %v10916_v30 = vadd.f32 %v17671_v4, %v16348_v55 }
 0x6fa   :  { %v12643_v53 = vpop.eup %12642  ;;  %9615 = vst [vmem:[#allocation2 + $0x21c] sm:$0xff] %v10460_v54  ;;  %12662 = vpow2.f32 %v8260_v11  ;;  %v16966_v25 = vadd.f32 %v10688_v33, %v10687_v47 }
 0x6fb   :  { %v12645_v52 = vpop.eup %12644  ;;  %v10463_v22 = vpack.c.bf16 %v12643_v53, %v12639_v0  ;;  %12664 = vpow2.f32 %v8264_v49  ;;  %v10690_v49 = vpop.f32.mrb[34].mxu1  ;;  %v8290_v56 = vmul.f32 1.442695, %v7890_v37  ;;  %v17670_v0 = vld [vmem:[#allocation9_spill] sm:$0xff] }
 0x6fc   :  { %v12647_v41 = vpop.eup %12646  ;;  %v10464_v2 = vpack.c.bf16 %v12645_v52, %v12641_v19  ;;  %12666 = vpow2.f32 %v8262_v51  ;;  %v8292_v51 = vmul.f32 1.442695, %v7891_v1  ;;  %v10691_v15 = vpop.f32.mrb[35].mxu1  ;;  %v10979_v54 = vadd.f32 %v17670_v0, %v16343_v40 }
 0x6fd   :  { %v12649_v35 = vpop.eup %12648  ;;  %9618 = vst [vmem:[#allocation2 + $0x230] sm:$0xff] %v10463_v22  ;;  %12668 = vpow2.f32 %v8266_v38  ;;  %v16968_v46 = vadd.f32 %v10691_v15, %v10690_v49  ;;  %v7896_v52 = vsub.f32 0.0, %v10915_v20  ;;  %v17673_v49 = vld [vmem:[#allocation11_spill] sm:$0xff] }
 0x6fe   :  { %v12651_v11 = vpop.eup %12650  ;;  %9619 = vst [vmem:[#allocation2 + $0x238] sm:$0xff] %v10464_v2  ;;  %12670 = vpow2.f32 %v8274_v17  ;;  %v7898_v2 = vsub.f32 0.0, %v10979_v54 }
 0x6ff   :  { %v12653_v24 = vpop.eup %12652  ;;  %v10467_v31 = vpack.c.bf16 %v12651_v11, %v12647_v41  ;;  %12672 = vpow2.f32 %v8278_v61  ;;  %v8302_v15 = vmul.f32 1.442695, %v7896_v52 }
 0x700   :  { %v12655_v57 = vpop.eup %12654  ;;  %v10468_v32 = vpack.c.bf16 %v12653_v24, %v12649_v35  ;;  %12674 = vpow2.f32 %v8276_v23  ;;  %v10693_v16 = vpop.f32.mrb[36].mxu1  ;;  %v7897_v23 = vsub.f32 0.0, %v10916_v30  ;;  %v10917_v24 = vadd.f32 %v17673_v49, %v16340_v26 }
 0x701   :  { %v16970_v48 = vpop.eup %12656  ;;  %9622 = vst [vmem:[#allocation2 + $0x24c] sm:$0xff] %v10467_v31  ;;  %12676 = vpow2.f32 %v8280_v58  ;;  %v10694_v53 = vpop.f32.mrb[37].mxu1  ;;  %v17672_v58 = vld [vmem:[#allocation33_spill] sm:$0xff] }
 0x702   :  { %v12659_v14 = vpop.eup %12658  ;;  %9623 = vst [vmem:[#allocation2 + $0x254] sm:$0xff] %v10468_v32  ;;  %12678 = vpow2.f32 %v8288_v10  ;;  %v16978_v22 = vadd.f32 %v10694_v53, %v10693_v16  ;;  %v10696_v61 = vpop.f32.mrb[38].mxu1  ;;  %v10980_v44 = vadd.f32 %v17672_v58, %v16351_v62  ;;  %v7903_v30 = vsub.f32 0.0, %v10917_v24  ;;  %v17676_v53 = vld [vmem:[#allocation37_spill] sm:$0xff] }
 0x703   :  { %v12661_v21 = vpop.eup %12660  ;;  %v10471_v8 = vpack.c.bf16 %v12659_v14, %v12655_v57  ;;  %12680 = vpow2.f32 %v8292_v51  ;;  %v10697_v37 = vpop.f32.mrb[39].mxu1  ;;  %v17678_v58 = vld [vmem:[#allocation41_spill] sm:$0xff] }
 0x704   :  { %v12663_v19 = vpop.eup %12662  ;;  %v8543_v38 = vadd.f32 1.0, %v12661_v21  ;;  %12682 = vpow2.f32 %v8290_v56  ;;  %v16982_v33 = vadd.f32 %v10697_v37, %v10696_v61  ;;  %v8306_v56 = vmul.f32 1.442695, %v7898_v2  ;;  %v17677_v2 = vld [vmem:[#allocation35_spill] sm:$0xff] }
 0x705   :  { %v12665_v6 = vpop.eup %12664  ;;  %9626 = vst [vmem:[#allocation2 + $0x268] sm:$0xff] %v10471_v8  ;;  %v8547_v42 = vadd.f32 1.0, %v12663_v19  ;;  %12684 = vpow2.f32 %v8294_v29  ;;  %v17674_v29 = vld [vmem:[#allocation12_spill] sm:$0xff]  ;;  %v8304_v21 = vmul.f32 1.442695, %v7897_v23  ;;  %v7899_v8 = vsub.f32 0.0, %v10980_v44 }
 0x706   :  { %v12667_v17 = vpop.eup %12666  ;;  %12686 = vrcp.f32 %v8543_v38  ;;  %v8549_v50 = vadd.f32 1.0, %v12665_v6  ;;  %v10981_v14 = vadd.f32 %v17674_v29, %v16343_v40  ;;  %v17675_v19 = vld [vmem:[#allocation31_spill] sm:$0xff]  ;;  %v10919_v23 = vadd.f32 %v17677_v2, %v16340_v26 }
 0x707   :  { %v12669_v1 = vpop.eup %12668  ;;  %12688 = vrcp.f32 %v8547_v42  ;;  %v8548_v41 = vadd.f32 1.0, %v12667_v17  ;;  %v10918_v38 = vadd.f32 %v17675_v19, %v16348_v55  ;;  %v10982_v17 = vadd.f32 %v17676_v53, %v16351_v62 }
 0x708   :  { %v12671_v47 = vpop.eup %12670  ;;  %12690 = vrcp.f32 %v8549_v50  ;;  %v8550_v35 = vadd.f32 1.0, %v12669_v1  ;;  %v10699_v0 = vpop.f32.mrb[40].mxu1  ;;  %v10983_v44 = vadd.f32 %v17678_v58, %v16343_v40 }
 0x709   :  { %v12673_v11 = vpop.eup %12672  ;;  %12692 = vrcp.f32 %v8548_v41  ;;  %v8554_v10 = vadd.f32 1.0, %v12671_v47  ;;  %v10700_v16 = vpop.f32.mrb[41].mxu1  ;;  %v7905_v41 = vsub.f32 0.0, %v10981_v14  ;;  %v7904_v24 = vsub.f32 0.0, %v10918_v38  ;;  %v17680_v14 = vld [vmem:[#allocation44_spill] sm:$0xff] }
 0x70a   :  { %v12675_v31 = vpop.eup %12674  ;;  %12694 = vrcp.f32 %v8550_v35  ;;  %v8556_v51 = vadd.f32 1.0, %v12673_v11  ;;  %v16992_v50 = vadd.f32 %v10700_v16, %v10699_v0  ;;  %v10702_v52 = vpop.f32.mrb[42].mxu1  ;;  %v7906_v29 = vsub.f32 0.0, %v10982_v17 }
 0x70b   :  { %v12677_v57 = vpop.eup %12676  ;;  %12696 = vrcp.f32 %v8554_v10  ;;  %v8555_v32 = vadd.f32 1.0, %v12675_v31  ;;  %v10703_v37 = vpop.f32.mrb[43].mxu1  ;;  %v17679_v31 = vld [vmem:[#allocation39_spill] sm:$0xff]  ;;  %v8316_v0 = vmul.f32 1.442695, %v7903_v30 }
 0x70c   :  { %v12679_v13 = vpop.eup %12678  ;;  %12698 = vrcp.f32 %v8556_v51  ;;  %v8557_v20 = vadd.f32 1.0, %v12677_v57  ;;  %v16998_v11 = vadd.f32 %v10703_v37, %v10702_v52  ;;  %v10920_v51 = vadd.f32 %v17679_v31, %v16348_v55 }
 0x70d   :  { %v12681_v54 = vpop.eup %12680  ;;  %12700 = vrcp.f32 %v8555_v32  ;;  %v8561_v4 = vadd.f32 1.0, %v12679_v13  ;;  %v8308_v32 = vmul.f32 1.442695, %v7899_v8  ;;  %v10984_v13 = vadd.f32 %v17680_v14, %v16351_v62 }
 0x70e   :  { %v12683_v6 = vpop.eup %12682  ;;  %12702 = vrcp.f32 %v8557_v20  ;;  %v8563_v42 = vadd.f32 1.0, %v12681_v54  ;;  %v7910_v54 = vsub.f32 0.0, %v10919_v23  ;;  %v8320_v16 = vmul.f32 1.442695, %v7905_v41 }
 0x70f   :  { %v12685_v61 = vpop.eup %12684  ;;  %12704 = vrcp.f32 %v8561_v4  ;;  %v8562_v1 = vadd.f32 1.0, %v12683_v6  ;;  %v17681_v4 = vld [vmem:[#allocation13_spill] sm:$0xff]  ;;  %v7912_v6 = vsub.f32 0.0, %v10983_v44  ;;  %v8318_v17 = vmul.f32 1.442695, %v7904_v24 }
 0x710   :  { %v12687_v47 = vpop.eup %12686  ;;  %12706 = vrcp.f32 %v8563_v42  ;;  %v8564_v35 = vadd.f32 1.0, %v12685_v61  ;;  %v10705_v42 = vpop.f32.mrb[44].mxu1  ;;  %v7911_v52 = vsub.f32 0.0, %v10920_v51  ;;  %v7913_v30 = vsub.f32 0.0, %v10984_v13 }
 0x711   :  { %v12689_v10 = vpop.eup %12688  ;;  %v10472_v49 = vpack.c.bf16 %v12687_v47, %v16970_v48  ;;  %12708 = vrcp.f32 %v8562_v1  ;;  %v10921_v48 = vadd.f32 %v17681_v4, %v16340_v26  ;;  %v10706_v61 = vpop.f32.mrb[45].mxu1 }
 0x712   :  { %v12691_v57 = vpop.eup %12690  ;;  %12710 = vrcp.f32 %v8564_v35  ;;  %v17007_v2 = vadd.f32 %v10706_v61, %v10705_v42  ;;  %v10708_v23 = vpop.f32.mrb[46].mxu1  ;;  %v8332_v24 = vmul.f32 1.442695, %v7911_v52  ;;  %v8336_v51 = vmul.f32 1.442695, %v7913_v30 }
 0x713   :  { %v12693_v20 = vpop.eup %12692  ;;  %9627 = vst [vmem:[#allocation2 + $0x270] sm:$0xff] %v10472_v49  ;;  %12712 = vpow2.f32 %v8302_v15  ;;  %v8322_v15 = vmul.f32 1.442695, %v7906_v29  ;;  %v7917_v41 = vsub.f32 0.0, %v10921_v48  ;;  %v10709_v47 = vpop.f32.mrb[47].mxu1 }
 0x714   :  { %v12695_v19 = vpop.eup %12694  ;;  %v10475_v38 = vpack.c.bf16 %v12693_v20, %v12689_v10  ;;  %12714 = vpow2.f32 %v8306_v56  ;;  %v8330_v56 = vmul.f32 1.442695, %v7910_v54  ;;  %v17009_v44 = vadd.f32 %v10709_v47, %v10708_v23  ;;  %v17682_v54 = vld [vmem:[#allocation15_spill] sm:$0xff] }
 0x715   :  { %v12697_v53 = vpop.eup %12696  ;;  %v10476_v8 = vpack.c.bf16 %v12695_v19, %v12691_v57  ;;  %12716 = vpow2.f32 %v8304_v21  ;;  %v8334_v21 = vmul.f32 1.442695, %v7912_v6  ;;  %v10985_v4 = vadd.f32 %v17682_v54, %v16343_v40  ;;  %v17687_v54 = vld [vmem:[#allocation30_spill] sm:$0xff] }
 0x716   :  { %v12699_v1 = vpop.eup %12698  ;;  %9630 = vst [vmem:[#allocation2 + $0x284] sm:$0xff] %v10475_v38  ;;  %12718 = vpow2.f32 %v8308_v32  ;;  %v8344_v32 = vmul.f32 1.442695, %v7917_v41 }
 0x717   :  { %v12701_v37 = vpop.eup %12700  ;;  %9631 = vst [vmem:[#allocation2 + $0x28c] sm:$0xff] %v10476_v8  ;;  %12720 = vpow2.f32 %v8316_v0  ;;  %v17683_v8 = vld [vmem:[#allocation14_spill] sm:$0xff]  ;;  %v7919_v41 = vsub.f32 0.0, %v10985_v4  ;;  %v10924_v4 = vadd.f32 %v17687_v54, %v16348_v55 }
 0x718   :  { %v12703_v35 = vpop.eup %12702  ;;  %v10479_v58 = vpack.c.bf16 %v12701_v37, %v12697_v53  ;;  %12722 = vpow2.f32 %v8320_v16  ;;  %v10711_v13 = vpop.f32.mrb[48].mxu1 }
 0x719   :  { %v12705_v10 = vpop.eup %12704  ;;  %v10480_v49 = vpack.c.bf16 %v12703_v35, %v12699_v1  ;;  %12724 = vpow2.f32 %v8318_v17  ;;  %v10712_v48 = vpop.f32.mrb[49].mxu1  ;;  %v10922_v17 = vadd.f32 %v17683_v8, %v16348_v55 }
 0x71a   :  { %v12707_v31 = vpop.eup %12706  ;;  %9634 = vst [vmem:[#allocation2 + $0x2a0] sm:$0xff] %v10479_v58  ;;  %12726 = vpow2.f32 %v8322_v15  ;;  %v17013_v16 = vadd.f32 %v10712_v48, %v10711_v13  ;;  %v10714_v6 = vpop.f32.mrb[50].mxu1  ;;  %v17684_v15 = vld [vmem:[#allocation21_spill] sm:$0xff]  ;;  %v17685_v58 = vld [vmem:[#allocation26_spill] sm:$0xff] }
 0x71b   :  { %v12709_v57 = vpop.eup %12708  ;;  %9635 = vst [vmem:[#allocation2 + $0x2a8] sm:$0xff] %v10480_v49  ;;  %12728 = vpow2.f32 %v8330_v56  ;;  %v10715_v52 = vpop.f32.mrb[51].mxu1  ;;  %v10986_v30 = vadd.f32 %v17684_v15, %v16351_v62 }
 0x71c   :  { %v12711_v29 = vpop.eup %12710  ;;  %v10483_v14 = vpack.c.bf16 %v12709_v57, %v12705_v10  ;;  %12730 = vpow2.f32 %v8334_v21  ;;  %v17019_v23 = vadd.f32 %v10715_v52, %v10714_v6  ;;  %v10923_v21 = vadd.f32 %v17685_v58, %v16340_v26 }
 0x71d   :  { %v12713_v20 = vpop.eup %12712  ;;  %v10484_v0 = vpack.c.bf16 %v12711_v29, %v12707_v31  ;;  %12732 = vpow2.f32 %v8332_v24  ;;  %v17686_v24 = vld [vmem:[#allocation24_spill] sm:$0xff]  ;;  %v7920_v29 = vsub.f32 0.0, %v10986_v30 }
 0x71e   :  { %v12715_v19 = vpop.eup %12714  ;;  %9638 = vst [vmem:[#allocation2 + $0x2bc] sm:$0xff] %v10483_v14  ;;  %v8568_v38 = vadd.f32 1.0, %v12713_v20  ;;  %12734 = vpow2.f32 %v8336_v51  ;;  %v10987_v31 = vadd.f32 %v17686_v24, %v16343_v40  ;;  %v7924_v6 = vsub.f32 0.0, %v10923_v21 }
 0x71f   :  { %v12717_v42 = vpop.eup %12716  ;;  %9639 = vst [vmem:[#allocation2 + $0x2c4] sm:$0xff] %v10484_v0  ;;  %v8570_v53 = vadd.f32 1.0, %v12715_v19  ;;  %12736 = vpow2.f32 %v8344_v32  ;;  %v7918_v32 = vsub.f32 0.0, %v10922_v17  ;;  %v8348_v0 = vmul.f32 1.442695, %v7919_v41 }
 0x720   :  { %v12719_v61 = vpop.eup %12718  ;;  %12738 = vrcp.f32 %v8568_v38  ;;  %v8569_v1 = vadd.f32 1.0, %v12717_v42  ;;  %v10717_v14 = vpop.f32.mrb[52].mxu1  ;;  %v7926_v52 = vsub.f32 0.0, %v10987_v31  ;;  %v7925_v21 = vsub.f32 0.0, %v10924_v4 }
 0x721   :  { %v12721_v37 = vpop.eup %12720  ;;  %12740 = vrcp.f32 %v8570_v53  ;;  %v8571_v56 = vadd.f32 1.0, %v12719_v61  ;;  %v10718_v48 = vpop.f32.mrb[53].mxu1  ;;  %v17688_v61 = vld [vmem:[#allocation48_spill] sm:$0xff]  ;;  %v8346_v31 = vmul.f32 1.442695, %v7918_v32 }
 0x722   :  { %v12723_v47 = vpop.eup %12722  ;;  %12742 = vrcp.f32 %v8569_v1  ;;  %v8575_v35 = vadd.f32 1.0, %v12721_v37  ;;  %v17027_v42 = vadd.f32 %v10718_v48, %v10717_v14  ;;  %v10720_v53 = vpop.f32.mrb[54].mxu1  ;;  %v10988_v1 = vadd.f32 %v17688_v61, %v16351_v62 }
 0x723   :  { %v12725_v10 = vpop.eup %12724  ;;  %12744 = vrcp.f32 %v8571_v56  ;;  %v8577_v49 = vadd.f32 1.0, %v12723_v47  ;;  %v10721_v15 = vpop.f32.mrb[55].mxu1  ;;  %v17689_v56 = vld [vmem:[#allocation49_spill] sm:$0xff] }
 0x724   :  { %v12727_v51 = vpop.eup %12726  ;;  %12746 = vrcp.f32 %v8575_v35  ;;  %v8576_v57 = vadd.f32 1.0, %v12725_v10  ;;  %v10925_v41 = vadd.f32 %v17689_v56, %v16340_v26  ;;  %v17033_v47 = vadd.f32 %v10721_v15, %v10720_v53  ;;  %v17690_v10 = vld [vmem:[#allocation50_spill] sm:$0xff]  ;;  %v17692_v26 = vld [vmem:[#allocation52_spill] sm:$0xff] }
 0x725   :  { %v12729_v13 = vpop.eup %12728  ;;  %12748 = vrcp.f32 %v8577_v49  ;;  %v8578_v20 = vadd.f32 1.0, %v12727_v51  ;;  %v10989_v49 = vadd.f32 %v17690_v10, %v16343_v40  ;;  %v17691_v51 = vld [vmem:[#allocation51_spill] sm:$0xff]  ;;  %v10990_v54 = vadd.f32 %v17692_v26, %v16351_v62 }
 0x726   :  { %v12731_v19 = vpop.eup %12730  ;;  %12750 = vrcp.f32 %v8576_v57  ;;  %v8582_v38 = vadd.f32 1.0, %v12729_v13  ;;  %v10926_v57 = vadd.f32 %v17691_v51, %v16348_v55  ;;  %v8350_v13 = vmul.f32 1.442695, %v7920_v29 }
 0x727   :  { %v12733_v8 = vpop.eup %12732  ;;  %12752 = vrcp.f32 %v8578_v20  ;;  %v8584_v17 = vadd.f32 1.0, %v12731_v19  ;;  %v7927_v20 = vsub.f32 0.0, %v10988_v1  ;;  %v8358_v19 = vmul.f32 1.442695, %v7924_v6 }
 0x728   :  { %v12735_v30 = vpop.eup %12734  ;;  %12754 = vrcp.f32 %v8582_v38  ;;  %v8583_v37 = vadd.f32 1.0, %v12733_v8  ;;  %v8362_v38 = vmul.f32 1.442695, %v7926_v52  ;;  %v7931_v4 = vsub.f32 0.0, %v10925_v41  ;;  %v10723_v53 = vpop.f32.mrb[56].mxu1 }
 0x729   :  { %v12737_v35 = vpop.eup %12736  ;;  %12756 = vrcp.f32 %v8584_v17  ;;  %v8585_v58 = vadd.f32 1.0, %v12735_v30  ;;  %v8360_v17 = vmul.f32 1.442695, %v7925_v21  ;;  %v7933_v32 = vsub.f32 0.0, %v10989_v49  ;;  %v10724_v61 = vpop.f32.mrb[57].mxu1 }
 0x72a   :  { %v12739_v24 = vpop.eup %12738  ;;  %12758 = vrcp.f32 %v8583_v37  ;;  %v7932_v30 = vsub.f32 0.0, %v10926_v57  ;;  %v17041_v29 = vadd.f32 %v10724_v61, %v10723_v53  ;;  %v10726_v1 = vpop.f32.mrb[58].mxu1  ;;  %v8364_v62 = vmul.f32 1.442695, %v7927_v20  ;;  %v17693_v57 = vld [vmem:[#allocation8_spill] sm:$0xff] }
 0x72b   :  { %v12741_v14 = vpop.eup %12740  ;;  %12760 = vrcp.f32 %v8585_v58  ;;  %v7934_v6 = vsub.f32 0.0, %v10990_v54  ;;  %v10727_v52 = vpop.f32.mrb[59].mxu1  ;;  %v8376_v10 = vmul.f32 1.442695, %v7933_v32  ;;  %v5273_v53 = vsub.s32 5, %v17693_v57 }
 0x72c   :  { %v12743_v48 = vpop.eup %12742  ;;  %12762 = vpow2.f32 %v8348_v0  ;;  %v8372_v0 = vmul.f32 1.442695, %v7931_v4  ;;  %v17043_v41 = vadd.f32 %v10727_v52, %v10726_v1 }
 0x72d   :  { %v12745_v8 = vpop.eup %12744  ;;  %v10487_v40 = vpack.c.bf16 %v12743_v48, %v12739_v24  ;;  %12764 = vpow2.f32 %v8346_v31  ;;  %v8374_v31 = vmul.f32 1.442695, %v7932_v30  ;;  %v5269_v48 = vsub.s32 4, %v17693_v57 }
 0x72e   :  { %v12747_v15 = vpop.eup %12746  ;;  %v10488_v55 = vpack.c.bf16 %v12745_v8, %v12741_v14  ;;  %12766 = vpow2.f32 %v8350_v13  ;;  %v5277_v14 = vsub.s32 6, %v17693_v57  ;;  %v8378_v13 = vmul.f32 1.442695, %v7934_v6 }
 0x72f   :  { %v12749_v37 = vpop.eup %12748  ;;  %9642 = vst [vmem:[#allocation2 + $0x2d8] sm:$0xff] %v10487_v40  ;;  %12768 = vpow2.f32 %v8358_v19 }
 0x730   :  { %v12751_v56 = vpop.eup %12750  ;;  %9643 = vst [vmem:[#allocation2 + $0x2e0] sm:$0xff] %v10488_v55  ;;  %12770 = vpow2.f32 %v8362_v38  ;;  %v10729_v26 = vpop.f32.mrb[60].mxu1  ;;  %v8589_v38 = vadd.f32 1.0, %v12737_v35 }
 0x731   :  { %v12753_v58 = vpop.eup %12752  ;;  %v10491_v21 = vpack.c.bf16 %v12751_v56, %v12747_v15  ;;  %12772 = vpow2.f32 %v8360_v17  ;;  %v10730_v4 = vpop.f32.mrb[61].mxu1  ;;  %v13192_v15 = vld [vmem:[%s17460_s9] sm:$0xff]  ;;  %s13243_s9 = smov [#allocation4]  }
 0x732   :  { %v12755_v49 = vpop.eup %12754  ;;  %v10492_v24 = vpack.c.bf16 %v12753_v58, %v12749_v37  ;;  %12774 = vpow2.f32 %v8364_v62  ;;  %v17048_v40 = vadd.f32 %v10730_v4, %v10729_v26  ;;  %v10732_v17 = vpop.f32.mrb[62].mxu1  ;;  %v17053_v55 = vrot.slane %v13192_v15, %v5277_v14  ;;  %s9683_s12 = sshll.u32 %s13243_s9, 4  ;;  %s17283_s12 = int_to_ptr.vmem [resolvable:$true] %s9683_s12 }
 0x733   :  { %v12757_v51 = vpop.eup %12756  ;;  %9646 = vst [vmem:[#allocation2 + $0x2f4] sm:$0xff] %v10491_v21  ;;  %12776 = vpow2.f32 %v8372_v0  ;;  %v10733_v61 = vpop.f32.mrb[63].mxu1  ;;  %v17057_v6 = vrot.slane %v13192_v15, %v5269_v48  ;;  %v17059_v0 = vrot.slane %v13192_v15, %v5273_v53  ;;  %s13193_s13 = scalar_lea.vmem %s17283_s12, 4096  ;;  %p13198_p1 = scmp.lt.s32.totalorder %s17283_s12, %s17283_s12 }
 0x734   :  { %v12759_v20 = vpop.eup %12758  ;;  %9647 = vst [vmem:[#allocation2 + $0x2fc] sm:$0xff] %v10492_v24  ;;  %12778 = vpow2.f32 %v8376_v10  ;;  %v17055_v1 = vadd.f32 %v10733_v61, %v10732_v17  ;;  %v7427_v10 = vadd.f32 %v16885_v36, %v17053_v55  ;;  %p13194_p0 = scmp.ne.s32.totalorder %s17283_s12, %s13193_s13  ;;  %p13199_p2 = scmp.lt.s32.totalorder %s13193_s13, %s13193_s13 }
 0x735   :  { %v12761_v54 = vpop.eup %12760  ;;  %v10495_v19 = vpack.c.bf16 %v12759_v20, %v12755_v49  ;;  %12780 = vpow2.f32 %v8374_v31 }
 0x736   :  { %v10496_v8 = vpack.c.bf16 %v12761_v54, %v12757_v51  ;;  %v12763_v32 = vpop.eup %12762  ;;  %12782 = vpow2.f32 %v8378_v13  ;;  %p13200_p3 = por %p13199_p2, %p13198_p1 }
 0x737   :  { %9650 = vst [vmem:[#allocation2 + $0x310] sm:$0xff] %v10495_v19  ;;  %v12765_v35 = vpop.eup %12764  ;;  %v8591_v30 = vadd.f32 1.0, %v12763_v32  ;;  %12784 = vrcp.f32 %v8589_v38 }
 0x738   :  { %9651 = vst [vmem:[#allocation2 + $0x318] sm:$0xff] %v10496_v8  ;;  %v12767_v37 = vpop.eup %12766  ;;  %v8590_v62 = vadd.f32 1.0, %v12765_v35  ;;  %v7233_v31 = vpop.f32.mrb[0].mxu0  ;;  %p13201_p4 = pnand %p13200_p3, %p13194_p0 }
 0x739   :  { %v12769_v52 = vpop.eup %12768  ;;  %12786 = vrcp.f32 %v8591_v30  ;;  %v8592_v56 = vadd.f32 1.0, %v12767_v37  ;;  %v7587_v51 = vpop.f32.mrb[64].mxu1  ;;  %v10991_v13 = vadd.f32 %v7233_v31, %v17057_v6 }
 0x73a   :  { %v12771_v58 = vpop.eup %12770  ;;  %12788 = vrcp.f32 %v8590_v62  ;;  %v8596_v21 = vadd.f32 1.0, %v12769_v52  ;;  %v7588_v20 = vadd.f32 %v7587_v51, %v7427_v10  ;;  %v7235_v26 = vpop.f32.mrb[1].mxu0 }
 0x73b   :  { %v12773_v49 = vpop.eup %12772  ;;  %12790 = vrcp.f32 %v8592_v56  ;;  %v8598_v24 = vadd.f32 1.0, %v12771_v58  ;;  %v7589_v54 = vpop.f32.mrb[65].mxu1  ;;  %v10992_v38 = vadd.f32 %v7235_v26, %v17059_v0  ;;  %v7718_v17 = vsub.f32 0.0, %v10991_v13 }
 0x73c   :  { %v12775_v57 = vpop.eup %12774  ;;  %12792 = vrcp.f32 %v8596_v21  ;;  %v8597_v14 = vadd.f32 1.0, %v12773_v49  ;;  %v7237_v4 = vpop.f32.mrb[2].mxu0  ;;  %v7720_v32 = vsub.f32 0.0, %v7588_v20  ;;  %v7430_v21 = vadd.f32 %v16891_v27, %v17053_v55 }
 0x73d   :  { %v12777_v48 = vpop.eup %12776  ;;  %12794 = vrcp.f32 %v8598_v24  ;;  %v8599_v19 = vadd.f32 1.0, %v12775_v57  ;;  %v7590_v36 = vpop.f32.mrb[66].mxu1  ;;  %v7719_v37 = vsub.f32 0.0, %v10992_v38  ;;  %v10993_v62 = vadd.f32 %v7237_v4, %v17057_v6 }
 0x73e   :  { %v12779_v53 = vpop.eup %12778  ;;  %12796 = vrcp.f32 %v8597_v14  ;;  %v8603_v8 = vadd.f32 1.0, %v12777_v48  ;;  %v7239_v61 = vpop.f32.mrb[3].mxu0  ;;  %v7946_v58 = vmul.f32 1.442695, %v7718_v17  ;;  %v7950_v49 = vmul.f32 1.442695, %v7720_v32 }
 0x73f   :  { %v7592_v15 = vpop.f32.mrb[67].mxu1  ;;  %v12781_v35 = vpop.eup %12780  ;;  %12798 = vrcp.f32 %v8599_v19  ;;  %v8605_v30 = vadd.f32 1.0, %v12779_v53  ;;  %v7725_v24 = vsub.f32 0.0, %v10993_v62  ;;  %v7948_v51 = vmul.f32 1.442695, %v7719_v37 }
 0x740   :  { %v12783_v52 = vpop.eup %12782  ;;  %12800 = vrcp.f32 %v8603_v8  ;;  %v8604_v56 = vadd.f32 1.0, %v12781_v35  ;;  %v7591_v57 = vadd.f32 %v7590_v36, %v7430_v21  ;;  %v10994_v14 = vadd.f32 %v7239_v61, %v17059_v0  ;;  %v7243_v26 = vpop.f32.mrb[4].mxu0 }
 0x741   :  { %12802 = vrcp.f32 %v8605_v30  ;;  %v8606_v10 = vadd.f32 1.0, %v12783_v52  ;;  %v12785_v31 = vpop.eup %12784  ;;  %v7960_v20 = vmul.f32 1.442695, %v7725_v24  ;;  %v7435_v54 = vadd.f32 %v16895_v28, %v17053_v55  ;;  %v7595_v48 = vpop.f32.mrb[68].mxu1 }
 0x742   :  { %12804 = vrcp.f32 %v8604_v56  ;;  %v7438_v27 = vadd.f32 %v16899_v39, %v17053_v55  ;;  %v7727_v38 = vsub.f32 0.0, %v7591_v57  ;;  %v7726_v4 = vsub.f32 0.0, %v10994_v14  ;;  %v7245_v36 = vpop.f32.mrb[5].mxu0  ;;  %v7597_v8 = vpop.f32.mrb[69].mxu1 }
 0x743   :  { %v12787_v13 = vpop.eup %12786  ;;  %12806 = vrcp.f32 %v8606_v10  ;;  %v10995_v53 = vadd.f32 %v7243_v26, %v17057_v6  ;;  %v7596_v61 = vadd.f32 %v7595_v48, %v7435_v54  ;;  %v10996_v15 = vadd.f32 %v7245_v36, %v17059_v0  ;;  %v7247_v35 = vpop.f32.mrb[6].mxu0 }
 0x744   :  { %v12789_v19 = vpop.eup %12788  ;;  %12808 = vpow2.f32 %v7946_v58  ;;  %v7598_v28 = vpop.f32.mrb[70].mxu1  ;;  %v7964_v39 = vmul.f32 1.442695, %v7727_v38  ;;  %v7962_v62 = vmul.f32 1.442695, %v7726_v4 }
 0x745   :  { %v12791_v17 = vpop.eup %12790  ;;  %v10499_v32 = vpack.c.bf16 %v12789_v19, %v12785_v31  ;;  %12810 = vpow2.f32 %v7950_v49  ;;  %v7249_v52 = vpop.f32.mrb[7].mxu0  ;;  %v7732_v21 = vsub.f32 0.0, %v10995_v53  ;;  %v7734_v10 = vsub.f32 0.0, %v7596_v61 }
 0x746   :  { %v12793_v30 = vpop.eup %12792  ;;  %v10500_v37 = vpack.c.bf16 %v12791_v17, %v12787_v13  ;;  %12812 = vpow2.f32 %v7948_v51  ;;  %v7600_v56 = vpop.f32.mrb[71].mxu1  ;;  %v7733_v24 = vsub.f32 0.0, %v10996_v15  ;;  %v10997_v49 = vadd.f32 %v7247_v35, %v17057_v6 }
 0x747   :  { %v12795_v58 = vpop.eup %12794  ;;  %9654 = vst [vmem:[#allocation2 + $0x32c] sm:$0xff] %v10499_v32  ;;  %12814 = vpow2.f32 %v7960_v20  ;;  %v7599_v57 = vadd.f32 %v7598_v28, %v7438_v27  ;;  %v10998_v14 = vadd.f32 %v7249_v52, %v17059_v0  ;;  %v7974_v26 = vmul.f32 1.442695, %v7732_v21 }
 0x748   :  { %v12797_v31 = vpop.eup %12796  ;;  %9655 = vst [vmem:[#allocation2 + $0x334] sm:$0xff] %v10500_v37  ;;  %12816 = vpow2.f32 %v7964_v39  ;;  %v7978_v54 = vmul.f32 1.442695, %v7734_v10  ;;  %v7976_v38 = vmul.f32 1.442695, %v7733_v24  ;;  %v7739_v20 = vsub.f32 0.0, %v10997_v49 }
 0x749   :  { %v12799_v13 = vpop.eup %12798  ;;  %v10503_v51 = vpack.c.bf16 %v12797_v31, %v12793_v30  ;;  %12818 = vpow2.f32 %v7962_v62  ;;  %v7741_v4 = vsub.f32 0.0, %v7599_v57  ;;  %v7740_v36 = vsub.f32 0.0, %v10998_v14  ;;  %v7253_v8 = vpop.f32.mrb[8].mxu0 }
 0x74a   :  { %v12801_v48 = vpop.eup %12800  ;;  %v10504_v19 = vpack.c.bf16 %v12799_v13, %v12795_v58  ;;  %12820 = vpow2.f32 %v7974_v26  ;;  %v7443_v27 = vadd.f32 %v16903_v45, %v17053_v55  ;;  %v7603_v17 = vpop.f32.mrb[72].mxu1  ;;  %v7988_v61 = vmul.f32 1.442695, %v7739_v20 }
 0x74b   :  { %v12803_v53 = vpop.eup %12802  ;;  %9658 = vst [vmem:[#allocation2 + $0x348] sm:$0xff] %v10503_v51  ;;  %12822 = vpow2.f32 %v7978_v54  ;;  %v7992_v15 = vmul.f32 1.442695, %v7741_v4  ;;  %v10999_v35 = vadd.f32 %v7253_v8, %v17057_v6  ;;  %v7255_v28 = vpop.f32.mrb[9].mxu0  ;;  %v7990_v62 = vmul.f32 1.442695, %v7740_v36 }
 0x74c   :  { %v12805_v32 = vpop.eup %12804  ;;  %9659 = vst [vmem:[#allocation2 + $0x350] sm:$0xff] %v10504_v19  ;;  %v7605_v30 = vpop.f32.mrb[73].mxu1  ;;  %12824 = vpow2.f32 %v7976_v38  ;;  %v7604_v52 = vadd.f32 %v7603_v17, %v7443_v27  ;;  %v11000_v51 = vadd.f32 %v7255_v28, %v17059_v0  ;;  %v7446_v26 = vadd.f32 %v16907_v12, %v17053_v55 }
 0x74d   :  { %v12807_v37 = vpop.eup %12806  ;;  %v10507_v39 = vpack.c.bf16 %v12805_v32, %v12801_v48  ;;  %v7257_v56 = vpop.f32.mrb[10].mxu0  ;;  %12826 = vpow2.f32 %v7988_v61  ;;  %v7746_v57 = vsub.f32 0.0, %v10999_v35 }
 0x74e   :  { %v7606_v58 = vpop.f32.mrb[74].mxu1  ;;  %v12809_v21 = vpop.eup %12808  ;;  %v10508_v10 = vpack.c.bf16 %v12807_v37, %v12803_v53  ;;  %12828 = vpow2.f32 %v7992_v15  ;;  %v11001_v19 = vadd.f32 %v7257_v56, %v17057_v6  ;;  %v7451_v53 = vadd.f32 %v16911_v7, %v17053_v55 }
 0x74f   :  { %v7259_v45 = vpop.f32.mrb[11].mxu0  ;;  %v7608_v24 = vpop.f32.mrb[75].mxu1  ;;  %9662 = vst [vmem:[#allocation2 + $0x364] sm:$0xff] %v10507_v39  ;;  %v8390_v49 = vadd.f32 1.0, %v12809_v21  ;;  %12830 = vpow2.f32 %v7990_v62  ;;  %v7607_v4 = vadd.f32 %v7606_v58, %v7446_v26  ;;  %v8002_v27 = vmul.f32 1.442695, %v7746_v57 }
 0x750   :  { %v12811_v31 = vpop.eup %12810  ;;  %9663 = vst [vmem:[#allocation2 + $0x36c] sm:$0xff] %v10508_v10  ;;  %v7748_v17 = vsub.f32 0.0, %v7604_v52  ;;  %v7263_v32 = vpop.f32.mrb[12].mxu0  ;;  %v7747_v15 = vsub.f32 0.0, %v11000_v51  ;;  %v7753_v37 = vsub.f32 0.0, %v11001_v19  ;;  %v7454_v7 = vadd.f32 %v16917_v5, %v17053_v55 }
 0x751   :  { %v12813_v14 = vpop.eup %12812  ;;  %v8392_v13 = vadd.f32 1.0, %v12811_v31  ;;  %12832 = vrcp.f32 %v8390_v49  ;;  %v7611_v61 = vpop.f32.mrb[76].mxu1  ;;  %v11002_v21 = vadd.f32 %v7259_v45, %v17059_v0  ;;  %v7459_v31 = vadd.f32 %v16920_v3, %v17053_v55 }
 0x752   :  { %v12815_v54 = vpop.eup %12814  ;;  %v8391_v48 = vadd.f32 1.0, %v12813_v14  ;;  %v7265_v35 = vpop.f32.mrb[13].mxu0  ;;  %v17086_v39 = vadd.f32 %v7611_v61, %v7451_v53  ;;  %v8006_v14 = vmul.f32 1.442695, %v7748_v17  ;;  %v8004_v26 = vmul.f32 1.442695, %v7747_v15 }
 0x753   :  { %v12817_v38 = vpop.eup %12816  ;;  %12834 = vrcp.f32 %v8392_v13  ;;  %v8397_v20 = vadd.f32 1.0, %v12815_v54  ;;  %v7613_v28 = vpop.f32.mrb[77].mxu1  ;;  %v11003_v13 = vadd.f32 %v7263_v32, %v17057_v6  ;;  %v7755_v54 = vsub.f32 0.0, %v7607_v4 }
 0x754   :  { %v12819_v36 = vpop.eup %12818  ;;  %12836 = vrcp.f32 %v8391_v48  ;;  %v8399_v8 = vadd.f32 1.0, %v12817_v38  ;;  %v7267_v62 = vpop.f32.mrb[14].mxu0  ;;  %v8016_v45 = vmul.f32 1.442695, %v7753_v37  ;;  %v11004_v38 = vadd.f32 %v7265_v35, %v17059_v0 }
 0x755   :  { %12838 = vrcp.f32 %v8397_v20  ;;  %v8398_v12 = vadd.f32 1.0, %v12819_v36  ;;  %v12821_v30 = vpop.eup %12820  ;;  %v7614_v56 = vpop.f32.mrb[78].mxu1  ;;  %v7754_v53 = vsub.f32 0.0, %v11002_v21  ;;  %v7760_v17 = vsub.f32 0.0, %v11003_v13 }
 0x756   :  { %12840 = vrcp.f32 %v8399_v8  ;;  %v12823_v58 = vpop.eup %12822  ;;  %v8404_v52 = vadd.f32 1.0, %v12821_v30  ;;  %v7269_v10 = vpop.f32.mrb[15].mxu0  ;;  %v7615_v36 = vadd.f32 %v7614_v56, %v7454_v7  ;;  %v11005_v32 = vadd.f32 %v7267_v62, %v17057_v6 }
 0x757   :  { %12842 = vrcp.f32 %v8398_v12  ;;  %v7616_v24 = vpop.f32.mrb[79].mxu1  ;;  %v12825_v49 = vpop.eup %12824  ;;  %v8406_v57 = vadd.f32 1.0, %v12823_v58  ;;  %v8020_v15 = vmul.f32 1.442695, %v7755_v54  ;;  %v7762_v28 = vsub.f32 0.0, %v17086_v39 }
 0x758   :  { %12844 = vpow2.f32 %v8002_v27  ;;  %v12827_v51 = vpop.eup %12826  ;;  %v8405_v5 = vadd.f32 1.0, %v12825_v49  ;;  %v7273_v61 = vpop.f32.mrb[16].mxu0  ;;  %v7761_v56 = vsub.f32 0.0, %v11004_v38  ;;  %v7767_v54 = vsub.f32 0.0, %v11005_v32 }
 0x759   :  { %12846 = vrcp.f32 %v8404_v52  ;;  %v12829_v48 = vpop.eup %12828  ;;  %v8411_v19 = vadd.f32 1.0, %v12827_v51  ;;  %v7619_v12 = vpop.f32.mrb[80].mxu1  ;;  %v11006_v52 = vadd.f32 %v7269_v10, %v17059_v0  ;;  %v11007_v39 = vadd.f32 %v7273_v61, %v17057_v6 }
 0x75a   :  { %12848 = vrcp.f32 %v8406_v57  ;;  %v12831_v20 = vpop.eup %12830  ;;  %v8413_v3 = vadd.f32 1.0, %v12829_v48  ;;  %v17097_v30 = vadd.f32 %v7619_v12, %v7459_v31  ;;  %v17099_v35 = vpop.f32.mrb[17].mxu0  ;;  %v8018_v57 = vmul.f32 1.442695, %v7754_v53 }
 0x75b   :  { %12850 = vrcp.f32 %v8405_v5  ;;  %v12833_v8 = vpop.eup %12832  ;;  %v8412_v27 = vadd.f32 1.0, %v12831_v20  ;;  %v7621_v37 = vpop.f32.mrb[81].mxu1  ;;  %v8030_v5 = vmul.f32 1.442695, %v7760_v17  ;;  %v7462_v10 = vadd.f32 %v16924_v18, %v17053_v55 }
 0x75c   :  { %12852 = vrcp.f32 %v8411_v19  ;;  %v17102_v21 = vpop.f32.mrb[18].mxu0  ;;  %v7622_v62 = vpop.f32.mrb[82].mxu1  ;;  %v8034_v38 = vmul.f32 1.442695, %v7762_v28  ;;  %v8032_v53 = vmul.f32 1.442695, %v7761_v56  ;;  %v7467_v28 = vadd.f32 %v16926_v34, %v17053_v55 }
 0x75d   :  { %v12835_v4 = vpop.eup %12834  ;;  %12854 = vrcp.f32 %v8413_v3  ;;  %v17105_v31 = vpop.f32.mrb[19].mxu0  ;;  %v17109_v17 = vadd.f32 %v7622_v62, %v7462_v10  ;;  %v8044_v18 = vmul.f32 1.442695, %v7767_v54 }
 0x75e   :  { %v12837_v58 = vpop.eup %12836  ;;  %v10386_v7 = vpack.c.bf16 %v12835_v4, %v12835_v4  ;;  %12856 = vrcp.f32 %v8412_v27  ;;  %v7624_v13 = vpop.f32.mrb[83].mxu1 }
 0x75f   :  { %v12839_v24 = vpop.eup %12838  ;;  %v10385_v49 = vpack.c.bf16 %v12837_v58, %v12833_v8  ;;  %12858 = vpow2.f32 %v8006_v14  ;;  %v7769_v14 = vsub.f32 0.0, %v7615_v36  ;;  %v7768_v8 = vsub.f32 0.0, %v11006_v52 }
 0x760   :  { %v12841_v51 = vpop.eup %12840  ;;  %9541 = vst [vmem:[#allocation2 + $0x18] sm:$0xf] %v10386_v7  ;;  %12860 = vpow2.f32 %v8004_v26  ;;  %v7774_v26 = vsub.f32 0.0, %v11007_v39  ;;  %v17111_v12 = vpop.f32.mrb[20].mxu0 }
 0x761   :  { %v12843_v48 = vpop.eup %12842  ;;  %9540 = vst [vmem:[#allocation2 + $0x10] sm:$0xff] %v10385_v49  ;;  %v10390_v19 = vpack.c.bf16 %v12841_v51, %v12841_v51  ;;  %12862 = vpow2.f32 %v8016_v45  ;;  %v7627_v45 = vpop.f32.mrb[84].mxu1  ;;  %v8046_v52 = vmul.f32 1.442695, %v7768_v8 }
 0x762   :  { %v12845_v20 = vpop.eup %12844  ;;  %v10389_v3 = vpack.c.bf16 %v12843_v48, %v12839_v24  ;;  %12864 = vpow2.f32 %v8020_v15  ;;  %v8048_v15 = vmul.f32 1.442695, %v7769_v14  ;;  %v17115_v37 = vpop.f32.mrb[21].mxu0  ;;  %v17119_v39 = vadd.f32 %v7627_v45, %v7467_v28 }
 0x763   :  { %v12847_v27 = vpop.eup %12846  ;;  %9545 = vst [vmem:[#allocation2 + $0x34] sm:$0xf] %v10390_v19  ;;  %v8418_v61 = vadd.f32 1.0, %v12845_v20  ;;  %12866 = vpow2.f32 %v8018_v57  ;;  %v7629_v58 = vpop.f32.mrb[85].mxu1  ;;  %v8058_v57 = vmul.f32 1.442695, %v7774_v26  ;;  %v7470_v48 = vadd.f32 %v16928_v9, %v17053_v55 }
 0x764   :  { %v12849_v32 = vpop.eup %12848  ;;  %9544 = vst [vmem:[#allocation2 + $0x2c] sm:$0xff] %v10389_v3  ;;  %12868 = vpow2.f32 %v8030_v5  ;;  %v17117_v62 = vpop.f32.mrb[22].mxu0  ;;  %v7776_v14 = vsub.f32 0.0, %v17097_v30  ;;  %v11008_v20 = vadd.f32 %v17099_v35, %v17059_v0  ;;  %v7475_v35 = vadd.f32 %v16938_v59, %v17053_v55 }
 0x765   :  { %v12851_v36 = vpop.eup %12850  ;;  %v10394_v4 = vpack.c.bf16 %v12849_v32, %v12849_v32  ;;  %12870 = vrcp.f32 %v8418_v61  ;;  %v7630_v24 = vpop.f32.mrb[86].mxu1  ;;  %v11009_v61 = vadd.f32 %v17102_v21, %v17057_v6  ;;  %v7478_v59 = vadd.f32 %v16944_v63, %v17053_v55 }
 0x766   :  { %v12853_v7 = vpop.eup %12852  ;;  %v10393_v56 = vpack.c.bf16 %v12851_v36, %v12847_v27  ;;  %12872 = vpow2.f32 %v8034_v38  ;;  %v17121_v13 = vpop.f32.mrb[23].mxu0  ;;  %v17130_v9 = vadd.f32 %v7630_v24, %v7470_v48  ;;  %v8062_v28 = vmul.f32 1.442695, %v7776_v14 }
 0x767   :  { %v12855_v49 = vpop.eup %12854  ;;  %9549 = vst [vmem:[#allocation2 + $0x50] sm:$0xf] %v10394_v4  ;;  %12874 = vpow2.f32 %v8032_v53  ;;  %v7632_v51 = vpop.f32.mrb[87].mxu1  ;;  %v7775_v58 = vsub.f32 0.0, %v11008_v20  ;;  %v11010_v24 = vadd.f32 %v17105_v31, %v17059_v0  ;;  %v11011_v31 = vadd.f32 %v17111_v12, %v17057_v6 }
 0x768   :  { %v12857_v34 = vpop.eup %12856  ;;  %9548 = vst [vmem:[#allocation2 + $0x48] sm:$0xff] %v10393_v56  ;;  %v10398_v5 = vpack.c.bf16 %v12855_v49, %v12855_v49  ;;  %12876 = vpow2.f32 %v8044_v18  ;;  %v17132_v26 = vpop.f32.mrb[24].mxu0  ;;  %v17156_v63 = vadd.f32 %v16962_v43, %v17053_v55  ;;  %v7783_v20 = vsub.f32 0.0, %v17109_v17 }
 0x769   :  { %v12859_v54 = vpop.eup %12858  ;;  %v10397_v10 = vpack.c.bf16 %v12857_v34, %v12853_v7  ;;  %12878 = vpow2.f32 %v8048_v15  ;;  %v7635_v32 = vpop.f32.mrb[88].mxu1  ;;  %v7781_v34 = vsub.f32 0.0, %v11009_v61  ;;  %v8060_v14 = vmul.f32 1.442695, %v7775_v58 }
 0x76a   :  { %v12861_v19 = vpop.eup %12860  ;;  %9553 = vst [vmem:[#allocation2 + $0x6c] sm:$0xf] %v10398_v5  ;;  %v8420_v38 = vadd.f32 1.0, %v12859_v54  ;;  %12880 = vpow2.f32 %v8046_v52  ;;  %v17136_v45 = vpop.f32.mrb[25].mxu0  ;;  %v17148_v5 = vadd.f32 %v7635_v32, %v7475_v35  ;;  %v7483_v54 = vadd.f32 %v16954_v60, %v17053_v55 }
 0x76b   :  { %v12863_v3 = vpop.eup %12862  ;;  %9552 = vst [vmem:[#allocation2 + $0x64] sm:$0xff] %v10397_v10  ;;  %v8419_v53 = vadd.f32 1.0, %v12861_v19  ;;  %12882 = vpow2.f32 %v8058_v57  ;;  %v7637_v36 = vpop.f32.mrb[89].mxu1  ;;  %v7782_v60 = vsub.f32 0.0, %v11010_v24  ;;  %v8072_v12 = vmul.f32 1.442695, %v7781_v34 }
 0x76c   :  { %v12865_v8 = vpop.eup %12864  ;;  %12884 = vrcp.f32 %v8420_v38  ;;  %v8425_v27 = vadd.f32 1.0, %v12863_v3  ;;  %v17138_v21 = vpop.f32.mrb[26].mxu0  ;;  %v11012_v43 = vadd.f32 %v17115_v37, %v17059_v0  ;;  %v7788_v35 = vsub.f32 0.0, %v11011_v31 }
 0x76d   :  { %v12867_v18 = vpop.eup %12866  ;;  %12886 = vrcp.f32 %v8419_v53  ;;  %v8427_v30 = vadd.f32 1.0, %v12865_v8  ;;  %v7638_v7 = vpop.f32.mrb[90].mxu1  ;;  %v11013_v17 = vadd.f32 %v17117_v62, %v17057_v6  ;;  %v8076_v58 = vmul.f32 1.442695, %v7783_v20 }
 0x76e   :  { %v12869_v4 = vpop.eup %12868  ;;  %12888 = vrcp.f32 %v8425_v27  ;;  %v8426_v15 = vadd.f32 1.0, %v12867_v18  ;;  %v17146_v49 = vpop.f32.mrb[27].mxu0  ;;  %v17159_v8 = vadd.f32 %v7638_v7, %v7478_v59  ;;  %v7790_v7 = vsub.f32 0.0, %v17119_v39 }
 0x76f   :  { %v17140_v56 = vpop.eup %12870  ;;  %12890 = vrcp.f32 %v8427_v30  ;;  %v8432_v52 = vadd.f32 1.0, %v12869_v4  ;;  %v7640_v57 = vpop.f32.mrb[91].mxu1  ;;  %v7789_v31 = vsub.f32 0.0, %v11012_v43  ;;  %v11015_v39 = vadd.f32 %v17132_v26, %v17057_v6 }
 0x770   :  { %v12873_v51 = vpop.eup %12872  ;;  %12892 = vrcp.f32 %v8426_v15  ;;  %v17163_v32 = vpop.f32.mrb[28].mxu0  ;;  %v8074_v57 = vmul.f32 1.442695, %v7782_v60  ;;  %v8086_v20 = vmul.f32 1.442695, %v7788_v35 }
 0x771   :  { %v12875_v10 = vpop.eup %12874  ;;  %12894 = vrcp.f32 %v8432_v52  ;;  %v8434_v48 = vadd.f32 1.0, %v12873_v51  ;;  %v7643_v36 = vpop.f32.mrb[92].mxu1  ;;  %v11014_v51 = vadd.f32 %v17121_v13, %v17059_v0 }
 0x772   :  { %v12877_v19 = vpop.eup %12876  ;;  %v8433_v38 = vadd.f32 1.0, %v12875_v10  ;;  %12896 = vpow2.f32 %v8062_v28  ;;  %v17167_v4 = vpop.f32.mrb[29].mxu0 }
 0x773   :  { %v12879_v3 = vpop.eup %12878  ;;  %12898 = vrcp.f32 %v8434_v48  ;;  %v8439_v53 = vadd.f32 1.0, %v12877_v19  ;;  %v7645_v52 = vpop.f32.mrb[93].mxu1 }
 0x774   :  { %v12881_v27 = vpop.eup %12880  ;;  %12900 = vrcp.f32 %v8433_v38  ;;  %v8441_v61 = vadd.f32 1.0, %v12879_v3  ;;  %v17170_v37 = vpop.f32.mrb[30].mxu0  ;;  %v7795_v3 = vsub.f32 0.0, %v11013_v17 }
 0x775   :  { %v12883_v18 = vpop.eup %12882  ;;  %12902 = vrcp.f32 %v8439_v53  ;;  %v8440_v30 = vadd.f32 1.0, %v12881_v27  ;;  %v7646_v62 = vpop.f32.mrb[94].mxu1  ;;  %v17179_v53 = vadd.f32 %v7643_v36, %v7483_v54  ;;  %v8090_v27 = vmul.f32 1.442695, %v7790_v7 }
 0x776   :  { %v12885_v15 = vpop.eup %12884  ;;  %12904 = vrcp.f32 %v8441_v61  ;;  %v8446_v28 = vadd.f32 1.0, %v12883_v18  ;;  %v17174_v34 = vpop.f32.mrb[31].mxu0  ;;  %v7796_v18 = vsub.f32 0.0, %v11014_v51  ;;  %v17183_v35 = vadd.f32 %v7646_v62, %v17156_v63 }
 0x777   :  { %v12887_v24 = vpop.eup %12886  ;;  %v10402_v59 = vpack.c.bf16 %v12885_v15, %v12885_v15  ;;  %12906 = vrcp.f32 %v8440_v30  ;;  %v7648_v19 = vpop.f32.mrb[95].mxu1  ;;  %v8088_v30 = vmul.f32 1.442695, %v7789_v31  ;;  %v7804_v15 = vsub.f32 0.0, %v17148_v5 }
 0x778   :  { %v12889_v10 = vpop.eup %12888  ;;  %v10401_v48 = vpack.c.bf16 %v12887_v24, %v17140_v56  ;;  %12908 = vrcp.f32 %v8446_v28  ;;  %v7797_v56 = vsub.f32 0.0, %v17130_v9  ;;  %v17185_v54 = vpop.f32.mrb[32].mxu0  ;;  %v8100_v9 = vmul.f32 1.442695, %v7795_v3 }
 0x779   :  { %v12891_v38 = vpop.eup %12890  ;;  %9557 = vst [vmem:[#allocation2 + $0x88] sm:$0xf] %v10402_v59  ;;  %12910 = vpow2.f32 %v8060_v14  ;;  %v7802_v14 = vsub.f32 0.0, %v11015_v39  ;;  %v7651_v17 = vpop.f32.mrb[96].mxu1  ;;  %v7491_v63 = vadd.f32 %v16966_v25, %v17053_v55  ;;  %v8102_v62 = vmul.f32 1.442695, %v7796_v18 }
 0x77a   :  { %v12893_v13 = vpop.eup %12892  ;;  %9556 = vst [vmem:[#allocation2 + $0x80] sm:$0xff] %v10401_v48  ;;  %v10406_v60 = vpack.c.bf16 %v12891_v38, %v12891_v38  ;;  %12912 = vpow2.f32 %v8072_v12  ;;  %v17188_v28 = vpop.f32.mrb[33].mxu0  ;;  %v8104_v52 = vmul.f32 1.442695, %v7797_v56  ;;  %v11016_v39 = vadd.f32 %v17136_v45, %v17059_v0 }
 0x77b   :  { %v12895_v61 = vpop.eup %12894  ;;  %v10405_v43 = vpack.c.bf16 %v12893_v13, %v12889_v10  ;;  %12914 = vpow2.f32 %v8076_v58  ;;  %v7653_v24 = vpop.f32.mrb[97].mxu1  ;;  %v8114_v31 = vmul.f32 1.442695, %v7802_v14  ;;  %v17198_v19 = vadd.f32 %v7651_v17, %v7491_v63 }
 0x77c   :  { %v12897_v26 = vpop.eup %12896  ;;  %9561 = vst [vmem:[#allocation2 + $0xa4] sm:$0xf] %v10406_v60  ;;  %12916 = vpow2.f32 %v8074_v57  ;;  %v17192_v59 = vpop.f32.mrb[34].mxu0  ;;  %v8118_v3 = vmul.f32 1.442695, %v7804_v15  ;;  %v7494_v13 = vadd.f32 %v16968_v46, %v17053_v55  ;;  %v11017_v45 = vadd.f32 %v17138_v21, %v17057_v6 }
 0x77d   :  { %v12899_v36 = vpop.eup %12898  ;;  %9560 = vst [vmem:[#allocation2 + $0x9c] sm:$0xff] %v10405_v43  ;;  %v8448_v12 = vadd.f32 1.0, %v12897_v26  ;;  %12918 = vpow2.f32 %v8086_v20  ;;  %v7654_v10 = vpop.f32.mrb[98].mxu1  ;;  %v7803_v26 = vsub.f32 0.0, %v11016_v39  ;;  %v7499_v21 = vadd.f32 %v16978_v22, %v17053_v55 }
 0x77e   :  { %v12901_v58 = vpop.eup %12900  ;;  %v10410_v7 = vpack.c.bf16 %v12899_v36, %v12899_v36  ;;  %12920 = vpow2.f32 %v8090_v27  ;;  %v17194_v48 = vpop.f32.mrb[35].mxu0  ;;  %v7809_v63 = vsub.f32 0.0, %v11017_v45  ;;  %v11018_v24 = vadd.f32 %v17146_v49, %v17059_v0 }
 0x77f   :  { %v12903_v57 = vpop.eup %12902  ;;  %v10409_v51 = vpack.c.bf16 %v12901_v58, %v12895_v61  ;;  %12922 = vrcp.f32 %v8448_v12  ;;  %v7656_v25 = vpop.f32.mrb[99].mxu1  ;;  %v17206_v61 = vadd.f32 %v7654_v10, %v7494_v13  ;;  %v8116_v10 = vmul.f32 1.442695, %v7803_v26 }
 0x780   :  { %v12905_v5 = vpop.eup %12904  ;;  %9565 = vst [vmem:[#allocation2 + $0xc0] sm:$0xf] %v10410_v7  ;;  %12924 = vpow2.f32 %v8088_v30  ;;  %v7502_v13 = vadd.f32 %v16982_v33, %v17053_v55  ;;  %v8128_v45 = vmul.f32 1.442695, %v7809_v63 }
 0x781   :  { %v12907_v38 = vpop.eup %12906  ;;  %9564 = vst [vmem:[#allocation2 + $0xb8] sm:$0xff] %v10409_v51  ;;  %v10414_v20 = vpack.c.bf16 %v12905_v5, %v12905_v5  ;;  %12926 = vpow2.f32 %v8100_v9  ;;  %v17208_v30 = vpop.f32.mrb[36].mxu0  ;;  %v7811_v5 = vsub.f32 0.0, %v17159_v8  ;;  %v7507_v8 = vadd.f32 %v16992_v50, %v17053_v55 }
 0x782   :  { %v17202_v60 = vpop.eup %12908  ;;  %v10413_v27 = vpack.c.bf16 %v12907_v38, %v12903_v57  ;;  %12928 = vpow2.f32 %v8104_v52  ;;  %v7659_v17 = vpop.f32.mrb[100].mxu1  ;;  %v11019_v38 = vadd.f32 %v17163_v32, %v17057_v6  ;;  %v11020_v32 = vadd.f32 %v17167_v4, %v17059_v0 }
 0x783   :  { %v12911_v56 = vpop.eup %12910  ;;  %9569 = vst [vmem:[#allocation2 + $0xdc] sm:$0xf] %v10414_v20  ;;  %12930 = vpow2.f32 %v8102_v62  ;;  %v17210_v36 = vpop.f32.mrb[37].mxu0  ;;  %v17223_v20 = vadd.f32 %v7659_v17, %v7499_v21  ;;  %v11021_v4 = vadd.f32 %v17170_v37, %v17057_v6  ;;  %v11022_v37 = vadd.f32 %v17174_v34, %v17059_v0 }
 0x784   :  { %v12913_v43 = vpop.eup %12912  ;;  %9568 = vst [vmem:[#allocation2 + $0xd4] sm:$0xff] %v10413_v27  ;;  %v8447_v18 = vadd.f32 1.0, %v12911_v56  ;;  %12932 = vpow2.f32 %v8114_v31  ;;  %v7661_v15 = vpop.f32.mrb[101].mxu1  ;;  %v7825_v34 = vsub.f32 0.0, %v17183_v35  ;;  %v7515_v35 = vadd.f32 %v17007_v2, %v17053_v55 }
 0x785   :  { %v12915_v46 = vpop.eup %12914  ;;  %v8453_v14 = vadd.f32 1.0, %v12913_v43  ;;  %12934 = vpow2.f32 %v8118_v3  ;;  %v17214_v58 = vpop.f32.mrb[38].mxu0  ;;  %v7810_v43 = vsub.f32 0.0, %v11018_v24 }
 0x786   :  { %v12917_v12 = vpop.eup %12916  ;;  %12936 = vrcp.f32 %v8447_v18  ;;  %v8455_v9 = vadd.f32 1.0, %v12915_v46  ;;  %v7662_v57 = vpop.f32.mrb[102].mxu1 }
 0x787   :  { %v12919_v7 = vpop.eup %12918  ;;  %12938 = vrcp.f32 %v8453_v14  ;;  %v8454_v52 = vadd.f32 1.0, %v12917_v12  ;;  %v17219_v31 = vpop.f32.mrb[39].mxu0  ;;  %v17231_v46 = vadd.f32 %v7662_v57, %v7502_v13  ;;  %v8132_v12 = vmul.f32 1.442695, %v7811_v5 }
 0x788   :  { %v12921_v51 = vpop.eup %12920  ;;  %12940 = vrcp.f32 %v8455_v9  ;;  %v8460_v62 = vadd.f32 1.0, %v12919_v7  ;;  %v7664_v22 = vpop.f32.mrb[103].mxu1  ;;  %v7816_v9 = vsub.f32 0.0, %v11019_v38 }
 0x789   :  { %v12923_v39 = vpop.eup %12922  ;;  %12942 = vrcp.f32 %v8454_v52  ;;  %v8462_v25 = vadd.f32 1.0, %v12921_v51  ;;  %v17233_v14 = vpop.f32.mrb[40].mxu0  ;;  %v7818_v52 = vsub.f32 0.0, %v17179_v53  ;;  %v7817_v53 = vsub.f32 0.0, %v11020_v32 }
 0x78a   :  { %v12925_v3 = vpop.eup %12924  ;;  %v10418_v49 = vpack.c.bf16 %v12923_v39, %v12923_v39  ;;  %12944 = vrcp.f32 %v8460_v62  ;;  %v7667_v33 = vpop.f32.mrb[104].mxu1  ;;  %v8130_v62 = vmul.f32 1.442695, %v7810_v43  ;;  %v8142_v13 = vmul.f32 1.442695, %v7816_v9 }
 0x78b   :  { %v12927_v27 = vpop.eup %12926  ;;  %12946 = vrcp.f32 %v8462_v25  ;;  %v8461_v56 = vadd.f32 1.0, %v12925_v3  ;;  %v17235_v21 = vpop.f32.mrb[41].mxu0  ;;  %v7823_v43 = vsub.f32 0.0, %v11021_v4  ;;  %v8144_v9 = vmul.f32 1.442695, %v7817_v53 }
 0x78c   :  { %v12929_v18 = vpop.eup %12928  ;;  %9573 = vst [vmem:[#allocation2 + $0xf8] sm:$0xf] %v10418_v49  ;;  %v8467_v26 = vadd.f32 1.0, %v12927_v27  ;;  %12948 = vpow2.f32 %v8116_v10  ;;  %v7669_v63 = vpop.f32.mrb[105].mxu1  ;;  %v7510_v10 = vadd.f32 %v16998_v11, %v17053_v55  ;;  %v11023_v27 = vadd.f32 %v17185_v54, %v17057_v6 }
 0x78d   :  { %v12931_v17 = vpop.eup %12930  ;;  %12950 = vrcp.f32 %v8461_v56  ;;  %v8469_v50 = vadd.f32 1.0, %v12929_v18  ;;  %v17240_v24 = vpop.f32.mrb[42].mxu0  ;;  %v8146_v56 = vmul.f32 1.442695, %v7818_v52  ;;  %v17251_v18 = vadd.f32 %v7667_v33, %v7507_v8 }
 0x78e   :  { %v12933_v15 = vpop.eup %12932  ;;  %12952 = vrcp.f32 %v8467_v26  ;;  %v8468_v7 = vadd.f32 1.0, %v12931_v17  ;;  %v7670_v5 = vpop.f32.mrb[106].mxu1  ;;  %v7824_v54 = vsub.f32 0.0, %v11022_v37  ;;  %v7830_v8 = vsub.f32 0.0, %v11023_v27 }
 0x78f   :  { %v12935_v57 = vpop.eup %12934  ;;  %12954 = vrcp.f32 %v8469_v50  ;;  %v8474_v51 = vadd.f32 1.0, %v12933_v15  ;;  %v17244_v22 = vpop.f32.mrb[43].mxu0  ;;  %v17258_v33 = vadd.f32 %v7670_v5, %v7510_v10  ;;  %v8156_v63 = vmul.f32 1.442695, %v7823_v43 }
 0x790   :  { %v12937_v39 = vpop.eup %12936  ;;  %12956 = vrcp.f32 %v8468_v7  ;;  %v8476_v25 = vadd.f32 1.0, %v12935_v57  ;;  %v7672_v38 = vpop.f32.mrb[107].mxu1  ;;  %v7832_v57 = vsub.f32 0.0, %v17198_v19  ;;  %v8160_v10 = vmul.f32 1.442695, %v7825_v34 }
 0x791   :  { %v12939_v3 = vpop.eup %12938  ;;  %v10417_v49 = vpack.c.bf16 %v12937_v39, %v17202_v60  ;;  %12958 = vrcp.f32 %v8474_v51  ;;  %v11024_v60 = vadd.f32 %v17188_v28, %v17059_v0  ;;  %v17256_v15 = vpop.f32.mrb[44].mxu0  ;;  %v7518_v27 = vadd.f32 %v17009_v44, %v17053_v55 }
 0x792   :  { %v12941_v11 = vpop.eup %12940  ;;  %12960 = vrcp.f32 %v8476_v25  ;;  %v7675_v7 = vpop.f32.mrb[108].mxu1  ;;  %v8174_v43 = vmul.f32 1.442695, %v7832_v57 }
 0x793   :  { %v12943_v26 = vpop.eup %12942  ;;  %9572 = vst [vmem:[#allocation2 + $0xf0] sm:$0xff] %v10417_v49  ;;  %v10422_v32 = vpack.c.bf16 %v12941_v11, %v12941_v11  ;;  %12962 = vpow2.f32 %v8128_v45  ;;  %v17262_v45 = vpop.f32.mrb[45].mxu0  ;;  %v7831_v5 = vsub.f32 0.0, %v11024_v60  ;;  %v17269_v19 = vadd.f32 %v7675_v7, %v7515_v35 }
 0x794   :  { %v12945_v17 = vpop.eup %12944  ;;  %v10421_v50 = vpack.c.bf16 %v12943_v26, %v12939_v3  ;;  %12964 = vpow2.f32 %v8132_v12  ;;  %v7677_v28 = vpop.f32.mrb[109].mxu1  ;;  %v8158_v3 = vmul.f32 1.442695, %v7824_v54  ;;  %v11025_v26 = vadd.f32 %v17192_v59, %v17057_v6 }
 0x795   :  { %v12947_v52 = vpop.eup %12946  ;;  %9577 = vst [vmem:[#allocation2 + $0x114] sm:$0xf] %v10422_v32  ;;  %12966 = vpow2.f32 %v8130_v62  ;;  %v17265_v51 = vpop.f32.mrb[46].mxu0  ;;  %v8172_v60 = vmul.f32 1.442695, %v7831_v5 }
 0x796   :  { %v12949_v4 = vpop.eup %12948  ;;  %9576 = vst [vmem:[#allocation2 + $0x10c] sm:$0xff] %v10421_v50  ;;  %v10426_v12 = vpack.c.bf16 %v12947_v52, %v12947_v52  ;;  %12968 = vpow2.f32 %v8142_v13  ;;  %v7678_v39 = vpop.f32.mrb[110].mxu1  ;;  %v8170_v13 = vmul.f32 1.442695, %v7830_v8  ;;  %v7837_v28 = vsub.f32 0.0, %v11025_v26 }
 0x797   :  { %v12951_v62 = vpop.eup %12950  ;;  %v8475_v25 = vadd.f32 1.0, %v12949_v4  ;;  %12970 = vpow2.f32 %v8146_v56  ;;  %v17267_v53 = vpop.f32.mrb[47].mxu0  ;;  %v17277_v50 = vadd.f32 %v7678_v39, %v7518_v27 }
 0x798   :  { %v7680_v2 = vpop.f32.mrb[111].mxu1  ;;  %v12953_v37 = vpop.eup %12952  ;;  %9581 = vst [vmem:[#allocation2 + $0x130] sm:$0xf] %v10426_v12  ;;  %v10425_v38 = vpack.c.bf16 %v12951_v62, %v12945_v17  ;;  %12972 = vpow2.f32 %v8144_v9 }
 0x799   :  { %v12955_v49 = vpop.eup %12954  ;;  %12974 = vrcp.f32 %v8475_v25  ;;  %v17279_v9 = vpop.f32.mrb[48].mxu0 }
 0x79a   :  { %v12957_v11 = vpop.eup %12956  ;;  %9580 = vst [vmem:[#allocation2 + $0x128] sm:$0xff] %v10425_v38  ;;  %v10430_v56 = vpack.c.bf16 %v12955_v49, %v12955_v49  ;;  %12976 = vpow2.f32 %v8156_v63  ;;  %v7683_v44 = vpop.f32.mrb[112].mxu1 }
 0x79b   :  { %v17275_v32 = vpop.eup %12958  ;;  %v10429_v34 = vpack.c.bf16 %v12957_v11, %v12953_v37  ;;  %12978 = vpow2.f32 %v8160_v10  ;;  %v17281_v59 = vpop.f32.mrb[49].mxu0 }
 0x79c   :  { %v12961_v17 = vpop.eup %12960  ;;  %9585 = vst [vmem:[#allocation2 + $0x14c] sm:$0xf] %v10430_v56  ;;  %12980 = vpow2.f32 %v8158_v3  ;;  %v7685_v52 = vpop.f32.mrb[113].mxu1 }
 0x79d   :  { %v12963_v54 = vpop.eup %12962  ;;  %9584 = vst [vmem:[#allocation2 + $0x144] sm:$0xff] %v10429_v34  ;;  %v10434_v7 = vpack.c.bf16 %v12961_v17, %v12961_v17  ;;  %12982 = vpow2.f32 %v8170_v13  ;;  %v17285_v4 = vpop.f32.mrb[50].mxu0 }
 0x79e   :  { %v12965_v8 = vpop.eup %12964  ;;  %v8481_v35 = vadd.f32 1.0, %v12963_v54  ;;  %12984 = vpow2.f32 %v8174_v43  ;;  %v7686_v12 = vpop.f32.mrb[114].mxu1 }
 0x79f   :  { %v12967_v63 = vpop.eup %12966  ;;  %9589 = vst [vmem:[#allocation2 + $0x168] sm:$0xf] %v10434_v7  ;;  %v8483_v57 = vadd.f32 1.0, %v12965_v8  ;;  %12986 = vpow2.f32 %v8172_v60  ;;  %v17287_v39 = vpop.f32.mrb[51].mxu0 }
 0x7a0   :  { %v7688_v62 = vpop.f32.mrb[115].mxu1 }
 0x7a1   :  { %13204 = shalt.err (!%p13201_p4)
}
 0x7a2   :  { %s13205_s15 = scalar_lea.hbm %s17462_s11, 4096 }
 0x7a3   :  { %p13206_p5 = scmp.ne.s32.totalorder %s17462_s11, %s13205_s15  ;;  %p13209_p6 = scmp.lt.u32.totalorder %s13205_s15, %s17462_s11 }
 0x7a5   :  { %p13211_p7 = pnand %p13209_p6, %p13206_p5 }
 0x7a7   :  { %13214 = shalt.err (!%p13211_p7)
}
 0x7a8   :  { %s13244_s19 = smov 128   ;;  %s13245_s20 = smov 8   ;;  %v12969_v25 = vpop.eup %12968  ;;  %12988 = vrcp.f32 %v8481_v35  ;;  %v8482_v10 = vadd.f32 1.0, %v12967_v63  ;;  %v11026_v5 = vadd.f32 %v17194_v48, %v17059_v0  ;;  %v7523_v2 = vadd.f32 %v17013_v16, %v17053_v55  ;;  %v17322_v17 = vpop.f32.mrb[52].mxu0 }
 0x7a9   :  { %9689 = dma.vmem_to_hbm [thread:$0]  %s17283_s12, 4096, %s17462_s11, [#allocation5], %s13244_s19, %s13244_s19, %s13245_s20   ;;  %v12971_v37 = vpop.eup %12970  ;;  %12990 = vrcp.f32 %v8483_v57  ;;  %v8488_v38 = vadd.f32 1.0, %v12969_v25  ;;  %v11027_v3 = vadd.f32 %v17208_v30, %v17057_v6  ;;  %v7526_v49 = vadd.f32 %v17019_v23, %v17053_v55 }
 0x7aa   :  { %v12973_v13 = vpop.eup %12972  ;;  %12992 = vrcp.f32 %v8482_v10  ;;  %v8490_v27 = vadd.f32 1.0, %v12971_v37  ;;  %v8184_v11 = vmul.f32 1.442695, %v7837_v28  ;;  %v17314_v56 = vadd.f32 %v7683_v44, %v7523_v2  ;;  %v7691_v44 = vpop.f32.mrb[116].mxu1  ;;  %s13246_s11 = smov [#allocation2]  }
 0x7ab   :  { %v12975_v43 = vpop.eup %12974  ;;  %12994 = vrcp.f32 %v8488_v38  ;;  %v8489_v48 = vadd.f32 1.0, %v12973_v13  ;;  %v11028_v16 = vadd.f32 %v17210_v36, %v17059_v0  ;;  %v7531_v26 = vadd.f32 %v17027_v42, %v17053_v55  ;;  %v17326_v36 = vpop.f32.mrb[53].mxu0  ;;  %s9671_s0 = sshll.u32 %s13246_s11, 4  ;;  %s9672_s0 = int_to_ptr.vmem [resolvable:$true] %s9671_s0 }
 0x7ac   :  { %v12977_v34 = vpop.eup %12976  ;;  %v10433_v30 = vpack.c.bf16 %v12975_v43, %v17275_v32  ;;  %12996 = vrcp.f32 %v8490_v27  ;;  %v7839_v23 = vsub.f32 0.0, %v17206_v61  ;;  %v7838_v60 = vsub.f32 0.0, %v11026_v5  ;;  %v7693_v35 = vpop.f32.mrb[117].mxu1  ;;  %s13215_s3 = scalar_lea.vmem %s9672_s0, 14336  ;;  %p13220_p9 = scmp.lt.s32.totalorder %s9672_s0, %s9672_s0 }
 0x7ad   :  { %v12979_v54 = vpop.eup %12978  ;;  %12998 = vrcp.f32 %v8489_v48  ;;  %v8495_v7 = vadd.f32 1.0, %v12977_v34  ;;  %v7844_v52 = vsub.f32 0.0, %v11027_v3  ;;  %v17324_v8 = vadd.f32 %v7686_v12, %v7526_v49  ;;  %v17330_v32 = vpop.f32.mrb[54].mxu0  ;;  %p13216_p8 = scmp.ne.s32.totalorder %s9672_s0, %s13215_s3  ;;  %p13221_p10 = scmp.lt.s32.totalorder %s13215_s3, %s13215_s3 }
 0x7ae   :  { %v12981_v42 = vpop.eup %12980  ;;  %9588 = vst [vmem:[#allocation2 + $0x160] sm:$0xff] %v10433_v30  ;;  %v8497_v28 = vadd.f32 1.0, %v12979_v54  ;;  %13000 = vpow2.f32 %v8184_v11  ;;  %v11029_v61 = vadd.f32 %v17214_v58, %v17057_v6  ;;  %v7534_v63 = vadd.f32 %v17033_v47, %v17053_v55  ;;  %v7694_v10 = vpop.f32.mrb[118].mxu1 }
 0x7af   :  { %v12983_v57 = vpop.eup %12982  ;;  %13002 = vrcp.f32 %v8495_v7  ;;  %v8496_v62 = vadd.f32 1.0, %v12981_v42  ;;  %v7846_v12 = vsub.f32 0.0, %v17223_v20  ;;  %v7845_v25 = vsub.f32 0.0, %v11028_v16  ;;  %v17335_v5 = vpop.f32.mrb[55].mxu0  ;;  %p13222_p11 = por %p13221_p10, %p13220_p9 }
 0x7b0   :  { %v12985_v2 = vpop.eup %12984  ;;  %13004 = vrcp.f32 %v8497_v28  ;;  %v8502_v37 = vadd.f32 1.0, %v12983_v57  ;;  %v8188_v38 = vmul.f32 1.442695, %v7839_v23  ;;  %v8186_v3 = vmul.f32 1.442695, %v7838_v60  ;;  %v7696_v58 = vpop.f32.mrb[119].mxu1 }
 0x7b1   :  { %v12987_v49 = vpop.eup %12986  ;;  %13006 = vrcp.f32 %v8496_v62  ;;  %v8504_v13 = vadd.f32 1.0, %v12985_v2  ;;  %v8198_v27 = vmul.f32 1.442695, %v7844_v52  ;;  %v11030_v47 = vadd.f32 %v17219_v31, %v17059_v0  ;;  %v17346_v52 = vpop.f32.mrb[56].mxu0  ;;  %p13223_p12 = pnand %p13222_p11, %p13216_p8 }
 0x7b2   :  { %v12989_v11 = vpop.eup %12988  ;;  %13008 = vrcp.f32 %v8502_v37  ;;  %v8503_v20 = vadd.f32 1.0, %v12987_v49  ;;  %v7851_v43 = vsub.f32 0.0, %v11029_v61  ;;  %v11031_v48 = vadd.f32 %v17233_v14, %v17057_v6  ;;  %v7699_v35 = vpop.f32.mrb[120].mxu1 }
 0x7b3   :  { %v12991_v16 = vpop.eup %12990  ;;  %13010 = vrcp.f32 %v8504_v13  ;;  %v8202_v34 = vmul.f32 1.442695, %v7846_v12  ;;  %v8200_v30 = vmul.f32 1.442695, %v7845_v25  ;;  %v17341_v23 = vadd.f32 %v7691_v44, %v7531_v26  ;;  %v17350_v26 = vpop.f32.mrb[57].mxu0 }
 0x7b4   :  { %v12993_v60 = vpop.eup %12992  ;;  %v10438_v54 = vpack.c.bf16 %v12991_v16, %v12991_v16  ;;  %13012 = vrcp.f32 %v8503_v20  ;;  %v7853_v7 = vsub.f32 0.0, %v17231_v46  ;;  %v11032_v31 = vadd.f32 %v17235_v21, %v17059_v0  ;;  %v7701_v44 = vpop.f32.mrb[121].mxu1 }
 0x7b5   :  { %v12995_v42 = vpop.eup %12994  ;;  %v10437_v28 = vpack.c.bf16 %v12993_v60, %v12989_v11  ;;  %13014 = vpow2.f32 %v8188_v38  ;;  %v7852_v14 = vsub.f32 0.0, %v11030_v47  ;;  %v11033_v61 = vadd.f32 %v17240_v24, %v17057_v6  ;;  %v17354_v21 = vpop.f32.mrb[58].mxu0 }
 0x7b6   :  { %v12997_v57 = vpop.eup %12996  ;;  %9593 = vst [vmem:[#allocation2 + $0x184] sm:$0xf] %v10438_v54  ;;  %13016 = vpow2.f32 %v8186_v3  ;;  %v8212_v46 = vmul.f32 1.442695, %v7851_v43  ;;  %v7858_v62 = vsub.f32 0.0, %v11031_v48  ;;  %v17352_v12 = vadd.f32 %v7694_v10, %v7534_v63  ;;  %v7702_v25 = vpop.f32.mrb[122].mxu1 }
 0x7b7   :  { %v12999_v2 = vpop.eup %12998  ;;  %9592 = vst [vmem:[#allocation2 + $0x17c] sm:$0xff] %v10437_v28  ;;  %v10442_v37 = vpack.c.bf16 %v12997_v57, %v12997_v57  ;;  %13018 = vpow2.f32 %v8198_v27  ;;  %v7860_v38 = vsub.f32 0.0, %v17251_v18  ;;  %v7539_v24 = vadd.f32 %v17041_v29, %v17053_v55  ;;  %v17359_v58 = vpop.f32.mrb[59].mxu0 }
 0x7b8   :  { %v7704_v49 = vpop.f32.mrb[123].mxu1  ;;  %v13001_v3 = vpop.eup %13000  ;;  %v10441_v13 = vpack.c.bf16 %v12999_v2, %v12995_v42  ;;  %13020 = vpow2.f32 %v8202_v34  ;;  %v8216_v63 = vmul.f32 1.442695, %v7853_v7  ;;  %v7859_v10 = vsub.f32 0.0, %v11032_v31 }
 0x7b9   :  { %v13003_v47 = vpop.eup %13002  ;;  %9597 = vst [vmem:[#allocation2 + $0x1a0] sm:$0xf] %v10442_v37  ;;  %v8509_v11 = vadd.f32 1.0, %v13001_v3  ;;  %13022 = vpow2.f32 %v8200_v30  ;;  %v8214_v20 = vmul.f32 1.442695, %v7852_v14  ;;  %v7865_v43 = vsub.f32 0.0, %v11033_v61 }
 0x7ba   :  { %v13005_v27 = vpop.eup %13004  ;;  %9596 = vst [vmem:[#allocation2 + $0x198] sm:$0xff] %v10441_v13  ;;  %13024 = vpow2.f32 %v8212_v46  ;;  %v8226_v18 = vmul.f32 1.442695, %v7858_v62  ;;  %v17361_v48 = vadd.f32 %v7699_v35, %v7539_v24  ;;  %v8230_v60 = vmul.f32 1.442695, %v7860_v38  ;;  %v17365_v30 = vpop.f32.mrb[60].mxu0 }
 0x7bb   :  { %v13007_v29 = vpop.eup %13006  ;;  %v10446_v16 = vpack.c.bf16 %v13005_v27, %v13005_v27  ;;  %13026 = vrcp.f32 %v8509_v11  ;;  %v7542_v34 = vadd.f32 %v17043_v41, %v17053_v55  ;;  %v8228_v31 = vmul.f32 1.442695, %v7859_v10  ;;  %v7707_v42 = vpop.f32.mrb[124].mxu1 }
 0x7bc   :  { %v13009_v54 = vpop.eup %13008  ;;  %v10445_v7 = vpack.c.bf16 %v13007_v29, %v13003_v47  ;;  %13028 = vpow2.f32 %v8216_v63  ;;  %v8240_v14 = vmul.f32 1.442695, %v7865_v43  ;;  %v17369_v61 = vpop.f32.mrb[61].mxu0  ;;  %v7867_v3 = vsub.f32 0.0, %v17258_v33 }
 0x7bd   :  { %v13011_v28 = vpop.eup %13010  ;;  %9601 = vst [vmem:[#allocation2 + $0x1bc] sm:$0xf] %v10446_v16  ;;  %13030 = vpow2.f32 %v8214_v20  ;;  %v17367_v35 = vadd.f32 %v7702_v25, %v7542_v34  ;;  %v7709_v44 = vpop.f32.mrb[125].mxu1  ;;  %v11034_v10 = vadd.f32 %v17244_v22, %v17059_v0  ;;  %v7547_v47 = vadd.f32 %v17048_v40, %v17053_v55 }
 0x7be   :  { %v13013_v57 = vpop.eup %13012  ;;  %9600 = vst [vmem:[#allocation2 + $0x1b4] sm:$0xff] %v10445_v7  ;;  %v10450_v46 = vpack.c.bf16 %v13011_v28, %v13011_v28  ;;  %13032 = vpow2.f32 %v8226_v18  ;;  %v17371_v41 = vpop.f32.mrb[62].mxu0  ;;  %v11035_v43 = vadd.f32 %v17256_v15, %v17057_v6  ;;  %v7550_v22 = vadd.f32 %v17055_v1, %v17053_v55 }
 0x7bf   :  { %v7710_v62 = vpop.f32.mrb[126].mxu1  ;;  %v13015_v2 = vpop.eup %13014  ;;  %v10449_v37 = vpack.c.bf16 %v13013_v57, %v13009_v54  ;;  %13034 = vpow2.f32 %v8230_v60  ;;  %v17382_v33 = vadd.f32 %v7707_v42, %v7547_v47  ;;  %v8244_v60 = vmul.f32 1.442695, %v7867_v3 }
 0x7c0   :  { %v17373_v38 = vpop.f32.mrb[63].mxu0  ;;  %v7712_v24 = vpop.f32.mrb[127].mxu1  ;;  %9605 = vst [vmem:[#allocation2 + $0x1d8] sm:$0xf] %v10450_v46  ;;  %v8511_v25 = vadd.f32 1.0, %v13015_v2  ;;  %13036 = vpow2.f32 %v8228_v31  ;;  %v7866_v54 = vsub.f32 0.0, %v11034_v10  ;;  %v11036_v7 = vadd.f32 %v17262_v45, %v17059_v0 }
 0x7c1   :  { %v13017_v49 = vpop.eup %13016  ;;  %9604 = vst [vmem:[#allocation2 + $0x1d0] sm:$0xff] %v10449_v37  ;;  %13038 = vpow2.f32 %v8240_v14  ;;  %v7872_v31 = vsub.f32 0.0, %v11035_v43  ;;  %v17388_v28 = vadd.f32 %v7710_v62, %v7550_v22  ;;  %v11037_v44 = vadd.f32 %v17265_v51, %v17057_v6 }
 0x7c2   :  { %v13019_v13 = vpop.eup %13018  ;;  %v8510_v63 = vadd.f32 1.0, %v13017_v49  ;;  %13040 = vrcp.f32 %v8511_v25  ;;  %v7874_v1 = vsub.f32 0.0, %v17269_v19  ;;  %v8242_v45 = vmul.f32 1.442695, %v7866_v54 }
 0x7c3   :  { %v13021_v11 = vpop.eup %13020  ;;  %v8516_v20 = vadd.f32 1.0, %v13019_v13  ;;  %v7873_v37 = vsub.f32 0.0, %v11036_v7  ;;  %v8254_v49 = vmul.f32 1.442695, %v7872_v31  ;;  %v11038_v25 = vadd.f32 %v17267_v53, %v17059_v0 }
 0x7c4   :  { %v13023_v27 = vpop.eup %13022  ;;  %13042 = vrcp.f32 %v8510_v63  ;;  %v8518_v18 = vadd.f32 1.0, %v13021_v11  ;;  %v7879_v13 = vsub.f32 0.0, %v11037_v44  ;;  %v11039_v63 = vadd.f32 %v17279_v9, %v17057_v6 }
 0x7c5   :  { %v13025_v29 = vpop.eup %13024  ;;  %13044 = vrcp.f32 %v8516_v20  ;;  %v8517_v16 = vadd.f32 1.0, %v13023_v27  ;;  %v8258_v47 = vmul.f32 1.442695, %v7874_v1  ;;  %v7881_v11 = vsub.f32 0.0, %v17277_v50 }
 0x7c6   :  { %v13027_v34 = vpop.eup %13026  ;;  %13046 = vrcp.f32 %v8518_v18  ;;  %v8523_v40 = vadd.f32 1.0, %v13025_v29  ;;  %v8256_v27 = vmul.f32 1.442695, %v7873_v37  ;;  %v11040_v53 = vadd.f32 %v17281_v59, %v17059_v0 }
 0x7c7   :  { %v13029_v15 = vpop.eup %13028  ;;  %13048 = vrcp.f32 %v8517_v16  ;;  %v7880_v16 = vsub.f32 0.0, %v11038_v25  ;;  %v11041_v9 = vadd.f32 %v17285_v4, %v17057_v6  ;;  %v8268_v22 = vmul.f32 1.442695, %v7879_v13 }
 0x7c8   :  { %v13031_v42 = vpop.eup %13030  ;;  %13050 = vrcp.f32 %v8523_v40  ;;  %v8525_v14 = vadd.f32 1.0, %v13029_v15  ;;  %v7886_v40 = vsub.f32 0.0, %v11039_v63  ;;  %v8272_v7 = vmul.f32 1.442695, %v7881_v11 }
 0x7c9   :  { %v13033_v57 = vpop.eup %13032  ;;  %v8524_v55 = vadd.f32 1.0, %v13031_v42  ;;  %13052 = vpow2.f32 %v8244_v60  ;;  %v7888_v15 = vsub.f32 0.0, %v17314_v56  ;;  %v8270_v4 = vmul.f32 1.442695, %v7880_v16 }
 0x7ca   :  { %v13035_v46 = vpop.eup %13034  ;;  %13054 = vrcp.f32 %v8525_v14  ;;  %v8530_v2 = vadd.f32 1.0, %v13033_v57  ;;  %v7893_v14 = vsub.f32 0.0, %v11041_v9  ;;  %v7895_v1 = vsub.f32 0.0, %v17324_v8 }
 0x7cb   :  { %v13037_v24 = vpop.eup %13036  ;;  %13056 = vrcp.f32 %v8524_v55  ;;  %v8532_v62 = vadd.f32 1.0, %v13035_v46  ;;  %v8282_v55 = vmul.f32 1.442695, %v7886_v40  ;;  %v8286_v56 = vmul.f32 1.442695, %v7888_v15 }
 0x7cc   :  { %v13039_v3 = vpop.eup %13038  ;;  %13058 = vrcp.f32 %v8530_v2  ;;  %v8531_v51 = vadd.f32 1.0, %v13037_v24  ;;  %v11042_v25 = vadd.f32 %v17287_v39, %v17059_v0  ;;  %v8300_v8 = vmul.f32 1.442695, %v7895_v1 }
 0x7cd   :  { %v13041_v19 = vpop.eup %13040  ;;  %13060 = vrcp.f32 %v8532_v62  ;;  %v8537_v10 = vadd.f32 1.0, %v13039_v3 }
 0x7ce   :  { %v13043_v20 = vpop.eup %13042  ;;  %v10454_v43 = vpack.c.bf16 %v13041_v19, %v13041_v19  ;;  %13062 = vrcp.f32 %v8531_v51  ;;  %v7894_v11 = vsub.f32 0.0, %v11042_v25 }
 0x7cf   :  { %v13045_v18 = vpop.eup %13044  ;;  %v10453_v29 = vpack.c.bf16 %v13043_v20, %v13027_v34  ;;  %13064 = vrcp.f32 %v8537_v10  ;;  %v7887_v34 = vsub.f32 0.0, %v11040_v53 }
 0x7d0   :  { %v13047_v60 = vpop.eup %13046  ;;  %9609 = vst [vmem:[#allocation2 + $0x1f4] sm:$0xf] %v10454_v43  ;;  %13066 = vpow2.f32 %v8242_v45 }
 0x7d1   :  { %v13049_v50 = vpop.eup %13048  ;;  %9608 = vst [vmem:[#allocation2 + $0x1ec] sm:$0xff] %v10453_v29  ;;  %v10458_v54 = vpack.c.bf16 %v13047_v60, %v13047_v60  ;;  %13068 = vpow2.f32 %v8254_v49  ;;  %v8284_v24 = vmul.f32 1.442695, %v7887_v34  ;;  %v8296_v49 = vmul.f32 1.442695, %v7893_v14 }
 0x7d2   :  { %v13051_v59 = vpop.eup %13050  ;;  %v10457_v31 = vpack.c.bf16 %v13049_v50, %v13045_v18  ;;  %13070 = vpow2.f32 %v8258_v47  ;;  %v11043_v29 = vadd.f32 %v17322_v17, %v17057_v6  ;;  %v8298_v60 = vmul.f32 1.442695, %v7894_v11 }
 0x7d3   :  { %v13053_v42 = vpop.eup %13052  ;;  %9613 = vst [vmem:[#allocation2 + $0x210] sm:$0xf] %v10458_v54  ;;  %13072 = vpow2.f32 %v8256_v27  ;;  %v11044_v50 = vadd.f32 %v17326_v36, %v17059_v0  ;;  %v11045_v54 = vadd.f32 %v17330_v32, %v17057_v6  ;;  %v7902_v34 = vsub.f32 0.0, %v17341_v23 }
 0x7d4   :  { %v13055_v44 = vpop.eup %13054  ;;  %9612 = vst [vmem:[#allocation2 + $0x208] sm:$0xff] %v10457_v31  ;;  %v8539_v57 = vadd.f32 1.0, %v13053_v42  ;;  %13074 = vpow2.f32 %v8268_v22  ;;  %v7900_v17 = vsub.f32 0.0, %v11043_v29  ;;  %v11046_v14 = vadd.f32 %v17335_v5, %v17059_v0 }
 0x7d5   :  { %v13057_v46 = vpop.eup %13056  ;;  %v10462_v2 = vpack.c.bf16 %v13055_v44, %v13055_v44  ;;  %13076 = vpow2.f32 %v8272_v7  ;;  %v7901_v32 = vsub.f32 0.0, %v11044_v50  ;;  %v11047_v23 = vadd.f32 %v17346_v52, %v17057_v6 }
 0x7d6   :  { %v13059_v45 = vpop.eup %13058  ;;  %v10461_v37 = vpack.c.bf16 %v13057_v46, %v13051_v59  ;;  %13078 = vrcp.f32 %v8539_v57  ;;  %v7907_v57 = vsub.f32 0.0, %v11045_v54  ;;  %v7909_v46 = vsub.f32 0.0, %v17352_v12 }
 0x7d7   :  { %v13061_v62 = vpop.eup %13060  ;;  %9617 = vst [vmem:[#allocation2 + $0x22c] sm:$0xf] %v10462_v2  ;;  %13080 = vpow2.f32 %v8270_v4  ;;  %v8312_v12 = vmul.f32 1.442695, %v7901_v32  ;;  %v11049_v52 = vadd.f32 %v17354_v21, %v17057_v6  ;;  %v7916_v11 = vsub.f32 0.0, %v17361_v48 }
 0x7d8   :  { %v13063_v3 = vpop.eup %13062  ;;  %9616 = vst [vmem:[#allocation2 + $0x224] sm:$0xff] %v10461_v37  ;;  %v10466_v51 = vpack.c.bf16 %v13061_v62, %v13061_v62  ;;  %13082 = vpow2.f32 %v8282_v55  ;;  %v8314_v37 = vmul.f32 1.442695, %v7902_v34  ;;  %v7908_v62 = vsub.f32 0.0, %v11046_v14 }
 0x7d9   :  { %v17406_v13 = vpop.eup %13064  ;;  %v10465_v63 = vpack.c.bf16 %v13063_v3, %v13059_v45  ;;  %13084 = vpow2.f32 %v8286_v56  ;;  %v8310_v45 = vmul.f32 1.442695, %v7900_v17 }
 0x7da   :  { %v13067_v19 = vpop.eup %13066  ;;  %9621 = vst [vmem:[#allocation2 + $0x248] sm:$0xf] %v10466_v51  ;;  %13086 = vpow2.f32 %v8284_v24 }
 0x7db   :  { %v13069_v10 = vpop.eup %13068  ;;  %9620 = vst [vmem:[#allocation2 + $0x240] sm:$0xff] %v10465_v63  ;;  %v8538_v47 = vadd.f32 1.0, %v13067_v19  ;;  %13088 = vpow2.f32 %v8296_v49  ;;  %v11048_v49 = vadd.f32 %v17350_v26, %v17059_v0  ;;  %v8328_v63 = vmul.f32 1.442695, %v7909_v46 }
 0x7dc   :  { %v13071_v20 = vpop.eup %13070  ;;  %v8544_v43 = vadd.f32 1.0, %v13069_v10  ;;  %13090 = vpow2.f32 %v8300_v8  ;;  %v8324_v8 = vmul.f32 1.442695, %v7907_v57  ;;  %v7914_v19 = vsub.f32 0.0, %v11047_v23 }
 0x7dd   :  { %v13073_v39 = vpop.eup %13072  ;;  %13092 = vrcp.f32 %v8538_v47  ;;  %v8546_v27 = vadd.f32 1.0, %v13071_v20  ;;  %v11050_v26 = vadd.f32 %v17359_v58, %v17059_v0  ;;  %v8342_v58 = vmul.f32 1.442695, %v7916_v11 }
 0x7de   :  { %v13075_v53 = vpop.eup %13074  ;;  %13094 = vrcp.f32 %v8544_v43  ;;  %v8545_v18 = vadd.f32 1.0, %v13073_v39  ;;  %v8326_v43 = vmul.f32 1.442695, %v7908_v62  ;;  %v7915_v39 = vsub.f32 0.0, %v11048_v49 }
 0x7df   :  { %v13077_v16 = vpop.eup %13076  ;;  %13096 = vrcp.f32 %v8546_v27  ;;  %v8551_v9 = vadd.f32 1.0, %v13075_v53  ;;  %v7921_v27 = vsub.f32 0.0, %v11049_v52  ;;  %v8338_v29 = vmul.f32 1.442695, %v7914_v19 }
 0x7e0   :  { %v13079_v22 = vpop.eup %13078  ;;  %13098 = vrcp.f32 %v8545_v18  ;;  %v8553_v40 = vadd.f32 1.0, %v13077_v16  ;;  %v7923_v16 = vsub.f32 0.0, %v17367_v35  ;;  %v8340_v50 = vmul.f32 1.442695, %v7915_v39 }
 0x7e1   :  { %v13081_v7 = vpop.eup %13080  ;;  %v10470_v15 = vpack.c.bf16 %v13079_v22, %v13079_v22  ;;  %13100 = vrcp.f32 %v8551_v9  ;;  %v11051_v35 = vadd.f32 %v17365_v30, %v17057_v6  ;;  %v11053_v49 = vadd.f32 %v17371_v41, %v17057_v6 }
 0x7e2   :  { %v13083_v59 = vpop.eup %13082  ;;  %13102 = vrcp.f32 %v8553_v40  ;;  %v8552_v31 = vadd.f32 1.0, %v13081_v7  ;;  %v8352_v7 = vmul.f32 1.442695, %v7921_v27 }
 0x7e3   :  { %v13085_v42 = vpop.eup %13084  ;;  %9625 = vst [vmem:[#allocation2 + $0x264] sm:$0xf] %v10470_v15  ;;  %v8558_v4 = vadd.f32 1.0, %v13083_v59  ;;  %13104 = vpow2.f32 %v8298_v60  ;;  %v7922_v60 = vsub.f32 0.0, %v11050_v26  ;;  %v7928_v57 = vsub.f32 0.0, %v11051_v35 }
 0x7e4   :  { %v13087_v36 = vpop.eup %13086  ;;  %13106 = vrcp.f32 %v8552_v31  ;;  %v8560_v44 = vadd.f32 1.0, %v13085_v42  ;;  %v8356_v31 = vmul.f32 1.442695, %v7923_v16  ;;  %v7935_v6 = vsub.f32 0.0, %v11053_v49 }
 0x7e5   :  { %v13089_v55 = vpop.eup %13088  ;;  %13108 = vrcp.f32 %v8558_v4  ;;  %v8559_v1 = vadd.f32 1.0, %v13087_v36  ;;  %v8354_v42 = vmul.f32 1.442695, %v7922_v60  ;;  %v7937_v26 = vsub.f32 0.0, %v17388_v28 }
 0x7e6   :  { %v13091_v2 = vpop.eup %13090  ;;  %13110 = vrcp.f32 %v8560_v44  ;;  %v8565_v56 = vadd.f32 1.0, %v13089_v55  ;;  %v8380_v27 = vmul.f32 1.442695, %v7935_v6 }
 0x7e7   :  { %v13093_v24 = vpop.eup %13092  ;;  %13112 = vrcp.f32 %v8559_v1  ;;  %v8567_v5 = vadd.f32 1.0, %v13091_v2 }
 0x7e8   :  { %v13095_v25 = vpop.eup %13094  ;;  %v10469_v3 = vpack.c.bf16 %v13093_v24, %v17406_v13  ;;  %13114 = vrcp.f32 %v8565_v56  ;;  %v11052_v24 = vadd.f32 %v17369_v61, %v17059_v0 }
 0x7e9   :  { %v13097_v51 = vpop.eup %13096  ;;  %13116 = vrcp.f32 %v8567_v5 }
 0x7ea   :  { %v13099_v10 = vpop.eup %13098  ;;  %9624 = vst [vmem:[#allocation2 + $0x25c] sm:$0xff] %v10469_v3  ;;  %v10474_v47 = vpack.c.bf16 %v13097_v51, %v13097_v51  ;;  %13118 = vpow2.f32 %v8310_v45  ;;  %v7930_v51 = vsub.f32 0.0, %v17382_v33  ;;  %v7929_v19 = vsub.f32 0.0, %v11052_v24 }
 0x7eb   :  { %v13101_v13 = vpop.eup %13100  ;;  %v10473_v20 = vpack.c.bf16 %v13099_v10, %v13095_v25  ;;  %13120 = vpow2.f32 %v8314_v37  ;;  %v8366_v37 = vmul.f32 1.442695, %v7928_v57 }
 0x7ec   :  { %v13103_v21 = vpop.eup %13102  ;;  %9629 = vst [vmem:[#allocation2 + $0x280] sm:$0xf] %v10474_v47  ;;  %13122 = vpow2.f32 %v8312_v12  ;;  %v8368_v39 = vmul.f32 1.442695, %v7929_v19 }
 0x7ed   :  { %v13105_v53 = vpop.eup %13104  ;;  %9628 = vst [vmem:[#allocation2 + $0x278] sm:$0xff] %v10473_v20  ;;  %v10478_v18 = vpack.c.bf16 %v13103_v21, %v13103_v21  ;;  %13124 = vpow2.f32 %v8324_v8  ;;  %v11054_v8 = vadd.f32 %v17373_v38, %v17059_v0  ;;  %v8370_v20 = vmul.f32 1.442695, %v7930_v51 }
 0x7ee   :  { %v13107_v48 = vpop.eup %13106  ;;  %v8566_v9 = vadd.f32 1.0, %v13105_v53  ;;  %13126 = vpow2.f32 %v8328_v63 }
 0x7ef   :  { %v13109_v22 = vpop.eup %13108  ;;  %9633 = vst [vmem:[#allocation2 + $0x29c] sm:$0xf] %v10478_v18  ;;  %v10477_v40 = vpack.c.bf16 %v13107_v48, %v13101_v13  ;;  %13128 = vpow2.f32 %v8326_v43  ;;  %v7936_v43 = vsub.f32 0.0, %v11054_v8 }
 0x7f0   :  { %v13111_v54 = vpop.eup %13110  ;;  %13130 = vrcp.f32 %v8566_v9 }
 0x7f1   :  { %v13113_v15 = vpop.eup %13112  ;;  %9632 = vst [vmem:[#allocation2 + $0x294] sm:$0xff] %v10477_v40  ;;  %v10482_v59 = vpack.c.bf16 %v13111_v54, %v13111_v54  ;;  %13132 = vpow2.f32 %v8338_v29  ;;  %v8384_v29 = vmul.f32 1.442695, %v7937_v26  ;;  %v8382_v28 = vmul.f32 1.442695, %v7936_v43 }
 0x7f2   :  { %v13115_v17 = vpop.eup %13114  ;;  %v10481_v34 = vpack.c.bf16 %v13113_v15, %v13109_v22  ;;  %13134 = vpow2.f32 %v8342_v58 }
 0x7f3   :  { %v13117_v4 = vpop.eup %13116  ;;  %9637 = vst [vmem:[#allocation2 + $0x2b8] sm:$0xf] %v10482_v59  ;;  %13136 = vpow2.f32 %v8340_v50 }
 0x7f4   :  { %v13119_v14 = vpop.eup %13118  ;;  %9636 = vst [vmem:[#allocation2 + $0x2b0] sm:$0xff] %v10481_v34  ;;  %v10486_v36 = vpack.c.bf16 %v13117_v4, %v13117_v4  ;;  %13138 = vpow2.f32 %v8352_v7 }
 0x7f5   :  { %v13121_v44 = vpop.eup %13120  ;;  %v8572_v32 = vadd.f32 1.0, %v13119_v14  ;;  %13140 = vpow2.f32 %v8356_v31 }
 0x7f6   :  { %v13123_v55 = vpop.eup %13122  ;;  %9641 = vst [vmem:[#allocation2 + $0x2d4] sm:$0xf] %v10486_v36  ;;  %v8574_v1 = vadd.f32 1.0, %v13121_v44  ;;  %13142 = vpow2.f32 %v8354_v42 }
 0x7f7   :  { %v13125_v30 = vpop.eup %13124  ;;  %13144 = vrcp.f32 %v8572_v32  ;;  %v8573_v46 = vadd.f32 1.0, %v13123_v55 }
 0x7f8   :  { %v13127_v23 = vpop.eup %13126  ;;  %13146 = vrcp.f32 %v8574_v1  ;;  %v8579_v2 = vadd.f32 1.0, %v13125_v30 }
 0x7f9   :  { %v13129_v56 = vpop.eup %13128  ;;  %13148 = vrcp.f32 %v8573_v46  ;;  %v8581_v45 = vadd.f32 1.0, %v13127_v23 }
 0x7fa   :  { %v13131_v5 = vpop.eup %13130  ;;  %13150 = vrcp.f32 %v8579_v2  ;;  %v8580_v62 = vadd.f32 1.0, %v13129_v56 }
 0x7fb   :  { %v13133_v25 = vpop.eup %13132  ;;  %v10485_v3 = vpack.c.bf16 %v13131_v5, %v13115_v17  ;;  %13152 = vrcp.f32 %v8581_v45 }
 0x7fc   :  { %v13135_v12 = vpop.eup %13134  ;;  %13154 = vrcp.f32 %v8580_v62  ;;  %v8586_v52 = vadd.f32 1.0, %v13133_v25 }
 0x7fd   :  { %v13137_v63 = vpop.eup %13136  ;;  %9640 = vst [vmem:[#allocation2 + $0x2cc] sm:$0xff] %v10485_v3  ;;  %v8588_v61 = vadd.f32 1.0, %v13135_v12  ;;  %13156 = vpow2.f32 %v8366_v37 }
 0x7fe   :  { %v13139_v10 = vpop.eup %13138  ;;  %13158 = vrcp.f32 %v8586_v52  ;;  %v8587_v47 = vadd.f32 1.0, %v13137_v63 }
 0x7ff   :  { %v13141_v41 = vpop.eup %13140  ;;  %13160 = vrcp.f32 %v8588_v61  ;;  %v8593_v11 = vadd.f32 1.0, %v13139_v10 }
 0x800   :  { %v13143_v13 = vpop.eup %13142  ;;  %13162 = vrcp.f32 %v8587_v47  ;;  %v8595_v33 = vadd.f32 1.0, %v13141_v41 }
 0x801   :  { %v13145_v0 = vpop.eup %13144  ;;  %13164 = vrcp.f32 %v8593_v11  ;;  %v8594_v38 = vadd.f32 1.0, %v13143_v13 }
 0x802   :  { %v13147_v21 = vpop.eup %13146  ;;  %13166 = vrcp.f32 %v8595_v33 }
 0x803   :  { %v13149_v53 = vpop.eup %13148  ;;  %v10490_v18 = vpack.c.bf16 %v13147_v21, %v13147_v21  ;;  %13168 = vrcp.f32 %v8594_v38 }
 0x804   :  { %v13151_v16 = vpop.eup %13150  ;;  %v10489_v48 = vpack.c.bf16 %v13149_v53, %v13145_v0  ;;  %13170 = vpow2.f32 %v8370_v20 }
 0x805   :  { %v13153_v9 = vpop.eup %13152  ;;  %9645 = vst [vmem:[#allocation2 + $0x2f0] sm:$0xf] %v10490_v18  ;;  %13172 = vpow2.f32 %v8368_v39 }
 0x806   :  { %v13155_v58 = vpop.eup %13154  ;;  %9644 = vst [vmem:[#allocation2 + $0x2e8] sm:$0xff] %v10489_v48  ;;  %v10494_v60 = vpack.c.bf16 %v13153_v9, %v13153_v9  ;;  %13174 = vpow2.f32 %v8380_v27 }
 0x807   :  { %v13157_v22 = vpop.eup %13156  ;;  %v10493_v40 = vpack.c.bf16 %v13155_v58, %v13151_v16  ;;  %13176 = vpow2.f32 %v8384_v29 }
 0x808   :  { %v13159_v50 = vpop.eup %13158  ;;  %9649 = vst [vmem:[#allocation2 + $0x30c] sm:$0xf] %v10494_v60  ;;  %13178 = vpow2.f32 %v8382_v28  ;;  %v8600_v17 = vadd.f32 1.0, %v13157_v22 }
 0x809   :  { %v13161_v54 = vpop.eup %13160  ;;  %9648 = vst [vmem:[#allocation2 + $0x304] sm:$0xff] %v10493_v40 }
 0x80a   :  { %v13163_v7 = vpop.eup %13162  ;;  %v10498_v15 = vpack.c.bf16 %v13161_v54, %v13161_v54  ;;  %13180 = vrcp.f32 %v8600_v17 }
 0x80b   :  { %v13165_v59 = vpop.eup %13164  ;;  %v10497_v31 = vpack.c.bf16 %v13163_v7, %v13159_v50 }
 0x80c   :  { %v13167_v35 = vpop.eup %13166  ;;  %9653 = vst [vmem:[#allocation2 + $0x328] sm:$0xf] %v10498_v15 }
 0x80d   :  { %v13169_v34 = vpop.eup %13168  ;;  %9652 = vst [vmem:[#allocation2 + $0x320] sm:$0xff] %v10497_v31  ;;  %v10502_v42 = vpack.c.bf16 %v13167_v35, %v13167_v35 }
 0x80e   :  { %v13171_v4 = vpop.eup %13170  ;;  %v10501_v14 = vpack.c.bf16 %v13169_v34, %v13165_v59 }
 0x80f   :  { %v13173_v36 = vpop.eup %13172  ;;  %9657 = vst [vmem:[#allocation2 + $0x344] sm:$0xf] %v10502_v42  ;;  %v8602_v44 = vadd.f32 1.0, %v13171_v4 }
 0x810   :  { %v13175_v32 = vpop.eup %13174  ;;  %9656 = vst [vmem:[#allocation2 + $0x33c] sm:$0xff] %v10501_v14  ;;  %v8601_v57 = vadd.f32 1.0, %v13173_v36 }
 0x811   :  { %v13177_v55 = vpop.eup %13176  ;;  %13182 = vrcp.f32 %v8602_v44  ;;  %v8607_v1 = vadd.f32 1.0, %v13175_v32 }
 0x812   :  { %v13179_v30 = vpop.eup %13178  ;;  %13184 = vrcp.f32 %v8601_v57  ;;  %v8609_v46 = vadd.f32 1.0, %v13177_v55 }
 0x813   :  { %13186 = vrcp.f32 %v8607_v1  ;;  %v8608_v23 = vadd.f32 1.0, %v13179_v30 }
 0x814   :  { %13188 = vrcp.f32 %v8609_v46  ;;  %v13181_v2 = vpop.eup %13180 }
 0x815   :  { %13190 = vrcp.f32 %v8608_v23 }
 0x81b   :  { %v13183_v56 = vpop.eup %13182 }
 0x81c   :  { %v13185_v45 = vpop.eup %13184  ;;  %v10506_v37 = vpack.c.bf16 %v13183_v56, %v13183_v56 }
 0x81d   :  { %v13187_v24 = vpop.eup %13186  ;;  %v10505_v5 = vpack.c.bf16 %v13185_v45, %v13181_v2 }
 0x81e   :  { %v13189_v62 = vpop.eup %13188  ;;  %9661 = vst [vmem:[#allocation2 + $0x360] sm:$0xf] %v10506_v37 }
 0x81f   :  { %v13191_v49 = vpop.eup %13190  ;;  %9660 = vst [vmem:[#allocation2 + $0x358] sm:$0xff] %v10505_v5  ;;  %v10510_v25 = vpack.c.bf16 %v13189_v62, %v13189_v62 }
 0x820   :  { %v10509_v3 = vpack.c.bf16 %v13191_v49, %v13187_v24 }
 0x821   :  { %9665 = vst [vmem:[#allocation2 + $0x37c] sm:$0xf] %v10510_v25 }
 0x822   :  { %9664 = vst [vmem:[#allocation2 + $0x374] sm:$0xff] %v10509_v3 }
 0x823   :  { %13226 = shalt.err (!%p13223_p12)
}
 0x824   :  { %s13227_s24 = scalar_lea.hbm %s17461_s10, 14336 }
 0x825   :  { %p13228_p13 = scmp.ne.s32.totalorder %s17461_s10, %s13227_s24  ;;  %p13231_p0 = scmp.lt.u32.totalorder %s13227_s24, %s17461_s10 }
 0x827   :  { %p13233_p1 = pnand %p13231_p0, %p13228_p13 }
 0x829   :  { %13236 = shalt.err (!%p13233_p1)
}
 0x82a   :  { %s13247_s7 = smov 448   ;;  %s13248_s28 = smov 28  }
 0x82b   :  { %9677 = dma.vmem_to_hbm [thread:$0]  %s9672_s0, 14336, %s17461_s10, [#allocation3], %s13247_s7, %s13247_s7, %s13248_s28  }
 0x82c   :  { %13237 = dma.done.wait [#allocation3], 14336  }
 0x82d   :  { %13238 = vsyncadd [#allocation3], 4294952960 }
 0x82e   :  { %13239 = dma.done.wait [#allocation5], 4096  }
 0x82f   :  { %13240 = vsyncadd [#allocation5], 4294963200 }
 0x830   :  { %9696 = vsyncpa [#allocation3], 1 }
 0x831   :  { %9697 = vsyncpa [#allocation5], 1 }

</bundles_post_ra>
